<compile_context>
chip_gen: v5e
topology: v5e:2x2
jax: 0.10.0
libtpu: 0.0.40
codegen_flags: <defaults>
</compile_context>

<pallas_src>
import numpy as np
import jax
import jax.numpy as jnp
from jax import lax
from jax.experimental import pallas as pl
from jax.experimental.pallas import tpu as pltpu

WIN = 11
HALF = WIN // 2
SIGMA = 1.5
C1 = 0.01 ** 2
C2 = 0.03 ** 2

# Keep the block-diagonal H-pass matrix (TB*H, TB*H) and data blocks modest.
_MAX_BLOCK_ROWS = 256
_VMEM_LIMIT_BYTES = 48 * 1024 * 1024


def _gaussian_1d():
    g = np.exp(-((np.arange(WIN) - HALF) ** 2) / (2.0 * SIGMA ** 2))
    return (g / g.sum()).astype(np.float32)


def _band_matrix(n):
    """(n, n) banded matrix M such that (M @ v) and (v @ M) are the 1-D
    'same' (zero-padded) gaussian convolutions of v along that axis."""
    g = _gaussian_1d()
    m = np.zeros((n, n), np.float32)
    for j in range(n):
        for k in range(WIN):
            i = j + k - HALF
            if 0 <= i < n:
                m[i, j] = g[k]
    return m


def _choose_images_per_block(bc, h):
    """Largest divisor TB of bc with TB*h <= _MAX_BLOCK_ROWS and TB*h % 8 == 0
    (sublane-legal block).  Falls back to the whole batch (full-dim block)."""
    cap = max(1, min(bc, _MAX_BLOCK_ROWS // max(1, h)))
    for d in range(cap, 0, -1):
        if bc % d == 0 and (d * h) % 8 == 0:
            return d
    # TODO(synk): if H is not a multiple of 8 and no divisor works this falls
    # back to one whole-batch block; very large inputs would need row tiling.
    return bc


def _ssim_kernel(abd_ref, bw_ref, x_ref, y_ref, acc_ref):
    """One grid step: TB images stacked as a (TB*H, W) row block."""

    @pl.when(pl.program_id(1) == 0)
    def _init():
        acc_ref[...] = jnp.zeros_like(acc_ref)

    a_bd = abd_ref[...]   # (TB*H, TB*H) block-diag band matrix (H-pass, "same" conv)
    b_w = bw_ref[...]     # (W, W)       band matrix            (W-pass, "same" conv)
    x = x_ref[...]        # (TB*H, W)
    y = y_ref[...]

    def gconv(z):
        # Separable "same" gaussian conv as two MXU matmuls.
        zw = jnp.dot(z, b_w, precision=lax.Precision.HIGHEST,
                     preferred_element_type=jnp.float32)
        return jnp.dot(a_bd, zw, precision=lax.Precision.HIGHEST,
                       preferred_element_type=jnp.float32)

    mu1 = gconv(x)
    mu2 = gconv(y)
    e_x2 = gconv(x * x)
    e_y2 = gconv(y * y)
    e_xy = gconv(x * y)

    mu1_sq = mu1 * mu1
    mu2_sq = mu2 * mu2
    mu1_mu2 = mu1 * mu2
    sigma1_sq = e_x2 - mu1_sq
    sigma2_sq = e_y2 - mu2_sq
    sigma12 = e_xy - mu1_mu2

    num = (2.0 * mu1_mu2 + C1) * (2.0 * sigma12 + C2)
    den = (mu1_sq + mu2_sq + C1) * (sigma1_sq + sigma2_sq + C2)
    # EUP approximate reciprocal + one Newton step (~f32 accurate, off the VALU).
    r = pl.reciprocal(den, approx=True)
    r = r * (2.0 - den * r)
    block_sum = jnp.sum(num * r)

    acc_ref[...] = acc_ref[...] + block_sum


def ssim_loss(outputs, targets):
    """1 - SSIM(outputs, targets); inputs are NCHW float arrays."""
    assert outputs.shape == targets.shape
    b, c, h, w = outputs.shape
    bc = b * c

    # Row-stack all images: (BC*H, W).  Pure reshape -> no extra HBM pass.
    x = outputs.astype(jnp.float32).reshape(bc * h, w)
    y = targets.astype(jnp.float32).reshape(bc * h, w)

    tb = _choose_images_per_block(bc, h)
    bm = tb * h                        # rows per block (whole images)
    n_blocks = bc // tb
    # Split the accumulation across 2 TensorCores when possible (v7x megacore).
    num_shards = 2 if (n_blocks >= 2 and n_blocks % 2 == 0) else 1
    bps = n_blocks // num_shards       # blocks per shard

    band_h = _band_matrix(h)
    a_bd = jnp.asarray(np.kron(np.eye(tb, dtype=np.float32), band_h))  # (bm, bm)
    b_w = jnp.asarray(_band_matrix(w))                                 # (w, w)

    partials = pl.pallas_call(
        _ssim_kernel,
        out_shape=jax.ShapeDtypeStruct((num_shards * 8, 128), jnp.float32),
        grid_spec=pltpu.PrefetchScalarGridSpec(
            num_scalar_prefetch=0,
            grid=(num_shards, bps),
            in_specs=[
                pl.BlockSpec((bm, bm), lambda s, j: (0, 0)),           # A (resident)
                pl.BlockSpec((w, w), lambda s, j: (0, 0)),             # Bw (resident)
                pl.BlockSpec((bm, w), lambda s, j: (s * bps + j, 0)),  # x block
                pl.BlockSpec((bm, w), lambda s, j: (s * bps + j, 0)),  # y block
            ],
            out_specs=pl.BlockSpec((8, 128), lambda s, j: (s, 0)),
        ),
        compiler_params=pltpu.CompilerParams(
            dimension_semantics=("parallel", "arbitrary"),
            vmem_limit_bytes=_VMEM_LIMIT_BYTES,
        ),
    )(a_bd, b_w, x, y)

    # Every element of shard s's (8, 128) block holds that shard's SSIM sum.
    ssim_sum = jnp.sum(partials[::8, 0])
    return 1.0 - ssim_sum / (bc * h * w)


def _ssim_loss_reference(outputs, targets):
    """Pure-JAX tap-based reference (independent formulation) for checking."""
    b, c, h, w = outputs.shape
    pad = HALF
    g = jnp.asarray(_gaussian_1d())

    def sep_conv(img):  # img: (BC, Hp, Wp), zero-padded
        tmp = sum(g[k] * img[:, k:k + h, :] for k in range(WIN))
        return sum(g[k] * tmp[:, :, k:k + w] for k in range(WIN))

    x = outputs.astype(jnp.float32).reshape(b * c, h, w)
    y = targets.astype(jnp.float32).reshape(b * c, h, w)
    xp = jnp.pad(x, ((0, 0), (pad, pad), (pad, pad)))
    yp = jnp.pad(y, ((0, 0), (pad, pad), (pad, pad)))
    mu1, mu2 = sep_conv(xp), sep_conv(yp)
    e_x2, e_y2, e_xy = sep_conv(xp * xp), sep_conv(yp * yp), sep_conv(xp * yp)
    s1 = e_x2 - mu1 * mu1
    s2 = e_y2 - mu2 * mu2
    s12 = e_xy - mu1 * mu2
    ssim_map = ((2 * mu1 * mu2 + C1) * (2 * s12 + C2)) / (
        (mu1 * mu1 + mu2 * mu2 + C1) * (s1 + s2 + C2))
    return 1.0 - jnp.mean(ssim_map)


if __name__ == "__main__":
    key = jax.random.PRNGKey(0)
    k1, k2, k3, k4 = jax.random.split(key, 4)

    # Case 1: small images -> single block, single shard.
    out1 = jax.random.uniform(k1, (2, 4, 16, 16), dtype=jnp.float32)
    tgt1 = jax.random.uniform(k2, (2, 4, 16, 16), dtype=jnp.float32)
    loss1 = ssim_loss(out1, tgt1)
    jax.block_until_ready(loss1)
    np.testing.assert_allclose(np.asarray(loss1),
                               np.asarray(_ssim_loss_reference(out1, tgt1)),
                               rtol=1e-4, atol=1e-5)

    # Case 2: taller images -> multiple blocks + 2-way sharded accumulator.
    out2 = jax.random.uniform(k3, (4, 4, 64, 20), dtype=jnp.float32)
    tgt2 = jax.random.uniform(k4, (4, 4, 64, 20), dtype=jnp.float32)
    loss2 = ssim_loss(out2, tgt2)
    jax.block_until_ready(loss2)
    np.testing.assert_allclose(np.asarray(loss2),
                               np.asarray(_ssim_loss_reference(out2, tgt2)),
                               rtol=1e-4, atol=1e-5)

    print("KERNEL_OK")
</pallas_src>

<mosaic_0001>
module attributes {stable_mosaic.version = 11 : i64} {
  func.func @_ssim_kernel(%arg0: i32, %arg1: i32, %arg2: memref<128x128xf32, #tpu.memory_space<vmem>>, %arg3: memref<16x16xf32, #tpu.memory_space<vmem>>, %arg4: memref<128x16xf32, #tpu.memory_space<vmem>>, %arg5: memref<128x16xf32, #tpu.memory_space<vmem>>, %arg6: memref<8x128xf32, #tpu.memory_space<vmem>>) attributes {dimension_semantics = [#tpu.dimension_semantics<parallel>, #tpu.dimension_semantics<arbitrary>], iteration_bounds = array<i64: 1, 1>, scalar_prefetch = 0 : i64, scratch_operands = 0 : i64, tpu.core_type = #tpu.core_type<tc>, window_params = [{pipeline_mode = #tpu.pipeline_mode<synchronous>, transform_indices = @transform_0, window_bounds = array<i64: 128, 128>}, {pipeline_mode = #tpu.pipeline_mode<synchronous>, transform_indices = @transform_1, window_bounds = array<i64: 16, 16>}, {transform_indices = @transform_2, window_bounds = array<i64: 128, 16>}, {transform_indices = @transform_3, window_bounds = array<i64: 128, 16>}, {transform_indices = @transform_4, window_bounds = array<i64: 8, 128>}]} {
    %c0_i32 = arith.constant 0 : i32
    %0 = arith.cmpi eq, %arg1, %c0_i32 : i32
    %1 = arith.extui %0 : i1 to i32
    %c0_i32_0 = arith.constant 0 : i32
    %2 = arith.cmpi ne, %1, %c0_i32_0 : i32
    scf.if %2 {
      %cst_29 = arith.constant 0.000000e+00 : f32
      %56 = vector.broadcast %cst_29 : f32 to vector<8x128xf32>
      %c0_30 = arith.constant 0 : index
      %c0_31 = arith.constant 0 : index
      %57 = vector.load %arg6[%c0_30, %c0_31] : memref<8x128xf32, #tpu.memory_space<vmem>>, vector<8x128xf32>
      tpu.vector_store %arg6[%c0_30, %c0_31], %56 {strides = array<i32>} : memref<8x128xf32, #tpu.memory_space<vmem>>, vector<8x128xf32>,
    } else {
    }
    %c0 = arith.constant 0 : index
    %c0_1 = arith.constant 0 : index
    %3 = vector.load %arg2[%c0, %c0_1] : memref<128x128xf32, #tpu.memory_space<vmem>>, vector<128x128xf32>
    %c0_2 = arith.constant 0 : index
    %c0_3 = arith.constant 0 : index
    %4 = vector.load %arg3[%c0_2, %c0_3] : memref<16x16xf32, #tpu.memory_space<vmem>>, vector<16x16xf32>
    %c0_4 = arith.constant 0 : index
    %c0_5 = arith.constant 0 : index
    %5 = vector.load %arg4[%c0_4, %c0_5] : memref<128x16xf32, #tpu.memory_space<vmem>>, vector<128x16xf32>
    %c0_6 = arith.constant 0 : index
    %c0_7 = arith.constant 0 : index
    %6 = vector.load %arg5[%c0_6, %c0_7] : memref<128x16xf32, #tpu.memory_space<vmem>>, vector<128x16xf32>
    %cst = arith.constant dense<0.000000e+00> : vector<128x16xf32>
    %7 = tpu.matmul %5, %4, %cst {dimension_numbers = #tpu.dot_dimension_numbers<[1], [0], [0], [1], [0, 0, 1, 1], [], []>, precision = #tpu.contract_precision<fp32>} : vector<128x16xf32>, vector<16x16xf32>, vector<128x16xf32> -> vector<128x16xf32>
    %cst_8 = arith.constant dense<0.000000e+00> : vector<128x16xf32>
    %8 = tpu.matmul %3, %7, %cst_8 {dimension_numbers = #tpu.dot_dimension_numbers<[1], [0], [0], [1], [0, 0, 1, 1], [], []>, precision = #tpu.contract_precision<fp32>} : vector<128x128xf32>, vector<128x16xf32>, vector<128x16xf32> -> vector<128x16xf32>
    %cst_9 = arith.constant dense<0.000000e+00> : vector<128x16xf32>
    %9 = tpu.matmul %6, %4, %cst_9 {dimension_numbers = #tpu.dot_dimension_numbers<[1], [0], [0], [1], [0, 0, 1, 1], [], []>, precision = #tpu.contract_precision<fp32>} : vector<128x16xf32>, vector<16x16xf32>, vector<128x16xf32> -> vector<128x16xf32>
    %cst_10 = arith.constant dense<0.000000e+00> : vector<128x16xf32>
    %10 = tpu.matmul %3, %9, %cst_10 {dimension_numbers = #tpu.dot_dimension_numbers<[1], [0], [0], [1], [0, 0, 1, 1], [], []>, precision = #tpu.contract_precision<fp32>} : vector<128x128xf32>, vector<128x16xf32>, vector<128x16xf32> -> vector<128x16xf32>
    %11 = arith.mulf %5, %5 : vector<128x16xf32>
    %cst_11 = arith.constant dense<0.000000e+00> : vector<128x16xf32>
    %12 = tpu.matmul %11, %4, %cst_11 {dimension_numbers = #tpu.dot_dimension_numbers<[1], [0], [0], [1], [0, 0, 1, 1], [], []>, precision = #tpu.contract_precision<fp32>} : vector<128x16xf32>, vector<16x16xf32>, vector<128x16xf32> -> vector<128x16xf32>
    %cst_12 = arith.constant dense<0.000000e+00> : vector<128x16xf32>
    %13 = tpu.matmul %3, %12, %cst_12 {dimension_numbers = #tpu.dot_dimension_numbers<[1], [0], [0], [1], [0, 0, 1, 1], [], []>, precision = #tpu.contract_precision<fp32>} : vector<128x128xf32>, vector<128x16xf32>, vector<128x16xf32> -> vector<128x16xf32>
    %14 = arith.mulf %6, %6 : vector<128x16xf32>
    %cst_13 = arith.constant dense<0.000000e+00> : vector<128x16xf32>
    %15 = tpu.matmul %14, %4, %cst_13 {dimension_numbers = #tpu.dot_dimension_numbers<[1], [0], [0], [1], [0, 0, 1, 1], [], []>, precision = #tpu.contract_precision<fp32>} : vector<128x16xf32>, vector<16x16xf32>, vector<128x16xf32> -> vector<128x16xf32>
    %cst_14 = arith.constant dense<0.000000e+00> : vector<128x16xf32>
    %16 = tpu.matmul %3, %15, %cst_14 {dimension_numbers = #tpu.dot_dimension_numbers<[1], [0], [0], [1], [0, 0, 1, 1], [], []>, precision = #tpu.contract_precision<fp32>} : vector<128x128xf32>, vector<128x16xf32>, vector<128x16xf32> -> vector<128x16xf32>
    %17 = arith.mulf %5, %6 : vector<128x16xf32>
    %cst_15 = arith.constant dense<0.000000e+00> : vector<128x16xf32>
    %18 = tpu.matmul %17, %4, %cst_15 {dimension_numbers = #tpu.dot_dimension_numbers<[1], [0], [0], [1], [0, 0, 1, 1], [], []>, precision = #tpu.contract_precision<fp32>} : vector<128x16xf32>, vector<16x16xf32>, vector<128x16xf32> -> vector<128x16xf32>
    %cst_16 = arith.constant dense<0.000000e+00> : vector<128x16xf32>
    %19 = tpu.matmul %3, %18, %cst_16 {dimension_numbers = #tpu.dot_dimension_numbers<[1], [0], [0], [1], [0, 0, 1, 1], [], []>, precision = #tpu.contract_precision<fp32>} : vector<128x128xf32>, vector<128x16xf32>, vector<128x16xf32> -> vector<128x16xf32>
    %20 = arith.mulf %8, %8 : vector<128x16xf32>
    %21 = arith.mulf %10, %10 : vector<128x16xf32>
    %22 = arith.mulf %8, %10 : vector<128x16xf32>
    %23 = arith.subf %13, %20 : vector<128x16xf32>
    %24 = arith.subf %16, %21 : vector<128x16xf32>
    %25 = arith.subf %19, %22 : vector<128x16xf32>
    %cst_17 = arith.constant 2.000000e+00 : f32
    %26 = vector.broadcast %cst_17 : f32 to vector<128x16xf32>
    %27 = arith.mulf %26, %22 : vector<128x16xf32>
    %cst_18 = arith.constant 9.99999974E-5 : f32
    %28 = vector.broadcast %cst_18 : f32 to vector<128x16xf32>
    %29 = arith.addf %27, %28 : vector<128x16xf32>
    %cst_19 = arith.constant 2.000000e+00 : f32
    %30 = vector.broadcast %cst_19 : f32 to vector<128x16xf32>
    %31 = arith.mulf %30, %25 : vector<128x16xf32>
    %cst_20 = arith.constant 8.99999984E-4 : f32
    %32 = vector.broadcast %cst_20 : f32 to vector<128x16xf32>
    %33 = arith.addf %31, %32 : vector<128x16xf32>
    %34 = arith.mulf %29, %33 : vector<128x16xf32>
    %35 = arith.addf %20, %21 : vector<128x16xf32>
    %cst_21 = arith.constant 9.99999974E-5 : f32
    %36 = vector.broadcast %cst_21 : f32 to vector<128x16xf32>
    %37 = arith.addf %35, %36 : vector<128x16xf32>
    %38 = arith.addf %23, %24 : vector<128x16xf32>
    %cst_22 = arith.constant 8.99999984E-4 : f32
    %39 = vector.broadcast %cst_22 : f32 to vector<128x16xf32>
    %40 = arith.addf %38, %39 : vector<128x16xf32>
    %41 = arith.mulf %37, %40 : vector<128x16xf32>
    %42 = tpu.reciprocal %41 {approx = true} : vector<128x16xf32> -> vector<128x16xf32>
    %43 = arith.mulf %41, %42 : vector<128x16xf32>
    %cst_23 = arith.constant 2.000000e+00 : f32
    %44 = vector.broadcast %cst_23 : f32 to vector<128x16xf32>
    %45 = arith.subf %44, %43 : vector<128x16xf32>
    %46 = arith.mulf %42, %45 : vector<128x16xf32>
    %47 = arith.mulf %34, %46 : vector<128x16xf32>
    %48 = vector.shape_cast %47 : vector<128x16xf32> to vector<1x128x16xf32>
    %cst_24 = arith.constant dense<0.000000e+00> : vector<1xf32>
    %49 = vector.multi_reduction <add>, %48, %cst_24 [1, 2] : vector<1x128x16xf32> to vector<1xf32>
    %50 = vector.shape_cast %49 : vector<1xf32> to vector<1x1x1xf32>
    %51 = vector.extract %50[0, 0, 0] : f32 from vector<1x1x1xf32>
    %c0_25 = arith.constant 0 : index
    %c0_26 = arith.constant 0 : index
    %52 = vector.load %arg6[%c0_25, %c0_26] : memref<8x128xf32, #tpu.memory_space<vmem>>, vector<8x128xf32>
    %53 = vector.broadcast %51 : f32 to vector<8x128xf32>
    %54 = arith.addf %52, %53 : vector<8x128xf32>
    %c0_27 = arith.constant 0 : index
    %c0_28 = arith.constant 0 : index
    %55 = vector.load %arg6[%c0_27, %c0_28] : memref<8x128xf32, #tpu.memory_space<vmem>>, vector<8x128xf32>
    tpu.vector_store %arg6[%c0_27, %c0_28], %54 {strides = array<i32>} : memref<8x128xf32, #tpu.memory_space<vmem>>, vector<8x128xf32>,
    return
  }
  func.func @transform_0(%arg0: i32, %arg1: i32) -> (i32, i32) {
    %c0_i32 = arith.constant 0 : i32
    %c0_i32_0 = arith.constant 0 : i32
    %c0_i32_1 = arith.constant 0 : i32
    return %c0_i32, %c0_i32_0 : i32, i32
  }
  func.func @transform_1(%arg0: i32, %arg1: i32) -> (i32, i32) {
    %c0_i32 = arith.constant 0 : i32
    %c0_i32_0 = arith.constant 0 : i32
    %c0_i32_1 = arith.constant 0 : i32
    return %c0_i32, %c0_i32_0 : i32, i32
  }
  func.func @transform_2(%arg0: i32, %arg1: i32) -> (i32, i32) {
    %c1_i32 = arith.constant 1 : i32
    %0 = arith.muli %arg0, %c1_i32 : i32
    %1 = arith.addi %0, %arg1 : i32
    %c0_i32 = arith.constant 0 : i32
    %c0_i32_0 = arith.constant 0 : i32
    return %1, %c0_i32 : i32, i32
  }
  func.func @transform_3(%arg0: i32, %arg1: i32) -> (i32, i32) {
    %c1_i32 = arith.constant 1 : i32
    %0 = arith.muli %arg0, %c1_i32 : i32
    %1 = arith.addi %0, %arg1 : i32
    %c0_i32 = arith.constant 0 : i32
    %c0_i32_0 = arith.constant 0 : i32
    return %1, %c0_i32 : i32, i32
  }
  func.func @transform_4(%arg0: i32, %arg1: i32) -> (i32, i32) {
    %c0_i32 = arith.constant 0 : i32
    %c0_i32_0 = arith.constant 0 : i32
    return %arg0, %c0_i32 : i32, i32
  }
}

</mosaic_0001>

<bundles_post_ra>
// kernel: tpu_custom_call.1
= control target key start
LH: loop header
LB: loop body
LE: loop exit
PB: predicated region body
PF: predicated region fallthrough
CT: control target
= control target key end

     0   :  { %vm117_vm0 = vcmask 130048   ;;  %s13337_s0 = inlined_call_operand.vmem [shape: f32[128,128], index: 0, kind: input, shape index: {}]   ;;  %s13338_s1 = inlined_call_operand.vmem [shape: f32[16,16], index: 1, kind: input, shape index: {}]   ;;  %s13339_s2 = inlined_call_operand.vmem [shape: f32[128,16], index: 2, kind: input, shape index: {}]   ;;  %s13340_s3 = inlined_call_operand.vmem [shape: f32[128,16], index: 3, kind: input, shape index: {}]   ;;  %s13341_s4 = inlined_call_operand.hbm [shape: f32[8,128], index: 4, kind: output, shape index: {}]  }
   0x1   :  { %v84_v0 = vld [vmem:[%s13338_s1 + $0x8] sm:$0xff]  ;;  %v83_v1 = vld [vmem:[%s13338_s1] sm:$0xff] }
   0x2   :  { %v85_v2 = vld [vmem:[%s13339_s2] sm:$0xff]  ;;  %v8124_v3 = vand.u32 4294901760, %v84_v0  ;;  %v8126_v4 = vand.u32 4294901760, %v83_v1  ;;  %v86_v11 = vld [vmem:[%s13339_s2 + $0x8] sm:$0xff] }
   0x3   :  { %v101_v5 = vld [vmem:[%s13340_s3] sm:$0xff]  ;;  %v119_v6 = vsel %vm117_vm0, %v85_v2, 0 }
   0x4   :  { %13717 = vst [vmem:[#allocation5_spill] sm:$0xff] %v8124_v3  ;;  %v8132_v7 = vand.u32 4294901760, %v119_v6  ;;  %v8134_v8 = vmul.f32 %v101_v5, %v85_v2  ;;  %v8137_v9 = vsub.f32 %v84_v0, %v8124_v3  ;;  %181 = vmatpush.msra.mxu0 %v8124_v3  ;;  %v8141_v10 = vsub.f32 %v83_v1, %v8126_v4 }
   0x5   :  { %13718 = vst [vmem:[#allocation6_spill] sm:$0xff] %v8126_v4  ;;  %520 = vmatpush.msra.mxu3 %v8124_v3 }
   0x6   :  { %13719 = vst [vmem:[#allocation7_spill] sm:$0xff] %v8134_v8 }
   0x7   :  { %13720 = vst [vmem:[#allocation8_spill] sm:$0xff] %v8137_v9 }
   0x8   :  { %13721 = vst [vmem:[#allocation9_spill] sm:$0xff] %v8141_v10 }
   0x9   :  { %9 = vsyncpa [#allocation3], 0  ;;  %v185_v12 = vsub.f32 %v119_v6, %v8132_v7  ;;  %420 = vmatpush.msra.mxu2 %v8137_v9  ;;  %183 = vmatpush.msra.mxu0 %v8126_v4  ;;  %v8151_v13 = vand.u32 4294901760, %v8137_v9  ;;  %v87_v14 = vld [vmem:[%s13339_s2 + $0x10] sm:$0xff]  ;;  %v8158_v16 = vand.u32 4294901760, %v8141_v10  ;;  %v122_v17 = vsel %vm117_vm0, %v86_v11, 0 }
   0xa   :  { %522 = vmatpush.msra.mxu3 %v8126_v4  ;;  %v8164_v19 = vand.u32 4294901760, %v122_v17  ;;  %v125_v22 = vsel %vm117_vm0, %v87_v14, 0  ;;  %v88_v28 = vld [vmem:[%s13339_s2 + $0x18] sm:$0xff]  ;;  %v89_v36 = vld [vmem:[%s13339_s2 + $0x20] sm:$0xff]  ;;  %v90_v43 = vld [vmem:[%s13339_s2 + $0x28] sm:$0xff]  ;;  %s7943_s21 = sshll.u32 %s13341_s4, 4  ;;  %s7944_s21 = int_to_ptr.hbm [resolvable:$true] %s7943_s21 }
   0xb   :  { %13722 = vst [vmem:[#allocation10_spill] sm:$0xff] %v8151_v13  ;;  %v186_v15 = vand.u32 4294901760, %v185_v12  ;;  %423 = vmatpush.msra.mxu2 %v8141_v10  ;;  %v330_v18 = vsub.f32 %v8137_v9, %v8151_v13  ;;  %637 = vmatpush.msrb.mxu0 %v8151_v13  ;;  %v336_v21 = vsub.f32 %v8141_v10, %v8158_v16  ;;  %v8173_v25 = vand.u32 4294901760, %v125_v22  ;;  %v91_v50 = vld [vmem:[%s13339_s2 + $0x30] sm:$0xff]  ;;  %v92_v57 = vld [vmem:[%s13339_s2 + $0x38] sm:$0xff]  ;;  %v93_v0 = vld [vmem:[%s13339_s2 + $0x40] sm:$0xff] }
   0xc   :  { %13723 = vst [vmem:[#allocation11_spill] sm:$0xff] %v8158_v16  ;;  %426 = vmatmul.f32.vlgmr.msra.gmra.mxu2 %v185_v12  ;;  %v193_v24 = vsub.f32 %v122_v17, %v8164_v19  ;;  %v128_v32 = vsel %vm117_vm0, %v88_v28, 0  ;;  %v131_v39 = vsel %vm117_vm0, %v89_v36, 0  ;;  %v134_v46 = vsel %vm117_vm0, %v90_v43, 0  ;;  %v94_v14 = vld [vmem:[%s13339_s2 + $0x48] sm:$0xff] }
   0xd   :  { %v187_v20 = vsub.f32 %v185_v12, %v186_v15  ;;  %526 = vmatmul.f32.vlgmr.msra.gmra.mxu3 %v186_v15  ;;  %v8170_v23 = vand.u32 4294901760, %v330_v18  ;;  %641 = vmatpush.msrb.mxu0 %v8158_v16  ;;  %v8176_v27 = vand.u32 4294901760, %v336_v21  ;;  %v201_v30 = vsub.f32 %v125_v22, %v8173_v25 }
   0xe   :  { %v194_v29 = vand.u32 4294901760, %v193_v24  ;;  %v8187_v35 = vand.u32 4294901760, %v128_v32  ;;  %v8196_v42 = vand.u32 4294901760, %v131_v39  ;;  %v8204_v49 = vand.u32 4294901760, %v134_v46 }
   0xf   :  { %13724 = vst [vmem:[#allocation12_spill] sm:$0xff] %v8170_v23  ;;  %v188_v26 = vand.u32 4294901760, %v187_v20  ;;  %332 = vmatpush.msra.mxu1 %v8170_v23  ;;  %v202_v34 = vand.u32 4294901760, %v201_v30  ;;  %v137_v53 = vsel %vm117_vm0, %v91_v50, 0  ;;  %v140_v60 = vsel %vm117_vm0, %v92_v57, 0  ;;  %v98_v50 = vld [vmem:[%s13339_s2 + $0x68] sm:$0xff] }
  0x10   :  { %13725 = vst [vmem:[#allocation13_spill] sm:$0xff] %v8176_v27  ;;  %v195_v31 = vsub.f32 %v193_v24, %v194_v29  ;;  %v209_v38 = vsub.f32 %v128_v32, %v8187_v35  ;;  %v217_v45 = vsub.f32 %v131_v39, %v8196_v42  ;;  %v225_v52 = vsub.f32 %v134_v46, %v8204_v49 }
  0x11   :  { %189 = vmatmul.f32.vlgmr.msra.gmra.mxu0 %v188_v26  ;;  %338 = vmatpush.msra.mxu1 %v8176_v27  ;;  %v203_v37 = vsub.f32 %v201_v30, %v202_v34  ;;  %v8212_v56 = vand.u32 4294901760, %v137_v53  ;;  %v8220_v63 = vand.u32 4294901760, %v140_v60  ;;  %v143_v5 = vsel %vm117_vm0, %v93_v0, 0 }
  0x12   :  { %340 = vmatmul.f32.vlgmr.msra.gmra.mxu1 %v8132_v7  ;;  %v196_v33 = vand.u32 4294901760, %v195_v31  ;;  %v210_v41 = vand.u32 4294901760, %v209_v38  ;;  %v218_v48 = vand.u32 4294901760, %v217_v45  ;;  %v226_v55 = vand.u32 4294901760, %v225_v52 }
  0x13   :  { %722 = vmatpush.msrb.mxu1 %v8124_v3  ;;  %v204_v40 = vand.u32 4294901760, %v203_v37  ;;  %v233_v59 = vsub.f32 %v137_v53, %v8212_v56  ;;  %v241_v2 = vsub.f32 %v140_v60, %v8220_v63  ;;  %v8228_v12 = vand.u32 4294901760, %v143_v5 }
  0x14   :  { %431 = vmatmul.f32.gmra.mxu2 %v193_v24  ;;  %v211_v44 = vsub.f32 %v209_v38, %v210_v41  ;;  %v219_v51 = vsub.f32 %v217_v45, %v218_v48  ;;  %v227_v58 = vsub.f32 %v225_v52, %v226_v55  ;;  %v146_v18 = vsel %vm117_vm0, %v94_v14, 0  ;;  %v95_v24 = vld [vmem:[%s13339_s2 + $0x50] sm:$0xff] }
  0x15   :  { %532 = vmatmul.f32.gmra.mxu3 %v194_v29  ;;  %724 = vmatpush.msrb.mxu1 %v8126_v4  ;;  %v234_v62 = vand.u32 4294901760, %v233_v59  ;;  %v242_v11 = vand.u32 4294901760, %v241_v2  ;;  %v249_v17 = vsub.f32 %v143_v5, %v8228_v12  ;;  %v8236_v22 = vand.u32 4294901760, %v146_v18 }
  0x16   :  { %v212_v47 = vand.u32 4294901760, %v211_v44  ;;  %v220_v54 = vand.u32 4294901760, %v219_v51  ;;  %v228_v61 = vand.u32 4294901760, %v227_v58  ;;  %v149_v29 = vsel %vm117_vm0, %v95_v24, 0  ;;  %v99_v58 = vld [vmem:[%s13339_s2 + $0x70] sm:$0xff] }
  0x17   :  { %v235_v1 = vsub.f32 %v233_v59, %v234_v62  ;;  %v243_v15 = vsub.f32 %v241_v2, %v242_v11  ;;  %v250_v21 = vand.u32 4294901760, %v249_v17  ;;  %v257_v28 = vsub.f32 %v146_v18, %v8236_v22 }
  0x18   :  { %v8244_v32 = vand.u32 4294901760, %v149_v29  ;;  %v158_v53 = vsel %vm117_vm0, %v98_v50, 0 }
  0x19   :  { %197 = vmatmul.f32.gmra.mxu0 %v196_v33  ;;  %v236_v6 = vand.u32 4294901760, %v235_v1  ;;  %v244_v20 = vand.u32 4294901760, %v243_v15  ;;  %v251_v26 = vsub.f32 %v249_v17, %v250_v21  ;;  %v258_v31 = vand.u32 4294901760, %v257_v28  ;;  %v96_v33 = vld [vmem:[%s13339_s2 + $0x58] sm:$0xff] }
  0x1a   :  { %344 = vmatmul.f32.gmra.mxu1 %v8164_v19  ;;  %v265_v36 = vsub.f32 %v149_v29, %v8244_v32  ;;  %v152_v37 = vsel %vm117_vm0, %v96_v33, 0  ;;  %v8268_v57 = vand.u32 4294901760, %v158_v53 }
  0x1c   :  { %436 = vmatmul.f32.gmra.mxu2 %v201_v30  ;;  %v252_v30 = vand.u32 4294901760, %v251_v26  ;;  %v266_v39 = vand.u32 4294901760, %v265_v36  ;;  %v289_v60 = vsub.f32 %v158_v53, %v8268_v57 }
  0x1d   :  { %538 = vmatmul.f32.gmra.mxu3 %v202_v34  ;;  %v259_v34 = vsub.f32 %v257_v28, %v258_v31 }
  0x1e   :  { %v267_v43 = vsub.f32 %v265_v36, %v266_v39  ;;  %v290_v0 = vand.u32 4294901760, %v289_v60 }
  0x20   :  { %v268_v46 = vand.u32 4294901760, %v267_v43  ;;  %v291_v5 = vsub.f32 %v289_v60, %v290_v0 }
  0x21   :  { %205 = vmatmul.f32.gmra.mxu0 %v204_v40  ;;  %v8252_v40 = vand.u32 4294901760, %v152_v37 }
  0x22   :  { %348 = vmatmul.f32.gmra.mxu1 %v8173_v25  ;;  %v292_v14 = vand.u32 4294901760, %v291_v5 }
  0x23   :  { %v273_v44 = vsub.f32 %v152_v37, %v8252_v40 }
  0x24   :  { %441 = vmatmul.f32.gmra.mxu2 %v209_v38  ;;  %v260_v38 = vand.u32 4294901760, %v259_v34 }
  0x25   :  { %544 = vmatmul.f32.gmra.mxu3 %v210_v41  ;;  %v97_v41 = vld [vmem:[%s13339_s2 + $0x60] sm:$0xff] }
  0x29   :  { %213 = vmatmul.f32.gmra.mxu0 %v212_v47  ;;  %v274_v47 = vand.u32 4294901760, %v273_v44 }
  0x2a   :  { %352 = vmatmul.f32.gmra.mxu1 %v8187_v35 }
  0x2b   :  { %v275_v51 = vsub.f32 %v273_v44, %v274_v47 }
  0x2c   :  { %446 = vmatmul.f32.gmra.mxu2 %v217_v45  ;;  %v155_v45 = vsel %vm117_vm0, %v97_v41, 0 }
  0x2d   :  { %550 = vmatmul.f32.gmra.mxu3 %v218_v48  ;;  %v8260_v48 = vand.u32 4294901760, %v155_v45 }
  0x31   :  { %221 = vmatmul.f32.gmra.mxu0 %v220_v54  ;;  %v276_v54 = vand.u32 4294901760, %v275_v51 }
  0x32   :  { %356 = vmatmul.f32.gmra.mxu1 %v8196_v42 }
  0x34   :  { %451 = vmatmul.f32.gmra.mxu2 %v225_v52  ;;  %v281_v52 = vsub.f32 %v155_v45, %v8260_v48 }
  0x35   :  { %556 = vmatmul.f32.gmra.mxu3 %v226_v55 }
  0x36   :  { %v282_v55 = vand.u32 4294901760, %v281_v52 }
  0x39   :  { %229 = vmatmul.f32.gmra.mxu0 %v228_v61  ;;  %v161_v61 = vsel %vm117_vm0, %v99_v58, 0 }
  0x3a   :  { %360 = vmatmul.f32.gmra.mxu1 %v8204_v49  ;;  %v8276_v1 = vand.u32 4294901760, %v161_v61 }
  0x3c   :  { %456 = vmatmul.f32.gmra.mxu2 %v233_v59  ;;  %v283_v59 = vsub.f32 %v281_v52, %v282_v55 }
  0x3d   :  { %562 = vmatmul.f32.gmra.mxu3 %v234_v62 }
  0x3e   :  { %v284_v62 = vand.u32 4294901760, %v283_v59 }
  0x41   :  { %237 = vmatmul.f32.gmra.mxu0 %v236_v6  ;;  %v297_v6 = vsub.f32 %v161_v61, %v8276_v1 }
  0x42   :  { %364 = vmatmul.f32.gmra.mxu1 %v8212_v56 }
  0x43   :  { %v298_v15 = vand.u32 4294901760, %v297_v6 }
  0x44   :  { %461 = vmatmul.f32.gmra.mxu2 %v241_v2  ;;  %v100_v2 = vld [vmem:[%s13339_s2 + $0x78] sm:$0xff] }
  0x45   :  { %568 = vmatmul.f32.gmra.mxu3 %v242_v11  ;;  %v164_v11 = vsel %vm117_vm0, %v100_v2, 0  ;;  %v299_v18 = vsub.f32 %v297_v6, %v298_v15 }
  0x49   :  { %245 = vmatmul.f32.gmra.mxu0 %v244_v20 }
  0x4a   :  { %368 = vmatmul.f32.gmra.mxu1 %v8220_v63 }
  0x4c   :  { %466 = vmatmul.f32.gmra.mxu2 %v249_v17  ;;  %v8284_v17 = vand.u32 4294901760, %v164_v11 }
  0x4d   :  { %574 = vmatmul.f32.gmra.mxu3 %v250_v21  ;;  %v300_v21 = vand.u32 4294901760, %v299_v18 }
  0x4e   :  { %v305_v20 = vsub.f32 %v164_v11, %v8284_v17 }
  0x50   :  { %v306_v24 = vand.u32 4294901760, %v305_v20 }
  0x51   :  { %253 = vmatmul.f32.gmra.mxu0 %v252_v30 }
  0x52   :  { %372 = vmatmul.f32.gmra.mxu1 %v8228_v12  ;;  %v307_v26 = vsub.f32 %v305_v20, %v306_v24 }
  0x54   :  { %471 = vmatmul.f32.gmra.mxu2 %v257_v28  ;;  %v308_v28 = vand.u32 4294901760, %v307_v26 }
  0x55   :  { %580 = vmatmul.f32.gmra.mxu3 %v258_v31 }
  0x59   :  { %261 = vmatmul.f32.gmra.mxu0 %v260_v38 }
  0x5a   :  { %376 = vmatmul.f32.gmra.mxu1 %v8236_v22 }
  0x5c   :  { %476 = vmatmul.f32.gmra.mxu2 %v265_v36 }
  0x5d   :  { %586 = vmatmul.f32.gmra.mxu3 %v266_v39 }
  0x61   :  { %269 = vmatmul.f32.gmra.mxu0 %v268_v46 }
  0x62   :  { %380 = vmatmul.f32.gmra.mxu1 %v8244_v32 }
  0x64   :  { %481 = vmatmul.f32.gmra.mxu2 %v273_v44 }
  0x65   :  { %592 = vmatmul.f32.gmra.mxu3 %v274_v47 }
  0x69   :  { %277 = vmatmul.f32.gmra.mxu0 %v276_v54 }
  0x6a   :  { %384 = vmatmul.f32.gmra.mxu1 %v8252_v40 }
  0x6c   :  { %486 = vmatmul.f32.gmra.mxu2 %v281_v52 }
  0x6d   :  { %598 = vmatmul.f32.gmra.mxu3 %v282_v55 }
  0x71   :  { %285 = vmatmul.f32.gmra.mxu0 %v284_v62 }
  0x72   :  { %388 = vmatmul.f32.gmra.mxu1 %v8260_v48 }
  0x74   :  { %491 = vmatmul.f32.gmra.mxu2 %v289_v60 }
  0x75   :  { %604 = vmatmul.f32.gmra.mxu3 %v290_v0 }
  0x79   :  { %293 = vmatmul.f32.gmra.mxu0 %v292_v14 }
  0x7a   :  { %392 = vmatmul.f32.gmra.mxu1 %v8268_v57 }
  0x7c   :  { %496 = vmatmul.f32.gmra.mxu2 %v297_v6 }
  0x7d   :  { %610 = vmatmul.f32.gmra.mxu3 %v298_v15 }
  0x81   :  { %301 = vmatmul.f32.gmra.mxu0 %v300_v21 }
  0x82   :  { %396 = vmatmul.f32.gmra.mxu1 %v8276_v1 }
  0x84   :  { %501 = vmatmul.f32.gmra.mxu2 %v305_v20 }
  0x85   :  { %616 = vmatmul.f32.gmra.mxu3 %v306_v24 }
  0x89   :  { %309 = vmatmul.f32.gmra.mxu0 %v308_v28 }
  0x8a   :  { %400 = vmatmul.f32.gmra.mxu1 %v8284_v17 }
  0x8e   :  { %v8290_v29 = vpop.f32.mrf.mxu0 }
  0x8f   :  { %v8292_v30 = vpop.f32.mrf.mxu1  ;;  %v8358_v50 = vpop.f32.mrf.mxu2 }
  0x90   :  { %v8364_v51 = vpop.f32.mrf.mxu3 }
  0x91   :  { %643 = vmatmul.f32.vlgmr.msrb.gmra.mxu0 %v8132_v7  ;;  %13729 = vst [vmem:[#allocation17_spill] sm:$0xff] %v8364_v51 }
  0x92   :  { %726 = vmatmul.f32.vlgmr.msrb.gmra.mxu1 %v8132_v7 }
  0x96   :  { %v8296_v31 = vpop.f32.mrf.mxu0 }
  0x97   :  { %v8298_v33 = vpop.f32.mrf.mxu1  ;;  %v8371_v53 = vpop.f32.mrf.mxu2 }
  0x99   :  { %647 = vmatmul.f32.gmra.mxu0 %v8164_v19 }
  0x9a   :  { %730 = vmatmul.f32.gmra.mxu1 %v8164_v19 }
  0x9e   :  { %v8302_v34 = vpop.f32.mrf.mxu0 }
  0x9f   :  { %13726 = vst [vmem:[#allocation14_spill] sm:$0xff] %v8302_v34  ;;  %v8304_v36 = vpop.f32.mrf.mxu1 }
  0xa0   :  { %13727 = vst [vmem:[#allocation15_spill] sm:$0xff] %v8304_v36 }
  0xa1   :  { %651 = vmatmul.f32.gmra.mxu0 %v8173_v25 }
  0xa2   :  { %734 = vmatmul.f32.gmra.mxu1 %v8173_v25 }
  0xa6   :  { %v8308_v37 = vpop.f32.mrf.mxu0 }
  0xa7   :  { %v8310_v38 = vpop.f32.mrf.mxu1 }
  0xa8   :  { %13728 = vst [vmem:[#allocation16_spill] sm:$0xff] %v8310_v38 }
  0xa9   :  { %655 = vmatmul.f32.gmra.mxu0 %v8187_v35 }
  0xaa   :  { %738 = vmatmul.f32.gmra.mxu1 %v8187_v35 }
  0xae   :  { %v8314_v7 = vpop.f32.mrf.mxu0 }
  0xaf   :  { %v8316_v39 = vpop.f32.mrf.mxu1 }
  0xb1   :  { %659 = vmatmul.f32.gmra.mxu0 %v8196_v42 }
  0xb2   :  { %742 = vmatmul.f32.gmra.mxu1 %v8196_v42 }
  0xb6   :  { %v8320_v19 = vpop.f32.mrf.mxu0 }
  0xb7   :  { %v8322_v41 = vpop.f32.mrf.mxu1 }
  0xb9   :  { %663 = vmatmul.f32.gmra.mxu0 %v8204_v49 }
  0xba   :  { %746 = vmatmul.f32.gmra.mxu1 %v8204_v49 }
  0xbe   :  { %v8326_v25 = vpop.f32.mrf.mxu0 }
  0xbf   :  { %v8328_v43 = vpop.f32.mrf.mxu1 }
  0xc1   :  { %667 = vmatmul.f32.gmra.mxu0 %v8212_v56 }
  0xc2   :  { %750 = vmatmul.f32.gmra.mxu1 %v8212_v56 }
  0xc6   :  { %v8332_v35 = vpop.f32.mrf.mxu0 }
  0xc7   :  { %v8334_v44 = vpop.f32.mrf.mxu1 }
  0xc9   :  { %671 = vmatmul.f32.gmra.mxu0 %v8220_v63 }
  0xca   :  { %754 = vmatmul.f32.gmra.mxu1 %v8220_v63 }
  0xce   :  { %v8338_v42 = vpop.f32.mrf.mxu0 }
  0xcf   :  { %v8340_v45 = vpop.f32.mrf.mxu1 }
  0xd1   :  { %675 = vmatmul.f32.gmra.mxu0 %v8228_v12 }
  0xd2   :  { %758 = vmatmul.f32.gmra.mxu1 %v8228_v12 }
  0xd6   :  { %v8344_v49 = vpop.f32.mrf.mxu0 }
  0xd7   :  { %v8346_v46 = vpop.f32.mrf.mxu1 }
  0xd8   :  { %v378_v38 = vadd.f32 %v8346_v46, %v8344_v49 }
  0xd9   :  { %679 = vmatmul.f32.gmra.mxu0 %v8236_v22 }
  0xda   :  { %762 = vmatmul.f32.gmra.mxu1 %v8236_v22 }
  0xde   :  { %v8350_v56 = vpop.f32.mrf.mxu0 }
  0xdf   :  { %v8352_v47 = vpop.f32.mrf.mxu1 }
  0xe1   :  { %683 = vmatmul.f32.gmra.mxu0 %v8244_v32 }
  0xe2   :  { %766 = vmatmul.f32.gmra.mxu1 %v8244_v32  ;;  %v8374_v32 = vpop.f32.mrf.mxu3 }
  0xe3   :  { %13730 = vst [vmem:[#allocation18_spill] sm:$0xff] %v8374_v32 }
  0xe6   :  { %v8356_v63 = vpop.f32.mrf.mxu0 }
  0xe7   :  { %v8360_v12 = vpop.f32.mrf.mxu1 }
  0xe8   :  { %v386_v34 = vadd.f32 %v8360_v12, %v8356_v63 }
  0xe9   :  { %687 = vmatmul.f32.gmra.mxu0 %v8252_v40 }
  0xea   :  { %770 = vmatmul.f32.gmra.mxu1 %v8252_v40  ;;  %v8380_v40 = vpop.f32.mrf.mxu2  ;;  %v8382_v59 = vpop.f32.mrf.mxu3 }
  0xeb   :  { %13731 = vst [vmem:[#allocation19_spill] sm:$0xff] %v8380_v40 }
  0xec   :  { %13732 = vst [vmem:[#allocation20_spill] sm:$0xff] %v8382_v59 }
  0xee   :  { %v8366_v22 = vpop.f32.mrf.mxu0 }
  0xef   :  { %v8368_v52 = vpop.f32.mrf.mxu1 }
  0xf1   :  { %691 = vmatmul.f32.gmra.mxu0 %v8260_v48 }
  0xf2   :  { %774 = vmatmul.f32.gmra.mxu1 %v8260_v48  ;;  %v8386_v48 = vpop.f32.mrf.mxu2  ;;  %v8393_v0 = vpop.f32.mrf.mxu3 }
  0xf3   :  { %13733 = vst [vmem:[#allocation21_spill] sm:$0xff] %v8386_v48 }
  0xf4   :  { %13734 = vst [vmem:[#allocation22_spill] sm:$0xff] %v8393_v0 }
  0xf6   :  { %v8376_v54 = vpop.f32.mrf.mxu0 }
  0xf7   :  { %v393_v55 = vpop.f32.mrf.mxu1 }
  0xf9   :  { %695 = vmatmul.f32.gmra.mxu0 %v8268_v57 }
  0xfa   :  { %778 = vmatmul.f32.gmra.mxu1 %v8268_v57  ;;  %v8398_v2 = vpop.f32.mrf.mxu2  ;;  %v8402_v6 = vpop.f32.mrf.mxu3 }
  0xfb   :  { %13736 = vst [vmem:[#allocation24_spill] sm:$0xff] %v8398_v2 }
  0xfc   :  { %13738 = vst [vmem:[#allocation26_spill] sm:$0xff] %v8402_v6 }
  0xfe   :  { %v302_v58 = vpop.f32.mrf.mxu0 }
  0xff   :  { %v397_v60 = vpop.f32.mrf.mxu1 }
 0x101   :  { %699 = vmatmul.f32.gmra.mxu0 %v8276_v1 }
 0x102   :  { %782 = vmatmul.f32.gmra.mxu1 %v8276_v1  ;;  %v8408_v14 = vpop.f32.mrf.mxu2  ;;  %v8410_v15 = vpop.f32.mrf.mxu3 }
 0x103   :  { %13741 = vst [vmem:[#allocation29_spill] sm:$0xff] %v8408_v14 }
 0x104   :  { %13742 = vst [vmem:[#allocation30_spill] sm:$0xff] %v8410_v15 }
 0x106   :  { %v8388_v61 = vpop.f32.mrf.mxu0 }
 0x107   :  { %v8390_v62 = vpop.f32.mrf.mxu1 }
 0x109   :  { %703 = vmatmul.f32.gmra.mxu0 %v8284_v17 }
 0x10a   :  { %786 = vmatmul.f32.gmra.mxu1 %v8284_v17  ;;  %v8416_v17 = vpop.f32.mrf.mxu2  ;;  %v8420_v24 = vpop.f32.mrf.mxu3 }
 0x10b   :  { %13746 = vst [vmem:[#allocation34_spill] sm:$0xff] %v8420_v24 }
 0x10e   :  { %v8396_v57 = vpop.f32.mrf.mxu0 }
 0x10f   :  { %13735 = vst [vmem:[#allocation23_spill] sm:$0xff] %v8396_v57  ;;  %v8400_v5 = vpop.f32.mrf.mxu1 }
 0x110   :  { %13737 = vst [vmem:[#allocation25_spill] sm:$0xff] %v8400_v5 }
 0x112   :  { %v8424_v28 = vpop.f32.mrf.mxu2  ;;  %v8430_v9 = vpop.f32.mrf.mxu3 }
 0x113   :  { %13750 = vst [vmem:[#allocation38_spill] sm:$0xff] %v8430_v9  ;;  %v382_v9 = vadd.f32 %v8352_v47, %v8350_v56 }
 0x116   :  { %v8404_v1 = vpop.f32.mrf.mxu0 }
 0x117   :  { %13739 = vst [vmem:[#allocation27_spill] sm:$0xff] %v8404_v1  ;;  %v8406_v11 = vpop.f32.mrf.mxu1 }
 0x118   :  { %13740 = vst [vmem:[#allocation28_spill] sm:$0xff] %v8406_v11 }
 0x11a   :  { %v467_v13 = vpop.f32.mrf.mxu2  ;;  %v8436_v4 = vpop.f32.mrf.mxu3 }
 0x11e   :  { %v8412_v18 = vpop.f32.mrf.mxu0 }
 0x11f   :  { %13743 = vst [vmem:[#allocation31_spill] sm:$0xff] %v8412_v18  ;;  %v8414_v20 = vpop.f32.mrf.mxu1 }
 0x120   :  { %13744 = vst [vmem:[#allocation32_spill] sm:$0xff] %v8414_v20 }
 0x122   :  { %v472_v5 = vpop.f32.mrf.mxu2  ;;  %v8442_v11 = vpop.f32.mrf.mxu3 }
 0x126   :  { %v8418_v21 = vpop.f32.mrf.mxu0 }
 0x127   :  { %13745 = vst [vmem:[#allocation33_spill] sm:$0xff] %v8418_v21  ;;  %v8422_v26 = vpop.f32.mrf.mxu1 }
 0x128   :  { %13747 = vst [vmem:[#allocation35_spill] sm:$0xff] %v8422_v26 }
 0x12a   :  { %v477_v26 = vpop.f32.mrf.mxu2  ;;  %v587_v51 = vpop.f32.mrf.mxu3 }
 0x12e   :  { %v8426_v8 = vpop.f32.mrf.mxu0 }
 0x12f   :  { %13748 = vst [vmem:[#allocation36_spill] sm:$0xff] %v8426_v8  ;;  %v8428_v10 = vpop.f32.mrf.mxu1 }
 0x130   :  { %13749 = vst [vmem:[#allocation37_spill] sm:$0xff] %v8428_v10 }
 0x132   :  { %v482_v18 = vpop.f32.mrf.mxu2  ;;  %v593_v21 = vpop.f32.mrf.mxu3 }
 0x136   :  { %v8432_v16 = vpop.f32.mrf.mxu0 }
 0x137   :  { %13751 = vst [vmem:[#allocation39_spill] sm:$0xff] %v8432_v16  ;;  %v8434_v27 = vpop.f32.mrf.mxu1 }
 0x138   :  { %13752 = vst [vmem:[#allocation40_spill] sm:$0xff] %v8434_v27 }
 0x13a   :  { %v599_v0 = vpop.f32.mrf.mxu3 }
 0x13e   :  { %v8438_v23 = vpop.f32.mrf.mxu0 }
 0x13f   :  { %13753 = vst [vmem:[#allocation41_spill] sm:$0xff] %v8438_v23  ;;  %v8440_v3 = vpop.f32.mrf.mxu1 }
 0x140   :  { %13754 = vst [vmem:[#allocation42_spill] sm:$0xff] %v8440_v3  ;;  %v487_v3 = vpop.f32.mrf.mxu2 }
 0x142   :  { %v605_v40 = vpop.f32.mrf.mxu3 }
 0x146   :  { %v8444_v20 = vpop.f32.mrf.mxu0 }
 0x147   :  { %13755 = vst [vmem:[#allocation43_spill] sm:$0xff] %v8444_v20  ;;  %v8446_v57 = vpop.f32.mrf.mxu1  ;;  %v398_v20 = vadd.f32 %v397_v60, %v302_v58 }
 0x148   :  { %13756 = vst [vmem:[#allocation44_spill] sm:$0xff] %v8446_v57  ;;  %v492_v57 = vpop.f32.mrf.mxu2 }
 0x14a   :  { %v611_v2 = vpop.f32.mrf.mxu3 }
 0x14e   :  { %v8448_v1 = vpop.f32.mrf.mxu0 }
 0x14f   :  { %13757 = vst [vmem:[#allocation45_spill] sm:$0xff] %v8448_v1  ;;  %v8450_v10 = vpop.f32.mrf.mxu1 }
 0x150   :  { %13758 = vst [vmem:[#allocation46_spill] sm:$0xff] %v8450_v10  ;;  %v497_v48 = vpop.f32.mrf.mxu2  ;;  %v394_v10 = vadd.f32 %v393_v55, %v8376_v54  ;;  %v483_v54 = vadd.f32 %v482_v18, %v386_v34 }
 0x151   :  { %v498_v1 = vadd.f32 %v497_v48, %v398_v20  ;;  %v13766_v20 = vld [vmem:[#allocation14_spill] sm:$0xff] }
 0x152   :  { %v594_v49 = vadd.f32 %v593_v21, %v483_v54  ;;  %v13770_v54 = vld [vmem:[#allocation43_spill] sm:$0xff] }
 0x153   :  { %v612_v58 = vadd.f32 %v611_v2, %v498_v1  ;;  %v13763_v1 = vld [vmem:[#allocation38_spill] sm:$0xff] }
 0x156   :  { %v8452_v32 = vpop.f32.mrf.mxu0 }
 0x157   :  { %v8454_v27 = vpop.f32.mrf.mxu1 }
 0x158   :  { %13759 = vst [vmem:[#allocation47_spill] sm:$0xff] %v8454_v27  ;;  %v390_v27 = vadd.f32 %v8368_v52, %v8366_v22  ;;  %v402_v22 = vadd.f32 %v8390_v62, %v8388_v61  ;;  %v374_v52 = vadd.f32 %v8340_v45, %v8338_v42  ;;  %v502_v60 = vpop.f32.mrf.mxu2  ;;  %v346_v42 = vadd.f32 %v8298_v33, %v8296_v31 }
 0x15a   :  { %v488_v14 = vadd.f32 %v487_v3, %v390_v27  ;;  %v342_v3 = vadd.f32 %v8292_v30, %v8290_v29  ;;  %v370_v27 = vadd.f32 %v8334_v44, %v8332_v35  ;;  %v503_v46 = vadd.f32 %v502_v60, %v402_v22 }
 0x15b   :  { %v468_v45 = vadd.f32 %v467_v13, %v374_v52  ;;  %v8489_v13 = vadd.f32 %v8371_v53, %v346_v42  ;;  %v13776_v42 = vld [vmem:[#allocation19_spill] sm:$0xff] }
 0x15c   :  { %v600_v12 = vadd.f32 %v599_v0, %v488_v14  ;;  %v8480_v30 = vadd.f32 %v8358_v50, %v342_v3  ;;  %v13764_v14 = vld [vmem:[#allocation45_spill] sm:$0xff] }
 0x15d   :  { %v13774_v3 = vld [vmem:[#allocation41_spill] sm:$0xff] }
 0x15e   :  { %v684_v59 = vpop.f32.mrf.mxu0 }
 0x15f   :  { %v8456_v8 = vpop.f32.mrf.mxu1 }
 0x160   :  { %13760 = vst [vmem:[#allocation48_spill] sm:$0xff] %v8456_v8  ;;  %v493_v8 = vadd.f32 %v492_v57, %v394_v10  ;;  %v478_v10 = vadd.f32 %v477_v26, %v382_v9  ;;  %v366_v9 = vadd.f32 %v8328_v43, %v8326_v25  ;;  %v576_v25 = vadd.f32 %v8436_v4, %v468_v45  ;;  %v13769_v26 = vld [vmem:[#allocation34_spill] sm:$0xff] }
 0x161   :  { %v13777_v45 = vld [vmem:[#allocation26_spill] sm:$0xff] }
 0x162   :  { %v606_v55 = vadd.f32 %v605_v40, %v493_v8  ;;  %v473_v8 = vadd.f32 %v472_v5, %v378_v38  ;;  %v617_v40 = vpop.f32.mrf.mxu3  ;;  %v588_v61 = vadd.f32 %v587_v51, %v478_v10  ;;  %v362_v38 = vadd.f32 %v8322_v41, %v8320_v19  ;;  %v13762_v5 = vld [vmem:[#allocation29_spill] sm:$0xff] }
 0x163   :  { %v618_v44 = vadd.f32 %v617_v40, %v503_v46  ;;  %v13772_v10 = vld [vmem:[#allocation21_spill] sm:$0xff] }
 0x164   :  { %v582_v35 = vadd.f32 %v8442_v11, %v473_v8  ;;  %v685_v31 = vadd.f32 %v684_v59, %v588_v61  ;;  %v13761_v59 = vld [vmem:[#allocation16_spill] sm:$0xff]  ;;  %v453_v53 = vadd.f32 %v13762_v5, %v362_v38  ;;  %v13775_v8 = vld [vmem:[#allocation46_spill] sm:$0xff]  ;;  %v13778_v61 = vld [vmem:[#allocation39_spill] sm:$0xff] }
 0x165   :  { %v354_v2 = vadd.f32 %v13761_v59, %v8308_v37 }
 0x166   :  { %v688_v16 = vpop.f32.mrf.mxu0  ;;  %v681_v41 = vadd.f32 %v8452_v32, %v582_v35 }
 0x167   :  { %v771_v6 = vpop.f32.mrf.mxu1  ;;  %v689_v62 = vadd.f32 %v688_v16, %v594_v49  ;;  %v358_v16 = vadd.f32 %v8316_v39, %v8314_v7  ;;  %v677_v7 = vadd.f32 %v13764_v14, %v576_v25 }
 0x169   :  { %v772_v43 = vadd.f32 %v771_v6, %v689_v62 }
 0x16b   :  { %v8515_v52 = vand.u32 4294901760, %v772_v43 }
 0x16d   :  { %v8544_v35 = vsub.f32 %v772_v43, %v8515_v52 }
 0x16e   :  { %v692_v23 = vpop.f32.mrf.mxu0 }
 0x16f   :  { %v775_v15 = vpop.f32.mrf.mxu1  ;;  %v693_v56 = vadd.f32 %v692_v23, %v600_v12  ;;  %v463_v23 = vadd.f32 %v8424_v28, %v370_v27  ;;  %v443_v12 = vadd.f32 %v13772_v10, %v354_v2 }
 0x171   :  { %v776_v33 = vadd.f32 %v775_v15, %v693_v56  ;;  %v570_v11 = vadd.f32 %v13763_v1, %v463_v23  ;;  %v13765_v15 = vld [vmem:[#allocation48_spill] sm:$0xff] }
 0x172   :  { %v768_v18 = vadd.f32 %v13765_v15, %v685_v31 }
 0x173   :  { %v8504_v4 = vand.u32 4294901760, %v776_v33 }
 0x174   :  { %v8526_v49 = vand.u32 4294901760, %v768_v18 }
 0x175   :  { %v8529_v46 = vsub.f32 %v776_v33, %v8504_v4  ;;  %v13780_v33 = vld [vmem:[#allocation22_spill] sm:$0xff] }
 0x176   :  { %v696_v24 = vpop.f32.mrf.mxu0  ;;  %v8557_v43 = vsub.f32 %v768_v18, %v8526_v49 }
 0x177   :  { %v779_v36 = vpop.f32.mrf.mxu1  ;;  %v697_v48 = vadd.f32 %v696_v24, %v606_v55  ;;  %v13768_v24 = vld [vmem:[#allocation24_spill] sm:$0xff]  ;;  %v673_v55 = vadd.f32 %v13770_v54, %v570_v11  ;;  %v971_v5 = vand.u32 4294901760, %v8529_v46  ;;  %v13784_v11 = vld [vmem:[#allocation33_spill] sm:$0xff] }
 0x178   :  { %v448_v37 = vadd.f32 %v13768_v24, %v358_v16  ;;  %v546_v16 = vadd.f32 %v13780_v33, %v443_v12  ;;  %v13789_v12 = vld [vmem:[#allocation17_spill] sm:$0xff] }
 0x179   :  { %v780_v29 = vadd.f32 %v779_v36, %v697_v48  ;;  %v458_v36 = vadd.f32 %v8416_v17, %v366_v9  ;;  %v13767_v17 = vld [vmem:[#allocation15_spill] sm:$0xff]  ;;  %v13773_v48 = vld [vmem:[#allocation30_spill] sm:$0xff]  ;;  %v972_v10 = vsub.f32 %v8529_v46, %v971_v5 }
 0x17a   :  { %v350_v21 = vadd.f32 %v13767_v17, %v13766_v20  ;;  %v552_v40 = vadd.f32 %v13777_v45, %v448_v37  ;;  %v657_v14 = vadd.f32 %v13784_v11, %v546_v16  ;;  %v977_v17 = vand.u32 4294901760, %v8544_v35  ;;  %v13787_v37 = vld [vmem:[#allocation31_spill] sm:$0xff] }
 0x17b   :  { %v8496_v50 = vand.u32 4294901760, %v780_v29  ;;  %v564_v28 = vadd.f32 %v13769_v26, %v458_v36  ;;  %v13781_v36 = vld [vmem:[#allocation36_spill] sm:$0xff] }
 0x17c   :  { %v438_v9 = vadd.f32 %v13776_v42, %v350_v21  ;;  %v661_v25 = vadd.f32 %v13781_v36, %v552_v40  ;;  %v13786_v21 = vld [vmem:[#allocation18_spill] sm:$0xff]  ;;  %v978_v45 = vsub.f32 %v8544_v35, %v977_v17 }
 0x17d   :  { %v8518_v60 = vsub.f32 %v780_v29, %v8496_v50  ;;  %v669_v27 = vadd.f32 %v13774_v3, %v564_v28  ;;  %v13779_v29 = vld [vmem:[#allocation44_spill] sm:$0xff]  ;;  %v534_v24 = vadd.f32 %v13786_v21, %v8489_v13  ;;  %v13788_v28 = vld [vmem:[#allocation37_spill] sm:$0xff]  ;;  %v983_v13 = vand.u32 4294901760, %v8557_v43 }
 0x17e   :  { %v700_v63 = vpop.f32.mrf.mxu0  ;;  %v756_v38 = vadd.f32 %v13779_v29, %v673_v55  ;;  %v744_v54 = vadd.f32 %v13788_v28, %v661_v25  ;;  %v13793_v29 = vld [vmem:[#allocation32_spill] sm:$0xff]  ;;  %v979_v11 = vand.u32 4294901760, %v978_v45 }
 0x17f   :  { %v701_v57 = vadd.f32 %v700_v63, %v612_v58  ;;  %v783_v34 = vpop.f32.mrf.mxu1  ;;  %v13771_v58 = vld [vmem:[#allocation47_spill] sm:$0xff]  ;;  %v965_v31 = vand.u32 4294901760, %v8518_v60  ;;  %v984_v25 = vsub.f32 %v8557_v43, %v983_v13 }
 0x180   :  { %v764_v22 = vadd.f32 %v13771_v58, %v681_v41  ;;  %v8571_v15 = vand.u32 4294901760, %v756_v38  ;;  %v8619_v16 = vand.u32 4294901760, %v744_v54 }
 0x181   :  { %v784_v47 = vadd.f32 %v783_v34, %v701_v57  ;;  %v558_v57 = vadd.f32 %v13773_v48, %v453_v53  ;;  %v760_v34 = vadd.f32 %v13775_v8, %v677_v7  ;;  %v13783_v53 = vld [vmem:[#allocation20_spill] sm:$0xff]  ;;  %v966_v20 = vsub.f32 %v8518_v60, %v965_v31 }
 0x182   :  { %v8541_v23 = vand.u32 4294901760, %v764_v22  ;;  %v540_v1 = vadd.f32 %v13783_v53, %v438_v9  ;;  %v13785_v7 = vld [vmem:[#allocation40_spill] sm:$0xff]  ;;  %v528_v48 = vadd.f32 %v13789_v12, %v8480_v30  ;;  %v8610_v9 = vsub.f32 %v756_v38, %v8571_v15 }
 0x183   :  { %v8486_v0 = vand.u32 4294901760, %v784_v47  ;;  %v665_v62 = vadd.f32 %v13778_v61, %v558_v57  ;;  %v13790_v57 = vld [vmem:[#allocation27_spill] sm:$0xff]  ;;  %v967_v30 = vand.u32 4294901760, %v966_v20  ;;  %v973_v38 = vand.u32 4294901760, %v972_v10 }
 0x184   :  { %v8575_v18 = vsub.f32 %v764_v22, %v8541_v23  ;;  %v653_v26 = vadd.f32 %v13787_v37, %v540_v1  ;;  %v649_v3 = vadd.f32 %v13790_v57, %v534_v24  ;;  %v13792_v61 = vld [vmem:[#allocation23_spill] sm:$0xff]  ;;  %v8650_v24 = vsub.f32 %v744_v54, %v8619_v16  ;;  %v68_v54 = vld [vmem:[%s13337_s0 + $0x8] sm:$0xff] }
 0x185   :  { %v8507_v32 = vsub.f32 %v784_v47, %v8486_v0 }
 0x186   :  { %v704_v19 = vpop.f32.mrf.mxu0  ;;  %v989_v40 = vand.u32 4294901760, %v8575_v18  ;;  %v736_v33 = vadd.f32 %v13793_v29, %v653_v26 }
 0x187   :  { %v705_v51 = vadd.f32 %v704_v19, %v618_v44  ;;  %v787_v39 = vpop.f32.mrf.mxu1  ;;  %v959_v47 = vand.u32 4294901760, %v8507_v32  ;;  %v13782_v19 = vld [vmem:[#allocation42_spill] sm:$0xff] }
 0x188   :  { %v752_v41 = vadd.f32 %v13782_v19, %v669_v27  ;;  %v13791_v27 = vld [vmem:[#allocation35_spill] sm:$0xff]  ;;  %v8647_v21 = vand.u32 4294901760, %v736_v33 }
 0x189   :  { %v788_v6 = vadd.f32 %v787_v39, %v705_v51  ;;  %v8553_v51 = vand.u32 4294901760, %v760_v34  ;;  %v960_v2 = vsub.f32 %v8507_v32, %v959_v47  ;;  %v748_v39 = vadd.f32 %v13785_v7, %v665_v62 }
 0x18a   :  { %v8587_v55 = vand.u32 4294901760, %v752_v41  ;;  %v740_v8 = vadd.f32 %v13791_v27, %v657_v14  ;;  %v645_v62 = vadd.f32 %v13792_v61, %v528_v48  ;;  %v990_v14 = vsub.f32 %v8575_v18, %v989_v40 }
 0x18b   :  { %v8520_v63 = vand.u32 4294901760, %v788_v6  ;;  %v8591_v58 = vsub.f32 %v760_v34, %v8553_v51  ;;  %v961_v22 = vand.u32 4294901760, %v960_v2  ;;  %v8602_v42 = vand.u32 4294901760, %v748_v39  ;;  %v67_v34 = vld [vmem:[%s13337_s0] sm:$0xff] }
 0x18c   :  { %v8622_v36 = vsub.f32 %v752_v41, %v8587_v55  ;;  %v13795_v2 = vld [vmem:[#allocation28_spill] sm:$0xff]  ;;  %v8634_v41 = vand.u32 4294901760, %v740_v8  ;;  %v1001_v7 = vand.u32 4294901760, %v8610_v9  ;;  %v991_v12 = vand.u32 4294901760, %v990_v14 }
 0x18d   :  { %v8532_v56 = vsub.f32 %v788_v6, %v8520_v63  ;;  %791 = vmatpush.msrb.mxu2 %v8520_v63  ;;  %1242 = vmatpush.msra.mxu1 %v8520_v63  ;;  %v995_v19 = vand.u32 4294901760, %v8591_v58  ;;  %v732_v53 = vadd.f32 %v13795_v2, %v649_v3  ;;  %v8639_v1 = vsub.f32 %v748_v39, %v8602_v42 }
 0x18e   :  { %v985_v39 = vand.u32 4294901760, %v984_v25  ;;  %v1007_v26 = vand.u32 4294901760, %v8622_v36  ;;  %v8670_v10 = vsub.f32 %v740_v8, %v8634_v41  ;;  %v1002_v48 = vsub.f32 %v8610_v9, %v1001_v7 }
 0x18f   :  { %793 = vmatpush.msrb.mxu2 %v8486_v0  ;;  %1114 = vmatpush.msra.mxu0 %v8532_v56  ;;  %v953_v44 = vand.u32 4294901760, %v8532_v56  ;;  %v996_v37 = vsub.f32 %v8591_v58, %v995_v19  ;;  %v1013_v57 = vand.u32 4294901760, %v8639_v1  ;;  %v8680_v27 = vsub.f32 %v736_v33, %v8647_v21 }
 0x190   :  { %1244 = vmatpush.msra.mxu1 %v8486_v0  ;;  %v1019_v8 = vand.u32 4294901760, %v8650_v24  ;;  %v8692_v61 = vand.u32 4294901760, %v68_v54  ;;  %v1003_v29 = vand.u32 4294901760, %v1002_v48 }
 0x191   :  { %795 = vmatpush.msrb.mxu2 %v8496_v50  ;;  %1117 = vmatpush.msra.mxu0 %v8507_v32  ;;  %v954_v59 = vsub.f32 %v8532_v56, %v953_v44  ;;  %v1014_v33 = vsub.f32 %v8639_v1, %v1013_v57  ;;  %v1031_v2 = vand.u32 4294901760, %v8680_v27  ;;  %v13810_v32 = vld [vmem:[#allocation6_spill] sm:$0xff] }
 0x192   :  { %1246 = vmatpush.msra.mxu1 %v8496_v50  ;;  %13799 = vst [vmem:[#allocation45_spill] sm:$0xff] %v8692_v61 }
 0x193   :  { %797 = vmatpush.msrb.mxu2 %v8504_v4  ;;  %1120 = vmatpush.msra.mxu0 %v8518_v60  ;;  %v955_v6 = vand.u32 4294901760, %v954_v59  ;;  %v8631_v59 = vand.u32 4294901760, %v67_v34 }
 0x194   :  { %1248 = vmatpush.msra.mxu1 %v8504_v4 }
 0x195   :  { %799 = vmatpush.msrb.mxu2 %v8515_v52  ;;  %956 = vmatpush.msrb.mxu3 %v955_v6  ;;  %13794 = vst [vmem:[#allocation16_spill] sm:$0xff] %v8631_v59  ;;  %v13796_v6 = vld [vmem:[#allocation25_spill] sm:$0xff]  ;;  %v8660_v28 = vsub.f32 %v67_v34, %v8631_v59  ;;  %v997_v34 = vand.u32 4294901760, %v996_v37 }
 0x196   :  { %1123 = vmatpush.msra.mxu0 %v8529_v46  ;;  %1250 = vmatpush.msra.mxu1 %v8515_v52  ;;  %v728_v20 = vadd.f32 %v13796_v6, %v645_v62  ;;  %v8717_v6 = vsub.f32 %v68_v54, %v8692_v61  ;;  %v1032_v54 = vsub.f32 %v8680_v27, %v1031_v2  ;;  %v71_v46 = vld [vmem:[%s13337_s0 + $0x20] sm:$0xff] }
 0x197   :  { %801 = vmatpush.msrb.mxu2 %v8526_v49  ;;  %962 = vmatpush.msrb.mxu3 %v961_v22  ;;  %13797 = vst [vmem:[#allocation29_spill] sm:$0xff] %v8660_v28  ;;  %v8662_v22 = vand.u32 4294901760, %v732_v53  ;;  %v8690_v45 = vand.u32 4294901760, %v8660_v28 }
 0x198   :  { %1126 = vmatpush.msra.mxu0 %v8544_v35  ;;  %1252 = vmatpush.msra.mxu1 %v8526_v49  ;;  %v8677_v3 = vand.u32 4294901760, %v728_v20  ;;  %13800 = vst [vmem:[#allocation48_spill] sm:$0xff] %v8717_v6 }
 0x199   :  { %803 = vmatpush.msrb.mxu2 %v8541_v23  ;;  %968 = vmatpush.msrb.mxu3 %v967_v30  ;;  %v1008_v30 = vsub.f32 %v8622_v36, %v1007_v26  ;;  %13798 = vst [vmem:[#allocation38_spill] sm:$0xff] %v8690_v45  ;;  %v8697_v62 = vsub.f32 %v732_v53, %v8662_v22 }
 0x19a   :  { %1129 = vmatpush.msra.mxu0 %v8557_v43  ;;  %1254 = vmatpush.msra.mxu1 %v8541_v23  ;;  %v8705_v25 = vsub.f32 %v728_v20, %v8677_v3  ;;  %v825_v14 = vsub.f32 %v8660_v28, %v8690_v45  ;;  %v69_v20 = vld [vmem:[%s13337_s0 + $0x10] sm:$0xff] }
 0x19b   :  { %805 = vmatpush.msrb.mxu2 %v8553_v51  ;;  %974 = vmatpush.msrb.mxu3 %v973_v38  ;;  %v1025_v38 = vand.u32 4294901760, %v8670_v10  ;;  %v1009_v53 = vand.u32 4294901760, %v1008_v30 }
 0x19c   :  { %1132 = vmatpush.msra.mxu0 %v8575_v18  ;;  %1256 = vmatpush.msra.mxu1 %v8553_v51  ;;  %v13358_v48 = vand.u32 4294901760, %v8705_v25  ;;  %v8736_v30 = vand.u32 4294901760, %v825_v14 }
 0x19d   :  { %807 = vmatpush.msrb.mxu2 %v8571_v15  ;;  %980 = vmatpush.msrb.mxu3 %v979_v11  ;;  %v1020_v11 = vsub.f32 %v8650_v24, %v1019_v8  ;;  %v1026_v37 = vsub.f32 %v8670_v10, %v1025_v38 }
 0x19e   :  { %1135 = vmatpush.msra.mxu0 %v8591_v58  ;;  %1258 = vmatpush.msra.mxu1 %v8571_v15  ;;  %13801 = vst [vmem:[#allocation14_spill] sm:$0xff] %v8736_v30  ;;  %v1044_v14 = vsub.f32 %v8705_v25, %v13358_v48 }
 0x19f   :  { %809 = vmatpush.msrb.mxu2 %v8587_v55  ;;  %986 = vmatpush.msrb.mxu3 %v985_v39  ;;  %v1015_v39 = vand.u32 4294901760, %v1014_v33  ;;  %v8741_v33 = vand.u32 4294901760, %v69_v20 }
 0x1a0   :  { %1138 = vmatpush.msra.mxu0 %v8610_v9  ;;  %1260 = vmatpush.msra.mxu1 %v8587_v55 }
 0x1a1   :  { %811 = vmatpush.msrb.mxu2 %v8602_v42  ;;  %992 = vmatpush.msrb.mxu3 %v991_v12  ;;  %v13359_v12 = vand.u32 4294901760, %v8697_v62  ;;  %13803 = vst [vmem:[#allocation24_spill] sm:$0xff] %v8741_v33 }
 0x1a2   :  { %1141 = vmatpush.msra.mxu0 %v8622_v36  ;;  %1262 = vmatpush.msra.mxu1 %v8602_v42 }
 0x1a3   :  { %813 = vmatpush.msrb.mxu2 %v8619_v16  ;;  %998 = vmatpush.msrb.mxu3 %v997_v34  ;;  %v1021_v34 = vand.u32 4294901760, %v1020_v11  ;;  %v1033_v11 = vand.u32 4294901760, %v1032_v54 }
 0x1a4   :  { %1144 = vmatpush.msra.mxu0 %v8639_v1  ;;  %1264 = vmatpush.msra.mxu1 %v8619_v16  ;;  %v13830_v1 = vld [vmem:[#allocation9_spill] sm:$0xff] }
 0x1a5   :  { %815 = vmatpush.msrb.mxu2 %v8634_v41  ;;  %1004 = vmatpush.msrb.mxu3 %v1003_v29  ;;  %v8739_v29 = vand.u32 4294901760, %v8717_v6 }
 0x1a6   :  { %1147 = vmatpush.msra.mxu0 %v8650_v24  ;;  %1266 = vmatpush.msra.mxu1 %v8634_v41 }
 0x1a7   :  { %817 = vmatpush.msrb.mxu2 %v8647_v21  ;;  %1010 = vmatpush.msrb.mxu3 %v1009_v53  ;;  %13802 = vst [vmem:[#allocation15_spill] sm:$0xff] %v8739_v29  ;;  %v1027_v53 = vand.u32 4294901760, %v1026_v37  ;;  %v8758_v37 = vsub.f32 %v69_v20, %v8741_v33  ;;  %v1045_v20 = vand.u32 4294901760, %v1044_v14 }
 0x1a8   :  { %1150 = vmatpush.msra.mxu0 %v8670_v10  ;;  %1268 = vmatpush.msra.mxu1 %v8647_v21 }
 0x1a9   :  { %819 = vmatpush.msrb.mxu2 %v8662_v22  ;;  %1016 = vmatpush.msrb.mxu3 %v1015_v39  ;;  %v1038_v39 = vsub.f32 %v8697_v62, %v13359_v12  ;;  %13804 = vst [vmem:[#allocation34_spill] sm:$0xff] %v8758_v37  ;;  %v8773_v56 = vand.u32 4294901760, %v8758_v37  ;;  %v13808_v12 = vld [vmem:[#allocation5_spill] sm:$0xff] }
 0x1aa   :  { %1153 = vmatpush.msra.mxu0 %v8680_v27  ;;  %1270 = vmatpush.msra.mxu1 %v8662_v22 }
 0x1ab   :  { %821 = vmatpush.msrb.mxu2 %v8677_v3  ;;  %1022 = vmatpush.msrb.mxu3 %v1021_v34  ;;  %v833_v34 = vsub.f32 %v8717_v6, %v8739_v29  ;;  %v1039_v54 = vand.u32 4294901760, %v1038_v39  ;;  %13806 = vst [vmem:[#allocation47_spill] sm:$0xff] %v8773_v56  ;;  %v13809_v39 = vld [vmem:[#allocation12_spill] sm:$0xff] }
 0x1ac   :  { %1156 = vmatpush.msra.mxu0 %v8697_v62  ;;  %1272 = vmatpush.msra.mxu1 %v8677_v3 }
 0x1ad   :  { %827 = vmatmul.f32.vlgmr.msrb.gmra.mxu2 %v8736_v30  ;;  %1028 = vmatpush.msrb.mxu3 %v1027_v53  ;;  %v70_v53 = vld [vmem:[%s13337_s0 + $0x18] sm:$0xff]  ;;  %v8770_v48 = vand.u32 4294901760, %v833_v34  ;;  %v77_v34 = vld [vmem:[%s13337_s0 + $0x50] sm:$0xff] }
 0x1ae   :  { %1373 = vmatpush.msra.mxu2 %v953_v44  ;;  %1159 = vmatpush.msra.mxu0 %v8705_v25  ;;  %v8775_v44 = vand.u32 4294901760, %v70_v53 }
 0x1af   :  { %1034 = vmatpush.msrb.mxu3 %v1033_v11  ;;  %1162 = vmatmul.f32.vlgmr.msra.gmra.mxu0 %v8660_v28  ;;  %13805 = vst [vmem:[#allocation43_spill] sm:$0xff] %v8770_v48 }
 0x1b0   :  { %1377 = vmatpush.msra.mxu2 %v959_v47  ;;  %1276 = vmatmul.f32.vlgmr.msra.gmra.mxu1 %v8690_v45  ;;  %13807 = vst [vmem:[#allocation21_spill] sm:$0xff] %v8775_v44  ;;  %v841_v47 = vsub.f32 %v8758_v37, %v8773_v56  ;;  %v8790_v60 = vsub.f32 %v70_v53, %v8775_v44 }
 0x1b1   :  { %1040 = vmatpush.msrb.mxu3 %v1039_v54  ;;  %1659 = vmatpush.msrb.mxu0 %v13808_v12 }
 0x1b2   :  { %1381 = vmatpush.msra.mxu2 %v965_v31  ;;  %1810 = vmatpush.msrb.mxu1 %v13809_v39  ;;  %13811 = vst [vmem:[#allocation30_spill] sm:$0xff] %v8790_v60  ;;  %v13812_v31 = vld [vmem:[#allocation13_spill] sm:$0xff]  ;;  %v8807_v35 = vand.u32 4294901760, %v8790_v60 }
 0x1b3   :  { %1046 = vmatpush.msrb.mxu3 %v1045_v20  ;;  %1661 = vmatpush.msrb.mxu0 %v13810_v32  ;;  %v8964_v20 = vand.u32 4294901760, %v77_v34 }
 0x1b4   :  { %1385 = vmatpush.msra.mxu2 %v971_v5  ;;  %1048 = vmatmul.f32.vlgmr.msrb.gmra.mxu3 %v8631_v59  ;;  %13814 = vst [vmem:[#allocation46_spill] sm:$0xff] %v8807_v35  ;;  %v8809_v5 = vand.u32 4294901760, %v71_v46 }
 0x1b5   :  { %835 = vmatmul.f32.gmra.mxu2 %v8770_v48  ;;  %1500 = vmatpush.msra.mxu3 %v8520_v63  ;;  %v8804_v63 = vand.u32 4294901760, %v841_v47  ;;  %13845 = vst [vmem:[#allocation53_spill] sm:$0xff] %v8964_v20 }
 0x1b6   :  { %1389 = vmatpush.msra.mxu2 %v977_v17  ;;  %1816 = vmatpush.msrb.mxu1 %v13812_v31  ;;  %13815 = vst [vmem:[#allocation19_spill] sm:$0xff] %v8809_v5  ;;  %v13816_v17 = vld [vmem:[#allocation10_spill] sm:$0xff]  ;;  %v8825_v43 = vsub.f32 %v71_v46, %v8809_v5  ;;  %v8971_v46 = vsub.f32 %v77_v34, %v8964_v20 }
 0x1b7   :  { %1502 = vmatpush.msra.mxu3 %v8486_v0  ;;  %1167 = vmatmul.f32.gmra.mxu0 %v8717_v6  ;;  %13813 = vst [vmem:[#allocation41_spill] sm:$0xff] %v8804_v63  ;;  %v13817_v0 = vld [vmem:[#allocation11_spill] sm:$0xff] }
 0x1b8   :  { %1393 = vmatpush.msra.mxu2 %v983_v13  ;;  %1282 = vmatmul.f32.gmra.mxu1 %v8739_v29  ;;  %13818 = vst [vmem:[#allocation26_spill] sm:$0xff] %v8825_v43  ;;  %v8842_v18 = vand.u32 4294901760, %v8825_v43 }
 0x1b9   :  { %1504 = vmatpush.msra.mxu3 %v8496_v50  ;;  %2115 = vmatpush.msra.mxu0 %v13816_v17  ;;  %v849_v50 = vsub.f32 %v8790_v60, %v8807_v35  ;;  %13846 = vst [vmem:[#allocation54_spill] sm:$0xff] %v8971_v46 }
 0x1ba   :  { %1397 = vmatpush.msra.mxu2 %v989_v40  ;;  %2200 = vmatpush.msra.mxu1 %v13808_v12  ;;  %13820 = vst [vmem:[#allocation44_spill] sm:$0xff] %v8842_v18  ;;  %v13826_v40 = vand.u32 4294901760, %v8697_v62  ;;  %v76_v62 = vld [vmem:[%s13337_s0 + $0x48] sm:$0xff] }
 0x1bb   :  { %1506 = vmatpush.msra.mxu3 %v8504_v4  ;;  %2119 = vmatpush.msra.mxu0 %v13817_v0  ;;  %v72_v4 = vld [vmem:[%s13337_s0 + $0x28] sm:$0xff] }
 0x1bc   :  { %1401 = vmatpush.msra.mxu2 %v995_v19  ;;  %1052 = vmatmul.f32.gmra.mxu3 %v8692_v61  ;;  %v8844_v58 = vand.u32 4294901760, %v72_v4  ;;  %v74_v19 = vld [vmem:[%s13337_s0 + $0x38] sm:$0xff] }
 0x1bd   :  { %843 = vmatmul.f32.gmra.mxu2 %v8804_v63  ;;  %1508 = vmatpush.msra.mxu3 %v8515_v52  ;;  %v8839_v52 = vand.u32 4294901760, %v849_v50  ;;  %v8904_v24 = vand.u32 4294901760, %v74_v19  ;;  %v78_v50 = vld [vmem:[%s13337_s0 + $0x58] sm:$0xff] }
 0x1be   :  { %1405 = vmatpush.msra.mxu2 %v1001_v7  ;;  %2202 = vmatpush.msra.mxu1 %v13810_v32  ;;  %13821 = vst [vmem:[#allocation22_spill] sm:$0xff] %v8844_v58 }
 0x1bf   :  { %1510 = vmatpush.msra.mxu3 %v8526_v49  ;;  %1172 = vmatmul.f32.gmra.mxu0 %v8758_v37  ;;  %13819 = vst [vmem:[#allocation39_spill] sm:$0xff] %v8839_v52  ;;  %v857_v49 = vsub.f32 %v8825_v43, %v8842_v18 }
 0x1c0   :  { %1409 = vmatpush.msra.mxu2 %v1007_v26  ;;  %1288 = vmatmul.f32.gmra.mxu1 %v8773_v56  ;;  %13833 = vst [vmem:[#allocation37_spill] sm:$0xff] %v8904_v24  ;;  %v8912_v26 = vsub.f32 %v74_v19, %v8904_v24 }
 0x1c1   :  { %1512 = vmatpush.msra.mxu3 %v8541_v23  ;;  %v8857_v23 = vsub.f32 %v72_v4, %v8844_v58 }
 0x1c2   :  { %1413 = vmatpush.msra.mxu2 %v1013_v57  ;;  %13834 = vst [vmem:[#allocation17_spill] sm:$0xff] %v8912_v26  ;;  %v8924_v57 = vand.u32 4294901760, %v8912_v26 }
 0x1c3   :  { %1514 = vmatpush.msra.mxu3 %v8553_v51  ;;  %13822 = vst [vmem:[#allocation36_spill] sm:$0xff] %v8857_v23  ;;  %v73_v51 = vld [vmem:[%s13337_s0 + $0x30] sm:$0xff]  ;;  %v8873_v13 = vand.u32 4294901760, %v8857_v23 }
 0x1c4   :  { %1417 = vmatpush.msra.mxu2 %v1019_v8  ;;  %1056 = vmatmul.f32.gmra.mxu3 %v8741_v33  ;;  %v8875_v9 = vand.u32 4294901760, %v73_v51  ;;  %13836 = vst [vmem:[#allocation35_spill] sm:$0xff] %v8924_v57  ;;  %v881_v27 = vsub.f32 %v8912_v26, %v8924_v57 }
 0x1c5   :  { %851 = vmatmul.f32.gmra.mxu2 %v8839_v52  ;;  %1516 = vmatpush.msra.mxu3 %v8571_v15  ;;  %v8870_v15 = vand.u32 4294901760, %v857_v49  ;;  %13824 = vst [vmem:[#allocation20_spill] sm:$0xff] %v8873_v13  ;;  %v8981_v49 = vand.u32 4294901760, %v8971_v46 }
 0x1c6   :  { %1421 = vmatpush.msra.mxu2 %v1025_v38  ;;  %13825 = vst [vmem:[#allocation33_spill] sm:$0xff] %v8875_v9  ;;  %v8888_v36 = vsub.f32 %v73_v51, %v8875_v9  ;;  %v8940_v38 = vand.u32 4294901760, %v881_v27  ;;  %v8983_v51 = vand.u32 4294901760, %v78_v50 }
 0x1c7   :  { %1518 = vmatpush.msra.mxu3 %v8587_v55  ;;  %1177 = vmatmul.f32.gmra.mxu0 %v8790_v60  ;;  %13823 = vst [vmem:[#allocation42_spill] sm:$0xff] %v8870_v15  ;;  %v13827_v55 = vand.u32 4294901760, %v8705_v25 }
 0x1c8   :  { %1425 = vmatpush.msra.mxu2 %v1031_v2  ;;  %1294 = vmatmul.f32.gmra.mxu1 %v8807_v35  ;;  %13828 = vst [vmem:[#allocation40_spill] sm:$0xff] %v8888_v36  ;;  %v8902_v7 = vand.u32 4294901760, %v8888_v36  ;;  %v8945_v2 = vand.u32 4294901760, %v76_v62 }
 0x1c9   :  { %1520 = vmatpush.msra.mxu3 %v8602_v42  ;;  %v865_v42 = vsub.f32 %v8857_v23, %v8873_v13  ;;  %13839 = vst [vmem:[#allocation28_spill] sm:$0xff] %v8940_v38 }
 0x1ca   :  { %1429 = vmatpush.msra.mxu2 %v13826_v40  ;;  %13832 = vst [vmem:[#allocation31_spill] sm:$0xff] %v8902_v7  ;;  %v8952_v14 = vsub.f32 %v76_v62, %v8945_v2  ;;  %v905_v40 = vsub.f32 %v8971_v46, %v8981_v49 }
 0x1cb   :  { %1522 = vmatpush.msra.mxu3 %v8619_v16  ;;  %v13829_v16 = vld [vmem:[#allocation8_spill] sm:$0xff]  ;;  %13841 = vst [vmem:[#allocation49_spill] sm:$0xff] %v8945_v2 }
 0x1cc   :  { %1433 = vmatpush.msra.mxu2 %v13827_v55  ;;  %1060 = vmatmul.f32.gmra.mxu3 %v8775_v44  ;;  %13842 = vst [vmem:[#allocation50_spill] sm:$0xff] %v8952_v14  ;;  %v8962_v54 = vand.u32 4294901760, %v8952_v14  ;;  %v8990_v55 = vsub.f32 %v78_v50, %v8983_v51  ;;  %v8997_v19 = vand.u32 4294901760, %v905_v40 }
 0x1cd   :  { %859 = vmatmul.f32.gmra.mxu2 %v8870_v15  ;;  %1524 = vmatpush.msra.mxu3 %v8634_v41  ;;  %v8899_v41 = vand.u32 4294901760, %v865_v42  ;;  %13848 = vst [vmem:[#allocation56_spill] sm:$0xff] %v8981_v49  ;;  %v79_v42 = vld [vmem:[%s13337_s0 + $0x60] sm:$0xff] }
 0x1ce   :  { %1898 = vmatpush.msrb.mxu2 %v13829_v16  ;;  %13844 = vst [vmem:[#allocation52_spill] sm:$0xff] %v8962_v54  ;;  %v897_v47 = vsub.f32 %v8952_v14, %v8962_v54 }
 0x1cf   :  { %1526 = vmatpush.msra.mxu3 %v8647_v21  ;;  %1182 = vmatmul.f32.gmra.mxu0 %v8825_v43  ;;  %13831 = vst [vmem:[#allocation18_spill] sm:$0xff] %v8899_v41  ;;  %v873_v21 = vsub.f32 %v8888_v36, %v8902_v7 }
 0x1d0   :  { %1300 = vmatmul.f32.gmra.mxu1 %v8842_v18  ;;  %1901 = vmatpush.msrb.mxu2 %v13830_v1  ;;  %v8978_v4 = vand.u32 4294901760, %v897_v47  ;;  %13849 = vst [vmem:[#allocation57_spill] sm:$0xff] %v8983_v51 }
 0x1d1   :  { %1528 = vmatpush.msra.mxu3 %v8662_v22  ;;  %v75_v22 = vld [vmem:[%s13337_s0 + $0x40] sm:$0xff]  ;;  %v8921_v10 = vand.u32 4294901760, %v873_v21  ;;  %13850 = vst [vmem:[#allocation58_spill] sm:$0xff] %v8990_v55  ;;  %v9000_v21 = vand.u32 4294901760, %v8990_v55 }
 0x1d2   :  { %13847 = vst [vmem:[#allocation55_spill] sm:$0xff] %v8978_v4 }
 0x1d3   :  { %1530 = vmatpush.msra.mxu3 %v8677_v3  ;;  %13835 = vst [vmem:[#allocation27_spill] sm:$0xff] %v8921_v10  ;;  %v8926_v3 = vand.u32 4294901760, %v75_v22  ;;  %v913_v27 = vsub.f32 %v8990_v55, %v9000_v21 }
 0x1d4   :  { %1064 = vmatmul.f32.gmra.mxu3 %v8809_v5  ;;  %13851 = vst [vmem:[#allocation59_spill] sm:$0xff] %v8997_v19 }
 0x1d5   :  { %867 = vmatmul.f32.gmra.mxu2 %v8899_v41  ;;  %1998 = vmatpush.msrb.mxu3 %v13808_v12  ;;  %13837 = vst [vmem:[#allocation23_spill] sm:$0xff] %v8926_v3  ;;  %v8933_v8 = vsub.f32 %v75_v22, %v8926_v3  ;;  %v9002_v22 = vand.u32 4294901760, %v79_v42  ;;  %v9016_v34 = vand.u32 4294901760, %v913_v27  ;;  %v81_v27 = vld [vmem:[%s13337_s0 + $0x70] sm:$0xff] }
 0x1d6   :  { %13852 = vst [vmem:[#allocation60_spill] sm:$0xff] %v9000_v21 }
 0x1d7   :  { %1187 = vmatmul.f32.gmra.mxu0 %v8857_v23  ;;  %2000 = vmatpush.msrb.mxu3 %v13810_v32  ;;  %13838 = vst [vmem:[#allocation32_spill] sm:$0xff] %v8933_v8  ;;  %v8943_v25 = vand.u32 4294901760, %v8933_v8  ;;  %v9009_v62 = vsub.f32 %v79_v42, %v9002_v22 }
 0x1d8   :  { %1306 = vmatmul.f32.gmra.mxu1 %v8873_v13  ;;  %13853 = vst [vmem:[#allocation61_spill] sm:$0xff] %v9002_v22 }
 0x1d9   :  { %13840 = vst [vmem:[#allocation25_spill] sm:$0xff] %v8943_v25  ;;  %v889_v11 = vsub.f32 %v8933_v8, %v8943_v25  ;;  %v9019_v47 = vand.u32 4294901760, %v9009_v62 }
 0x1da   :  { %13854 = vst [vmem:[#allocation62_spill] sm:$0xff] %v9009_v62 }
 0x1db   :  { %v8959_v53 = vand.u32 4294901760, %v889_v11  ;;  %v80_v11 = vld [vmem:[%s13337_s0 + $0x68] sm:$0xff]  ;;  %13855 = vst [vmem:[#allocation63_spill] sm:$0xff] %v9016_v34  ;;  %v921_v40 = vsub.f32 %v9009_v62, %v9019_v47 }
 0x1dc   :  { %1068 = vmatmul.f32.gmra.mxu3 %v8844_v58  ;;  %13856 = vst [vmem:[#allocation64_spill] sm:$0xff] %v9019_v47  ;;  %v9021_v50 = vand.u32 4294901760, %v80_v11 }
 0x1dd   :  { %875 = vmatmul.f32.gmra.mxu2 %v8921_v10  ;;  %13843 = vst [vmem:[#allocation51_spill] sm:$0xff] %v8959_v53 }
 0x1de   :  { %13857 = vst [vmem:[#allocation65_spill] sm:$0xff] %v9021_v50  ;;  %v9028_v42 = vsub.f32 %v80_v11, %v9021_v50 }
 0x1df   :  { %1192 = vmatmul.f32.gmra.mxu0 %v8888_v36 }
 0x1e0   :  { %1312 = vmatmul.f32.gmra.mxu1 %v8902_v7  ;;  %13858 = vst [vmem:[#allocation66_spill] sm:$0xff] %v9028_v42 }
 0x1e4   :  { %1072 = vmatmul.f32.gmra.mxu3 %v8875_v9 }
 0x1e5   :  { %883 = vmatmul.f32.gmra.mxu2 %v8940_v38 }
 0x1e7   :  { %1197 = vmatmul.f32.gmra.mxu0 %v8912_v26 }
 0x1e8   :  { %1318 = vmatmul.f32.gmra.mxu1 %v8924_v57 }
 0x1ec   :  { %1076 = vmatmul.f32.gmra.mxu3 %v8904_v24 }
 0x1ed   :  { %891 = vmatmul.f32.gmra.mxu2 %v8959_v53 }
 0x1ef   :  { %1202 = vmatmul.f32.gmra.mxu0 %v8933_v8 }
 0x1f0   :  { %1324 = vmatmul.f32.gmra.mxu1 %v8943_v25 }
 0x1f4   :  { %1080 = vmatmul.f32.gmra.mxu3 %v8926_v3 }
 0x1f5   :  { %899 = vmatmul.f32.gmra.mxu2 %v8978_v4 }
 0x1f7   :  { %1207 = vmatmul.f32.gmra.mxu0 %v8952_v14 }
 0x1f8   :  { %1330 = vmatmul.f32.gmra.mxu1 %v8962_v54 }
 0x1fc   :  { %1084 = vmatmul.f32.gmra.mxu3 %v8945_v2 }
 0x1fd   :  { %907 = vmatmul.f32.gmra.mxu2 %v8997_v19 }
 0x1ff   :  { %1212 = vmatmul.f32.gmra.mxu0 %v8971_v46  ;;  %v9038_v46 = vand.u32 4294901760, %v9028_v42 }
 0x200   :  { %1336 = vmatmul.f32.gmra.mxu1 %v8981_v49  ;;  %v9035_v49 = vand.u32 4294901760, %v921_v40  ;;  %v82_v40 = vld [vmem:[%s13337_s0 + $0x78] sm:$0xff] }
 0x201   :  { %13860 = vst [vmem:[#allocation68_spill] sm:$0xff] %v9038_v46  ;;  %v929_v11 = vsub.f32 %v9028_v42, %v9038_v46 }
 0x202   :  { %13859 = vst [vmem:[#allocation67_spill] sm:$0xff] %v9035_v49 }
 0x204   :  { %1088 = vmatmul.f32.gmra.mxu3 %v8964_v20 }
 0x205   :  { %915 = vmatmul.f32.gmra.mxu2 %v9016_v34  ;;  %v9040_v34 = vand.u32 4294901760, %v81_v27 }
 0x207   :  { %1217 = vmatmul.f32.gmra.mxu0 %v8990_v55  ;;  %13861 = vst [vmem:[#allocation69_spill] sm:$0xff] %v9040_v34  ;;  %v9047_v19 = vsub.f32 %v81_v27, %v9040_v34 }
 0x208   :  { %1342 = vmatmul.f32.gmra.mxu1 %v9000_v21  ;;  %v9054_v21 = vand.u32 4294901760, %v929_v11  ;;  %v8000_v11 = vld [vmem:[%s13340_s3] sm:$0xff] }
 0x209   :  { %13862 = vst [vmem:[#allocation70_spill] sm:$0xff] %v9047_v19  ;;  %v9057_v55 = vand.u32 4294901760, %v9047_v19 }
 0x20a   :  { %13863 = vst [vmem:[#allocation71_spill] sm:$0xff] %v9054_v21 }
 0x20b   :  { %13864 = vst [vmem:[#allocation72_spill] sm:$0xff] %v9057_v55  ;;  %v937_v27 = vsub.f32 %v9047_v19, %v9057_v55 }
 0x20c   :  { %1092 = vmatmul.f32.gmra.mxu3 %v8983_v51 }
 0x20d   :  { %923 = vmatmul.f32.gmra.mxu2 %v9035_v49  ;;  %v9059_v49 = vand.u32 4294901760, %v82_v40 }
 0x20f   :  { %1222 = vmatmul.f32.gmra.mxu0 %v9009_v62  ;;  %13865 = vst [vmem:[#allocation73_spill] sm:$0xff] %v9059_v49  ;;  %v9066_v54 = vsub.f32 %v82_v40, %v9059_v49  ;;  %v9074_v62 = vand.u32 4294901760, %v937_v27  ;;  %v102_v40 = vld [vmem:[%s13340_s3 + $0x8] sm:$0xff] }
 0x210   :  { %1348 = vmatmul.f32.gmra.mxu1 %v9019_v47  ;;  %v1597_v47 = vsel %vm117_vm0, %v8000_v11, 0  ;;  %v1600_v27 = vsel %vm117_vm0, %v102_v40, 0 }
 0x211   :  { %13866 = vst [vmem:[#allocation74_spill] sm:$0xff] %v9066_v54  ;;  %v9079_v14 = vand.u32 4294901760, %v1597_v47  ;;  %v9097_v25 = vand.u32 4294901760, %v1600_v27 }
 0x212   :  { %13867 = vst [vmem:[#allocation75_spill] sm:$0xff] %v9074_v62 }
 0x213   :  { %v9109_v40 = vsub.f32 %v1600_v27, %v9097_v25 }
 0x214   :  { %1096 = vmatmul.f32.gmra.mxu3 %v9002_v22 }
 0x215   :  { %931 = vmatmul.f32.gmra.mxu2 %v9054_v21  ;;  %v9077_v21 = vand.u32 4294901760, %v9066_v54 }
 0x217   :  { %1227 = vmatmul.f32.gmra.mxu0 %v9028_v42  ;;  %13868 = vst [vmem:[#allocation76_spill] sm:$0xff] %v9077_v21  ;;  %v945_v11 = vsub.f32 %v9066_v54, %v9077_v21 }
 0x218   :  { %1354 = vmatmul.f32.gmra.mxu1 %v9038_v46  ;;  %v9089_v46 = vsub.f32 %v1597_v47, %v9079_v14 }
 0x219   :  { %v9094_v42 = vand.u32 4294901760, %v945_v11 }
 0x21a   :  { %v13404_v4 = vand.u32 4294901760, %v9089_v46 }
 0x21b   :  { %13869 = vst [vmem:[#allocation77_spill] sm:$0xff] %v9094_v42 }
 0x21c   :  { %1100 = vmatmul.f32.gmra.mxu3 %v9021_v50  ;;  %v1665_v47 = vsub.f32 %v9089_v46, %v13404_v4 }
 0x21d   :  { %939 = vmatmul.f32.gmra.mxu2 %v9074_v62  ;;  %v103_v62 = vld [vmem:[%s13340_s3 + $0x10] sm:$0xff] }
 0x21e   :  { %v1603_v11 = vsel %vm117_vm0, %v103_v62, 0 }
 0x21f   :  { %1232 = vmatmul.f32.gmra.mxu0 %v9047_v19  ;;  %v13413_v19 = vand.u32 4294901760, %v9109_v40  ;;  %v9114_v8 = vand.u32 4294901760, %v1603_v11 }
 0x220   :  { %1360 = vmatmul.f32.gmra.mxu1 %v9057_v55  ;;  %v1666_v55 = vand.u32 4294901760, %v1665_v47 }
 0x221   :  { %v1673_v62 = vsub.f32 %v9109_v40, %v13413_v19  ;;  %v9125_v47 = vsub.f32 %v1603_v11, %v9114_v8  ;;  %v105_v19 = vld [vmem:[%s13340_s3 + $0x20] sm:$0xff] }
 0x222   :  { %v1609_v10 = vsel %vm117_vm0, %v105_v19, 0 }
 0x223   :  { %v1674_v53 = vand.u32 4294901760, %v1673_v62  ;;  %v13428_v57 = vand.u32 4294901760, %v9125_v47  ;;  %v9146_v1 = vand.u32 4294901760, %v1609_v10 }
 0x224   :  { %1104 = vmatmul.f32.gmra.mxu3 %v9040_v34 }
 0x225   :  { %947 = vmatmul.f32.gmra.mxu2 %v9094_v42  ;;  %v9159_v19 = vsub.f32 %v1609_v10, %v9146_v1  ;;  %v107_v10 = vld [vmem:[%s13340_s3 + $0x30] sm:$0xff] }
 0x227   :  { %1237 = vmatmul.f32.gmra.mxu0 %v9066_v54  ;;  %v104_v54 = vld [vmem:[%s13340_s3 + $0x18] sm:$0xff]  ;;  %v13440_v43 = vand.u32 4294901760, %v9159_v19 }
 0x228   :  { %1366 = vmatmul.f32.gmra.mxu1 %v9077_v21  ;;  %v1606_v21 = vsel %vm117_vm0, %v104_v54, 0  ;;  %v1681_v54 = vsub.f32 %v9125_v47, %v13428_v57 }
 0x229   :  { %v9130_v26 = vand.u32 4294901760, %v1606_v21 }
 0x22a   :  { %v1682_v23 = vand.u32 4294901760, %v1681_v54 }
 0x22b   :  { %v9141_v62 = vsub.f32 %v1606_v21, %v9130_v26  ;;  %v106_v21 = vld [vmem:[%s13340_s3 + $0x28] sm:$0xff] }
 0x22c   :  { %1108 = vmatmul.f32.gmra.mxu3 %v9059_v49  ;;  %v1163_v42 = vpop.f32.mrf.mxu0 }
 0x22d   :  { %1435 = vmatmul.f32.vlgmr.msra.gmra.mxu2 %v8631_v59  ;;  %v1277_v27 = vpop.f32.mrf.mxu1  ;;  %v13433_v41 = vand.u32 4294901760, %v9141_v62 }
 0x22f   :  { %1667 = vmatmul.f32.vlgmr.msrb.gmra.mxu0 %v1666_v55 }
 0x230   :  { %v828_v4 = vpop.f32.mrf.mxu2  ;;  %1818 = vmatmul.f32.vlgmr.msrb.gmra.mxu1 %v9079_v14 }
 0x234   :  { %1532 = vmatmul.f32.vlgmr.msra.gmra.mxu3 %v8631_v59  ;;  %v1168_v55 = vpop.f32.mrf.mxu0 }
 0x235   :  { %1439 = vmatmul.f32.gmra.mxu2 %v8692_v61  ;;  %v1283_v11 = vpop.f32.mrf.mxu1 }
 0x237   :  { %v1049_v38 = vpop.f32.mrf.mxu3  ;;  %1675 = vmatmul.f32.gmra.mxu0 %v1674_v53 }
 0x238   :  { %v836_v7 = vpop.f32.mrf.mxu2  ;;  %v1050_v36 = vadd.f32 %v1049_v38, %v828_v4  ;;  %1822 = vmatmul.f32.gmra.mxu1 %v9097_v25 }
 0x23a   :  { %v1164_v13 = vadd.f32 %v1163_v42, %v1050_v36  ;;  %v1689_v36 = vsub.f32 %v9141_v62, %v13433_v41 }
 0x23c   :  { %v9148_v53 = vadd.f32 %v1277_v27, %v1164_v13  ;;  %1536 = vmatmul.f32.gmra.mxu3 %v8692_v61  ;;  %v1173_v57 = vpop.f32.mrf.mxu0  ;;  %v1612_v27 = vsel %vm117_vm0, %v106_v21, 0  ;;  %v1690_v18 = vand.u32 4294901760, %v1689_v36 }
 0x23d   :  { %1443 = vmatmul.f32.gmra.mxu2 %v8741_v33  ;;  %v1289_v38 = vpop.f32.mrf.mxu1  ;;  %v9164_v16 = vand.u32 4294901760, %v1612_v27 }
 0x23f   :  { %v1053_v4 = vpop.f32.mrf.mxu3  ;;  %1683 = vmatmul.f32.gmra.mxu0 %v1682_v23  ;;  %v9177_v21 = vsub.f32 %v1612_v27, %v9164_v16  ;;  %v108_v27 = vld [vmem:[%s13340_s3 + $0x38] sm:$0xff] }
 0x240   :  { %v844_v13 = vpop.f32.mrf.mxu2  ;;  %v1054_v42 = vadd.f32 %v1053_v4, %v836_v7  ;;  %1826 = vmatmul.f32.gmra.mxu1 %v9114_v8 }
 0x241   :  { %v13447_v35 = vand.u32 4294901760, %v9177_v21 }
 0x242   :  { %v1169_v54 = vadd.f32 %v1168_v55, %v1054_v42  ;;  %v1697_v55 = vsub.f32 %v9159_v19, %v13440_v43  ;;  %v1615_v42 = vsel %vm117_vm0, %v107_v10, 0 }
 0x243   :  { %v9182_v60 = vand.u32 4294901760, %v1615_v42 }
 0x244   :  { %v9166_v23 = vadd.f32 %v1283_v11, %v1169_v54  ;;  %1540 = vmatmul.f32.gmra.mxu3 %v8741_v33  ;;  %v1178_v41 = vpop.f32.mrf.mxu0  ;;  %v1698_v15 = vand.u32 4294901760, %v1697_v55 }
 0x245   :  { %1447 = vmatmul.f32.gmra.mxu2 %v8775_v44  ;;  %v1295_v7 = vpop.f32.mrf.mxu1  ;;  %v9195_v10 = vsub.f32 %v1615_v42, %v9182_v60  ;;  %v109_v42 = vld [vmem:[%s13340_s3 + $0x40] sm:$0xff] }
 0x247   :  { %v1057_v4 = vpop.f32.mrf.mxu3  ;;  %1691 = vmatmul.f32.gmra.mxu0 %v1690_v18  ;;  %v13454_v52 = vand.u32 4294901760, %v9195_v10 }
 0x248   :  { %v852_v11 = vpop.f32.mrf.mxu2  ;;  %v1058_v36 = vadd.f32 %v1057_v4, %v844_v13  ;;  %1830 = vmatmul.f32.gmra.mxu1 %v9130_v26 }
 0x24a   :  { %v1174_v54 = vadd.f32 %v1173_v57, %v1058_v36  ;;  %v1705_v57 = vsub.f32 %v9177_v21, %v13447_v35  ;;  %v1618_v36 = vsel %vm117_vm0, %v108_v27, 0 }
 0x24b   :  { %v9200_v33 = vand.u32 4294901760, %v1618_v36 }
 0x24c   :  { %v9184_v18 = vadd.f32 %v1289_v38, %v1174_v54  ;;  %1544 = vmatmul.f32.gmra.mxu3 %v8775_v44  ;;  %v1183_v43 = vpop.f32.mrf.mxu0  ;;  %v1706_v44 = vand.u32 4294901760, %v1705_v57 }
 0x24d   :  { %1451 = vmatmul.f32.gmra.mxu2 %v8809_v5  ;;  %v1301_v13 = vpop.f32.mrf.mxu1  ;;  %v9213_v27 = vsub.f32 %v1618_v36, %v9200_v33  ;;  %v110_v36 = vld [vmem:[%s13340_s3 + $0x48] sm:$0xff] }
 0x24f   :  { %v1061_v4 = vpop.f32.mrf.mxu3  ;;  %1699 = vmatmul.f32.gmra.mxu0 %v1698_v15  ;;  %v13461_v56 = vand.u32 4294901760, %v9213_v27 }
 0x250   :  { %v860_v38 = vpop.f32.mrf.mxu2  ;;  %v1062_v55 = vadd.f32 %v1061_v4, %v852_v11  ;;  %1834 = vmatmul.f32.gmra.mxu1 %v9146_v1 }
 0x252   :  { %v1179_v54 = vadd.f32 %v1178_v41, %v1062_v55  ;;  %v1713_v41 = vsub.f32 %v9195_v10, %v13454_v52  ;;  %v1621_v55 = vsel %vm117_vm0, %v109_v42, 0 }
 0x253   :  { %v9218_v37 = vand.u32 4294901760, %v1621_v55 }
 0x254   :  { %v9202_v15 = vadd.f32 %v1295_v7, %v1179_v54  ;;  %1548 = vmatmul.f32.gmra.mxu3 %v8809_v5  ;;  %v1188_v35 = vpop.f32.mrf.mxu0  ;;  %v1714_v5 = vand.u32 4294901760, %v1713_v41 }
 0x255   :  { %1455 = vmatmul.f32.gmra.mxu2 %v8844_v58  ;;  %v1307_v11 = vpop.f32.mrf.mxu1  ;;  %v9231_v42 = vsub.f32 %v1621_v55, %v9218_v37  ;;  %v111_v55 = vld [vmem:[%s13340_s3 + $0x50] sm:$0xff] }
 0x257   :  { %v1065_v4 = vpop.f32.mrf.mxu3  ;;  %1707 = vmatmul.f32.gmra.mxu0 %v1706_v44  ;;  %v13464_v63 = vand.u32 4294901760, %v9231_v42 }
 0x258   :  { %v868_v7 = vpop.f32.mrf.mxu2  ;;  %v1066_v57 = vadd.f32 %v1065_v4, %v860_v38  ;;  %1838 = vmatmul.f32.gmra.mxu1 %v9164_v16 }
 0x25a   :  { %v1184_v54 = vadd.f32 %v1183_v43, %v1066_v57  ;;  %v1721_v43 = vsub.f32 %v9213_v27, %v13461_v56  ;;  %v1624_v57 = vsel %vm117_vm0, %v110_v36, 0 }
 0x25b   :  { %v9236_v61 = vand.u32 4294901760, %v1624_v57 }
 0x25c   :  { %v9220_v44 = vadd.f32 %v1301_v13, %v1184_v54  ;;  %1552 = vmatmul.f32.gmra.mxu3 %v8844_v58  ;;  %v1193_v52 = vpop.f32.mrf.mxu0  ;;  %v1722_v58 = vand.u32 4294901760, %v1721_v43 }
 0x25d   :  { %1459 = vmatmul.f32.gmra.mxu2 %v8875_v9  ;;  %v1313_v38 = vpop.f32.mrf.mxu1  ;;  %v9249_v36 = vsub.f32 %v1624_v57, %v9236_v61  ;;  %v112_v57 = vld [vmem:[%s13340_s3 + $0x58] sm:$0xff] }
 0x25f   :  { %v1069_v4 = vpop.f32.mrf.mxu3  ;;  %1715 = vmatmul.f32.gmra.mxu0 %v1714_v5  ;;  %v13471_v0 = vand.u32 4294901760, %v9249_v36 }
 0x260   :  { %v876_v13 = vpop.f32.mrf.mxu2  ;;  %v1070_v41 = vadd.f32 %v1069_v4, %v868_v7  ;;  %1842 = vmatmul.f32.gmra.mxu1 %v9182_v60 }
 0x262   :  { %v1189_v54 = vadd.f32 %v1188_v35, %v1070_v41  ;;  %v1729_v35 = vsub.f32 %v9231_v42, %v13464_v63  ;;  %v1627_v41 = vsel %vm117_vm0, %v111_v55, 0 }
 0x263   :  { %v9254_v17 = vand.u32 4294901760, %v1627_v41 }
 0x264   :  { %v9238_v5 = vadd.f32 %v1307_v11, %v1189_v54  ;;  %1556 = vmatmul.f32.gmra.mxu3 %v8875_v9  ;;  %v1198_v56 = vpop.f32.mrf.mxu0  ;;  %v1730_v9 = vand.u32 4294901760, %v1729_v35 }
 0x265   :  { %1463 = vmatmul.f32.gmra.mxu2 %v8904_v24  ;;  %v1319_v7 = vpop.f32.mrf.mxu1  ;;  %v9267_v55 = vsub.f32 %v1627_v41, %v9254_v17  ;;  %v113_v41 = vld [vmem:[%s13340_s3 + $0x60] sm:$0xff] }
 0x267   :  { %v1073_v4 = vpop.f32.mrf.mxu3  ;;  %1723 = vmatmul.f32.gmra.mxu0 %v1722_v58  ;;  %v13476_v29 = vand.u32 4294901760, %v9267_v55 }
 0x268   :  { %v884_v11 = vpop.f32.mrf.mxu2  ;;  %v1074_v43 = vadd.f32 %v1073_v4, %v876_v13  ;;  %1846 = vmatmul.f32.gmra.mxu1 %v9200_v33 }
 0x26a   :  { %v1194_v54 = vadd.f32 %v1193_v52, %v1074_v43  ;;  %v1737_v52 = vsub.f32 %v9249_v36, %v13471_v0  ;;  %v1630_v43 = vsel %vm117_vm0, %v112_v57, 0 }
 0x26b   :  { %v9272_v6 = vand.u32 4294901760, %v1630_v43 }
 0x26c   :  { %v9256_v58 = vadd.f32 %v1313_v38, %v1194_v54  ;;  %1560 = vmatmul.f32.gmra.mxu3 %v8904_v24  ;;  %v1203_v63 = vpop.f32.mrf.mxu0  ;;  %v1738_v24 = vand.u32 4294901760, %v1737_v52 }
 0x26d   :  { %1467 = vmatmul.f32.gmra.mxu2 %v8926_v3  ;;  %v1325_v13 = vpop.f32.mrf.mxu1  ;;  %v9285_v57 = vsub.f32 %v1630_v43, %v9272_v6  ;;  %v114_v43 = vld [vmem:[%s13340_s3 + $0x68] sm:$0xff] }
 0x26f   :  { %v1077_v4 = vpop.f32.mrf.mxu3  ;;  %1731 = vmatmul.f32.gmra.mxu0 %v1730_v9  ;;  %v13481_v31 = vand.u32 4294901760, %v9285_v57 }
 0x270   :  { %v892_v38 = vpop.f32.mrf.mxu2  ;;  %v1078_v35 = vadd.f32 %v1077_v4, %v884_v11  ;;  %1850 = vmatmul.f32.gmra.mxu1 %v9218_v37 }
 0x272   :  { %v1199_v54 = vadd.f32 %v1198_v56, %v1078_v35  ;;  %v1745_v56 = vsub.f32 %v9267_v55, %v13476_v29  ;;  %v1633_v35 = vsel %vm117_vm0, %v113_v41, 0 }
 0x273   :  { %v9290_v48 = vand.u32 4294901760, %v1633_v35 }
 0x274   :  { %v9274_v9 = vadd.f32 %v1319_v7, %v1199_v54  ;;  %1564 = vmatmul.f32.gmra.mxu3 %v8926_v3  ;;  %v1208_v0 = vpop.f32.mrf.mxu0  ;;  %v1746_v3 = vand.u32 4294901760, %v1745_v56 }
 0x275   :  { %1471 = vmatmul.f32.gmra.mxu2 %v8945_v2  ;;  %v1331_v11 = vpop.f32.mrf.mxu1  ;;  %v9303_v41 = vsub.f32 %v1633_v35, %v9290_v48  ;;  %v115_v35 = vld [vmem:[%s13340_s3 + $0x70] sm:$0xff] }
 0x277   :  { %v1081_v4 = vpop.f32.mrf.mxu3  ;;  %1739 = vmatmul.f32.gmra.mxu0 %v1738_v24 }
 0x278   :  { %v900_v7 = vpop.f32.mrf.mxu2  ;;  %v1082_v52 = vadd.f32 %v1081_v4, %v892_v38  ;;  %1854 = vmatmul.f32.gmra.mxu1 %v9236_v61 }
 0x27a   :  { %v1204_v54 = vadd.f32 %v1203_v63, %v1082_v52  ;;  %v1753_v63 = vsub.f32 %v9285_v57, %v13481_v31  ;;  %v1636_v52 = vsel %vm117_vm0, %v114_v43, 0 }
 0x27b   :  { %v9308_v59 = vand.u32 4294901760, %v1636_v52 }
 0x27c   :  { %v9292_v24 = vadd.f32 %v1325_v13, %v1204_v54  ;;  %1568 = vmatmul.f32.gmra.mxu3 %v8945_v2  ;;  %v1213_v29 = vpop.f32.mrf.mxu0  ;;  %v13485_v2 = vand.u32 4294901760, %v9303_v41 }
 0x27d   :  { %1475 = vmatmul.f32.gmra.mxu2 %v8964_v20  ;;  %v1337_v38 = vpop.f32.mrf.mxu1  ;;  %v9321_v43 = vsub.f32 %v1636_v52, %v9308_v59  ;;  %v116_v52 = vld [vmem:[%s13340_s3 + $0x78] sm:$0xff] }
 0x27e   :  { %13870 = vst [vmem:[#allocation78_spill] sm:$0xff] %v9292_v24  ;;  %v1754_v24 = vand.u32 4294901760, %v1753_v63 }
 0x27f   :  { %v1085_v4 = vpop.f32.mrf.mxu3  ;;  %1747 = vmatmul.f32.gmra.mxu0 %v1746_v3 }
 0x280   :  { %v908_v13 = vpop.f32.mrf.mxu2  ;;  %v1086_v56 = vadd.f32 %v1085_v4, %v900_v7  ;;  %1858 = vmatmul.f32.gmra.mxu1 %v9254_v17 }
 0x282   :  { %v1209_v54 = vadd.f32 %v1208_v0, %v1086_v56  ;;  %v1761_v0 = vsub.f32 %v9303_v41, %v13485_v2  ;;  %v1639_v56 = vsel %vm117_vm0, %v115_v35, 0 }
 0x283   :  { %v9326_v32 = vand.u32 4294901760, %v1639_v56 }
 0x284   :  { %v9310_v3 = vadd.f32 %v1331_v11, %v1209_v54  ;;  %1572 = vmatmul.f32.gmra.mxu3 %v8964_v20  ;;  %v1218_v31 = vpop.f32.mrf.mxu0  ;;  %v13488_v20 = vand.u32 4294901760, %v9321_v43 }
 0x285   :  { %1479 = vmatmul.f32.gmra.mxu2 %v8983_v51  ;;  %v1343_v7 = vpop.f32.mrf.mxu1  ;;  %v9339_v35 = vsub.f32 %v1639_v56, %v9326_v32 }
 0x286   :  { %13871 = vst [vmem:[#allocation79_spill] sm:$0xff] %v9310_v3  ;;  %v1762_v3 = vand.u32 4294901760, %v1761_v0 }
 0x287   :  { %v1089_v4 = vpop.f32.mrf.mxu3  ;;  %1755 = vmatmul.f32.gmra.mxu0 %v1754_v24 }
 0x288   :  { %v916_v11 = vpop.f32.mrf.mxu2  ;;  %v1090_v63 = vadd.f32 %v1089_v4, %v908_v13  ;;  %1862 = vmatmul.f32.gmra.mxu1 %v9272_v6 }
 0x28a   :  { %v1214_v54 = vadd.f32 %v1213_v29, %v1090_v63  ;;  %v1769_v29 = vsub.f32 %v9321_v43, %v13488_v20  ;;  %v1642_v63 = vsel %vm117_vm0, %v116_v52, 0 }
 0x28b   :  { %v9344_v39 = vand.u32 4294901760, %v1642_v63 }
 0x28c   :  { %v9328_v24 = vadd.f32 %v1337_v38, %v1214_v54  ;;  %1576 = vmatmul.f32.gmra.mxu3 %v8983_v51  ;;  %v1223_v2 = vpop.f32.mrf.mxu0  ;;  %v13490_v51 = vand.u32 4294901760, %v9339_v35 }
 0x28d   :  { %1483 = vmatmul.f32.gmra.mxu2 %v9002_v22  ;;  %v1349_v13 = vpop.f32.mrf.mxu1 }
 0x28e   :  { %13872 = vst [vmem:[#allocation80_spill] sm:$0xff] %v9328_v24  ;;  %v1770_v24 = vand.u32 4294901760, %v1769_v29 }
 0x28f   :  { %v1093_v4 = vpop.f32.mrf.mxu3  ;;  %1763 = vmatmul.f32.gmra.mxu0 %v1762_v3 }
 0x290   :  { %v924_v38 = vpop.f32.mrf.mxu2  ;;  %v1094_v0 = vadd.f32 %v1093_v4, %v916_v11  ;;  %1866 = vmatmul.f32.gmra.mxu1 %v9290_v48  ;;  %v1777_v11 = vsub.f32 %v9339_v35, %v13490_v51 }
 0x292   :  { %v1219_v54 = vadd.f32 %v1218_v31, %v1094_v0  ;;  %v9354_v31 = vsub.f32 %v1642_v63, %v9344_v39  ;;  %v1778_v29 = vand.u32 4294901760, %v1777_v11 }
 0x294   :  { %v9346_v3 = vadd.f32 %v1343_v7, %v1219_v54  ;;  %1580 = vmatmul.f32.gmra.mxu3 %v9002_v22  ;;  %v1228_v20 = vpop.f32.mrf.mxu0  ;;  %v13493_v0 = vand.u32 4294901760, %v9354_v31 }
 0x295   :  { %1487 = vmatmul.f32.gmra.mxu2 %v9021_v50  ;;  %v1355_v56 = vpop.f32.mrf.mxu1 }
 0x296   :  { %13873 = vst [vmem:[#allocation81_spill] sm:$0xff] %v9346_v3 }
 0x297   :  { %v1097_v12 = vpop.f32.mrf.mxu3  ;;  %1771 = vmatmul.f32.gmra.mxu0 %v1770_v24 }
 0x298   :  { %v932_v52 = vpop.f32.mrf.mxu2  ;;  %v1098_v4 = vadd.f32 %v1097_v12, %v924_v38  ;;  %1870 = vmatmul.f32.gmra.mxu1 %v9308_v59  ;;  %v1785_v12 = vsub.f32 %v9354_v31, %v13493_v0 }
 0x29a   :  { %v1224_v7 = vadd.f32 %v1223_v2, %v1098_v4  ;;  %v1786_v11 = vand.u32 4294901760, %v1785_v12 }
 0x29c   :  { %v9358_v54 = vadd.f32 %v1349_v13, %v1224_v7  ;;  %1584 = vmatmul.f32.gmra.mxu3 %v9021_v50  ;;  %v1233_v24 = vpop.f32.mrf.mxu0 }
 0x29d   :  { %1491 = vmatmul.f32.gmra.mxu2 %v9040_v34  ;;  %v1361_v3 = vpop.f32.mrf.mxu1 }
 0x29e   :  { %13874 = vst [vmem:[#allocation82_spill] sm:$0xff] %v9358_v54 }
 0x29f   :  { %v1101_v51 = vpop.f32.mrf.mxu3  ;;  %1779 = vmatmul.f32.gmra.mxu0 %v1778_v29 }
 0x2a0   :  { %v940_v38 = vpop.f32.mrf.mxu2  ;;  %v1102_v63 = vadd.f32 %v1101_v51, %v932_v52  ;;  %1874 = vmatmul.f32.gmra.mxu1 %v9326_v32 }
 0x2a2   :  { %v1229_v2 = vadd.f32 %v1228_v20, %v1102_v63 }
 0x2a4   :  { %v9366_v13 = vadd.f32 %v1355_v56, %v1229_v2  ;;  %1588 = vmatmul.f32.gmra.mxu3 %v9040_v34  ;;  %v1238_v4 = vpop.f32.mrf.mxu0 }
 0x2a5   :  { %1495 = vmatmul.f32.gmra.mxu2 %v9059_v49  ;;  %v1367_v7 = vpop.f32.mrf.mxu1 }
 0x2a6   :  { %13875 = vst [vmem:[#allocation83_spill] sm:$0xff] %v9366_v13 }
 0x2a7   :  { %v1105_v54 = vpop.f32.mrf.mxu3  ;;  %1787 = vmatmul.f32.gmra.mxu0 %v1786_v11 }
 0x2a8   :  { %v948_v29 = vpop.f32.mrf.mxu2  ;;  %v1106_v50 = vadd.f32 %v1105_v54, %v940_v38  ;;  %1878 = vmatmul.f32.gmra.mxu1 %v9344_v39 }
 0x2aa   :  { %v1234_v0 = vadd.f32 %v1233_v24, %v1106_v50 }
 0x2ac   :  { %v9371_v51 = vadd.f32 %v1361_v3, %v1234_v0  ;;  %1592 = vmatmul.f32.gmra.mxu3 %v9059_v49  ;;  %v9374_v20 = vpop.f32.mrf.mxu0  ;;  %v13878_v0 = vand.u32 4294901760, %v9089_v46 }
 0x2ad   :  { %1904 = vmatmul.f32.vlgmr.msrb.gmra.mxu2 %v9089_v46  ;;  %v9377_v56 = vpop.f32.mrf.mxu1 }
 0x2ae   :  { %13876 = vst [vmem:[#allocation84_spill] sm:$0xff] %v9371_v51  ;;  %v13911_v51 = vand.u32 4294901760, %v9321_v43 }
 0x2af   :  { %v1109_v52 = vpop.f32.mrf.mxu3  ;;  %2121 = vmatmul.f32.vlgmr.msra.gmra.mxu0 %v9079_v14 }
 0x2b0   :  { %v1110_v12 = vadd.f32 %v1109_v52, %v948_v29  ;;  %v1436_v63 = vpop.f32.mrf.mxu2  ;;  %2204 = vmatmul.f32.vlgmr.msra.gmra.mxu1 %v9079_v14 }
 0x2b1   :  { %v1437_v54 = vadd.f32 %v1436_v63, %v9148_v53  ;;  %v13880_v53 = vand.u32 4294901760, %v9109_v40 }
 0x2b2   :  { %v1239_v50 = vadd.f32 %v1238_v4, %v1110_v12 }
 0x2b4   :  { %v9382_v3 = vadd.f32 %v1367_v7, %v1239_v50  ;;  %2004 = vmatmul.f32.vlgmr.msrb.gmra.mxu3 %v13878_v0  ;;  %v9386_v24 = vpop.f32.mrf.mxu0 }
 0x2b5   :  { %1909 = vmatmul.f32.gmra.mxu2 %v9109_v40  ;;  %v9389_v38 = vpop.f32.mrf.mxu1 }
 0x2b6   :  { %13877 = vst [vmem:[#allocation85_spill] sm:$0xff] %v9382_v3 }
 0x2b7   :  { %v1533_v2 = vpop.f32.mrf.mxu3  ;;  %2125 = vmatmul.f32.gmra.mxu0 %v9097_v25 }
 0x2b8   :  { %v1440_v11 = vpop.f32.mrf.mxu2  ;;  %v9392_v29 = vadd.f32 %v1533_v2, %v1437_v54  ;;  %2208 = vmatmul.f32.gmra.mxu1 %v9097_v25 }
 0x2b9   :  { %v1441_v14 = vadd.f32 %v1440_v11, %v9166_v23  ;;  %v13882_v23 = vand.u32 4294901760, %v9125_v47 }
 0x2ba   :  { %13879 = vst [vmem:[#allocation86_spill] sm:$0xff] %v9392_v29 }
 0x2bc   :  { %2010 = vmatmul.f32.gmra.mxu3 %v13880_v53  ;;  %v9398_v46 = vpop.f32.mrf.mxu0 }
 0x2bd   :  { %1914 = vmatmul.f32.gmra.mxu2 %v9125_v47  ;;  %v9401_v4 = vpop.f32.mrf.mxu1 }
 0x2bf   :  { %v1537_v7 = vpop.f32.mrf.mxu3  ;;  %2129 = vmatmul.f32.gmra.mxu0 %v9114_v8 }
 0x2c0   :  { %v1444_v52 = vpop.f32.mrf.mxu2  ;;  %v9404_v12 = vadd.f32 %v1537_v7, %v1441_v14  ;;  %2212 = vmatmul.f32.gmra.mxu1 %v9114_v8 }
 0x2c1   :  { %v1445_v25 = vadd.f32 %v1444_v52, %v9184_v18  ;;  %v13884_v18 = vand.u32 4294901760, %v9141_v62 }
 0x2c2   :  { %13881 = vst [vmem:[#allocation87_spill] sm:$0xff] %v9404_v12 }
 0x2c4   :  { %2016 = vmatmul.f32.gmra.mxu3 %v13882_v23  ;;  %v9410_v40 = vpop.f32.mrf.mxu0 }
 0x2c5   :  { %1919 = vmatmul.f32.gmra.mxu2 %v9141_v62  ;;  %v9413_v63 = vpop.f32.mrf.mxu1 }
 0x2c7   :  { %v1541_v54 = vpop.f32.mrf.mxu3  ;;  %2133 = vmatmul.f32.gmra.mxu0 %v9130_v26 }
 0x2c8   :  { %v1448_v50 = vpop.f32.mrf.mxu2  ;;  %v9416_v0 = vadd.f32 %v1541_v54, %v1445_v25  ;;  %2216 = vmatmul.f32.gmra.mxu1 %v9130_v26 }
 0x2c9   :  { %v1449_v8 = vadd.f32 %v1448_v50, %v9202_v15  ;;  %v13886_v15 = vand.u32 4294901760, %v9159_v19 }
 0x2ca   :  { %13883 = vst [vmem:[#allocation88_spill] sm:$0xff] %v9416_v0 }
 0x2cc   :  { %2022 = vmatmul.f32.gmra.mxu3 %v13884_v18  ;;  %v9422_v47 = vpop.f32.mrf.mxu0 }
 0x2cd   :  { %1924 = vmatmul.f32.gmra.mxu2 %v9159_v19  ;;  %v9425_v2 = vpop.f32.mrf.mxu1 }
 0x2cf   :  { %v1545_v11 = vpop.f32.mrf.mxu3  ;;  %2137 = vmatmul.f32.gmra.mxu0 %v9146_v1 }
 0x2d0   :  { %v1452_v14 = vpop.f32.mrf.mxu2  ;;  %v9428_v53 = vadd.f32 %v1545_v11, %v1449_v8  ;;  %2220 = vmatmul.f32.gmra.mxu1 %v9146_v1 }
 0x2d1   :  { %v1453_v26 = vadd.f32 %v1452_v14, %v9220_v44  ;;  %v13889_v44 = vand.u32 4294901760, %v9177_v21 }
 0x2d2   :  { %13885 = vst [vmem:[#allocation89_spill] sm:$0xff] %v9428_v53 }
 0x2d4   :  { %2028 = vmatmul.f32.gmra.mxu3 %v13886_v15  ;;  %v9434_v62 = vpop.f32.mrf.mxu0 }
 0x2d5   :  { %1929 = vmatmul.f32.gmra.mxu2 %v9177_v21  ;;  %v9437_v7 = vpop.f32.mrf.mxu1 }
 0x2d6   :  { %13887 = vst [vmem:[#allocation90_spill] sm:$0xff] %v9437_v7 }
 0x2d7   :  { %v1549_v52 = vpop.f32.mrf.mxu3  ;;  %2141 = vmatmul.f32.gmra.mxu0 %v9164_v16 }
 0x2d8   :  { %v1456_v25 = vpop.f32.mrf.mxu2  ;;  %v9440_v23 = vadd.f32 %v1549_v52, %v1453_v26  ;;  %2224 = vmatmul.f32.gmra.mxu1 %v9164_v16 }
 0x2d9   :  { %v1457_v1 = vadd.f32 %v1456_v25, %v9238_v5  ;;  %v13891_v5 = vand.u32 4294901760, %v9195_v10 }
 0x2da   :  { %13888 = vst [vmem:[#allocation91_spill] sm:$0xff] %v9440_v23 }
 0x2dc   :  { %2034 = vmatmul.f32.gmra.mxu3 %v13889_v44  ;;  %v9446_v19 = vpop.f32.mrf.mxu0 }
 0x2dd   :  { %1934 = vmatmul.f32.gmra.mxu2 %v9195_v10  ;;  %v9449_v54 = vpop.f32.mrf.mxu1 }
 0x2df   :  { %v1553_v50 = vpop.f32.mrf.mxu3  ;;  %2145 = vmatmul.f32.gmra.mxu0 %v9182_v60 }
 0x2e0   :  { %v1460_v8 = vpop.f32.mrf.mxu2  ;;  %v9452_v18 = vadd.f32 %v1553_v50, %v1457_v1  ;;  %2228 = vmatmul.f32.gmra.mxu1 %v9182_v60 }
 0x2e1   :  { %v1461_v16 = vadd.f32 %v1460_v8, %v9256_v58  ;;  %v13893_v58 = vand.u32 4294901760, %v9213_v27 }
 0x2e2   :  { %13890 = vst [vmem:[#allocation92_spill] sm:$0xff] %v9452_v18 }
 0x2e4   :  { %2040 = vmatmul.f32.gmra.mxu3 %v13891_v5  ;;  %v9458_v21 = vpop.f32.mrf.mxu0 }
 0x2e5   :  { %1939 = vmatmul.f32.gmra.mxu2 %v9213_v27  ;;  %v9461_v11 = vpop.f32.mrf.mxu1 }
 0x2e7   :  { %v1557_v14 = vpop.f32.mrf.mxu3  ;;  %2149 = vmatmul.f32.gmra.mxu0 %v9200_v33 }
 0x2e8   :  { %v1464_v26 = vpop.f32.mrf.mxu2  ;;  %v9464_v15 = vadd.f32 %v1557_v14, %v1461_v16  ;;  %2232 = vmatmul.f32.gmra.mxu1 %v9200_v33  ;;  %v13896_v33 = vand.u32 4294901760, %v9231_v42  ;;  %v13899_v16 = vand.u32 4294901760, %v9249_v36 }
 0x2e9   :  { %v1465_v60 = vadd.f32 %v1464_v26, %v9274_v9  ;;  %v13902_v26 = vand.u32 4294901760, %v9267_v55 }
 0x2ea   :  { %13892 = vst [vmem:[#allocation93_spill] sm:$0xff] %v9464_v15 }
 0x2ec   :  { %2046 = vmatmul.f32.gmra.mxu3 %v13893_v58  ;;  %v9470_v10 = vpop.f32.mrf.mxu0 }
 0x2ed   :  { %1944 = vmatmul.f32.gmra.mxu2 %v9231_v42  ;;  %v9473_v52 = vpop.f32.mrf.mxu1 }
 0x2ef   :  { %v1561_v25 = vpop.f32.mrf.mxu3  ;;  %2153 = vmatmul.f32.gmra.mxu0 %v9218_v37 }
 0x2f0   :  { %v9476_v1 = vpop.f32.mrf.mxu2  ;;  %v9478_v44 = vadd.f32 %v1561_v25, %v1465_v60  ;;  %2236 = vmatmul.f32.gmra.mxu1 %v9218_v37  ;;  %v13905_v25 = vand.u32 4294901760, %v9285_v57 }
 0x2f1   :  { %13894 = vst [vmem:[#allocation94_spill] sm:$0xff] %v9476_v1 }
 0x2f2   :  { %13895 = vst [vmem:[#allocation95_spill] sm:$0xff] %v9478_v44 }
 0x2f4   :  { %2052 = vmatmul.f32.gmra.mxu3 %v13896_v33  ;;  %v9483_v27 = vpop.f32.mrf.mxu0 }
 0x2f5   :  { %1949 = vmatmul.f32.gmra.mxu2 %v9249_v36  ;;  %v9486_v9 = vpop.f32.mrf.mxu1 }
 0x2f7   :  { %v9488_v50 = vpop.f32.mrf.mxu3  ;;  %2157 = vmatmul.f32.gmra.mxu0 %v9236_v61 }
 0x2f8   :  { %13897 = vst [vmem:[#allocation96_spill] sm:$0xff] %v9488_v50  ;;  %v9491_v8 = vpop.f32.mrf.mxu2  ;;  %2240 = vmatmul.f32.gmra.mxu1 %v9236_v61 }
 0x2f9   :  { %13898 = vst [vmem:[#allocation97_spill] sm:$0xff] %v9491_v8 }
 0x2fc   :  { %2058 = vmatmul.f32.gmra.mxu3 %v13899_v16  ;;  %v9496_v37 = vpop.f32.mrf.mxu0 }
 0x2fd   :  { %1954 = vmatmul.f32.gmra.mxu2 %v9267_v55  ;;  %v9499_v42 = vpop.f32.mrf.mxu1 }
 0x2ff   :  { %v9501_v5 = vpop.f32.mrf.mxu3  ;;  %2161 = vmatmul.f32.gmra.mxu0 %v9254_v17 }
 0x300   :  { %13900 = vst [vmem:[#allocation98_spill] sm:$0xff] %v9501_v5  ;;  %v9504_v14 = vpop.f32.mrf.mxu2  ;;  %2244 = vmatmul.f32.gmra.mxu1 %v9254_v17 }
 0x301   :  { %13901 = vst [vmem:[#allocation99_spill] sm:$0xff] %v9504_v14 }
 0x304   :  { %2064 = vmatmul.f32.gmra.mxu3 %v13902_v26  ;;  %v9509_v61 = vpop.f32.mrf.mxu0  ;;  %v13908_v26 = vand.u32 4294901760, %v9303_v41 }
 0x305   :  { %1959 = vmatmul.f32.gmra.mxu2 %v9285_v57  ;;  %v9512_v36 = vpop.f32.mrf.mxu1 }
 0x307   :  { %v9514_v60 = vpop.f32.mrf.mxu3  ;;  %2165 = vmatmul.f32.gmra.mxu0 %v9272_v6 }
 0x308   :  { %13903 = vst [vmem:[#allocation100_spill] sm:$0xff] %v9514_v60  ;;  %v9517_v58 = vpop.f32.mrf.mxu2  ;;  %2248 = vmatmul.f32.gmra.mxu1 %v9272_v6 }
 0x309   :  { %13904 = vst [vmem:[#allocation101_spill] sm:$0xff] %v9517_v58 }
 0x30c   :  { %2070 = vmatmul.f32.gmra.mxu3 %v13905_v25  ;;  %v9522_v17 = vpop.f32.mrf.mxu0 }
 0x30d   :  { %1964 = vmatmul.f32.gmra.mxu2 %v9303_v41  ;;  %v9525_v55 = vpop.f32.mrf.mxu1 }
 0x30f   :  { %v9527_v33 = vpop.f32.mrf.mxu3  ;;  %2169 = vmatmul.f32.gmra.mxu0 %v9290_v48 }
 0x310   :  { %13906 = vst [vmem:[#allocation102_spill] sm:$0xff] %v9527_v33  ;;  %v9530_v16 = vpop.f32.mrf.mxu2  ;;  %2252 = vmatmul.f32.gmra.mxu1 %v9290_v48 }
 0x311   :  { %13907 = vst [vmem:[#allocation103_spill] sm:$0xff] %v9530_v16 }
 0x314   :  { %2076 = vmatmul.f32.gmra.mxu3 %v13908_v26  ;;  %v9535_v6 = vpop.f32.mrf.mxu0 }
 0x315   :  { %1969 = vmatmul.f32.gmra.mxu2 %v9321_v43  ;;  %v9538_v57 = vpop.f32.mrf.mxu1 }
 0x317   :  { %v9540_v25 = vpop.f32.mrf.mxu3  ;;  %2173 = vmatmul.f32.gmra.mxu0 %v9308_v59 }
 0x318   :  { %13909 = vst [vmem:[#allocation104_spill] sm:$0xff] %v9540_v25  ;;  %v9543_v3 = vpop.f32.mrf.mxu2  ;;  %2256 = vmatmul.f32.gmra.mxu1 %v9308_v59 }
 0x319   :  { %13910 = vst [vmem:[#allocation105_spill] sm:$0xff] %v9543_v3  ;;  %v13914_v3 = vand.u32 4294901760, %v9339_v35 }
 0x31c   :  { %2082 = vmatmul.f32.gmra.mxu3 %v13911_v51  ;;  %v9548_v48 = vpop.f32.mrf.mxu0 }
 0x31d   :  { %1974 = vmatmul.f32.gmra.mxu2 %v9339_v35  ;;  %v9551_v41 = vpop.f32.mrf.mxu1 }
 0x31f   :  { %v9553_v26 = vpop.f32.mrf.mxu3  ;;  %2177 = vmatmul.f32.gmra.mxu0 %v9326_v32 }
 0x320   :  { %13912 = vst [vmem:[#allocation106_spill] sm:$0xff] %v9553_v26  ;;  %v9556_v13 = vpop.f32.mrf.mxu2  ;;  %2260 = vmatmul.f32.gmra.mxu1 %v9326_v32 }
 0x321   :  { %13913 = vst [vmem:[#allocation107_spill] sm:$0xff] %v9556_v13  ;;  %v13917_v13 = vand.u32 4294901760, %v9354_v31 }
 0x324   :  { %2088 = vmatmul.f32.gmra.mxu3 %v13914_v3  ;;  %v9561_v59 = vpop.f32.mrf.mxu0 }
 0x325   :  { %1979 = vmatmul.f32.gmra.mxu2 %v9354_v31  ;;  %v9564_v43 = vpop.f32.mrf.mxu1 }
 0x327   :  { %v9566_v51 = vpop.f32.mrf.mxu3  ;;  %2181 = vmatmul.f32.gmra.mxu0 %v9344_v39 }
 0x328   :  { %13915 = vst [vmem:[#allocation108_spill] sm:$0xff] %v9566_v51  ;;  %v9569_v26 = vpop.f32.mrf.mxu2  ;;  %2264 = vmatmul.f32.gmra.mxu1 %v9344_v39 }
 0x329   :  { %13916 = vst [vmem:[#allocation109_spill] sm:$0xff] %v9569_v26 }
 0x32c   :  { %2094 = vmatmul.f32.gmra.mxu3 %v13917_v13  ;;  %v9574_v32 = vpop.f32.mrf.mxu0 }
 0x32d   :  { %13918 = vst [vmem:[#allocation110_spill] sm:$0xff] %v9574_v32  ;;  %v9576_v35 = vpop.f32.mrf.mxu1 }
 0x32e   :  { %13919 = vst [vmem:[#allocation111_spill] sm:$0xff] %v9576_v35 }
 0x32f   :  { %v9578_v3 = vpop.f32.mrf.mxu3 }
 0x330   :  { %13920 = vst [vmem:[#allocation112_spill] sm:$0xff] %v9578_v3  ;;  %v9580_v25 = vpop.f32.mrf.mxu2 }
 0x331   :  { %13921 = vst [vmem:[#allocation113_spill] sm:$0xff] %v9580_v25 }
 0x334   :  { %v9582_v16 = vpop.f32.mrf.mxu0 }
 0x335   :  { %13922 = vst [vmem:[#allocation114_spill] sm:$0xff] %v9582_v16  ;;  %v9584_v51 = vpop.f32.mrf.mxu1 }
 0x336   :  { %13923 = vst [vmem:[#allocation115_spill] sm:$0xff] %v9584_v51 }
 0x337   :  { %v9586_v33 = vpop.f32.mrf.mxu3 }
 0x338   :  { %13924 = vst [vmem:[#allocation116_spill] sm:$0xff] %v9586_v33  ;;  %v9588_v26 = vpop.f32.mrf.mxu2 }
 0x339   :  { %13925 = vst [vmem:[#allocation117_spill] sm:$0xff] %v9588_v26  ;;  %v1876_v26 = vadd.f32 %v9551_v41, %v9548_v48 }
 0x33c   :  { %v9590_v39 = vpop.f32.mrf.mxu0 }
 0x33d   :  { %13926 = vst [vmem:[#allocation118_spill] sm:$0xff] %v9590_v39  ;;  %v9592_v31 = vpop.f32.mrf.mxu1 }
 0x33e   :  { %13927 = vst [vmem:[#allocation119_spill] sm:$0xff] %v9592_v31 }
 0x33f   :  { %v9594_v13 = vpop.f32.mrf.mxu3 }
 0x340   :  { %13928 = vst [vmem:[#allocation120_spill] sm:$0xff] %v9594_v13  ;;  %v9596_v58 = vpop.f32.mrf.mxu2 }
 0x341   :  { %13929 = vst [vmem:[#allocation121_spill] sm:$0xff] %v9596_v58 }
 0x344   :  { %v9598_v60 = vpop.f32.mrf.mxu0 }
 0x345   :  { %13930 = vst [vmem:[#allocation122_spill] sm:$0xff] %v9598_v60  ;;  %v9600_v3 = vpop.f32.mrf.mxu1 }
 0x346   :  { %13931 = vst [vmem:[#allocation123_spill] sm:$0xff] %v9600_v3 }
 0x347   :  { %v9602_v14 = vpop.f32.mrf.mxu3 }
 0x348   :  { %13932 = vst [vmem:[#allocation124_spill] sm:$0xff] %v9602_v14  ;;  %v9604_v5 = vpop.f32.mrf.mxu2 }
 0x349   :  { %13933 = vst [vmem:[#allocation125_spill] sm:$0xff] %v9604_v5 }
 0x34c   :  { %v9606_v8 = vpop.f32.mrf.mxu0 }
 0x34d   :  { %13934 = vst [vmem:[#allocation126_spill] sm:$0xff] %v9606_v8  ;;  %v9608_v50 = vpop.f32.mrf.mxu1 }
 0x34e   :  { %13935 = vst [vmem:[#allocation127_spill] sm:$0xff] %v9608_v50 }
 0x34f   :  { %v9610_v1 = vpop.f32.mrf.mxu3 }
 0x350   :  { %13936 = vst [vmem:[#allocation128_spill] sm:$0xff] %v9610_v1  ;;  %v9612_v44 = vpop.f32.mrf.mxu2 }
 0x351   :  { %13937 = vst [vmem:[#allocation129_spill] sm:$0xff] %v9612_v44  ;;  %v1868_v44 = vadd.f32 %v9525_v55, %v9522_v17  ;;  %v1856_v17 = vadd.f32 %v9486_v9, %v9483_v27 }
 0x354   :  { %v9614_v15 = vpop.f32.mrf.mxu0 }
 0x355   :  { %13938 = vst [vmem:[#allocation130_spill] sm:$0xff] %v9614_v15  ;;  %v9616_v18 = vpop.f32.mrf.mxu1 }
 0x356   :  { %13939 = vst [vmem:[#allocation131_spill] sm:$0xff] %v9616_v18 }
 0x357   :  { %v9618_v23 = vpop.f32.mrf.mxu3 }
 0x358   :  { %13940 = vst [vmem:[#allocation132_spill] sm:$0xff] %v9618_v23  ;;  %v9620_v53 = vpop.f32.mrf.mxu2 }
 0x359   :  { %13941 = vst [vmem:[#allocation133_spill] sm:$0xff] %v9620_v53 }
 0x35c   :  { %v9622_v0 = vpop.f32.mrf.mxu0 }
 0x35d   :  { %13942 = vst [vmem:[#allocation134_spill] sm:$0xff] %v9622_v0  ;;  %v9624_v12 = vpop.f32.mrf.mxu1 }
 0x35e   :  { %13943 = vst [vmem:[#allocation135_spill] sm:$0xff] %v9624_v12 }
 0x35f   :  { %v9626_v29 = vpop.f32.mrf.mxu3 }
 0x360   :  { %13944 = vst [vmem:[#allocation136_spill] sm:$0xff] %v9626_v29  ;;  %v9628_v49 = vpop.f32.mrf.mxu2  ;;  %v1872_v29 = vadd.f32 %v9538_v57, %v9535_v6 }
 0x361   :  { %13945 = vst [vmem:[#allocation137_spill] sm:$0xff] %v9628_v49  ;;  %v1860_v49 = vadd.f32 %v9499_v42, %v9496_v37 }
 0x364   :  { %v9630_v34 = vpop.f32.mrf.mxu0 }
 0x365   :  { %13946 = vst [vmem:[#allocation138_spill] sm:$0xff] %v9630_v34  ;;  %v9632_v22 = vpop.f32.mrf.mxu1 }
 0x366   :  { %13947 = vst [vmem:[#allocation139_spill] sm:$0xff] %v9632_v22 }
 0x367   :  { %v9634_v45 = vpop.f32.mrf.mxu3 }
 0x368   :  { %13948 = vst [vmem:[#allocation140_spill] sm:$0xff] %v9634_v45  ;;  %v9636_v28 = vpop.f32.mrf.mxu2  ;;  %v1864_v45 = vadd.f32 %v9512_v36, %v9509_v61 }
 0x36c   :  { %v9638_v30 = vpop.f32.mrf.mxu0 }
 0x36d   :  { %13949 = vst [vmem:[#allocation141_spill] sm:$0xff] %v9638_v30  ;;  %v9640_v35 = vpop.f32.mrf.mxu1 }
 0x36e   :  { %13950 = vst [vmem:[#allocation142_spill] sm:$0xff] %v9640_v35 }
 0x36f   :  { %v9642_v51 = vpop.f32.mrf.mxu3 }
 0x370   :  { %13951 = vst [vmem:[#allocation143_spill] sm:$0xff] %v9642_v51  ;;  %v1945_v31 = vpop.f32.mrf.mxu2 }
 0x374   :  { %v9644_v32 = vpop.f32.mrf.mxu0 }
 0x375   :  { %13952 = vst [vmem:[#allocation144_spill] sm:$0xff] %v9644_v32  ;;  %v9646_v3 = vpop.f32.mrf.mxu1 }
 0x376   :  { %13953 = vst [vmem:[#allocation145_spill] sm:$0xff] %v9646_v3 }
 0x377   :  { %v2053_v16 = vpop.f32.mrf.mxu3 }
 0x378   :  { %v1950_v50 = vpop.f32.mrf.mxu2 }
 0x37c   :  { %v2162_v39 = vpop.f32.mrf.mxu0 }
 0x37d   :  { %v9648_v18 = vpop.f32.mrf.mxu1 }
 0x37e   :  { %13954 = vst [vmem:[#allocation146_spill] sm:$0xff] %v9648_v18 }
 0x37f   :  { %v2059_v33 = vpop.f32.mrf.mxu3 }
 0x380   :  { %v1955_v60 = vpop.f32.mrf.mxu2 }
 0x381   :  { %v1956_v55 = vadd.f32 %v1955_v60, %v1860_v49  ;;  %v1824_v49 = vadd.f32 %v9389_v38, %v9386_v24 }
 0x384   :  { %v2166_v12 = vpop.f32.mrf.mxu0 }
 0x385   :  { %v9650_v14 = vpop.f32.mrf.mxu1 }
 0x386   :  { %13955 = vst [vmem:[#allocation147_spill] sm:$0xff] %v9650_v14 }
 0x387   :  { %v2065_v13 = vpop.f32.mrf.mxu3 }
 0x388   :  { %v1960_v8 = vpop.f32.mrf.mxu2 }
 0x389   :  { %v1961_v6 = vadd.f32 %v1960_v8, %v1864_v45  ;;  %v1951_v45 = vadd.f32 %v1950_v50, %v1856_v17  ;;  %v13969_v17 = vld [vmem:[#allocation138_spill] sm:$0xff] }
 0x38c   :  { %v2170_v1 = vpop.f32.mrf.mxu0 }
 0x38d   :  { %v2253_v58 = vpop.f32.mrf.mxu1  ;;  %v13960_v61 = vld [vmem:[#allocation147_spill] sm:$0xff] }
 0x38f   :  { %v2071_v22 = vpop.f32.mrf.mxu3 }
 0x390   :  { %v1965_v15 = vpop.f32.mrf.mxu2 }
 0x391   :  { %v1966_v53 = vadd.f32 %v1965_v15, %v1868_v44  ;;  %v1820_v15 = vadd.f32 %v9377_v56, %v9374_v20  ;;  %v2060_v56 = vadd.f32 %v2059_v33, %v1951_v45  ;;  %v13961_v33 = vld [vmem:[#allocation113_spill] sm:$0xff]  ;;  %v13972_v45 = vld [vmem:[#allocation132_spill] sm:$0xff] }
 0x394   :  { %v2174_v23 = vpop.f32.mrf.mxu0 }
 0x395   :  { %v2257_v5 = vpop.f32.mrf.mxu1 }
 0x397   :  { %v2077_v35 = vpop.f32.mrf.mxu3 }
 0x398   :  { %v1970_v0 = vpop.f32.mrf.mxu2  ;;  %v2078_v57 = vadd.f32 %v2077_v35, %v1966_v53  ;;  %v2066_v53 = vadd.f32 %v2065_v13, %v1956_v55 }
 0x399   :  { %v1971_v18 = vadd.f32 %v1970_v0, %v1872_v29  ;;  %v2072_v29 = vadd.f32 %v2071_v22, %v1961_v6  ;;  %v1848_v22 = vadd.f32 %v9461_v11, %v9458_v21  ;;  %v13956_v11 = vld [vmem:[#allocation90_spill] sm:$0xff]  ;;  %v13968_v6 = vld [vmem:[#allocation136_spill] sm:$0xff] }
 0x39a   :  { %v2171_v8 = vadd.f32 %v2170_v1, %v2078_v57  ;;  %v1844_v1 = vadd.f32 %v9449_v54, %v9446_v19  ;;  %v1840_v42 = vadd.f32 %v13956_v11, %v9434_v62 }
 0x39b   :  { %v1941_v27 = vadd.f32 %v9636_v28, %v1848_v22  ;;  %v13959_v28 = vld [vmem:[#allocation144_spill] sm:$0xff] }
 0x39c   :  { %v2178_v30 = vpop.f32.mrf.mxu0 }
 0x39d   :  { %v2261_v51 = vpop.f32.mrf.mxu1 }
 0x39f   :  { %v2083_v3 = vpop.f32.mrf.mxu3 }
 0x3a0   :  { %v1975_v34 = vpop.f32.mrf.mxu2  ;;  %v2084_v14 = vadd.f32 %v2083_v3, %v1971_v18  ;;  %v1880_v18 = vadd.f32 %v9564_v43, %v9561_v59  ;;  %v13965_v59 = vld [vmem:[#allocation146_spill] sm:$0xff]  ;;  %v13966_v3 = vld [vmem:[#allocation117_spill] sm:$0xff] }
 0x3a1   :  { %v1976_v25 = vadd.f32 %v1975_v34, %v1876_v26  ;;  %v1852_v34 = vadd.f32 %v9473_v52, %v9470_v10  ;;  %v1832_v52 = vadd.f32 %v9413_v63, %v9410_v40  ;;  %v13957_v40 = vld [vmem:[#allocation137_spill] sm:$0xff] }
 0x3a2   :  { %v2175_v0 = vadd.f32 %v2174_v23, %v2084_v14  ;;  %v1936_v63 = vadd.f32 %v13957_v40, %v1844_v1  ;;  %v2159_v14 = vadd.f32 %v13959_v28, %v2060_v56  ;;  %v13964_v26 = vld [vmem:[#allocation141_spill] sm:$0xff]  ;;  %v13976_v1 = vld [vmem:[#allocation128_spill] sm:$0xff]  ;;  %v13980_v40 = vld [vmem:[#allocation126_spill] sm:$0xff] }
 0x3a3   :  { %v1946_v20 = vadd.f32 %v1945_v31, %v1852_v34  ;;  %v13967_v31 = vld [vmem:[#allocation129_spill] sm:$0xff] }
 0x3a4   :  { %v2258_v23 = vadd.f32 %v2257_v5, %v2175_v0  ;;  %v2182_v9 = vpop.f32.mrf.mxu0  ;;  %v13958_v5 = vld [vmem:[#allocation143_spill] sm:$0xff] }
 0x3a5   :  { %v2054_v24 = vadd.f32 %v2053_v16, %v1946_v20  ;;  %v2048_v19 = vadd.f32 %v13958_v5, %v1941_v27  ;;  %v2265_v54 = vpop.f32.mrf.mxu1  ;;  %v1906_v16 = vadd.f32 %v13961_v33, %v1820_v15  ;;  %v13981_v5 = vld [vmem:[#allocation135_spill] sm:$0xff] }
 0x3a6   :  { %v9691_v60 = vand.u32 4294901760, %v2258_v23 }
 0x3a7   :  { %v2089_v32 = vpop.f32.mrf.mxu3  ;;  %v2155_v62 = vadd.f32 %v13964_v26, %v2054_v24  ;;  %v2151_v55 = vadd.f32 %v13969_v17, %v2048_v19  ;;  %v13977_v24 = vld [vmem:[#allocation130_spill] sm:$0xff] }
 0x3a8   :  { %v2090_v7 = vadd.f32 %v2089_v32, %v1976_v25  ;;  %v1980_v44 = vpop.f32.mrf.mxu2  ;;  %v13962_v25 = vld [vmem:[#allocation133_spill] sm:$0xff]  ;;  %v9711_v15 = vsub.f32 %v2258_v23, %v9691_v60 }
 0x3a9   :  { %v1981_v10 = vadd.f32 %v1980_v44, %v1880_v18  ;;  %v1931_v41 = vadd.f32 %v13962_v25, %v1840_v42  ;;  %v13971_v18 = vld [vmem:[#allocation125_spill] sm:$0xff]  ;;  %v13983_v25 = vld [vmem:[#allocation122_spill] sm:$0xff] }
 0x3aa   :  { %v2179_v48 = vadd.f32 %v2178_v30, %v2090_v7  ;;  %v1828_v30 = vadd.f32 %v9401_v4, %v9398_v46  ;;  %v2167_v7 = vadd.f32 %v2166_v12, %v2072_v29  ;;  %v2163_v46 = vadd.f32 %v2162_v39, %v2066_v53  ;;  %v13970_v29 = vld [vmem:[#allocation145_spill] sm:$0xff] }
 0x3ab   :  { %v2254_v4 = vadd.f32 %v2253_v58, %v2171_v8  ;;  %v1836_v12 = vadd.f32 %v9425_v2, %v9422_v47  ;;  %v13963_v47 = vld [vmem:[#allocation140_spill] sm:$0xff]  ;;  %v1911_v39 = vadd.f32 %v13966_v3, %v1824_v49  ;;  %v2036_v57 = vadd.f32 %v13968_v6, %v1931_v41  ;;  %v13973_v8 = vld [vmem:[#allocation134_spill] sm:$0xff]  ;;  %v13987_v6 = vld [vmem:[#allocation127_spill] sm:$0xff] }
 0x3ac   :  { %v2262_v37 = vadd.f32 %v2261_v51, %v2179_v48  ;;  %v2250_v36 = vadd.f32 %v13960_v61, %v2167_v7  ;;  %v2042_v2 = vadd.f32 %v13963_v47, %v1936_v63  ;;  %v2246_v43 = vadd.f32 %v13965_v59, %v2163_v46  ;;  %v13974_v49 = vld [vmem:[#allocation142_spill] sm:$0xff]  ;;  %v13984_v47 = vld [vmem:[#allocation131_spill] sm:$0xff]  ;;  %v13985_v3 = vld [vmem:[#allocation116_spill] sm:$0xff] }
 0x3ad   :  { %v9698_v51 = vand.u32 4294901760, %v2254_v4  ;;  %v1926_v13 = vadd.f32 %v13967_v31, %v1836_v12  ;;  %v2242_v0 = vadd.f32 %v13970_v29, %v2159_v14  ;;  %v1921_v44 = vadd.f32 %v13971_v18, %v1832_v52  ;;  %v13986_v31 = vld [vmem:[#allocation118_spill] sm:$0xff] }
 0x3ae   :  { %v9681_v50 = vand.u32 4294901760, %v2262_v37  ;;  %v9708_v48 = vand.u32 4294901760, %v2250_v36  ;;  %v2238_v22 = vadd.f32 %v13974_v49, %v2155_v62  ;;  %v9719_v20 = vand.u32 4294901760, %v2246_v43  ;;  %v13988_v18 = vld [vmem:[#allocation114_spill] sm:$0xff] }
 0x3af   :  { %v2095_v38 = vpop.f32.mrf.mxu3  ;;  %v2030_v53 = vadd.f32 %v13972_v45, %v1926_v13  ;;  %v9722_v56 = vsub.f32 %v2254_v4, %v9698_v51  ;;  %v2024_v27 = vadd.f32 %v13976_v1, %v1921_v44  ;;  %v2443_v11 = vand.u32 4294901760, %v9711_v15  ;;  %v13989_v45 = vld [vmem:[#allocation123_spill] sm:$0xff] }
 0x3b0   :  { %v2096_v21 = vadd.f32 %v2095_v38, %v1981_v10  ;;  %v9701_v32 = vsub.f32 %v2262_v37, %v9681_v50  ;;  %v2147_v37 = vadd.f32 %v13973_v8, %v2042_v2  ;;  %v13975_v10 = vld [vmem:[#allocation121_spill] sm:$0xff]  ;;  %v2143_v38 = vadd.f32 %v13977_v24, %v2036_v57 }
 0x3b1   :  { %v1916_v52 = vadd.f32 %v13975_v10, %v1828_v30  ;;  %v9737_v4 = vsub.f32 %v2250_v36, %v9708_v48  ;;  %v13979_v30 = vld [vmem:[#allocation124_spill] sm:$0xff]  ;;  %v2139_v63 = vadd.f32 %v13980_v40, %v2030_v53  ;;  %v9750_v28 = vsub.f32 %v2246_v43, %v9719_v20  ;;  %v13992_v40 = vld [vmem:[#allocation115_spill] sm:$0xff] }
 0x3b2   :  { %v2183_v58 = vadd.f32 %v2182_v9, %v2096_v21  ;;  %v2437_v23 = vand.u32 4294901760, %v9701_v32  ;;  %v13978_v9 = vld [vmem:[#allocation139_spill] sm:$0xff]  ;;  %v9734_v21 = vand.u32 4294901760, %v2242_v0  ;;  %v2230_v19 = vadd.f32 %v13981_v5, %v2147_v37 }
 0x3b3   :  { %v2234_v46 = vadd.f32 %v13978_v9, %v2151_v55  ;;  %v2018_v42 = vadd.f32 %v13979_v30, %v1916_v52  ;;  %v2449_v36 = vand.u32 4294901760, %v9722_v56  ;;  %v2135_v41 = vadd.f32 %v13983_v25, %v2024_v27  ;;  %v13990_v52 = vld [vmem:[#allocation110_spill] sm:$0xff]  ;;  %v13991_v27 = vld [vmem:[#allocation119_spill] sm:$0xff] }
 0x3b4   :  { %v2266_v35 = vadd.f32 %v2265_v54, %v2183_v58  ;;  %v9746_v54 = vand.u32 4294901760, %v2238_v22  ;;  %v2438_v61 = vsub.f32 %v9701_v32, %v2437_v23  ;;  %v13982_v58 = vld [vmem:[#allocation120_spill] sm:$0xff]  ;;  %v2226_v2 = vadd.f32 %v13984_v47, %v2143_v38 }
 0x3b5   :  { %v2012_v33 = vadd.f32 %v13982_v58, %v1911_v39  ;;  %v9764_v26 = vand.u32 4294901760, %v2234_v46  ;;  %v9768_v62 = vsub.f32 %v2242_v0, %v9734_v21  ;;  %v2444_v43 = vsub.f32 %v9711_v15, %v2443_v11 }
 0x3b6   :  { %v9713_v34 = vand.u32 4294901760, %v2266_v35  ;;  %v2006_v39 = vadd.f32 %v13985_v3, %v1906_v16  ;;  %v2131_v13 = vadd.f32 %v13986_v31, %v2018_v42  ;;  %v2222_v57 = vadd.f32 %v13987_v6, %v2139_v63 }
 0x3b7   :  { %v9779_v17 = vand.u32 4294901760, %v2230_v19  ;;  %v9783_v55 = vsub.f32 %v2238_v22, %v9746_v54  ;;  %v2439_v29 = vand.u32 4294901760, %v2438_v61  ;;  %v2450_v0 = vsub.f32 %v9722_v56, %v2449_v36 }
 0x3b8   :  { %v9725_v7 = vsub.f32 %v2266_v35, %v9713_v34  ;;  %2269 = vmatpush.msra.mxu2 %v9713_v34  ;;  %2720 = vmatpush.msrb.mxu1 %v9713_v34  ;;  %v2455_v35 = vand.u32 4294901760, %v9737_v4  ;;  %v2461_v16 = vand.u32 4294901760, %v9750_v28  ;;  %v2127_v44 = vadd.f32 %v13988_v18, %v2012_v33  ;;  %v13993_v33 = vld [vmem:[#allocation111_spill] sm:$0xff] }
 0x3b9   :  { %v2218_v53 = vadd.f32 %v13989_v45, %v2135_v41  ;;  %v9792_v8 = vand.u32 4294901760, %v2226_v2  ;;  %v9797_v37 = vsub.f32 %v2234_v46, %v9764_v26  ;;  %v2445_v49 = vand.u32 4294901760, %v2444_v43 }
 0x3ba   :  { %v2431_v12 = vand.u32 4294901760, %v9725_v7  ;;  %2271 = vmatpush.msra.mxu2 %v9681_v50  ;;  %2592 = vmatpush.msrb.mxu0 %v9725_v7  ;;  %v2456_v22 = vsub.f32 %v9737_v4, %v2455_v35  ;;  %v2467_v10 = vand.u32 4294901760, %v9768_v62  ;;  %v2123_v1 = vadd.f32 %v13990_v52, %v2006_v39 }
 0x3bb   :  { %2722 = vmatpush.msrb.mxu1 %v9681_v50  ;;  %v2214_v24 = vadd.f32 %v13991_v27, %v2131_v13  ;;  %v9806_v38 = vand.u32 4294901760, %v2222_v57  ;;  %v9811_v9 = vsub.f32 %v2230_v19, %v9779_v17  ;;  %v2451_v46 = vand.u32 4294901760, %v2450_v0 }
 0x3bc   :  { %2273 = vmatpush.msra.mxu2 %v9691_v60  ;;  %2595 = vmatpush.msrb.mxu0 %v9701_v32  ;;  %v2432_v14 = vsub.f32 %v9725_v7, %v2431_v12  ;;  %v2462_v30 = vsub.f32 %v9750_v28, %v2461_v16  ;;  %v2473_v42 = vand.u32 4294901760, %v9783_v55  ;;  %v2210_v63 = vadd.f32 %v13992_v40, %v2127_v44  ;;  %v13998_v7 = vld [vmem:[#allocation12_spill] sm:$0xff]  ;;  %v14001_v32 = vld [vmem:[#allocation43_spill] sm:$0xff] }
 0x3bd   :  { %2724 = vmatpush.msrb.mxu1 %v9691_v60  ;;  %v9819_v5 = vand.u32 4294901760, %v2218_v53  ;;  %v9824_v19 = vsub.f32 %v2226_v2, %v9792_v8  ;;  %v2468_v61 = vsub.f32 %v9768_v62, %v2467_v10  ;;  %v2479_v58 = vand.u32 4294901760, %v9797_v37 }
 0x3be   :  { %2275 = vmatpush.msra.mxu2 %v9698_v51  ;;  %2598 = vmatpush.msrb.mxu0 %v9711_v15  ;;  %v2433_v59 = vand.u32 4294901760, %v2432_v14  ;;  %v2457_v14 = vand.u32 4294901760, %v2456_v22  ;;  %v2206_v25 = vadd.f32 %v13993_v33, %v2123_v1  ;;  %v9832_v41 = vand.u32 4294901760, %v2214_v24  ;;  %v14003_v15 = vld [vmem:[#allocation48_spill] sm:$0xff] }
 0x3bf   :  { %2726 = vmatpush.msrb.mxu1 %v9698_v51  ;;  %v9837_v47 = vsub.f32 %v2222_v57, %v9806_v38  ;;  %v2463_v2 = vand.u32 4294901760, %v2462_v30  ;;  %v2485_v43 = vand.u32 4294901760, %v9811_v9  ;;  %v9844_v3 = vand.u32 4294901760, %v2210_v63 }
 0x3c0   :  { %2277 = vmatpush.msra.mxu2 %v9708_v48  ;;  %2434 = vmatpush.msra.mxu3 %v2433_v59  ;;  %v2474_v59 = vsub.f32 %v9783_v55, %v2473_v42  ;;  %v9849_v39 = vsub.f32 %v2218_v53, %v9819_v5  ;;  %v2469_v31 = vand.u32 4294901760, %v2468_v61  ;;  %v2480_v13 = vsub.f32 %v9797_v37, %v2479_v58 }
 0x3c1   :  { %2601 = vmatpush.msrb.mxu0 %v9722_v56  ;;  %2728 = vmatpush.msrb.mxu1 %v9708_v48  ;;  %v2491_v6 = vand.u32 4294901760, %v9824_v19  ;;  %v9856_v57 = vand.u32 4294901760, %v2206_v25  ;;  %v2486_v18 = vsub.f32 %v9811_v9, %v2485_v43  ;;  %v2497_v44 = vand.u32 4294901760, %v9837_v47  ;;  %v14004_v56 = vld [vmem:[#allocation15_spill] sm:$0xff] }
 0x3c2   :  { %2279 = vmatpush.msra.mxu2 %v9719_v20  ;;  %2440 = vmatpush.msra.mxu3 %v2439_v29  ;;  %v9861_v29 = vsub.f32 %v2214_v24, %v9832_v41  ;;  %v2475_v0 = vand.u32 4294901760, %v2474_v59  ;;  %v9871_v45 = vsub.f32 %v2210_v63, %v9844_v3  ;;  %v2481_v53 = vand.u32 4294901760, %v2480_v13 }
 0x3c3   :  { %2604 = vmatpush.msrb.mxu0 %v9737_v4  ;;  %2730 = vmatpush.msrb.mxu1 %v9719_v20  ;;  %v2503_v22 = vand.u32 4294901760, %v9849_v39  ;;  %v9881_v52 = vsub.f32 %v2206_v25, %v9856_v57  ;;  %v2487_v1 = vand.u32 4294901760, %v2486_v18  ;;  %v2498_v27 = vsub.f32 %v9837_v47, %v2497_v44  ;;  %v13996_v18 = vld [vmem:[#allocation38_spill] sm:$0xff]  ;;  %v14008_v4 = vld [vmem:[#allocation41_spill] sm:$0xff] }
 0x3c4   :  { %2281 = vmatpush.msra.mxu2 %v9734_v21  ;;  %2446 = vmatpush.msra.mxu3 %v2445_v49  ;;  %v2492_v49 = vsub.f32 %v9824_v19, %v2491_v6  ;;  %v2509_v24 = vand.u32 4294901760, %v9861_v29  ;;  %v2515_v40 = vand.u32 4294901760, %v9871_v45 }
 0x3c5   :  { %2607 = vmatpush.msrb.mxu0 %v9750_v28  ;;  %2732 = vmatpush.msrb.mxu1 %v9734_v21  ;;  %v2504_v30 = vsub.f32 %v9849_v39, %v2503_v22  ;;  %v2499_v63 = vand.u32 4294901760, %v2498_v27  ;;  %v2521_v61 = vand.u32 4294901760, %v9881_v52  ;;  %v14015_v28 = vld [vmem:[#allocation21_spill] sm:$0xff]  ;;  %v14044_v27 = vld [vmem:[#allocation56_spill] sm:$0xff] }
 0x3c6   :  { %2283 = vmatpush.msra.mxu2 %v9746_v54  ;;  %2452 = vmatpush.msra.mxu3 %v2451_v46  ;;  %v2493_v46 = vand.u32 4294901760, %v2492_v49  ;;  %v2516_v25 = vsub.f32 %v9871_v45, %v2515_v40  ;;  %v13997_v49 = vld [vmem:[#allocation5_spill] sm:$0xff] }
 0x3c7   :  { %2610 = vmatpush.msrb.mxu0 %v9768_v62  ;;  %2734 = vmatpush.msrb.mxu1 %v9746_v54  ;;  %v2505_v33 = vand.u32 4294901760, %v2504_v30  ;;  %v14018_v62 = vld [vmem:[#allocation26_spill] sm:$0xff] }
 0x3c8   :  { %2285 = vmatpush.msra.mxu2 %v9764_v26  ;;  %2458 = vmatpush.msra.mxu3 %v2457_v14  ;;  %v2510_v14 = vsub.f32 %v9861_v29, %v2509_v24  ;;  %v2517_v13 = vand.u32 4294901760, %v2516_v25  ;;  %v14047_v30 = vld [vmem:[#allocation58_spill] sm:$0xff]  ;;  %v8001_v25 = vld [vmem:[%s13339_s2] sm:$0xff] }
 0x3c9   :  { %2613 = vmatpush.msrb.mxu0 %v9783_v55  ;;  %2736 = vmatpush.msrb.mxu1 %v9764_v26  ;;  %v14021_v55 = vld [vmem:[#allocation19_spill] sm:$0xff] }
 0x3ca   :  { %2287 = vmatpush.msra.mxu2 %v9779_v17  ;;  %2464 = vmatpush.msra.mxu3 %v2463_v2  ;;  %v13994_v2 = vld [vmem:[#allocation14_spill] sm:$0xff]  ;;  %v2511_v59 = vand.u32 4294901760, %v2510_v14  ;;  %v14050_v14 = vld [vmem:[#allocation67_spill] sm:$0xff] }
 0x3cb   :  { %2616 = vmatpush.msrb.mxu0 %v9797_v37  ;;  %2738 = vmatpush.msrb.mxu1 %v9779_v17  ;;  %v14024_v37 = vld [vmem:[#allocation20_spill] sm:$0xff] }
 0x3cc   :  { %2289 = vmatpush.msra.mxu2 %v9792_v8  ;;  %2470 = vmatpush.msra.mxu3 %v2469_v31  ;;  %v2522_v31 = vsub.f32 %v9881_v52, %v2521_v61 }
 0x3cd   :  { %2619 = vmatpush.msrb.mxu0 %v9811_v9  ;;  %2740 = vmatpush.msrb.mxu1 %v9792_v8  ;;  %v14027_v9 = vld [vmem:[#allocation40_spill] sm:$0xff] }
 0x3ce   :  { %2291 = vmatpush.msra.mxu2 %v9806_v38  ;;  %2476 = vmatpush.msra.mxu3 %v2475_v0  ;;  %v13995_v0 = vld [vmem:[#allocation29_spill] sm:$0xff] }
 0x3cf   :  { %2622 = vmatpush.msrb.mxu0 %v9824_v19  ;;  %2742 = vmatpush.msrb.mxu1 %v9806_v38  ;;  %v14030_v19 = vld [vmem:[#allocation28_spill] sm:$0xff] }
 0x3d0   :  { %2293 = vmatpush.msra.mxu2 %v9819_v5  ;;  %2482 = vmatpush.msra.mxu3 %v2481_v53  ;;  %v2523_v53 = vand.u32 4294901760, %v2522_v31  ;;  %v14053_v31 = vld [vmem:[#allocation61_spill] sm:$0xff] }
 0x3d1   :  { %2625 = vmatpush.msrb.mxu0 %v9837_v47  ;;  %2744 = vmatpush.msrb.mxu1 %v9819_v5  ;;  %v14033_v47 = vld [vmem:[#allocation37_spill] sm:$0xff] }
 0x3d2   :  { %2295 = vmatpush.msra.mxu2 %v9832_v41  ;;  %2488 = vmatpush.msra.mxu3 %v2487_v1  ;;  %v14000_v1 = vld [vmem:[#allocation16_spill] sm:$0xff] }
 0x3d3   :  { %2628 = vmatpush.msrb.mxu0 %v9849_v39  ;;  %2746 = vmatpush.msrb.mxu1 %v9832_v41  ;;  %v14036_v39 = vld [vmem:[#allocation25_spill] sm:$0xff] }
 0x3d4   :  { %2297 = vmatpush.msra.mxu2 %v9844_v3  ;;  %2494 = vmatpush.msra.mxu3 %v2493_v46  ;;  %v14046_v46 = vld [vmem:[#allocation63_spill] sm:$0xff] }
 0x3d5   :  { %2631 = vmatpush.msrb.mxu0 %v9861_v29  ;;  %2748 = vmatpush.msrb.mxu1 %v9844_v3  ;;  %v14039_v29 = vld [vmem:[#allocation50_spill] sm:$0xff] }
 0x3d6   :  { %2299 = vmatpush.msra.mxu2 %v9856_v57  ;;  %2500 = vmatpush.msra.mxu3 %v2499_v63  ;;  %v14049_v63 = vld [vmem:[#allocation57_spill] sm:$0xff] }
 0x3d7   :  { %2634 = vmatpush.msrb.mxu0 %v9871_v45  ;;  %2750 = vmatpush.msrb.mxu1 %v9856_v57  ;;  %v14041_v45 = vld [vmem:[#allocation49_spill] sm:$0xff] }
 0x3d8   :  { %2305 = vmatmul.f32.vlgmr.msra.gmra.mxu2 %v13994_v2  ;;  %2506 = vmatpush.msra.mxu3 %v2505_v33  ;;  %v14052_v33 = vld [vmem:[#allocation64_spill] sm:$0xff] }
 0x3d9   :  { %2851 = vmatpush.msrb.mxu2 %v2431_v12  ;;  %2637 = vmatpush.msrb.mxu0 %v9881_v52  ;;  %v13999_v12 = vld [vmem:[#allocation6_spill] sm:$0xff] }
 0x3da   :  { %2512 = vmatpush.msra.mxu3 %v2511_v59  ;;  %2640 = vmatmul.f32.vlgmr.msrb.gmra.mxu0 %v13995_v0  ;;  %v14043_v52 = vld [vmem:[#allocation54_spill] sm:$0xff]  ;;  %v3074_v59 = vmul.f32 %v8001_v25, %v8001_v25  ;;  %v14058_v25 = vld [vmem:[#allocation75_spill] sm:$0xff] }
 0x3db   :  { %2855 = vmatpush.msrb.mxu2 %v2437_v23  ;;  %2754 = vmatmul.f32.vlgmr.msrb.gmra.mxu1 %v13996_v18  ;;  %v14002_v23 = vld [vmem:[#allocation13_spill] sm:$0xff] }
 0x3dc   :  { %2518 = vmatpush.msra.mxu3 %v2517_v13  ;;  %3153 = vmatpush.msra.mxu0 %v13997_v49  ;;  %v14054_v13 = vld [vmem:[#allocation71_spill] sm:$0xff] }
 0x3dd   :  { %2859 = vmatpush.msrb.mxu2 %v2443_v11  ;;  %3304 = vmatpush.msra.mxu1 %v13998_v7  ;;  %v14005_v11 = vld [vmem:[#allocation10_spill] sm:$0xff] }
 0x3de   :  { %2524 = vmatpush.msra.mxu3 %v2523_v53  ;;  %3155 = vmatpush.msra.mxu0 %v13999_v12  ;;  %v14055_v53 = vld [vmem:[#allocation66_spill] sm:$0xff] }
 0x3df   :  { %2863 = vmatpush.msrb.mxu2 %v2449_v36  ;;  %2526 = vmatmul.f32.vlgmr.msra.gmra.mxu3 %v14000_v1  ;;  %v14016_v36 = vld [vmem:[#allocation42_spill] sm:$0xff] }
 0x3e0   :  { %2313 = vmatmul.f32.gmra.mxu2 %v14001_v32  ;;  %2978 = vmatpush.msrb.mxu3 %v9713_v34  ;;  %v14006_v34 = vld [vmem:[#allocation11_spill] sm:$0xff] }
 0x3e1   :  { %2867 = vmatpush.msrb.mxu2 %v2455_v35  ;;  %3310 = vmatpush.msra.mxu1 %v14002_v23  ;;  %v14019_v35 = vld [vmem:[#allocation44_spill] sm:$0xff] }
 0x3e2   :  { %2980 = vmatpush.msrb.mxu3 %v9681_v50  ;;  %2645 = vmatmul.f32.gmra.mxu0 %v14003_v15  ;;  %v14007_v50 = vld [vmem:[#allocation45_spill] sm:$0xff] }
 0x3e3   :  { %2871 = vmatpush.msrb.mxu2 %v2461_v16  ;;  %2760 = vmatmul.f32.gmra.mxu1 %v14004_v56  ;;  %v14022_v16 = vld [vmem:[#allocation18_spill] sm:$0xff] }
 0x3e4   :  { %2982 = vmatpush.msrb.mxu3 %v9691_v60  ;;  %3609 = vmatpush.msrb.mxu0 %v14005_v11  ;;  %v14009_v60 = vld [vmem:[#allocation34_spill] sm:$0xff] }
 0x3e5   :  { %2875 = vmatpush.msrb.mxu2 %v2467_v10  ;;  %3694 = vmatpush.msrb.mxu1 %v13997_v49  ;;  %v14025_v10 = vld [vmem:[#allocation22_spill] sm:$0xff] }
 0x3e6   :  { %2984 = vmatpush.msrb.mxu3 %v9698_v51  ;;  %3613 = vmatpush.msrb.mxu0 %v14006_v34  ;;  %v14010_v51 = vld [vmem:[#allocation47_spill] sm:$0xff] }
 0x3e7   :  { %2879 = vmatpush.msrb.mxu2 %v2473_v42  ;;  %2530 = vmatmul.f32.gmra.mxu3 %v14007_v50  ;;  %v14028_v42 = vld [vmem:[#allocation31_spill] sm:$0xff] }
 0x3e8   :  { %2321 = vmatmul.f32.gmra.mxu2 %v14008_v4  ;;  %2986 = vmatpush.msrb.mxu3 %v9708_v48  ;;  %v14011_v48 = vld [vmem:[#allocation24_spill] sm:$0xff] }
 0x3e9   :  { %2883 = vmatpush.msrb.mxu2 %v2479_v58  ;;  %3696 = vmatpush.msrb.mxu1 %v13999_v12  ;;  %v14031_v58 = vld [vmem:[#allocation17_spill] sm:$0xff] }
 0x3ea   :  { %2988 = vmatpush.msrb.mxu3 %v9719_v20  ;;  %2650 = vmatmul.f32.gmra.mxu0 %v14009_v60  ;;  %v14012_v20 = vld [vmem:[#allocation39_spill] sm:$0xff] }
 0x3eb   :  { %2887 = vmatpush.msrb.mxu2 %v2485_v43  ;;  %2766 = vmatmul.f32.gmra.mxu1 %v14010_v51  ;;  %v14034_v43 = vld [vmem:[#allocation51_spill] sm:$0xff] }
 0x3ec   :  { %2990 = vmatpush.msrb.mxu3 %v9734_v21  ;;  %v14013_v21 = vld [vmem:[#allocation30_spill] sm:$0xff] }
 0x3ed   :  { %2891 = vmatpush.msrb.mxu2 %v2491_v6  ;;  %v14037_v6 = vld [vmem:[#allocation23_spill] sm:$0xff] }
 0x3ee   :  { %2992 = vmatpush.msrb.mxu3 %v9746_v54  ;;  %v14014_v54 = vld [vmem:[#allocation46_spill] sm:$0xff] }
 0x3ef   :  { %2895 = vmatpush.msrb.mxu2 %v2497_v44  ;;  %2534 = vmatmul.f32.gmra.mxu3 %v14011_v48  ;;  %v14040_v44 = vld [vmem:[#allocation52_spill] sm:$0xff] }
 0x3f0   :  { %2329 = vmatmul.f32.gmra.mxu2 %v14012_v20  ;;  %2994 = vmatpush.msrb.mxu3 %v9764_v26  ;;  %v14017_v26 = vld [vmem:[#allocation8_spill] sm:$0xff] }
 0x3f1   :  { %2899 = vmatpush.msrb.mxu2 %v2503_v22  ;;  %v14042_v22 = vld [vmem:[#allocation59_spill] sm:$0xff] }
 0x3f2   :  { %2996 = vmatpush.msrb.mxu3 %v9779_v17  ;;  %2655 = vmatmul.f32.gmra.mxu0 %v14013_v21  ;;  %v14020_v17 = vld [vmem:[#allocation9_spill] sm:$0xff] }
 0x3f3   :  { %2903 = vmatpush.msrb.mxu2 %v2509_v24  ;;  %2772 = vmatmul.f32.gmra.mxu1 %v14014_v54  ;;  %v14045_v24 = vld [vmem:[#allocation53_spill] sm:$0xff] }
 0x3f4   :  { %2998 = vmatpush.msrb.mxu3 %v9792_v8  ;;  %v14023_v8 = vld [vmem:[#allocation36_spill] sm:$0xff] }
 0x3f5   :  { %2907 = vmatpush.msrb.mxu2 %v2515_v40  ;;  %v14048_v40 = vld [vmem:[#allocation60_spill] sm:$0xff] }
 0x3f6   :  { %3000 = vmatpush.msrb.mxu3 %v9806_v38  ;;  %v14026_v38 = vld [vmem:[#allocation27_spill] sm:$0xff] }
 0x3f7   :  { %2911 = vmatpush.msrb.mxu2 %v2521_v61  ;;  %2538 = vmatmul.f32.gmra.mxu3 %v14015_v28  ;;  %v14051_v61 = vld [vmem:[#allocation62_spill] sm:$0xff] }
 0x3f8   :  { %2337 = vmatmul.f32.gmra.mxu2 %v14016_v36  ;;  %3002 = vmatpush.msrb.mxu3 %v9819_v5  ;;  %v14029_v5 = vld [vmem:[#allocation33_spill] sm:$0xff] }
 0x3f9   :  { %3392 = vmatpush.msra.mxu2 %v14017_v26 }
 0x3fa   :  { %3004 = vmatpush.msrb.mxu3 %v9832_v41  ;;  %2660 = vmatmul.f32.gmra.mxu0 %v14018_v62  ;;  %v14032_v41 = vld [vmem:[#allocation35_spill] sm:$0xff] }
 0x3fb   :  { %2778 = vmatmul.f32.gmra.mxu1 %v14019_v35  ;;  %3395 = vmatpush.msra.mxu2 %v14020_v17 }
 0x3fc   :  { %3006 = vmatpush.msrb.mxu3 %v9844_v3  ;;  %v14035_v3 = vld [vmem:[#allocation32_spill] sm:$0xff] }
 0x3fe   :  { %3008 = vmatpush.msrb.mxu3 %v9856_v57  ;;  %v14038_v57 = vld [vmem:[#allocation55_spill] sm:$0xff] }
 0x3ff   :  { %2542 = vmatmul.f32.gmra.mxu3 %v14021_v55 }
 0x400   :  { %2345 = vmatmul.f32.gmra.mxu2 %v14022_v16  ;;  %3492 = vmatpush.msra.mxu3 %v13997_v49 }
 0x402   :  { %2665 = vmatmul.f32.gmra.mxu0 %v14023_v8  ;;  %3494 = vmatpush.msra.mxu3 %v13999_v12 }
 0x403   :  { %2784 = vmatmul.f32.gmra.mxu1 %v14024_v37 }
 0x407   :  { %2546 = vmatmul.f32.gmra.mxu3 %v14025_v10 }
 0x408   :  { %2353 = vmatmul.f32.gmra.mxu2 %v14026_v38 }
 0x40a   :  { %2670 = vmatmul.f32.gmra.mxu0 %v14027_v9 }
 0x40b   :  { %2790 = vmatmul.f32.gmra.mxu1 %v14028_v42 }
 0x40f   :  { %2550 = vmatmul.f32.gmra.mxu3 %v14029_v5 }
 0x410   :  { %2361 = vmatmul.f32.gmra.mxu2 %v14030_v19 }
 0x412   :  { %2675 = vmatmul.f32.gmra.mxu0 %v14031_v58 }
 0x413   :  { %2796 = vmatmul.f32.gmra.mxu1 %v14032_v41 }
 0x417   :  { %2554 = vmatmul.f32.gmra.mxu3 %v14033_v47 }
 0x418   :  { %2369 = vmatmul.f32.gmra.mxu2 %v14034_v43 }
 0x41a   :  { %2680 = vmatmul.f32.gmra.mxu0 %v14035_v3  ;;  %v14065_v3 = vld [vmem:[#allocation73_spill] sm:$0xff] }
 0x41b   :  { %2802 = vmatmul.f32.gmra.mxu1 %v14036_v39 }
 0x41f   :  { %2558 = vmatmul.f32.gmra.mxu3 %v14037_v6 }
 0x420   :  { %2377 = vmatmul.f32.gmra.mxu2 %v14038_v57 }
 0x422   :  { %2685 = vmatmul.f32.gmra.mxu0 %v14039_v29 }
 0x423   :  { %2808 = vmatmul.f32.gmra.mxu1 %v14040_v44  ;;  %v14061_v44 = vld [vmem:[#allocation69_spill] sm:$0xff] }
 0x427   :  { %2562 = vmatmul.f32.gmra.mxu3 %v14041_v45 }
 0x428   :  { %2385 = vmatmul.f32.gmra.mxu2 %v14042_v22 }
 0x42a   :  { %2690 = vmatmul.f32.gmra.mxu0 %v14043_v52 }
 0x42b   :  { %2814 = vmatmul.f32.gmra.mxu1 %v14044_v27 }
 0x42f   :  { %2566 = vmatmul.f32.gmra.mxu3 %v14045_v24 }
 0x430   :  { %2393 = vmatmul.f32.gmra.mxu2 %v14046_v46  ;;  %v14057_v46 = vld [vmem:[#allocation65_spill] sm:$0xff] }
 0x432   :  { %2695 = vmatmul.f32.gmra.mxu0 %v14047_v30  ;;  %v14056_v30 = vld [vmem:[#allocation68_spill] sm:$0xff] }
 0x433   :  { %2820 = vmatmul.f32.gmra.mxu1 %v14048_v40  ;;  %v3091_v40 = vsel %vm117_vm0, %v3074_v59, 0 }
 0x437   :  { %2570 = vmatmul.f32.gmra.mxu3 %v14049_v63 }
 0x438   :  { %2401 = vmatmul.f32.gmra.mxu2 %v14050_v14  ;;  %v10033_v14 = vand.u32 4294901760, %v3091_v40 }
 0x43a   :  { %2700 = vmatmul.f32.gmra.mxu0 %v14051_v61  ;;  %v10041_v27 = vsub.f32 %v3091_v40, %v10033_v14  ;;  %v14063_v40 = vld [vmem:[#allocation74_spill] sm:$0xff] }
 0x43b   :  { %2826 = vmatmul.f32.gmra.mxu1 %v14052_v33  ;;  %v8002_v33 = vld [vmem:[%s13339_s2 + $0x8] sm:$0xff] }
 0x43c   :  { %v3075_v61 = vmul.f32 %v8002_v33, %v8002_v33  ;;  %v8003_v33 = vld [vmem:[%s13339_s2 + $0x10] sm:$0xff] }
 0x43d   :  { %v3076_v22 = vmul.f32 %v8003_v33, %v8003_v33 }
 0x43e   :  { %v3094_v59 = vsel %vm117_vm0, %v3075_v61, 0 }
 0x43f   :  { %2574 = vmatmul.f32.gmra.mxu3 %v14053_v31  ;;  %v10047_v52 = vand.u32 4294901760, %v3094_v59  ;;  %v3097_v29 = vsel %vm117_vm0, %v3076_v22, 0 }
 0x440   :  { %2409 = vmatmul.f32.gmra.mxu2 %v14054_v13  ;;  %v14059_v13 = vld [vmem:[#allocation70_spill] sm:$0xff]  ;;  %v10064_v39 = vand.u32 4294901760, %v3097_v29 }
 0x441   :  { %v10059_v61 = vsub.f32 %v3094_v59, %v10047_v52 }
 0x442   :  { %2705 = vmatmul.f32.gmra.mxu0 %v14055_v53  ;;  %v14060_v53 = vld [vmem:[#allocation72_spill] sm:$0xff] }
 0x443   :  { %2832 = vmatmul.f32.gmra.mxu1 %v14056_v30  ;;  %v13514_v30 = vand.u32 4294901760, %v10041_v27  ;;  %v13515_v33 = vand.u32 4294901760, %v10059_v61 }
 0x445   :  { %v3167_v22 = vsub.f32 %v10059_v61, %v13515_v33 }
 0x447   :  { %2578 = vmatmul.f32.gmra.mxu3 %v14057_v46 }
 0x448   :  { %2417 = vmatmul.f32.gmra.mxu2 %v14058_v25  ;;  %v14062_v25 = vld [vmem:[#allocation77_spill] sm:$0xff] }
 0x44a   :  { %2710 = vmatmul.f32.gmra.mxu0 %v14059_v13  ;;  %v14064_v13 = vld [vmem:[#allocation76_spill] sm:$0xff] }
 0x44b   :  { %2838 = vmatmul.f32.gmra.mxu1 %v14060_v53  ;;  %v3159_v53 = vsub.f32 %v10041_v27, %v13514_v30 }
 0x44d   :  { %v3160_v57 = vand.u32 4294901760, %v3159_v53  ;;  %v10075_v53 = vsub.f32 %v3097_v29, %v10064_v39 }
 0x44f   :  { %2582 = vmatmul.f32.gmra.mxu3 %v14061_v44  ;;  %v13516_v41 = vand.u32 4294901760, %v10075_v53 }
 0x450   :  { %2425 = vmatmul.f32.gmra.mxu2 %v14062_v25 }
 0x452   :  { %2715 = vmatmul.f32.gmra.mxu0 %v14063_v40  ;;  %v8004_v40 = vld [vmem:[%s13339_s2 + $0x18] sm:$0xff] }
 0x453   :  { %2844 = vmatmul.f32.gmra.mxu1 %v14064_v13  ;;  %v3077_v25 = vmul.f32 %v8004_v40, %v8004_v40  ;;  %v3168_v40 = vand.u32 4294901760, %v3167_v22 }
 0x455   :  { %v3100_v43 = vsel %vm117_vm0, %v3077_v25, 0  ;;  %v3175_v25 = vsub.f32 %v10075_v53, %v13516_v41 }
 0x456   :  { %v10080_v58 = vand.u32 4294901760, %v3100_v43 }
 0x457   :  { %2586 = vmatmul.f32.gmra.mxu3 %v14065_v3  ;;  %v2641_v30 = vpop.f32.mrf.mxu0  ;;  %v3176_v8 = vand.u32 4294901760, %v3175_v25 }
 0x458   :  { %2913 = vmatmul.f32.vlgmr.msrb.gmra.mxu2 %v14000_v1  ;;  %v2755_v59 = vpop.f32.mrf.mxu1  ;;  %v10091_v22 = vsub.f32 %v3100_v43, %v10080_v58 }
 0x45a   :  { %3161 = vmatmul.f32.vlgmr.msra.gmra.mxu0 %v3160_v57  ;;  %v8005_v57 = vld [vmem:[%s13339_s2 + $0x20] sm:$0xff]  ;;  %v13517_v16 = vand.u32 4294901760, %v10091_v22 }
 0x45b   :  { %v2306_v13 = vpop.f32.mrf.mxu2  ;;  %3312 = vmatmul.f32.vlgmr.msra.gmra.mxu1 %v10033_v14  ;;  %v3078_v19 = vmul.f32 %v8005_v57, %v8005_v57 }
 0x45d   :  { %v3103_v57 = vsel %vm117_vm0, %v3078_v19, 0 }
 0x45e   :  { %v10096_v17 = vand.u32 4294901760, %v3103_v57 }
 0x45f   :  { %3010 = vmatmul.f32.vlgmr.msrb.gmra.mxu3 %v14000_v1  ;;  %v2646_v33 = vpop.f32.mrf.mxu0 }
 0x460   :  { %2917 = vmatmul.f32.gmra.mxu2 %v14007_v50  ;;  %v2761_v29 = vpop.f32.mrf.mxu1 }
 0x462   :  { %v2527_v42 = vpop.f32.mrf.mxu3  ;;  %3169 = vmatmul.f32.gmra.mxu0 %v3168_v40  ;;  %v8006_v40 = vld [vmem:[%s13339_s2 + $0x28] sm:$0xff] }
 0x463   :  { %v2314_v9 = vpop.f32.mrf.mxu2  ;;  %v2528_v38 = vadd.f32 %v2527_v42, %v2306_v13  ;;  %3316 = vmatmul.f32.gmra.mxu1 %v10047_v52  ;;  %v3079_v41 = vmul.f32 %v8006_v40, %v8006_v40 }
 0x465   :  { %v2642_v37 = vadd.f32 %v2641_v30, %v2528_v38  ;;  %v3183_v38 = vsub.f32 %v10091_v22, %v13517_v16  ;;  %v10109_v30 = vsub.f32 %v3103_v57, %v10096_v17 }
 0x467   :  { %v10101_v35 = vadd.f32 %v2755_v59, %v2642_v37  ;;  %3014 = vmatmul.f32.gmra.mxu3 %v14007_v50  ;;  %v2651_v42 = vpop.f32.mrf.mxu0  ;;  %v3106_v37 = vsel %vm117_vm0, %v3079_v41, 0  ;;  %v3184_v40 = vand.u32 4294901760, %v3183_v38  ;;  %v13518_v62 = vand.u32 4294901760, %v10109_v30 }
 0x468   :  { %2921 = vmatmul.f32.gmra.mxu2 %v14011_v48  ;;  %v2767_v43 = vpop.f32.mrf.mxu1  ;;  %v10114_v26 = vand.u32 4294901760, %v3106_v37 }
 0x46a   :  { %v2531_v19 = vpop.f32.mrf.mxu3  ;;  %3177 = vmatmul.f32.gmra.mxu0 %v3176_v8  ;;  %v8007_v8 = vld [vmem:[%s13339_s2 + $0x30] sm:$0xff] }
 0x46b   :  { %v2322_v13 = vpop.f32.mrf.mxu2  ;;  %v2532_v25 = vadd.f32 %v2531_v19, %v2314_v9  ;;  %3320 = vmatmul.f32.gmra.mxu1 %v10064_v39  ;;  %v3080_v16 = vmul.f32 %v8007_v8, %v8007_v8  ;;  %v10127_v19 = vsub.f32 %v3106_v37, %v10114_v26 }
 0x46d   :  { %v2647_v59 = vadd.f32 %v2646_v33, %v2532_v25  ;;  %v3191_v33 = vsub.f32 %v10109_v30, %v13518_v62  ;;  %v13521_v54 = vand.u32 4294901760, %v10127_v19 }
 0x46f   :  { %v10119_v36 = vadd.f32 %v2761_v29, %v2647_v59  ;;  %3018 = vmatmul.f32.gmra.mxu3 %v14011_v48  ;;  %v2656_v9 = vpop.f32.mrf.mxu0  ;;  %v3109_v29 = vsel %vm117_vm0, %v3080_v16, 0  ;;  %v3192_v8 = vand.u32 4294901760, %v3191_v33 }
 0x470   :  { %2925 = vmatmul.f32.gmra.mxu2 %v14015_v28  ;;  %v2773_v57 = vpop.f32.mrf.mxu1  ;;  %v10132_v21 = vand.u32 4294901760, %v3109_v29 }
 0x472   :  { %v2535_v41 = vpop.f32.mrf.mxu3  ;;  %3185 = vmatmul.f32.gmra.mxu0 %v3184_v40  ;;  %v8008_v40 = vld [vmem:[%s13339_s2 + $0x38] sm:$0xff] }
 0x473   :  { %v2330_v38 = vpop.f32.mrf.mxu2  ;;  %v2536_v25 = vadd.f32 %v2535_v41, %v2322_v13  ;;  %3324 = vmatmul.f32.gmra.mxu1 %v10080_v58  ;;  %v3081_v62 = vmul.f32 %v8008_v40, %v8008_v40  ;;  %v10145_v41 = vsub.f32 %v3109_v29, %v10132_v21 }
 0x475   :  { %v2652_v59 = vadd.f32 %v2651_v42, %v2536_v25  ;;  %v3199_v42 = vsub.f32 %v10127_v19, %v13521_v54 }
 0x477   :  { %v10137_v20 = vadd.f32 %v2767_v43, %v2652_v59  ;;  %3022 = vmatmul.f32.gmra.mxu3 %v14015_v28  ;;  %v2661_v13 = vpop.f32.mrf.mxu0  ;;  %v3112_v43 = vsel %vm117_vm0, %v3081_v62, 0  ;;  %v3200_v40 = vand.u32 4294901760, %v3199_v42  ;;  %v13523_v28 = vand.u32 4294901760, %v10145_v41 }
 0x478   :  { %2929 = vmatmul.f32.gmra.mxu2 %v14021_v55  ;;  %v2779_v37 = vpop.f32.mrf.mxu1  ;;  %v10150_v48 = vand.u32 4294901760, %v3112_v43 }
 0x47a   :  { %v2539_v16 = vpop.f32.mrf.mxu3  ;;  %3193 = vmatmul.f32.gmra.mxu0 %v3192_v8  ;;  %v8009_v8 = vld [vmem:[%s13339_s2 + $0x40] sm:$0xff] }
 0x47b   :  { %v2338_v33 = vpop.f32.mrf.mxu2  ;;  %v2540_v25 = vadd.f32 %v2539_v16, %v2330_v38  ;;  %3328 = vmatmul.f32.gmra.mxu1 %v10096_v17  ;;  %v3082_v54 = vmul.f32 %v8009_v8, %v8009_v8  ;;  %v10163_v16 = vsub.f32 %v3112_v43, %v10150_v48 }
 0x47d   :  { %v2657_v59 = vadd.f32 %v2656_v9, %v2540_v25  ;;  %v3207_v9 = vsub.f32 %v10145_v41, %v13523_v28 }
 0x47f   :  { %v10155_v51 = vadd.f32 %v2773_v57, %v2657_v59  ;;  %3026 = vmatmul.f32.gmra.mxu3 %v14021_v55  ;;  %v2666_v38 = vpop.f32.mrf.mxu0  ;;  %v3115_v57 = vsel %vm117_vm0, %v3082_v54, 0  ;;  %v3208_v8 = vand.u32 4294901760, %v3207_v9  ;;  %v13526_v55 = vand.u32 4294901760, %v10163_v16 }
 0x480   :  { %2933 = vmatmul.f32.gmra.mxu2 %v14025_v10  ;;  %v2785_v29 = vpop.f32.mrf.mxu1  ;;  %v10168_v60 = vand.u32 4294901760, %v3115_v57 }
 0x482   :  { %v2543_v62 = vpop.f32.mrf.mxu3  ;;  %3201 = vmatmul.f32.gmra.mxu0 %v3200_v40  ;;  %v8010_v40 = vld [vmem:[%s13339_s2 + $0x48] sm:$0xff] }
 0x483   :  { %v2346_v42 = vpop.f32.mrf.mxu2  ;;  %v2544_v25 = vadd.f32 %v2543_v62, %v2338_v33  ;;  %3332 = vmatmul.f32.gmra.mxu1 %v10114_v26  ;;  %v3083_v28 = vmul.f32 %v8010_v40, %v8010_v40  ;;  %v10181_v62 = vsub.f32 %v3115_v57, %v10168_v60 }
 0x485   :  { %v2662_v59 = vadd.f32 %v2661_v13, %v2544_v25  ;;  %v3215_v13 = vsub.f32 %v10163_v16, %v13526_v55 }
 0x487   :  { %v10173_v4 = vadd.f32 %v2779_v37, %v2662_v59  ;;  %3030 = vmatmul.f32.gmra.mxu3 %v14025_v10  ;;  %v2671_v33 = vpop.f32.mrf.mxu0  ;;  %v3118_v37 = vsel %vm117_vm0, %v3083_v28, 0  ;;  %v3216_v40 = vand.u32 4294901760, %v3215_v13  ;;  %v13528_v10 = vand.u32 4294901760, %v10181_v62 }
 0x488   :  { %2937 = vmatmul.f32.gmra.mxu2 %v14029_v5  ;;  %v2791_v43 = vpop.f32.mrf.mxu1  ;;  %v10186_v50 = vand.u32 4294901760, %v3118_v37 }
 0x48a   :  { %v2547_v54 = vpop.f32.mrf.mxu3  ;;  %3209 = vmatmul.f32.gmra.mxu0 %v3208_v8  ;;  %v8011_v8 = vld [vmem:[%s13339_s2 + $0x50] sm:$0xff] }
 0x48b   :  { %v2354_v9 = vpop.f32.mrf.mxu2  ;;  %v2548_v25 = vadd.f32 %v2547_v54, %v2346_v42  ;;  %3336 = vmatmul.f32.gmra.mxu1 %v10132_v21  ;;  %v3084_v55 = vmul.f32 %v8011_v8, %v8011_v8  ;;  %v10199_v54 = vsub.f32 %v3118_v37, %v10186_v50 }
 0x48d   :  { %v2667_v59 = vadd.f32 %v2666_v38, %v2548_v25  ;;  %v3223_v38 = vsub.f32 %v10181_v62, %v13528_v10 }
 0x48f   :  { %v10191_v34 = vadd.f32 %v2785_v29, %v2667_v59  ;;  %3034 = vmatmul.f32.gmra.mxu3 %v14029_v5  ;;  %v2676_v42 = vpop.f32.mrf.mxu0  ;;  %v3121_v29 = vsel %vm117_vm0, %v3084_v55, 0  ;;  %v3224_v8 = vand.u32 4294901760, %v3223_v38  ;;  %v13530_v5 = vand.u32 4294901760, %v10199_v54 }
 0x490   :  { %2941 = vmatmul.f32.gmra.mxu2 %v14033_v47  ;;  %v2797_v57 = vpop.f32.mrf.mxu1  ;;  %v10204_v11 = vand.u32 4294901760, %v3121_v29 }
 0x492   :  { %v2551_v28 = vpop.f32.mrf.mxu3  ;;  %3217 = vmatmul.f32.gmra.mxu0 %v3216_v40  ;;  %v8012_v40 = vld [vmem:[%s13339_s2 + $0x58] sm:$0xff] }
 0x493   :  { %v2362_v13 = vpop.f32.mrf.mxu2  ;;  %v2552_v25 = vadd.f32 %v2551_v28, %v2354_v9  ;;  %3340 = vmatmul.f32.gmra.mxu1 %v10150_v48  ;;  %v3085_v10 = vmul.f32 %v8012_v40, %v8012_v40  ;;  %v10217_v28 = vsub.f32 %v3121_v29, %v10204_v11 }
 0x495   :  { %v2672_v59 = vadd.f32 %v2671_v33, %v2552_v25  ;;  %v3231_v33 = vsub.f32 %v10199_v54, %v13530_v5 }
 0x497   :  { %v10209_v56 = vadd.f32 %v2791_v43, %v2672_v59  ;;  %3038 = vmatmul.f32.gmra.mxu3 %v14033_v47  ;;  %v2681_v9 = vpop.f32.mrf.mxu0  ;;  %v3124_v43 = vsel %vm117_vm0, %v3085_v10, 0  ;;  %v3232_v40 = vand.u32 4294901760, %v3231_v33  ;;  %v13532_v47 = vand.u32 4294901760, %v10217_v28 }
 0x498   :  { %2945 = vmatmul.f32.gmra.mxu2 %v14037_v6  ;;  %v2803_v37 = vpop.f32.mrf.mxu1  ;;  %v10222_v15 = vand.u32 4294901760, %v3124_v43 }
 0x49a   :  { %v2555_v55 = vpop.f32.mrf.mxu3  ;;  %3225 = vmatmul.f32.gmra.mxu0 %v3224_v8  ;;  %v8013_v8 = vld [vmem:[%s13339_s2 + $0x60] sm:$0xff] }
 0x49b   :  { %v2370_v38 = vpop.f32.mrf.mxu2  ;;  %v2556_v25 = vadd.f32 %v2555_v55, %v2362_v13  ;;  %3344 = vmatmul.f32.gmra.mxu1 %v10168_v60  ;;  %v3086_v5 = vmul.f32 %v8013_v8, %v8013_v8  ;;  %v10235_v55 = vsub.f32 %v3124_v43, %v10222_v15 }
 0x49d   :  { %v2677_v59 = vadd.f32 %v2676_v42, %v2556_v25  ;;  %v3239_v42 = vsub.f32 %v10217_v28, %v13532_v47 }
 0x49f   :  { %v10227_v23 = vadd.f32 %v2797_v57, %v2677_v59  ;;  %3042 = vmatmul.f32.gmra.mxu3 %v14037_v6  ;;  %v2686_v13 = vpop.f32.mrf.mxu0  ;;  %v3127_v57 = vsel %vm117_vm0, %v3086_v5, 0  ;;  %v3240_v8 = vand.u32 4294901760, %v3239_v42  ;;  %v13536_v6 = vand.u32 4294901760, %v10235_v55 }
 0x4a0   :  { %2949 = vmatmul.f32.gmra.mxu2 %v14041_v45  ;;  %v2809_v29 = vpop.f32.mrf.mxu1  ;;  %v10240_v32 = vand.u32 4294901760, %v3127_v57 }
 0x4a2   :  { %v2559_v10 = vpop.f32.mrf.mxu3  ;;  %3233 = vmatmul.f32.gmra.mxu0 %v3232_v40  ;;  %v8014_v40 = vld [vmem:[%s13339_s2 + $0x68] sm:$0xff] }
 0x4a3   :  { %v2378_v33 = vpop.f32.mrf.mxu2  ;;  %v2560_v25 = vadd.f32 %v2559_v10, %v2370_v38  ;;  %3348 = vmatmul.f32.gmra.mxu1 %v10186_v50  ;;  %v3087_v47 = vmul.f32 %v8014_v40, %v8014_v40  ;;  %v10253_v10 = vsub.f32 %v3127_v57, %v10240_v32 }
 0x4a5   :  { %v2682_v59 = vadd.f32 %v2681_v9, %v2560_v25  ;;  %v3247_v9 = vsub.f32 %v10235_v55, %v13536_v6 }
 0x4a7   :  { %v10245_v1 = vadd.f32 %v2803_v37, %v2682_v59  ;;  %3046 = vmatmul.f32.gmra.mxu3 %v14041_v45  ;;  %v2691_v38 = vpop.f32.mrf.mxu0  ;;  %v3130_v37 = vsel %vm117_vm0, %v3087_v47, 0  ;;  %v3248_v40 = vand.u32 4294901760, %v3247_v9  ;;  %v13539_v45 = vand.u32 4294901760, %v10253_v10 }
 0x4a8   :  { %2953 = vmatmul.f32.gmra.mxu2 %v14045_v24  ;;  %v2815_v43 = vpop.f32.mrf.mxu1  ;;  %v10258_v12 = vand.u32 4294901760, %v3130_v37 }
 0x4aa   :  { %v2563_v5 = vpop.f32.mrf.mxu3  ;;  %3241 = vmatmul.f32.gmra.mxu0 %v3240_v8  ;;  %v8015_v8 = vld [vmem:[%s13339_s2 + $0x70] sm:$0xff] }
 0x4ab   :  { %v2386_v42 = vpop.f32.mrf.mxu2  ;;  %v2564_v25 = vadd.f32 %v2563_v5, %v2378_v33  ;;  %3352 = vmatmul.f32.gmra.mxu1 %v10204_v11  ;;  %v3088_v6 = vmul.f32 %v8015_v8, %v8015_v8  ;;  %v10271_v5 = vsub.f32 %v3130_v37, %v10258_v12 }
 0x4ad   :  { %v2687_v59 = vadd.f32 %v2686_v13, %v2564_v25  ;;  %v3255_v13 = vsub.f32 %v10253_v10, %v13539_v45 }
 0x4af   :  { %v10263_v7 = vadd.f32 %v2809_v29, %v2687_v59  ;;  %3050 = vmatmul.f32.gmra.mxu3 %v14045_v24  ;;  %v2696_v33 = vpop.f32.mrf.mxu0  ;;  %v3133_v29 = vsel %vm117_vm0, %v3088_v6, 0  ;;  %v3256_v8 = vand.u32 4294901760, %v3255_v13  ;;  %v13541_v24 = vand.u32 4294901760, %v10271_v5 }
 0x4b0   :  { %2957 = vmatmul.f32.gmra.mxu2 %v14049_v63  ;;  %v2821_v57 = vpop.f32.mrf.mxu1  ;;  %v10276_v49 = vand.u32 4294901760, %v3133_v29 }
 0x4b2   :  { %v2567_v47 = vpop.f32.mrf.mxu3  ;;  %3249 = vmatmul.f32.gmra.mxu0 %v3248_v40  ;;  %v8016_v40 = vld [vmem:[%s13339_s2 + $0x78] sm:$0xff] }
 0x4b3   :  { %v2394_v9 = vpop.f32.mrf.mxu2  ;;  %v2568_v25 = vadd.f32 %v2567_v47, %v2386_v42  ;;  %3356 = vmatmul.f32.gmra.mxu1 %v10222_v15  ;;  %v3089_v45 = vmul.f32 %v8016_v40, %v8016_v40  ;;  %v10289_v47 = vsub.f32 %v3133_v29, %v10276_v49 }
 0x4b5   :  { %v2692_v59 = vadd.f32 %v2691_v38, %v2568_v25  ;;  %v3263_v38 = vsub.f32 %v10271_v5, %v13541_v24  ;;  %14066 = vst [vmem:[#allocation90_spill] sm:$0xff] %v10289_v47 }
 0x4b7   :  { %v10281_v18 = vadd.f32 %v2815_v43, %v2692_v59  ;;  %3054 = vmatmul.f32.gmra.mxu3 %v14049_v63  ;;  %v2701_v42 = vpop.f32.mrf.mxu0  ;;  %v3136_v43 = vsel %vm117_vm0, %v3089_v45, 0  ;;  %v3264_v40 = vand.u32 4294901760, %v3263_v38  ;;  %v13543_v63 = vand.u32 4294901760, %v10289_v47 }
 0x4b8   :  { %2961 = vmatmul.f32.gmra.mxu2 %v14053_v31  ;;  %v2827_v37 = vpop.f32.mrf.mxu1  ;;  %v10294_v0 = vand.u32 4294901760, %v3136_v43 }
 0x4b9   :  { %v3271_v45 = vsub.f32 %v10289_v47, %v13543_v63 }
 0x4ba   :  { %v2571_v6 = vpop.f32.mrf.mxu3  ;;  %3257 = vmatmul.f32.gmra.mxu0 %v3256_v8 }
 0x4bb   :  { %v2402_v13 = vpop.f32.mrf.mxu2  ;;  %v2572_v25 = vadd.f32 %v2571_v6, %v2394_v9  ;;  %3360 = vmatmul.f32.gmra.mxu1 %v10240_v32  ;;  %v3272_v38 = vand.u32 4294901760, %v3271_v45 }
 0x4bd   :  { %v2697_v59 = vadd.f32 %v2696_v33, %v2572_v25  ;;  %v10304_v33 = vsub.f32 %v3136_v43, %v10294_v0 }
 0x4bf   :  { %v10296_v8 = vadd.f32 %v2821_v57, %v2697_v59  ;;  %3058 = vmatmul.f32.gmra.mxu3 %v14053_v31  ;;  %v2706_v24 = vpop.f32.mrf.mxu0  ;;  %v13547_v25 = vand.u32 4294901760, %v10304_v33 }
 0x4c0   :  { %2965 = vmatmul.f32.gmra.mxu2 %v14057_v46  ;;  %v2833_v29 = vpop.f32.mrf.mxu1 }
 0x4c2   :  { %v2575_v2 = vpop.f32.mrf.mxu3  ;;  %3265 = vmatmul.f32.gmra.mxu0 %v3264_v40 }
 0x4c3   :  { %v2410_v9 = vpop.f32.mrf.mxu2  ;;  %v2576_v6 = vadd.f32 %v2575_v2, %v2402_v13  ;;  %3364 = vmatmul.f32.gmra.mxu1 %v10258_v12  ;;  %v3279_v2 = vsub.f32 %v10304_v33, %v13547_v25 }
 0x4c5   :  { %v2702_v57 = vadd.f32 %v2701_v42, %v2576_v6  ;;  %v3280_v45 = vand.u32 4294901760, %v3279_v2 }
 0x4c7   :  { %v10308_v59 = vadd.f32 %v2827_v37, %v2702_v57  ;;  %3062 = vmatmul.f32.gmra.mxu3 %v14057_v46  ;;  %v2711_v40 = vpop.f32.mrf.mxu0 }
 0x4c8   :  { %2969 = vmatmul.f32.gmra.mxu2 %v14061_v44  ;;  %v2839_v31 = vpop.f32.mrf.mxu1 }
 0x4ca   :  { %v2579_v63 = vpop.f32.mrf.mxu3  ;;  %3273 = vmatmul.f32.gmra.mxu0 %v3272_v38 }
 0x4cb   :  { %v2418_v13 = vpop.f32.mrf.mxu2  ;;  %v2580_v43 = vadd.f32 %v2579_v63, %v2410_v9  ;;  %3368 = vmatmul.f32.gmra.mxu1 %v10276_v49 }
 0x4cd   :  { %v2707_v42 = vadd.f32 %v2706_v24, %v2580_v43 }
 0x4cf   :  { %v10316_v37 = vadd.f32 %v2833_v29, %v2707_v42  ;;  %3066 = vmatmul.f32.gmra.mxu3 %v14061_v44  ;;  %v2716_v6 = vpop.f32.mrf.mxu0 }
 0x4d0   :  { %2973 = vmatmul.f32.gmra.mxu2 %v14065_v3  ;;  %v2845_v57 = vpop.f32.mrf.mxu1 }
 0x4d2   :  { %v2583_v46 = vpop.f32.mrf.mxu3  ;;  %3281 = vmatmul.f32.gmra.mxu0 %v3280_v45 }
 0x4d3   :  { %v2426_v38 = vpop.f32.mrf.mxu2  ;;  %v2584_v47 = vadd.f32 %v2583_v46, %v2418_v13  ;;  %3372 = vmatmul.f32.gmra.mxu1 %v10294_v0 }
 0x4d5   :  { %v2712_v25 = vadd.f32 %v2711_v40, %v2584_v47 }
 0x4d7   :  { %v10321_v63 = vadd.f32 %v2839_v31, %v2712_v25  ;;  %3070 = vmatmul.f32.gmra.mxu3 %v14065_v3  ;;  %v10324_v24 = vpop.f32.mrf.mxu0  ;;  %v14067_v25 = vand.u32 4294901760, %v10041_v27 }
 0x4d8   :  { %3398 = vmatmul.f32.vlgmr.msra.gmra.mxu2 %v10041_v27  ;;  %v10327_v29 = vpop.f32.mrf.mxu1 }
 0x4da   :  { %v2587_v9 = vpop.f32.mrf.mxu3  ;;  %3615 = vmatmul.f32.vlgmr.msrb.gmra.mxu0 %v10033_v14 }
 0x4db   :  { %v2588_v2 = vadd.f32 %v2587_v9, %v2426_v38  ;;  %v2914_v43 = vpop.f32.mrf.mxu2  ;;  %3698 = vmatmul.f32.vlgmr.msrb.gmra.mxu1 %v10033_v14  ;;  %v14068_v14 = vld [vmem:[#allocation86_spill] sm:$0xff] }
 0x4dc   :  { %v2915_v46 = vadd.f32 %v2914_v43, %v10101_v35 }
 0x4dd   :  { %v2717_v47 = vadd.f32 %v2716_v6, %v2588_v2  ;;  %v10346_v6 = vmul.f32 %v14068_v14, %v14068_v14  ;;  %v14073_v2 = vand.u32 4294901760, %v10059_v61 }
 0x4df   :  { %v10332_v31 = vadd.f32 %v2845_v57, %v2717_v47  ;;  %3498 = vmatmul.f32.vlgmr.msra.gmra.mxu3 %v14067_v25  ;;  %v10336_v40 = vpop.f32.mrf.mxu0  ;;  %14069 = vst [vmem:[#allocation137_spill] sm:$0xff] %v10346_v6 }
 0x4e0   :  { %3403 = vmatmul.f32.gmra.mxu2 %v10059_v61  ;;  %v10339_v13 = vpop.f32.mrf.mxu1 }
 0x4e2   :  { %v3011_v42 = vpop.f32.mrf.mxu3  ;;  %3619 = vmatmul.f32.gmra.mxu0 %v10047_v52 }
 0x4e3   :  { %v2918_v45 = vpop.f32.mrf.mxu2  ;;  %v3012_v38 = vadd.f32 %v3011_v42, %v2915_v46  ;;  %3702 = vmatmul.f32.gmra.mxu1 %v10047_v52  ;;  %v14074_v42 = vld [vmem:[#allocation87_spill] sm:$0xff] }
 0x4e4   :  { %v2919_v35 = vadd.f32 %v2918_v45, %v10119_v36  ;;  %v10369_v45 = vmul.f32 %v14074_v42, %v14074_v42 }
 0x4e5   :  { %v10348_v27 = vmul.f32 %v3012_v38, %v3012_v38  ;;  %v10351_v57 = vmul.f32 %v3012_v38, %v14068_v14 }
 0x4e6   :  { %14075 = vst [vmem:[#allocation113_spill] sm:$0xff] %v10369_v45 }
 0x4e7   :  { %14070 = vst [vmem:[#allocation143_spill] sm:$0xff] %v10348_v27  ;;  %v10355_v9 = vadd.f32 %v10348_v27, %v10346_v6  ;;  %3504 = vmatmul.f32.gmra.mxu3 %v14073_v2  ;;  %v10359_v43 = vpop.f32.mrf.mxu0  ;;  %v14079_v2 = vand.u32 4294901760, %v10075_v53 }
 0x4e8   :  { %14071 = vst [vmem:[#allocation144_spill] sm:$0xff] %v10351_v57  ;;  %3408 = vmatmul.f32.gmra.mxu2 %v10075_v53  ;;  %v10362_v36 = vpop.f32.mrf.mxu1 }
 0x4e9   :  { %14072 = vst [vmem:[#allocation147_spill] sm:$0xff] %v10355_v9  ;;  %v14119_v9 = vld [vmem:[#allocation96_spill] sm:$0xff] }
 0x4ea   :  { %v3015_v52 = vpop.f32.mrf.mxu3  ;;  %3623 = vmatmul.f32.gmra.mxu0 %v10064_v39 }
 0x4eb   :  { %v2922_v46 = vpop.f32.mrf.mxu2  ;;  %v3016_v47 = vadd.f32 %v3015_v52, %v2919_v35  ;;  %3706 = vmatmul.f32.gmra.mxu1 %v10064_v39 }
 0x4ec   :  { %v2923_v25 = vadd.f32 %v2922_v46, %v10137_v20 }
 0x4ed   :  { %v10371_v61 = vmul.f32 %v3016_v47, %v3016_v47  ;;  %v10374_v38 = vmul.f32 %v3016_v47, %v14074_v42  ;;  %v14080_v42 = vld [vmem:[#allocation88_spill] sm:$0xff] }
 0x4ef   :  { %14076 = vst [vmem:[#allocation133_spill] sm:$0xff] %v10371_v61  ;;  %v10378_v14 = vadd.f32 %v10371_v61, %v10369_v45  ;;  %3510 = vmatmul.f32.gmra.mxu3 %v14079_v2  ;;  %v10382_v35 = vpop.f32.mrf.mxu0 }
 0x4f0   :  { %14077 = vst [vmem:[#allocation140_spill] sm:$0xff] %v10374_v38  ;;  %3413 = vmatmul.f32.gmra.mxu2 %v10091_v22  ;;  %v10385_v20 = vpop.f32.mrf.mxu1  ;;  %v10392_v38 = vmul.f32 %v14080_v42, %v14080_v42 }
 0x4f1   :  { %14078 = vst [vmem:[#allocation141_spill] sm:$0xff] %v10378_v14  ;;  %v14085_v14 = vand.u32 4294901760, %v10091_v22 }
 0x4f2   :  { %v3019_v39 = vpop.f32.mrf.mxu3  ;;  %3627 = vmatmul.f32.gmra.mxu0 %v10080_v58  ;;  %14081 = vst [vmem:[#allocation146_spill] sm:$0xff] %v10392_v38 }
 0x4f3   :  { %v2926_v52 = vpop.f32.mrf.mxu2  ;;  %v3020_v46 = vadd.f32 %v3019_v39, %v2923_v25  ;;  %3710 = vmatmul.f32.gmra.mxu1 %v10080_v58 }
 0x4f4   :  { %v2927_v47 = vadd.f32 %v2926_v52, %v10155_v51 }
 0x4f5   :  { %v10394_v53 = vmul.f32 %v3020_v46, %v3020_v46  ;;  %v10397_v2 = vmul.f32 %v3020_v46, %v14080_v42  ;;  %v14086_v42 = vld [vmem:[#allocation89_spill] sm:$0xff] }
 0x4f7   :  { %14082 = vst [vmem:[#allocation117_spill] sm:$0xff] %v10394_v53  ;;  %v10401_v57 = vadd.f32 %v10394_v53, %v10392_v38  ;;  %3516 = vmatmul.f32.gmra.mxu3 %v14085_v14  ;;  %v10405_v25 = vpop.f32.mrf.mxu0  ;;  %v14091_v53 = vand.u32 4294901760, %v10109_v30 }
 0x4f8   :  { %14083 = vst [vmem:[#allocation129_spill] sm:$0xff] %v10397_v2  ;;  %3418 = vmatmul.f32.gmra.mxu2 %v10109_v30  ;;  %v10408_v51 = vpop.f32.mrf.mxu1  ;;  %v10415_v2 = vmul.f32 %v14086_v42, %v14086_v42 }
 0x4f9   :  { %14084 = vst [vmem:[#allocation136_spill] sm:$0xff] %v10401_v57 }
 0x4fa   :  { %v3023_v58 = vpop.f32.mrf.mxu3  ;;  %3631 = vmatmul.f32.gmra.mxu0 %v10096_v17  ;;  %14087 = vst [vmem:[#allocation138_spill] sm:$0xff] %v10415_v2 }
 0x4fb   :  { %v2930_v39 = vpop.f32.mrf.mxu2  ;;  %v3024_v52 = vadd.f32 %v3023_v58, %v2927_v47  ;;  %3714 = vmatmul.f32.gmra.mxu1 %v10096_v17 }
 0x4fc   :  { %v2931_v46 = vadd.f32 %v2930_v39, %v10173_v4 }
 0x4fd   :  { %v10417_v22 = vmul.f32 %v3024_v52, %v3024_v52  ;;  %v10420_v14 = vmul.f32 %v3024_v52, %v14086_v42  ;;  %v14093_v42 = vld [vmem:[#allocation91_spill] sm:$0xff] }
 0x4ff   :  { %14088 = vst [vmem:[#allocation145_spill] sm:$0xff] %v10417_v22  ;;  %v10424_v57 = vadd.f32 %v10417_v22, %v10415_v2  ;;  %3522 = vmatmul.f32.gmra.mxu3 %v14091_v53  ;;  %v10428_v47 = vpop.f32.mrf.mxu0  ;;  %v14098_v22 = vand.u32 4294901760, %v10127_v19 }
 0x500   :  { %14089 = vst [vmem:[#allocation125_spill] sm:$0xff] %v10420_v14  ;;  %3423 = vmatmul.f32.gmra.mxu2 %v10127_v19  ;;  %v10431_v4 = vpop.f32.mrf.mxu1  ;;  %v10438_v14 = vmul.f32 %v14093_v42, %v14093_v42 }
 0x501   :  { %14090 = vst [vmem:[#allocation132_spill] sm:$0xff] %v10424_v57 }
 0x502   :  { %14092 = vst [vmem:[#allocation134_spill] sm:$0xff] %v10431_v4  ;;  %v3027_v17 = vpop.f32.mrf.mxu3  ;;  %3635 = vmatmul.f32.gmra.mxu0 %v10114_v26 }
 0x503   :  { %v2934_v58 = vpop.f32.mrf.mxu2  ;;  %v3028_v39 = vadd.f32 %v3027_v17, %v2931_v46  ;;  %3718 = vmatmul.f32.gmra.mxu1 %v10114_v26  ;;  %14094 = vst [vmem:[#allocation142_spill] sm:$0xff] %v10438_v14 }
 0x504   :  { %v2935_v52 = vadd.f32 %v2934_v58, %v10191_v34 }
 0x505   :  { %v10440_v30 = vmul.f32 %v3028_v39, %v3028_v39  ;;  %v10443_v53 = vmul.f32 %v3028_v39, %v14093_v42  ;;  %v14099_v42 = vld [vmem:[#allocation92_spill] sm:$0xff] }
 0x507   :  { %14095 = vst [vmem:[#allocation121_spill] sm:$0xff] %v10440_v30  ;;  %v10447_v57 = vadd.f32 %v10440_v30, %v10438_v14  ;;  %3528 = vmatmul.f32.gmra.mxu3 %v14098_v22  ;;  %v10451_v46 = vpop.f32.mrf.mxu0  ;;  %v14104_v30 = vand.u32 4294901760, %v10145_v41 }
 0x508   :  { %14096 = vst [vmem:[#allocation128_spill] sm:$0xff] %v10443_v53  ;;  %3428 = vmatmul.f32.gmra.mxu2 %v10145_v41  ;;  %v10454_v34 = vpop.f32.mrf.mxu1  ;;  %v10461_v53 = vmul.f32 %v14099_v42, %v14099_v42 }
 0x509   :  { %14097 = vst [vmem:[#allocation130_spill] sm:$0xff] %v10447_v57 }
 0x50a   :  { %v3031_v26 = vpop.f32.mrf.mxu3  ;;  %3639 = vmatmul.f32.gmra.mxu0 %v10132_v21  ;;  %14100 = vst [vmem:[#allocation139_spill] sm:$0xff] %v10461_v53 }
 0x50b   :  { %v2938_v17 = vpop.f32.mrf.mxu2  ;;  %v3032_v58 = vadd.f32 %v3031_v26, %v2935_v52  ;;  %3722 = vmatmul.f32.gmra.mxu1 %v10132_v21 }
 0x50c   :  { %v2939_v39 = vadd.f32 %v2938_v17, %v10209_v56 }
 0x50d   :  { %v10463_v19 = vmul.f32 %v3032_v58, %v3032_v58  ;;  %v10466_v22 = vmul.f32 %v3032_v58, %v14099_v42  ;;  %v14105_v42 = vld [vmem:[#allocation93_spill] sm:$0xff] }
 0x50f   :  { %14101 = vst [vmem:[#allocation124_spill] sm:$0xff] %v10463_v19  ;;  %v10470_v57 = vadd.f32 %v10463_v19, %v10461_v53  ;;  %3534 = vmatmul.f32.gmra.mxu3 %v14104_v30  ;;  %v10474_v52 = vpop.f32.mrf.mxu0  ;;  %v14110_v19 = vand.u32 4294901760, %v10163_v16 }
 0x510   :  { %14102 = vst [vmem:[#allocation126_spill] sm:$0xff] %v10466_v22  ;;  %3433 = vmatmul.f32.gmra.mxu2 %v10163_v16  ;;  %v10477_v56 = vpop.f32.mrf.mxu1  ;;  %v10484_v22 = vmul.f32 %v14105_v42, %v14105_v42 }
 0x511   :  { %14103 = vst [vmem:[#allocation135_spill] sm:$0xff] %v10470_v57 }
 0x512   :  { %v3035_v21 = vpop.f32.mrf.mxu3  ;;  %3643 = vmatmul.f32.gmra.mxu0 %v10150_v48  ;;  %14106 = vst [vmem:[#allocation120_spill] sm:$0xff] %v10484_v22 }
 0x513   :  { %v2942_v26 = vpop.f32.mrf.mxu2  ;;  %v3036_v17 = vadd.f32 %v3035_v21, %v2939_v39  ;;  %3726 = vmatmul.f32.gmra.mxu1 %v10150_v48 }
 0x514   :  { %v2943_v58 = vadd.f32 %v2942_v26, %v10227_v23 }
 0x515   :  { %v10486_v41 = vmul.f32 %v3036_v17, %v3036_v17  ;;  %v10489_v30 = vmul.f32 %v3036_v17, %v14105_v42  ;;  %v14111_v17 = vld [vmem:[#allocation95_spill] sm:$0xff] }
 0x516   :  { %v10506_v42 = vmul.f32 %v14111_v17, %v14111_v17 }
 0x517   :  { %14107 = vst [vmem:[#allocation122_spill] sm:$0xff] %v10486_v41  ;;  %v10493_v57 = vadd.f32 %v10486_v41, %v10484_v22  ;;  %3540 = vmatmul.f32.gmra.mxu3 %v14110_v19  ;;  %v10497_v39 = vpop.f32.mrf.mxu0  ;;  %v14115_v19 = vld [vmem:[#allocation78_spill] sm:$0xff] }
 0x518   :  { %14108 = vst [vmem:[#allocation131_spill] sm:$0xff] %v10489_v30  ;;  %3438 = vmatmul.f32.gmra.mxu2 %v10181_v62  ;;  %v10500_v23 = vpop.f32.mrf.mxu1 }
 0x519   :  { %14109 = vst [vmem:[#allocation116_spill] sm:$0xff] %v10493_v57  ;;  %v14116_v57 = vld [vmem:[#allocation94_spill] sm:$0xff] }
 0x51a   :  { %v3039_v48 = vpop.f32.mrf.mxu3  ;;  %3647 = vmatmul.f32.gmra.mxu0 %v10168_v60  ;;  %14112 = vst [vmem:[#allocation118_spill] sm:$0xff] %v10506_v42  ;;  %v1469_v41 = vadd.f32 %v14116_v57, %v14115_v19 }
 0x51b   :  { %v2946_v21 = vpop.f32.mrf.mxu2  ;;  %v3040_v26 = vadd.f32 %v3039_v48, %v2943_v58  ;;  %3730 = vmatmul.f32.gmra.mxu1 %v10168_v60  ;;  %v14118_v58 = vand.u32 4294901760, %v10181_v62 }
 0x51c   :  { %v1566_v27 = vadd.f32 %v14119_v9, %v1469_v41 }
 0x51d   :  { %v10508_v30 = vmul.f32 %v3040_v26, %v3040_v26  ;;  %v10511_v16 = vmul.f32 %v3040_v26, %v14111_v17  ;;  %v2947_v26 = vadd.f32 %v2946_v21, %v10245_v1  ;;  %v14126_v1 = vand.u32 4294901760, %v10199_v54  ;;  %v14127_v21 = vld [vmem:[#allocation98_spill] sm:$0xff] }
 0x51f   :  { %14113 = vst [vmem:[#allocation127_spill] sm:$0xff] %v10508_v30  ;;  %v10517_v61 = vadd.f32 %v10508_v30, %v10506_v42  ;;  %3546 = vmatmul.f32.gmra.mxu3 %v14118_v58  ;;  %v10521_v60 = vpop.f32.mrf.mxu0  ;;  %v14124_v30 = vld [vmem:[#allocation97_spill] sm:$0xff] }
 0x520   :  { %14114 = vst [vmem:[#allocation114_spill] sm:$0xff] %v10511_v16  ;;  %3443 = vmatmul.f32.gmra.mxu2 %v10199_v54  ;;  %v10524_v48 = vpop.f32.mrf.mxu1  ;;  %v10530_v16 = vmul.f32 %v1566_v27, %v1566_v27 }
 0x521   :  { %14117 = vst [vmem:[#allocation123_spill] sm:$0xff] %v10517_v61  ;;  %v14123_v61 = vld [vmem:[#allocation79_spill] sm:$0xff] }
 0x522   :  { %v3043_v17 = vpop.f32.mrf.mxu3  ;;  %3651 = vmatmul.f32.gmra.mxu0 %v10186_v50  ;;  %14120 = vst [vmem:[#allocation110_spill] sm:$0xff] %v10530_v16  ;;  %v1473_v42 = vadd.f32 %v14124_v30, %v14123_v61 }
 0x523   :  { %v2950_v57 = vpop.f32.mrf.mxu2  ;;  %v3044_v19 = vadd.f32 %v3043_v17, %v2947_v26  ;;  %3734 = vmatmul.f32.gmra.mxu1 %v10186_v50 }
 0x524   :  { %v1570_v26 = vadd.f32 %v14127_v21, %v1473_v42  ;;  %v14135_v21 = vld [vmem:[#allocation100_spill] sm:$0xff] }
 0x525   :  { %v10532_v62 = vmul.f32 %v3044_v19, %v3044_v19  ;;  %v10534_v58 = vmul.f32 %v3044_v19, %v1566_v27  ;;  %v2951_v27 = vadd.f32 %v2950_v57, %v10263_v7  ;;  %v14134_v7 = vand.u32 4294901760, %v10217_v28 }
 0x526   :  { %v10553_v19 = vmul.f32 %v1570_v26, %v1570_v26 }
 0x527   :  { %14121 = vst [vmem:[#allocation119_spill] sm:$0xff] %v10532_v62  ;;  %v10540_v9 = vadd.f32 %v10532_v62, %v10530_v16  ;;  %3552 = vmatmul.f32.gmra.mxu3 %v14126_v1  ;;  %v10544_v41 = vpop.f32.mrf.mxu0 }
 0x528   :  { %14122 = vst [vmem:[#allocation115_spill] sm:$0xff] %v10534_v58  ;;  %3448 = vmatmul.f32.gmra.mxu2 %v10217_v28  ;;  %v10547_v50 = vpop.f32.mrf.mxu1  ;;  %v14131_v58 = vld [vmem:[#allocation80_spill] sm:$0xff] }
 0x529   :  { %14125 = vst [vmem:[#allocation111_spill] sm:$0xff] %v10540_v9  ;;  %v14132_v9 = vld [vmem:[#allocation99_spill] sm:$0xff] }
 0x52a   :  { %v3047_v17 = vpop.f32.mrf.mxu3  ;;  %3655 = vmatmul.f32.gmra.mxu0 %v10204_v11  ;;  %14128 = vst [vmem:[#allocation86_spill] sm:$0xff] %v10553_v19  ;;  %v1477_v62 = vadd.f32 %v14132_v9, %v14131_v58 }
 0x52b   :  { %v2954_v61 = vpop.f32.mrf.mxu2  ;;  %v3048_v30 = vadd.f32 %v3047_v17, %v2951_v27  ;;  %3738 = vmatmul.f32.gmra.mxu1 %v10204_v11 }
 0x52c   :  { %v1574_v27 = vadd.f32 %v14135_v21, %v1477_v62  ;;  %v14143_v21 = vld [vmem:[#allocation102_spill] sm:$0xff] }
 0x52d   :  { %v10555_v54 = vmul.f32 %v3048_v30, %v3048_v30  ;;  %v10557_v1 = vmul.f32 %v3048_v30, %v1570_v26  ;;  %v2955_v26 = vadd.f32 %v2954_v61, %v10281_v18  ;;  %v14142_v18 = vand.u32 4294901760, %v10235_v55 }
 0x52e   :  { %v10576_v30 = vmul.f32 %v1574_v27, %v1574_v27 }
 0x52f   :  { %14129 = vst [vmem:[#allocation87_spill] sm:$0xff] %v10555_v54  ;;  %v10563_v42 = vadd.f32 %v10555_v54, %v10553_v19  ;;  %3558 = vmatmul.f32.gmra.mxu3 %v14134_v7  ;;  %v10567_v57 = vpop.f32.mrf.mxu0 }
 0x530   :  { %14130 = vst [vmem:[#allocation88_spill] sm:$0xff] %v10557_v1  ;;  %3453 = vmatmul.f32.gmra.mxu2 %v10235_v55  ;;  %v10570_v11 = vpop.f32.mrf.mxu1  ;;  %v14139_v1 = vld [vmem:[#allocation81_spill] sm:$0xff] }
 0x531   :  { %14133 = vst [vmem:[#allocation89_spill] sm:$0xff] %v10563_v42  ;;  %v14140_v42 = vld [vmem:[#allocation101_spill] sm:$0xff] }
 0x532   :  { %v3051_v17 = vpop.f32.mrf.mxu3  ;;  %3659 = vmatmul.f32.gmra.mxu0 %v10222_v15  ;;  %14136 = vst [vmem:[#allocation91_spill] sm:$0xff] %v10576_v30  ;;  %v1481_v54 = vadd.f32 %v14140_v42, %v14139_v1 }
 0x533   :  { %v2958_v58 = vpop.f32.mrf.mxu2  ;;  %v3052_v9 = vadd.f32 %v3051_v17, %v2955_v26  ;;  %3742 = vmatmul.f32.gmra.mxu1 %v10222_v15 }
 0x534   :  { %v1578_v26 = vadd.f32 %v14143_v21, %v1481_v54  ;;  %v14151_v21 = vld [vmem:[#allocation104_spill] sm:$0xff] }
 0x535   :  { %v10578_v28 = vmul.f32 %v3052_v9, %v3052_v9  ;;  %v10580_v7 = vmul.f32 %v3052_v9, %v1574_v27  ;;  %v2959_v27 = vadd.f32 %v2958_v58, %v10296_v8  ;;  %v14150_v8 = vand.u32 4294901760, %v10253_v10 }
 0x536   :  { %v10599_v9 = vmul.f32 %v1578_v26, %v1578_v26 }
 0x537   :  { %14137 = vst [vmem:[#allocation92_spill] sm:$0xff] %v10578_v28  ;;  %v10586_v62 = vadd.f32 %v10578_v28, %v10576_v30  ;;  %3564 = vmatmul.f32.gmra.mxu3 %v14142_v18  ;;  %v10590_v61 = vpop.f32.mrf.mxu0 }
 0x538   :  { %14138 = vst [vmem:[#allocation93_spill] sm:$0xff] %v10580_v7  ;;  %3458 = vmatmul.f32.gmra.mxu2 %v10253_v10  ;;  %v10593_v15 = vpop.f32.mrf.mxu1  ;;  %v14147_v7 = vld [vmem:[#allocation82_spill] sm:$0xff] }
 0x539   :  { %14141 = vst [vmem:[#allocation95_spill] sm:$0xff] %v10586_v62  ;;  %v14148_v62 = vld [vmem:[#allocation103_spill] sm:$0xff] }
 0x53a   :  { %v3055_v17 = vpop.f32.mrf.mxu3  ;;  %3663 = vmatmul.f32.gmra.mxu0 %v10240_v32  ;;  %14144 = vst [vmem:[#allocation78_spill] sm:$0xff] %v10599_v9  ;;  %v1485_v28 = vadd.f32 %v14148_v62, %v14147_v7 }
 0x53b   :  { %v2962_v1 = vpop.f32.mrf.mxu2  ;;  %v3056_v42 = vadd.f32 %v3055_v17, %v2959_v27  ;;  %3746 = vmatmul.f32.gmra.mxu1 %v10240_v32 }
 0x53c   :  { %v1582_v27 = vadd.f32 %v14151_v21, %v1485_v28  ;;  %v14159_v21 = vld [vmem:[#allocation90_spill] sm:$0xff] }
 0x53d   :  { %v10601_v55 = vmul.f32 %v3056_v42, %v3056_v42  ;;  %v10603_v18 = vmul.f32 %v3056_v42, %v1578_v26  ;;  %v2963_v26 = vadd.f32 %v2962_v1, %v10308_v59  ;;  %v14158_v59 = vand.u32 4294901760, %v10271_v5 }
 0x53e   :  { %v10622_v42 = vmul.f32 %v1582_v27, %v1582_v27 }
 0x53f   :  { %14145 = vst [vmem:[#allocation94_spill] sm:$0xff] %v10601_v55  ;;  %v10609_v54 = vadd.f32 %v10601_v55, %v10599_v9  ;;  %3570 = vmatmul.f32.gmra.mxu3 %v14150_v8  ;;  %v10613_v58 = vpop.f32.mrf.mxu0 }
 0x540   :  { %14146 = vst [vmem:[#allocation96_spill] sm:$0xff] %v10603_v18  ;;  %3463 = vmatmul.f32.gmra.mxu2 %v10271_v5  ;;  %v10616_v32 = vpop.f32.mrf.mxu1  ;;  %v14155_v18 = vld [vmem:[#allocation83_spill] sm:$0xff] }
 0x541   :  { %14149 = vst [vmem:[#allocation79_spill] sm:$0xff] %v10609_v54  ;;  %v14156_v54 = vld [vmem:[#allocation105_spill] sm:$0xff] }
 0x542   :  { %v3059_v17 = vpop.f32.mrf.mxu3  ;;  %3667 = vmatmul.f32.gmra.mxu0 %v10258_v12  ;;  %14152 = vst [vmem:[#allocation97_spill] sm:$0xff] %v10622_v42  ;;  %v1489_v55 = vadd.f32 %v14156_v54, %v14155_v18 }
 0x543   :  { %v2966_v7 = vpop.f32.mrf.mxu2  ;;  %v3060_v62 = vadd.f32 %v3059_v17, %v2963_v26  ;;  %3750 = vmatmul.f32.gmra.mxu1 %v10258_v12  ;;  %v14160_v26 = vld [vmem:[#allocation106_spill] sm:$0xff] }
 0x544   :  { %v1586_v17 = vadd.f32 %v14160_v26, %v1489_v55  ;;  %v14168_v26 = vld [vmem:[#allocation108_spill] sm:$0xff] }
 0x545   :  { %v10624_v10 = vmul.f32 %v3060_v62, %v3060_v62  ;;  %v10626_v8 = vmul.f32 %v3060_v62, %v1582_v27  ;;  %v2967_v27 = vadd.f32 %v2966_v7, %v10316_v37  ;;  %v14167_v37 = vand.u32 4294901760, %v14159_v21 }
 0x547   :  { %14153 = vst [vmem:[#allocation98_spill] sm:$0xff] %v10624_v10  ;;  %v10632_v28 = vadd.f32 %v10624_v10, %v10622_v42  ;;  %3576 = vmatmul.f32.gmra.mxu3 %v14158_v59  ;;  %v10636_v1 = vpop.f32.mrf.mxu0  ;;  %v14165_v10 = vld [vmem:[#allocation107_spill] sm:$0xff] }
 0x548   :  { %14154 = vst [vmem:[#allocation80_spill] sm:$0xff] %v10626_v8  ;;  %3468 = vmatmul.f32.gmra.mxu2 %v14159_v21  ;;  %v10639_v12 = vpop.f32.mrf.mxu1  ;;  %v10645_v8 = vmul.f32 %v1586_v17, %v1586_v17 }
 0x549   :  { %14157 = vst [vmem:[#allocation99_spill] sm:$0xff] %v10632_v28  ;;  %v14164_v28 = vld [vmem:[#allocation84_spill] sm:$0xff] }
 0x54a   :  { %v3063_v62 = vpop.f32.mrf.mxu3  ;;  %3671 = vmatmul.f32.gmra.mxu0 %v10276_v49  ;;  %14161 = vst [vmem:[#allocation100_spill] sm:$0xff] %v10645_v8  ;;  %v1493_v42 = vadd.f32 %v14165_v10, %v14164_v28 }
 0x54b   :  { %v2970_v18 = vpop.f32.mrf.mxu2  ;;  %v3064_v54 = vadd.f32 %v3063_v62, %v2967_v27  ;;  %3754 = vmatmul.f32.gmra.mxu1 %v10276_v49 }
 0x54c   :  { %v1590_v27 = vadd.f32 %v14168_v26, %v1493_v42 }
 0x54d   :  { %v10647_v5 = vmul.f32 %v3064_v54, %v3064_v54  ;;  %v10649_v59 = vmul.f32 %v3064_v54, %v1586_v17  ;;  %v2971_v17 = vadd.f32 %v2970_v18, %v10321_v63  ;;  %v14175_v63 = vand.u32 4294901760, %v10304_v33 }
 0x54e   :  { %v10668_v54 = vmul.f32 %v1590_v27, %v1590_v27 }
 0x54f   :  { %14162 = vst [vmem:[#allocation81_spill] sm:$0xff] %v10647_v5  ;;  %v10655_v55 = vadd.f32 %v10647_v5, %v10645_v8  ;;  %3582 = vmatmul.f32.gmra.mxu3 %v14167_v37  ;;  %v10659_v7 = vpop.f32.mrf.mxu0 }
 0x550   :  { %14163 = vst [vmem:[#allocation101_spill] sm:$0xff] %v10649_v59  ;;  %3473 = vmatmul.f32.gmra.mxu2 %v10304_v33  ;;  %v10662_v49 = vpop.f32.mrf.mxu1  ;;  %v14172_v59 = vld [vmem:[#allocation85_spill] sm:$0xff] }
 0x551   :  { %14166 = vst [vmem:[#allocation102_spill] sm:$0xff] %v10655_v55  ;;  %v14173_v55 = vld [vmem:[#allocation109_spill] sm:$0xff] }
 0x552   :  { %v3067_v62 = vpop.f32.mrf.mxu3  ;;  %3675 = vmatmul.f32.gmra.mxu0 %v10294_v0  ;;  %14169 = vst [vmem:[#allocation82_spill] sm:$0xff] %v10668_v54  ;;  %v1497_v5 = vadd.f32 %v14173_v55, %v14172_v59 }
 0x553   :  { %v2974_v10 = vpop.f32.mrf.mxu2  ;;  %v3068_v28 = vadd.f32 %v3067_v62, %v2971_v17  ;;  %3758 = vmatmul.f32.gmra.mxu1 %v10294_v0  ;;  %v14178_v0 = vld [vmem:[#allocation112_spill] sm:$0xff] }
 0x554   :  { %v1594_v17 = vadd.f32 %v14178_v0, %v1497_v5  ;;  %v2975_v62 = vadd.f32 %v2974_v10, %v10332_v31 }
 0x555   :  { %v10670_v21 = vmul.f32 %v3068_v28, %v3068_v28  ;;  %v10672_v37 = vmul.f32 %v3068_v28, %v1590_v27 }
 0x556   :  { %v10690_v59 = vmul.f32 %v1594_v17, %v1594_v17 }
 0x557   :  { %14170 = vst [vmem:[#allocation103_spill] sm:$0xff] %v10670_v21  ;;  %v10678_v42 = vadd.f32 %v10670_v21, %v10668_v54  ;;  %3588 = vmatmul.f32.gmra.mxu3 %v14175_v63  ;;  %v10682_v18 = vpop.f32.mrf.mxu0 }
 0x558   :  { %14171 = vst [vmem:[#allocation104_spill] sm:$0xff] %v10672_v37  ;;  %v10684_v26 = vpop.f32.mrf.mxu1 }
 0x559   :  { %14174 = vst [vmem:[#allocation83_spill] sm:$0xff] %v10678_v42 }
 0x55a   :  { %14176 = vst [vmem:[#allocation105_spill] sm:$0xff] %v10682_v18  ;;  %v3071_v27 = vpop.f32.mrf.mxu3 }
 0x55b   :  { %14177 = vst [vmem:[#allocation90_spill] sm:$0xff] %v10684_v26  ;;  %v3072_v28 = vadd.f32 %v3071_v27, %v2975_v62  ;;  %v10688_v37 = vpop.f32.mrf.mxu2 }
 0x55c   :  { %14179 = vst [vmem:[#allocation106_spill] sm:$0xff] %v10688_v37 }
 0x55d   :  { %14180 = vst [vmem:[#allocation84_spill] sm:$0xff] %v10690_v59  ;;  %v10692_v55 = vmul.f32 %v3072_v28, %v3072_v28  ;;  %v10694_v42 = vmul.f32 %v3072_v28, %v1594_v17 }
 0x55f   :  { %14181 = vst [vmem:[#allocation107_spill] sm:$0xff] %v10692_v55  ;;  %v10698_v33 = vadd.f32 %v10692_v55, %v10690_v59  ;;  %v10700_v63 = vpop.f32.mrf.mxu0 }
 0x560   :  { %14182 = vst [vmem:[#allocation108_spill] sm:$0xff] %v10694_v42  ;;  %v10702_v21 = vpop.f32.mrf.mxu1 }
 0x561   :  { %14183 = vst [vmem:[#allocation85_spill] sm:$0xff] %v10698_v33 }
 0x562   :  { %14184 = vst [vmem:[#allocation109_spill] sm:$0xff] %v10700_v63  ;;  %v10704_v5 = vpop.f32.mrf.mxu3 }
 0x563   :  { %14185 = vst [vmem:[#allocation112_spill] sm:$0xff] %v10702_v21  ;;  %v10706_v31 = vpop.f32.mrf.mxu2 }
 0x564   :  { %14186 = vst [vmem:[#allocation148_spill] sm:$0xff] %v10704_v5 }
 0x565   :  { %14187 = vst [vmem:[#allocation149_spill] sm:$0xff] %v10706_v31  ;;  %v3370_v31 = vadd.f32 %v10639_v12, %v10636_v1 }
 0x567   :  { %v10708_v10 = vpop.f32.mrf.mxu0 }
 0x568   :  { %14188 = vst [vmem:[#allocation150_spill] sm:$0xff] %v10708_v10  ;;  %v10710_v0 = vpop.f32.mrf.mxu1 }
 0x569   :  { %14189 = vst [vmem:[#allocation151_spill] sm:$0xff] %v10710_v0 }
 0x56a   :  { %v10712_v62 = vpop.f32.mrf.mxu3 }
 0x56b   :  { %14190 = vst [vmem:[#allocation152_spill] sm:$0xff] %v10712_v62  ;;  %v10714_v17 = vpop.f32.mrf.mxu2 }
 0x56c   :  { %14191 = vst [vmem:[#allocation153_spill] sm:$0xff] %v10714_v17 }
 0x56f   :  { %v10716_v27 = vpop.f32.mrf.mxu0 }
 0x570   :  { %14192 = vst [vmem:[#allocation154_spill] sm:$0xff] %v10716_v27  ;;  %v10718_v28 = vpop.f32.mrf.mxu1 }
 0x571   :  { %14193 = vst [vmem:[#allocation155_spill] sm:$0xff] %v10718_v28 }
 0x572   :  { %v10720_v42 = vpop.f32.mrf.mxu3 }
 0x573   :  { %14194 = vst [vmem:[#allocation156_spill] sm:$0xff] %v10720_v42  ;;  %v10722_v33 = vpop.f32.mrf.mxu2 }
 0x574   :  { %14195 = vst [vmem:[#allocation157_spill] sm:$0xff] %v10722_v33 }
 0x577   :  { %v10724_v55 = vpop.f32.mrf.mxu0 }
 0x578   :  { %14196 = vst [vmem:[#allocation158_spill] sm:$0xff] %v10724_v55  ;;  %v10726_v59 = vpop.f32.mrf.mxu1 }
 0x579   :  { %14197 = vst [vmem:[#allocation159_spill] sm:$0xff] %v10726_v59 }
 0x57a   :  { %v10728_v54 = vpop.f32.mrf.mxu3 }
 0x57b   :  { %14198 = vst [vmem:[#allocation160_spill] sm:$0xff] %v10728_v54  ;;  %v10730_v8 = vpop.f32.mrf.mxu2 }
 0x57c   :  { %14199 = vst [vmem:[#allocation161_spill] sm:$0xff] %v10730_v8  ;;  %v3362_v8 = vadd.f32 %v10593_v15, %v10590_v61  ;;  %v3350_v61 = vadd.f32 %v10524_v48, %v10521_v60  ;;  %v3326_v60 = vadd.f32 %v10385_v20, %v10382_v35  ;;  %v3338_v48 = vadd.f32 %v10454_v34, %v10451_v46 }
 0x57f   :  { %v10732_v9 = vpop.f32.mrf.mxu0 }
 0x580   :  { %14200 = vst [vmem:[#allocation162_spill] sm:$0xff] %v10732_v9  ;;  %v10734_v30 = vpop.f32.mrf.mxu1 }
 0x581   :  { %14201 = vst [vmem:[#allocation163_spill] sm:$0xff] %v10734_v30 }
 0x582   :  { %v10736_v19 = vpop.f32.mrf.mxu3 }
 0x583   :  { %14202 = vst [vmem:[#allocation164_spill] sm:$0xff] %v10736_v19  ;;  %v10738_v16 = vpop.f32.mrf.mxu2 }
 0x584   :  { %14203 = vst [vmem:[#allocation165_spill] sm:$0xff] %v10738_v16 }
 0x587   :  { %v10740_v22 = vpop.f32.mrf.mxu0 }
 0x588   :  { %14204 = vst [vmem:[#allocation166_spill] sm:$0xff] %v10740_v22  ;;  %v10742_v53 = vpop.f32.mrf.mxu1 }
 0x589   :  { %14205 = vst [vmem:[#allocation167_spill] sm:$0xff] %v10742_v53 }
 0x58a   :  { %v10744_v14 = vpop.f32.mrf.mxu3 }
 0x58b   :  { %14206 = vst [vmem:[#allocation168_spill] sm:$0xff] %v10744_v14  ;;  %v10746_v2 = vpop.f32.mrf.mxu2  ;;  %v3366_v14 = vadd.f32 %v10616_v32, %v10613_v58 }
 0x58c   :  { %14207 = vst [vmem:[#allocation169_spill] sm:$0xff] %v10746_v2  ;;  %v3354_v2 = vadd.f32 %v10547_v50, %v10544_v41 }
 0x58f   :  { %v10748_v38 = vpop.f32.mrf.mxu0 }
 0x590   :  { %14208 = vst [vmem:[#allocation170_spill] sm:$0xff] %v10748_v38  ;;  %v10750_v45 = vpop.f32.mrf.mxu1 }
 0x591   :  { %14209 = vst [vmem:[#allocation171_spill] sm:$0xff] %v10750_v45 }
 0x592   :  { %v10752_v6 = vpop.f32.mrf.mxu3 }
 0x593   :  { %14210 = vst [vmem:[#allocation172_spill] sm:$0xff] %v10752_v6  ;;  %v10754_v3 = vpop.f32.mrf.mxu2  ;;  %v3358_v6 = vadd.f32 %v10570_v11, %v10567_v57  ;;  %v3314_v57 = vadd.f32 %v10327_v29, %v10324_v24  ;;  %v3374_v11 = vadd.f32 %v10662_v49, %v10659_v7  ;;  %v3342_v24 = vadd.f32 %v10477_v56, %v10474_v52  ;;  %v14218_v56 = vld [vmem:[#allocation134_spill] sm:$0xff]  ;;  %v14219_v35 = vld [vmem:[#allocation169_spill] sm:$0xff] }
 0x594   :  { %v3334_v12 = vadd.f32 %v14218_v56, %v10428_v47  ;;  %v3430_v20 = vadd.f32 %v14219_v35, %v3338_v48  ;;  %v14238_v48 = vld [vmem:[#allocation160_spill] sm:$0xff]  ;;  %v14242_v35 = vld [vmem:[#allocation158_spill] sm:$0xff] }
 0x597   :  { %v10756_v44 = vpop.f32.mrf.mxu0 }
 0x598   :  { %14211 = vst [vmem:[#allocation173_spill] sm:$0xff] %v10756_v44  ;;  %v10758_v26 = vpop.f32.mrf.mxu1 }
 0x599   :  { %14212 = vst [vmem:[#allocation174_spill] sm:$0xff] %v10758_v26 }
 0x59a   :  { %v10760_v21 = vpop.f32.mrf.mxu3 }
 0x59b   :  { %14213 = vst [vmem:[#allocation175_spill] sm:$0xff] %v10760_v21  ;;  %v3439_v0 = vpop.f32.mrf.mxu2 }
 0x59f   :  { %v10762_v18 = vpop.f32.mrf.mxu0 }
 0x5a0   :  { %14214 = vst [vmem:[#allocation176_spill] sm:$0xff] %v10762_v18  ;;  %v10764_v28 = vpop.f32.mrf.mxu1 }
 0x5a1   :  { %14215 = vst [vmem:[#allocation177_spill] sm:$0xff] %v10764_v28 }
 0x5a2   :  { %v3547_v63 = vpop.f32.mrf.mxu3  ;;  %v14220_v7 = vld [vmem:[#allocation175_spill] sm:$0xff] }
 0x5a3   :  { %v3444_v59 = vpop.f32.mrf.mxu2 }
 0x5a7   :  { %v3656_v10 = vpop.f32.mrf.mxu0 }
 0x5a8   :  { %v10766_v30 = vpop.f32.mrf.mxu1 }
 0x5a9   :  { %14216 = vst [vmem:[#allocation178_spill] sm:$0xff] %v10766_v30 }
 0x5aa   :  { %v3553_v5 = vpop.f32.mrf.mxu3 }
 0x5ab   :  { %v3449_v27 = vpop.f32.mrf.mxu2 }
 0x5ac   :  { %v3450_v15 = vadd.f32 %v3449_v27, %v3354_v2  ;;  %v3318_v2 = vadd.f32 %v10339_v13, %v10336_v40  ;;  %v14229_v27 = vld [vmem:[#allocation161_spill] sm:$0xff] }
 0x5af   :  { %v3660_v53 = vpop.f32.mrf.mxu0 }
 0x5b0   :  { %v10768_v42 = vpop.f32.mrf.mxu1 }
 0x5b1   :  { %14217 = vst [vmem:[#allocation179_spill] sm:$0xff] %v10768_v42 }
 0x5b2   :  { %v3559_v62 = vpop.f32.mrf.mxu3 }
 0x5b3   :  { %v3454_v55 = vpop.f32.mrf.mxu2 }
 0x5b4   :  { %v3455_v58 = vadd.f32 %v3454_v55, %v3358_v6  ;;  %v3445_v6 = vadd.f32 %v3444_v59, %v3350_v61  ;;  %v14224_v59 = vld [vmem:[#allocation165_spill] sm:$0xff]  ;;  %v14231_v61 = vld [vmem:[#allocation170_spill] sm:$0xff] }
 0x5b5   :  { %v3425_v55 = vadd.f32 %v14224_v59, %v3334_v12  ;;  %v14245_v59 = vld [vmem:[#allocation154_spill] sm:$0xff] }
 0x5b7   :  { %v3664_v54 = vpop.f32.mrf.mxu0 }
 0x5b8   :  { %v3747_v17 = vpop.f32.mrf.mxu1 }
 0x5ba   :  { %v3565_v45 = vpop.f32.mrf.mxu3 }
 0x5bb   :  { %v3459_v9 = vpop.f32.mrf.mxu2 }
 0x5bc   :  { %v3460_v16 = vadd.f32 %v3459_v9, %v3362_v8 }
 0x5bf   :  { %v3668_v19 = vpop.f32.mrf.mxu0 }
 0x5c0   :  { %v3751_v33 = vpop.f32.mrf.mxu1 }
 0x5c2   :  { %v3571_v26 = vpop.f32.mrf.mxu3 }
 0x5c3   :  { %v3464_v22 = vpop.f32.mrf.mxu2  ;;  %v3572_v32 = vadd.f32 %v3571_v26, %v3460_v16  ;;  %v3560_v16 = vadd.f32 %v3559_v62, %v3450_v15  ;;  %v14228_v62 = vld [vmem:[#allocation149_spill] sm:$0xff] }
 0x5c4   :  { %v3465_v30 = vadd.f32 %v3464_v22, %v3366_v14  ;;  %v3566_v14 = vadd.f32 %v3565_v45, %v3455_v58  ;;  %v3554_v45 = vadd.f32 %v3553_v5, %v3445_v6  ;;  %v14230_v58 = vld [vmem:[#allocation168_spill] sm:$0xff] }
 0x5c5   :  { %v3665_v50 = vadd.f32 %v3664_v54, %v3572_v32  ;;  %v14222_v54 = vld [vmem:[#allocation179_spill] sm:$0xff]  ;;  %v3530_v32 = vadd.f32 %v14230_v58, %v3425_v55  ;;  %v14234_v6 = vld [vmem:[#allocation164_spill] sm:$0xff] }
 0x5c6   :  { %v14249_v58 = vld [vmem:[#allocation159_spill] sm:$0xff] }
 0x5c7   :  { %v3672_v44 = vpop.f32.mrf.mxu0 }
 0x5c8   :  { %v3755_v21 = vpop.f32.mrf.mxu1 }
 0x5ca   :  { %v3577_v28 = vpop.f32.mrf.mxu3 }
 0x5cb   :  { %v3469_v38 = vpop.f32.mrf.mxu2  ;;  %v3578_v42 = vadd.f32 %v3577_v28, %v3465_v30 }
 0x5cc   :  { %v3470_v37 = vadd.f32 %v3469_v38, %v3370_v31  ;;  %v3346_v38 = vadd.f32 %v10500_v23, %v10497_v39 }
 0x5cd   :  { %v3669_v22 = vadd.f32 %v3668_v19, %v3578_v42  ;;  %v3435_v19 = vadd.f32 %v10754_v3, %v3342_v24  ;;  %v14221_v3 = vld [vmem:[#allocation176_spill] sm:$0xff] }
 0x5ce   :  { %v3440_v29 = vadd.f32 %v3439_v0, %v3346_v38  ;;  %v3653_v49 = vadd.f32 %v14221_v3, %v3554_v45 }
 0x5cf   :  { %v3752_v39 = vadd.f32 %v3751_v33, %v3669_v22  ;;  %v3676_v9 = vpop.f32.mrf.mxu0  ;;  %v3542_v46 = vadd.f32 %v14220_v7, %v3435_v19  ;;  %v14226_v33 = vld [vmem:[#allocation173_spill] sm:$0xff]  ;;  %v14243_v7 = vld [vmem:[#allocation167_spill] sm:$0xff] }
 0x5d0   :  { %v3548_v40 = vadd.f32 %v3547_v63, %v3440_v29  ;;  %v3759_v34 = vpop.f32.mrf.mxu1  ;;  %v14227_v63 = vld [vmem:[#allocation178_spill] sm:$0xff] }
 0x5d1   :  { %v3645_v15 = vadd.f32 %v14231_v61, %v3542_v46 }
 0x5d2   :  { %v3583_v18 = vpop.f32.mrf.mxu3  ;;  %v3649_v47 = vadd.f32 %v14226_v33, %v3548_v40  ;;  %v14239_v40 = vld [vmem:[#allocation162_spill] sm:$0xff] }
 0x5d3   :  { %v3584_v4 = vadd.f32 %v3583_v18, %v3470_v37  ;;  %v3474_v41 = vpop.f32.mrf.mxu2  ;;  %v10809_v37 = vand.u32 4294901760, %v3752_v39  ;;  %v14223_v18 = vld [vmem:[#allocation106_spill] sm:$0xff] }
 0x5d4   :  { %v3475_v23 = vadd.f32 %v3474_v41, %v3374_v11  ;;  %v3400_v26 = vadd.f32 %v14223_v18, %v3314_v57  ;;  %v14233_v11 = vld [vmem:[#allocation157_spill] sm:$0xff] }
 0x5d5   :  { %v3673_v1 = vadd.f32 %v3672_v44, %v3584_v4  ;;  %v3322_v44 = vadd.f32 %v10362_v36, %v10359_v43  ;;  %v3661_v4 = vadd.f32 %v3660_v53, %v3566_v14  ;;  %v3657_v43 = vadd.f32 %v3656_v10, %v3560_v16  ;;  %v14232_v14 = vld [vmem:[#allocation177_spill] sm:$0xff] }
 0x5d6   :  { %v3748_v36 = vadd.f32 %v3747_v17, %v3665_v50  ;;  %v3330_v53 = vadd.f32 %v10408_v51, %v10405_v25  ;;  %v14225_v25 = vld [vmem:[#allocation172_spill] sm:$0xff]  ;;  %v3405_v17 = vadd.f32 %v14228_v62, %v3318_v2  ;;  %v3736_v22 = vadd.f32 %v14232_v14, %v3653_v49  ;;  %v14235_v50 = vld [vmem:[#allocation166_spill] sm:$0xff] }
 0x5d7   :  { %v3756_v30 = vadd.f32 %v3755_v21, %v3673_v1  ;;  %v3744_v21 = vadd.f32 %v14222_v54, %v3661_v4  ;;  %v3536_v51 = vadd.f32 %v14225_v25, %v3430_v20  ;;  %v3740_v5 = vadd.f32 %v14227_v63, %v3657_v43  ;;  %v14236_v2 = vld [vmem:[#allocation174_spill] sm:$0xff]  ;;  %v14246_v25 = vld [vmem:[#allocation163_spill] sm:$0xff]  ;;  %v14247_v62 = vld [vmem:[#allocation148_spill] sm:$0xff] }
 0x5d8   :  { %v10816_v31 = vand.u32 4294901760, %v3748_v36  ;;  %v3420_v28 = vadd.f32 %v14229_v27, %v3330_v53  ;;  %v10829_v57 = vsub.f32 %v3752_v39, %v10809_v37  ;;  %v3415_v41 = vadd.f32 %v14233_v11, %v3326_v60  ;;  %v14248_v27 = vld [vmem:[#allocation150_spill] sm:$0xff]  ;;  %v14250_v11 = vld [vmem:[#allocation109_spill] sm:$0xff] }
 0x5d9   :  { %v10799_v8 = vand.u32 4294901760, %v3756_v30  ;;  %v10826_v1 = vand.u32 4294901760, %v3744_v21  ;;  %v3732_v24 = vadd.f32 %v14236_v2, %v3649_v47  ;;  %v10837_v29 = vand.u32 4294901760, %v3740_v5 }
 0x5da   :  { %v3589_v13 = vpop.f32.mrf.mxu3  ;;  %v3524_v16 = vadd.f32 %v14234_v6, %v3420_v28  ;;  %v10840_v45 = vsub.f32 %v3748_v36, %v10816_v31  ;;  %v3518_v19 = vadd.f32 %v14238_v48, %v3415_v41  ;;  %v3937_v56 = vand.u32 4294901760, %v10829_v57  ;;  %v14251_v6 = vld [vmem:[#allocation155_spill] sm:$0xff] }
 0x5db   :  { %v3590_v52 = vadd.f32 %v3589_v13, %v3475_v23  ;;  %v10819_v10 = vsub.f32 %v3756_v30, %v10799_v8  ;;  %v3641_v30 = vadd.f32 %v14235_v50, %v3536_v51  ;;  %v14237_v23 = vld [vmem:[#allocation153_spill] sm:$0xff]  ;;  %v3637_v13 = vadd.f32 %v14239_v40, %v3530_v32 }
 0x5dc   :  { %v3410_v60 = vadd.f32 %v14237_v23, %v3322_v44  ;;  %v10855_v36 = vsub.f32 %v3744_v21, %v10826_v1  ;;  %v14241_v44 = vld [vmem:[#allocation156_spill] sm:$0xff]  ;;  %v3633_v20 = vadd.f32 %v14242_v35, %v3524_v16  ;;  %v10868_v3 = vsub.f32 %v3740_v5, %v10837_v29 }
 0x5dd   :  { %v3677_v42 = vadd.f32 %v3676_v9, %v3590_v52  ;;  %v3931_v39 = vand.u32 4294901760, %v10819_v10  ;;  %v14240_v9 = vld [vmem:[#allocation171_spill] sm:$0xff]  ;;  %v10852_v52 = vand.u32 4294901760, %v3736_v22  ;;  %v3724_v46 = vadd.f32 %v14243_v7, %v3641_v30  ;;  %v14254_v35 = vld [vmem:[#allocation112_spill] sm:$0xff] }
 0x5de   :  { %v3728_v43 = vadd.f32 %v14240_v9, %v3645_v15  ;;  %v3512_v12 = vadd.f32 %v14241_v44, %v3410_v60  ;;  %v3943_v21 = vand.u32 4294901760, %v10840_v45  ;;  %v3629_v55 = vadd.f32 %v14245_v59, %v3518_v19  ;;  %v14252_v60 = vld [vmem:[#allocation105_spill] sm:$0xff]  ;;  %v14253_v19 = vld [vmem:[#allocation151_spill] sm:$0xff] }
 0x5df   :  { %v3760_v0 = vadd.f32 %v3759_v34, %v3677_v42  ;;  %v10864_v34 = vand.u32 4294901760, %v3732_v24  ;;  %v3932_v54 = vsub.f32 %v10819_v10, %v3931_v39  ;;  %v14244_v42 = vld [vmem:[#allocation152_spill] sm:$0xff]  ;;  %v3720_v51 = vadd.f32 %v14246_v25, %v3637_v13 }
 0x5e0   :  { %v3506_v18 = vadd.f32 %v14244_v42, %v3405_v17  ;;  %v10882_v33 = vand.u32 4294901760, %v3728_v43  ;;  %v10886_v47 = vsub.f32 %v3736_v22, %v10852_v52  ;;  %v3938_v5 = vsub.f32 %v10829_v57, %v3937_v56 }
 0x5e1   :  { %v10831_v38 = vand.u32 4294901760, %v3760_v0  ;;  %v3500_v17 = vadd.f32 %v14247_v62, %v3400_v26  ;;  %v3625_v28 = vadd.f32 %v14248_v27, %v3512_v12  ;;  %v3716_v32 = vadd.f32 %v14249_v58, %v3633_v20 }
 0x5e2   :  { %v10897_v61 = vand.u32 4294901760, %v3724_v46  ;;  %v10901_v15 = vsub.f32 %v3732_v24, %v10864_v34  ;;  %v3933_v14 = vand.u32 4294901760, %v3932_v54  ;;  %v3944_v22 = vsub.f32 %v10840_v45, %v3943_v21 }
 0x5e3   :  { %v10843_v4 = vsub.f32 %v3760_v0, %v10831_v38  ;;  %3763 = vmatpush.msrb.mxu2 %v10831_v38  ;;  %4214 = vmatpush.msra.mxu1 %v10831_v38  ;;  %v3949_v0 = vand.u32 4294901760, %v10855_v36  ;;  %v3955_v26 = vand.u32 4294901760, %v10868_v3  ;;  %v3621_v41 = vadd.f32 %v14250_v11, %v3506_v18  ;;  %v14255_v18 = vld [vmem:[#allocation90_spill] sm:$0xff] }
 0x5e4   :  { %v3712_v16 = vadd.f32 %v14251_v6, %v3629_v55  ;;  %v10910_v50 = vand.u32 4294901760, %v3720_v51  ;;  %v10915_v30 = vsub.f32 %v3728_v43, %v10882_v33  ;;  %v3939_v2 = vand.u32 4294901760, %v3938_v5 }
 0x5e5   :  { %v3925_v53 = vand.u32 4294901760, %v10843_v4  ;;  %3765 = vmatpush.msrb.mxu2 %v10799_v8  ;;  %4086 = vmatpush.msra.mxu0 %v10843_v4  ;;  %v3950_v24 = vsub.f32 %v10855_v36, %v3949_v0  ;;  %v3961_v23 = vand.u32 4294901760, %v10886_v47  ;;  %v3617_v48 = vadd.f32 %v14252_v60, %v3500_v17 }
 0x5e6   :  { %4216 = vmatpush.msra.mxu1 %v10799_v8  ;;  %v3708_v40 = vadd.f32 %v14253_v19, %v3625_v28  ;;  %v10924_v13 = vand.u32 4294901760, %v3716_v32  ;;  %v10929_v9 = vsub.f32 %v3724_v46, %v10897_v61  ;;  %v3945_v43 = vand.u32 4294901760, %v3944_v22 }
 0x5e7   :  { %3767 = vmatpush.msrb.mxu2 %v10809_v37  ;;  %4089 = vmatpush.msra.mxu0 %v10819_v10  ;;  %v3926_v49 = vsub.f32 %v10843_v4, %v3925_v53  ;;  %v3956_v44 = vsub.f32 %v10868_v3, %v3955_v26  ;;  %v3967_v12 = vand.u32 4294901760, %v10901_v15  ;;  %v3704_v20 = vadd.f32 %v14254_v35, %v3621_v41  ;;  %v14260_v4 = vld [vmem:[#allocation12_spill] sm:$0xff]  ;;  %v14263_v10 = vld [vmem:[#allocation43_spill] sm:$0xff] }
 0x5e8   :  { %4218 = vmatpush.msra.mxu1 %v10809_v37  ;;  %v10937_v7 = vand.u32 4294901760, %v3712_v16  ;;  %v10942_v46 = vsub.f32 %v3720_v51, %v10910_v50  ;;  %v3962_v54 = vsub.f32 %v10886_v47, %v3961_v23  ;;  %v3973_v42 = vand.u32 4294901760, %v10915_v30 }
 0x5e9   :  { %3769 = vmatpush.msrb.mxu2 %v10816_v31  ;;  %4092 = vmatpush.msra.mxu0 %v10829_v57  ;;  %v3927_v63 = vand.u32 4294901760, %v3926_v49  ;;  %v3951_v49 = vand.u32 4294901760, %v3950_v24  ;;  %v3700_v59 = vadd.f32 %v14255_v18, %v3617_v48  ;;  %v10950_v55 = vand.u32 4294901760, %v3708_v40  ;;  %v14265_v57 = vld [vmem:[#allocation48_spill] sm:$0xff] }
 0x5ea   :  { %4220 = vmatpush.msra.mxu1 %v10816_v31  ;;  %v10955_v25 = vsub.f32 %v3716_v32, %v10924_v13  ;;  %v3957_v51 = vand.u32 4294901760, %v3956_v44  ;;  %v3979_v5 = vand.u32 4294901760, %v10929_v9  ;;  %v10962_v62 = vand.u32 4294901760, %v3704_v20 }
 0x5eb   :  { %3771 = vmatpush.msrb.mxu2 %v10826_v1  ;;  %3928 = vmatpush.msrb.mxu3 %v3927_v63  ;;  %v3968_v63 = vsub.f32 %v10901_v15, %v3967_v12  ;;  %v10967_v17 = vsub.f32 %v3712_v16, %v10937_v7  ;;  %v3963_v27 = vand.u32 4294901760, %v3962_v54  ;;  %v3974_v28 = vsub.f32 %v10915_v30, %v3973_v42 }
 0x5ec   :  { %4095 = vmatpush.msra.mxu0 %v10840_v45  ;;  %4222 = vmatpush.msra.mxu1 %v10826_v1  ;;  %v3985_v58 = vand.u32 4294901760, %v10942_v46  ;;  %v10974_v32 = vand.u32 4294901760, %v3700_v59  ;;  %v3980_v11 = vsub.f32 %v10929_v9, %v3979_v5  ;;  %v3991_v41 = vand.u32 4294901760, %v10955_v25  ;;  %v14266_v45 = vld [vmem:[#allocation15_spill] sm:$0xff] }
 0x5ed   :  { %3773 = vmatpush.msrb.mxu2 %v10837_v29  ;;  %3934 = vmatpush.msrb.mxu3 %v3933_v14  ;;  %v10979_v14 = vsub.f32 %v3708_v40, %v10950_v55  ;;  %v3969_v22 = vand.u32 4294901760, %v3968_v63  ;;  %v10989_v6 = vsub.f32 %v3704_v20, %v10962_v62  ;;  %v3975_v16 = vand.u32 4294901760, %v3974_v28 }
 0x5ee   :  { %4098 = vmatpush.msra.mxu0 %v10855_v36  ;;  %4224 = vmatpush.msra.mxu1 %v10837_v29  ;;  %v3997_v24 = vand.u32 4294901760, %v10967_v17  ;;  %v10999_v60 = vsub.f32 %v3700_v59, %v10974_v32  ;;  %v3981_v48 = vand.u32 4294901760, %v3980_v11  ;;  %v3992_v19 = vsub.f32 %v10955_v25, %v3991_v41  ;;  %v14258_v11 = vld [vmem:[#allocation38_spill] sm:$0xff]  ;;  %v14270_v36 = vld [vmem:[#allocation41_spill] sm:$0xff] }
 0x5ef   :  { %3775 = vmatpush.msrb.mxu2 %v10852_v52  ;;  %3940 = vmatpush.msrb.mxu3 %v3939_v2  ;;  %v3986_v2 = vsub.f32 %v10942_v46, %v3985_v58  ;;  %v4003_v40 = vand.u32 4294901760, %v10979_v14  ;;  %v4009_v35 = vand.u32 4294901760, %v10989_v6 }
 0x5f0   :  { %4101 = vmatpush.msra.mxu0 %v10868_v3  ;;  %4226 = vmatpush.msra.mxu1 %v10852_v52  ;;  %v3998_v44 = vsub.f32 %v10967_v17, %v3997_v24  ;;  %v3993_v20 = vand.u32 4294901760, %v3992_v19  ;;  %v4015_v54 = vand.u32 4294901760, %v10999_v60  ;;  %v14277_v3 = vld [vmem:[#allocation21_spill] sm:$0xff]  ;;  %v14306_v19 = vld [vmem:[#allocation56_spill] sm:$0xff] }
 0x5f1   :  { %3777 = vmatpush.msrb.mxu2 %v10864_v34  ;;  %3946 = vmatpush.msrb.mxu3 %v3945_v43  ;;  %v3987_v43 = vand.u32 4294901760, %v3986_v2  ;;  %v4010_v59 = vsub.f32 %v10989_v6, %v4009_v35  ;;  %v14259_v2 = vld [vmem:[#allocation5_spill] sm:$0xff] }
 0x5f2   :  { %4104 = vmatpush.msra.mxu0 %v10886_v47  ;;  %4228 = vmatpush.msra.mxu1 %v10864_v34  ;;  %v3999_v18 = vand.u32 4294901760, %v3998_v44  ;;  %v14280_v47 = vld [vmem:[#allocation26_spill] sm:$0xff] }
 0x5f3   :  { %3779 = vmatpush.msrb.mxu2 %v10882_v33  ;;  %3952 = vmatpush.msrb.mxu3 %v3951_v49  ;;  %v4004_v49 = vsub.f32 %v10979_v14, %v4003_v40  ;;  %v4011_v28 = vand.u32 4294901760, %v4010_v59  ;;  %v14309_v44 = vld [vmem:[#allocation58_spill] sm:$0xff]  ;;  %v8017_v59 = vld [vmem:[%s13340_s3] sm:$0xff] }
 0x5f4   :  { %4107 = vmatpush.msra.mxu0 %v10901_v15  ;;  %4230 = vmatpush.msra.mxu1 %v10882_v33  ;;  %v14283_v15 = vld [vmem:[#allocation19_spill] sm:$0xff] }
 0x5f5   :  { %3781 = vmatpush.msrb.mxu2 %v10897_v61  ;;  %3958 = vmatpush.msrb.mxu3 %v3957_v51  ;;  %v14256_v51 = vld [vmem:[#allocation14_spill] sm:$0xff]  ;;  %v4005_v63 = vand.u32 4294901760, %v4004_v49  ;;  %v14312_v49 = vld [vmem:[#allocation67_spill] sm:$0xff] }
 0x5f6   :  { %4110 = vmatpush.msra.mxu0 %v10915_v30  ;;  %4232 = vmatpush.msra.mxu1 %v10897_v61  ;;  %v14286_v30 = vld [vmem:[#allocation20_spill] sm:$0xff] }
 0x5f7   :  { %3783 = vmatpush.msrb.mxu2 %v10910_v50  ;;  %3964 = vmatpush.msrb.mxu3 %v3963_v27  ;;  %v4016_v27 = vsub.f32 %v10999_v60, %v4015_v54 }
 0x5f8   :  { %4113 = vmatpush.msra.mxu0 %v10929_v9  ;;  %4234 = vmatpush.msra.mxu1 %v10910_v50  ;;  %v14289_v9 = vld [vmem:[#allocation40_spill] sm:$0xff] }
 0x5f9   :  { %3785 = vmatpush.msrb.mxu2 %v10924_v13  ;;  %3970 = vmatpush.msrb.mxu3 %v3969_v22  ;;  %v14257_v22 = vld [vmem:[#allocation29_spill] sm:$0xff] }
 0x5fa   :  { %4116 = vmatpush.msra.mxu0 %v10942_v46  ;;  %4236 = vmatpush.msra.mxu1 %v10924_v13  ;;  %v14292_v46 = vld [vmem:[#allocation28_spill] sm:$0xff] }
 0x5fb   :  { %3787 = vmatpush.msrb.mxu2 %v10937_v7  ;;  %3976 = vmatpush.msrb.mxu3 %v3975_v16  ;;  %v4017_v16 = vand.u32 4294901760, %v4016_v27  ;;  %v14315_v27 = vld [vmem:[#allocation61_spill] sm:$0xff] }
 0x5fc   :  { %4119 = vmatpush.msra.mxu0 %v10955_v25  ;;  %4238 = vmatpush.msra.mxu1 %v10937_v7  ;;  %v14295_v25 = vld [vmem:[#allocation37_spill] sm:$0xff] }
 0x5fd   :  { %3789 = vmatpush.msrb.mxu2 %v10950_v55  ;;  %3982 = vmatpush.msrb.mxu3 %v3981_v48  ;;  %v14262_v48 = vld [vmem:[#allocation16_spill] sm:$0xff] }
 0x5fe   :  { %4122 = vmatpush.msra.mxu0 %v10967_v17  ;;  %4240 = vmatpush.msra.mxu1 %v10950_v55  ;;  %v14298_v17 = vld [vmem:[#allocation25_spill] sm:$0xff] }
 0x5ff   :  { %3791 = vmatpush.msrb.mxu2 %v10962_v62  ;;  %3988 = vmatpush.msrb.mxu3 %v3987_v43  ;;  %v14308_v43 = vld [vmem:[#allocation63_spill] sm:$0xff] }
 0x600   :  { %4125 = vmatpush.msra.mxu0 %v10979_v14  ;;  %4242 = vmatpush.msra.mxu1 %v10962_v62  ;;  %v14301_v14 = vld [vmem:[#allocation50_spill] sm:$0xff] }
 0x601   :  { %3793 = vmatpush.msrb.mxu2 %v10974_v32  ;;  %3994 = vmatpush.msrb.mxu3 %v3993_v20  ;;  %v14311_v20 = vld [vmem:[#allocation57_spill] sm:$0xff] }
 0x602   :  { %4128 = vmatpush.msra.mxu0 %v10989_v6  ;;  %4244 = vmatpush.msra.mxu1 %v10974_v32  ;;  %v14303_v6 = vld [vmem:[#allocation49_spill] sm:$0xff] }
 0x603   :  { %3799 = vmatmul.f32.vlgmr.msrb.gmra.mxu2 %v14256_v51  ;;  %4000 = vmatpush.msrb.mxu3 %v3999_v18  ;;  %v14314_v18 = vld [vmem:[#allocation64_spill] sm:$0xff] }
 0x604   :  { %4345 = vmatpush.msra.mxu2 %v3925_v53  ;;  %4131 = vmatpush.msra.mxu0 %v10999_v60  ;;  %v14261_v53 = vld [vmem:[#allocation6_spill] sm:$0xff] }
 0x605   :  { %4006 = vmatpush.msrb.mxu3 %v4005_v63  ;;  %4134 = vmatmul.f32.vlgmr.msra.gmra.mxu0 %v14257_v22  ;;  %v14305_v60 = vld [vmem:[#allocation54_spill] sm:$0xff]  ;;  %v4568_v63 = vmul.f32 %v8017_v59, %v8017_v59  ;;  %v14320_v59 = vld [vmem:[#allocation75_spill] sm:$0xff] }
 0x606   :  { %4349 = vmatpush.msra.mxu2 %v3931_v39  ;;  %4248 = vmatmul.f32.vlgmr.msra.gmra.mxu1 %v14258_v11  ;;  %v14264_v39 = vld [vmem:[#allocation13_spill] sm:$0xff] }
 0x607   :  { %4012 = vmatpush.msrb.mxu3 %v4011_v28  ;;  %4647 = vmatpush.msrb.mxu0 %v14259_v2  ;;  %v14316_v28 = vld [vmem:[#allocation71_spill] sm:$0xff] }
 0x608   :  { %4353 = vmatpush.msra.mxu2 %v3937_v56  ;;  %4798 = vmatpush.msrb.mxu1 %v14260_v4  ;;  %v14267_v56 = vld [vmem:[#allocation10_spill] sm:$0xff] }
 0x609   :  { %4018 = vmatpush.msrb.mxu3 %v4017_v16  ;;  %4649 = vmatpush.msrb.mxu0 %v14261_v53  ;;  %v14317_v16 = vld [vmem:[#allocation66_spill] sm:$0xff] }
 0x60a   :  { %4357 = vmatpush.msra.mxu2 %v3943_v21  ;;  %4020 = vmatmul.f32.vlgmr.msrb.gmra.mxu3 %v14262_v48  ;;  %v14278_v21 = vld [vmem:[#allocation42_spill] sm:$0xff] }
 0x60b   :  { %3807 = vmatmul.f32.gmra.mxu2 %v14263_v10  ;;  %4472 = vmatpush.msra.mxu3 %v10831_v38  ;;  %v14268_v38 = vld [vmem:[#allocation11_spill] sm:$0xff] }
 0x60c   :  { %4361 = vmatpush.msra.mxu2 %v3949_v0  ;;  %4804 = vmatpush.msrb.mxu1 %v14264_v39  ;;  %v14281_v0 = vld [vmem:[#allocation44_spill] sm:$0xff] }
 0x60d   :  { %4474 = vmatpush.msra.mxu3 %v10799_v8  ;;  %4139 = vmatmul.f32.gmra.mxu0 %v14265_v57  ;;  %v14269_v8 = vld [vmem:[#allocation45_spill] sm:$0xff] }
 0x60e   :  { %4365 = vmatpush.msra.mxu2 %v3955_v26  ;;  %4254 = vmatmul.f32.gmra.mxu1 %v14266_v45  ;;  %v14284_v26 = vld [vmem:[#allocation18_spill] sm:$0xff] }
 0x60f   :  { %4476 = vmatpush.msra.mxu3 %v10809_v37  ;;  %5103 = vmatpush.msra.mxu0 %v14267_v56  ;;  %v14271_v37 = vld [vmem:[#allocation34_spill] sm:$0xff] }
 0x610   :  { %4369 = vmatpush.msra.mxu2 %v3961_v23  ;;  %5188 = vmatpush.msra.mxu1 %v14259_v2  ;;  %v14287_v23 = vld [vmem:[#allocation22_spill] sm:$0xff] }
 0x611   :  { %4478 = vmatpush.msra.mxu3 %v10816_v31  ;;  %5107 = vmatpush.msra.mxu0 %v14268_v38  ;;  %v14272_v31 = vld [vmem:[#allocation47_spill] sm:$0xff] }
 0x612   :  { %4373 = vmatpush.msra.mxu2 %v3967_v12  ;;  %4024 = vmatmul.f32.gmra.mxu3 %v14269_v8  ;;  %v14290_v12 = vld [vmem:[#allocation31_spill] sm:$0xff] }
 0x613   :  { %3815 = vmatmul.f32.gmra.mxu2 %v14270_v36  ;;  %4480 = vmatpush.msra.mxu3 %v10826_v1  ;;  %v14273_v1 = vld [vmem:[#allocation24_spill] sm:$0xff] }
 0x614   :  { %4377 = vmatpush.msra.mxu2 %v3973_v42  ;;  %5190 = vmatpush.msra.mxu1 %v14261_v53  ;;  %v14293_v42 = vld [vmem:[#allocation17_spill] sm:$0xff] }
 0x615   :  { %4482 = vmatpush.msra.mxu3 %v10837_v29  ;;  %4144 = vmatmul.f32.gmra.mxu0 %v14271_v37  ;;  %v14274_v29 = vld [vmem:[#allocation39_spill] sm:$0xff] }
 0x616   :  { %4381 = vmatpush.msra.mxu2 %v3979_v5  ;;  %4260 = vmatmul.f32.gmra.mxu1 %v14272_v31  ;;  %v14296_v5 = vld [vmem:[#allocation51_spill] sm:$0xff] }
 0x617   :  { %4484 = vmatpush.msra.mxu3 %v10852_v52  ;;  %v14275_v52 = vld [vmem:[#allocation30_spill] sm:$0xff] }
 0x618   :  { %4385 = vmatpush.msra.mxu2 %v3985_v58  ;;  %v14299_v58 = vld [vmem:[#allocation23_spill] sm:$0xff] }
 0x619   :  { %4486 = vmatpush.msra.mxu3 %v10864_v34  ;;  %v14276_v34 = vld [vmem:[#allocation46_spill] sm:$0xff] }
 0x61a   :  { %4389 = vmatpush.msra.mxu2 %v3991_v41  ;;  %4028 = vmatmul.f32.gmra.mxu3 %v14273_v1  ;;  %v14302_v41 = vld [vmem:[#allocation52_spill] sm:$0xff] }
 0x61b   :  { %3823 = vmatmul.f32.gmra.mxu2 %v14274_v29  ;;  %4488 = vmatpush.msra.mxu3 %v10882_v33  ;;  %v14279_v33 = vld [vmem:[#allocation8_spill] sm:$0xff] }
 0x61c   :  { %4393 = vmatpush.msra.mxu2 %v3997_v24  ;;  %v14304_v24 = vld [vmem:[#allocation59_spill] sm:$0xff] }
 0x61d   :  { %4490 = vmatpush.msra.mxu3 %v10897_v61  ;;  %4149 = vmatmul.f32.gmra.mxu0 %v14275_v52  ;;  %v14282_v61 = vld [vmem:[#allocation9_spill] sm:$0xff] }
 0x61e   :  { %4397 = vmatpush.msra.mxu2 %v4003_v40  ;;  %4266 = vmatmul.f32.gmra.mxu1 %v14276_v34  ;;  %v14307_v40 = vld [vmem:[#allocation53_spill] sm:$0xff] }
 0x61f   :  { %4492 = vmatpush.msra.mxu3 %v10910_v50  ;;  %v14285_v50 = vld [vmem:[#allocation36_spill] sm:$0xff] }
 0x620   :  { %4401 = vmatpush.msra.mxu2 %v4009_v35  ;;  %v14310_v35 = vld [vmem:[#allocation60_spill] sm:$0xff] }
 0x621   :  { %4494 = vmatpush.msra.mxu3 %v10924_v13  ;;  %v14288_v13 = vld [vmem:[#allocation27_spill] sm:$0xff] }
 0x622   :  { %4405 = vmatpush.msra.mxu2 %v4015_v54  ;;  %4032 = vmatmul.f32.gmra.mxu3 %v14277_v3  ;;  %v14313_v54 = vld [vmem:[#allocation62_spill] sm:$0xff] }
 0x623   :  { %3831 = vmatmul.f32.gmra.mxu2 %v14278_v21  ;;  %4496 = vmatpush.msra.mxu3 %v10937_v7  ;;  %v14291_v7 = vld [vmem:[#allocation33_spill] sm:$0xff] }
 0x624   :  { %4886 = vmatpush.msrb.mxu2 %v14279_v33 }
 0x625   :  { %4498 = vmatpush.msra.mxu3 %v10950_v55  ;;  %4154 = vmatmul.f32.gmra.mxu0 %v14280_v47  ;;  %v14294_v55 = vld [vmem:[#allocation35_spill] sm:$0xff] }
 0x626   :  { %4272 = vmatmul.f32.gmra.mxu1 %v14281_v0  ;;  %4889 = vmatpush.msrb.mxu2 %v14282_v61 }
 0x627   :  { %4500 = vmatpush.msra.mxu3 %v10962_v62  ;;  %v14297_v62 = vld [vmem:[#allocation32_spill] sm:$0xff] }
 0x629   :  { %4502 = vmatpush.msra.mxu3 %v10974_v32  ;;  %v14300_v32 = vld [vmem:[#allocation55_spill] sm:$0xff] }
 0x62a   :  { %4036 = vmatmul.f32.gmra.mxu3 %v14283_v15 }
 0x62b   :  { %3839 = vmatmul.f32.gmra.mxu2 %v14284_v26  ;;  %4986 = vmatpush.msrb.mxu3 %v14259_v2 }
 0x62d   :  { %4159 = vmatmul.f32.gmra.mxu0 %v14285_v50  ;;  %4988 = vmatpush.msrb.mxu3 %v14261_v53 }
 0x62e   :  { %4278 = vmatmul.f32.gmra.mxu1 %v14286_v30 }
 0x632   :  { %4040 = vmatmul.f32.gmra.mxu3 %v14287_v23 }
 0x633   :  { %3847 = vmatmul.f32.gmra.mxu2 %v14288_v13 }
 0x635   :  { %4164 = vmatmul.f32.gmra.mxu0 %v14289_v9 }
 0x636   :  { %4284 = vmatmul.f32.gmra.mxu1 %v14290_v12 }
 0x63a   :  { %4044 = vmatmul.f32.gmra.mxu3 %v14291_v7 }
 0x63b   :  { %3855 = vmatmul.f32.gmra.mxu2 %v14292_v46 }
 0x63d   :  { %4169 = vmatmul.f32.gmra.mxu0 %v14293_v42 }
 0x63e   :  { %4290 = vmatmul.f32.gmra.mxu1 %v14294_v55 }
 0x642   :  { %4048 = vmatmul.f32.gmra.mxu3 %v14295_v25 }
 0x643   :  { %3863 = vmatmul.f32.gmra.mxu2 %v14296_v5 }
 0x645   :  { %4174 = vmatmul.f32.gmra.mxu0 %v14297_v62 }
 0x646   :  { %4296 = vmatmul.f32.gmra.mxu1 %v14298_v17 }
 0x64a   :  { %4052 = vmatmul.f32.gmra.mxu3 %v14299_v58 }
 0x64b   :  { %3871 = vmatmul.f32.gmra.mxu2 %v14300_v32 }
 0x64d   :  { %4179 = vmatmul.f32.gmra.mxu0 %v14301_v14 }
 0x64e   :  { %4302 = vmatmul.f32.gmra.mxu1 %v14302_v41  ;;  %v14324_v41 = vld [vmem:[#allocation77_spill] sm:$0xff] }
 0x652   :  { %4056 = vmatmul.f32.gmra.mxu3 %v14303_v6 }
 0x653   :  { %3879 = vmatmul.f32.gmra.mxu2 %v14304_v24  ;;  %v14323_v24 = vld [vmem:[#allocation69_spill] sm:$0xff] }
 0x655   :  { %4184 = vmatmul.f32.gmra.mxu0 %v14305_v60 }
 0x656   :  { %4308 = vmatmul.f32.gmra.mxu1 %v14306_v19  ;;  %v14321_v19 = vld [vmem:[#allocation70_spill] sm:$0xff] }
 0x65a   :  { %4060 = vmatmul.f32.gmra.mxu3 %v14307_v40 }
 0x65b   :  { %3887 = vmatmul.f32.gmra.mxu2 %v14308_v43 }
 0x65d   :  { %4189 = vmatmul.f32.gmra.mxu0 %v14309_v44  ;;  %v14318_v44 = vld [vmem:[#allocation68_spill] sm:$0xff] }
 0x65e   :  { %4314 = vmatmul.f32.gmra.mxu1 %v14310_v35  ;;  %v4585_v35 = vsel %vm117_vm0, %v4568_v63, 0 }
 0x662   :  { %4064 = vmatmul.f32.gmra.mxu3 %v14311_v20 }
 0x663   :  { %3895 = vmatmul.f32.gmra.mxu2 %v14312_v49  ;;  %v11151_v49 = vand.u32 4294901760, %v4585_v35 }
 0x665   :  { %4194 = vmatmul.f32.gmra.mxu0 %v14313_v54  ;;  %v14319_v54 = vld [vmem:[#allocation65_spill] sm:$0xff] }
 0x666   :  { %4320 = vmatmul.f32.gmra.mxu1 %v14314_v18  ;;  %v8018_v18 = vld [vmem:[%s13340_s3 + $0x8] sm:$0xff] }
 0x667   :  { %v4569_v43 = vmul.f32 %v8018_v18, %v8018_v18  ;;  %v8019_v18 = vld [vmem:[%s13340_s3 + $0x10] sm:$0xff] }
 0x669   :  { %v4588_v63 = vsel %vm117_vm0, %v4569_v43, 0 }
 0x66a   :  { %4068 = vmatmul.f32.gmra.mxu3 %v14315_v27  ;;  %v11165_v60 = vand.u32 4294901760, %v4588_v63 }
 0x66b   :  { %3903 = vmatmul.f32.gmra.mxu2 %v14316_v28  ;;  %v11160_v28 = vsub.f32 %v4585_v35, %v11151_v49 }
 0x66c   :  { %v11177_v43 = vsub.f32 %v4588_v63, %v11165_v60 }
 0x66d   :  { %4199 = vmatmul.f32.gmra.mxu0 %v14317_v16  ;;  %v14322_v16 = vld [vmem:[#allocation72_spill] sm:$0xff] }
 0x66e   :  { %4326 = vmatmul.f32.gmra.mxu1 %v14318_v44  ;;  %v13614_v44 = vand.u32 4294901760, %v11160_v28  ;;  %v13615_v17 = vand.u32 4294901760, %v11177_v43 }
 0x670   :  { %v4653_v35 = vsub.f32 %v11160_v28, %v13614_v44 }
 0x672   :  { %4072 = vmatmul.f32.gmra.mxu3 %v14319_v54  ;;  %v4654_v32 = vand.u32 4294901760, %v4653_v35 }
 0x673   :  { %3911 = vmatmul.f32.gmra.mxu2 %v14320_v59  ;;  %v4570_v59 = vmul.f32 %v8019_v18, %v8019_v18  ;;  %v14327_v18 = vld [vmem:[#allocation73_spill] sm:$0xff] }
 0x675   :  { %4204 = vmatmul.f32.gmra.mxu0 %v14321_v19  ;;  %v14325_v19 = vld [vmem:[#allocation74_spill] sm:$0xff]  ;;  %v4591_v14 = vsel %vm117_vm0, %v4570_v59, 0  ;;  %v4661_v59 = vsub.f32 %v11177_v43, %v13615_v17  ;;  %v8021_v17 = vld [vmem:[%s13340_s3 + $0x20] sm:$0xff] }
 0x676   :  { %4332 = vmatmul.f32.gmra.mxu1 %v14322_v16  ;;  %v14326_v16 = vld [vmem:[#allocation76_spill] sm:$0xff]  ;;  %v11182_v62 = vand.u32 4294901760, %v4591_v14  ;;  %v4572_v46 = vmul.f32 %v8021_v17, %v8021_v17 }
 0x677   :  { %v4662_v55 = vand.u32 4294901760, %v4661_v59 }
 0x678   :  { %v11193_v35 = vsub.f32 %v4591_v14, %v11182_v62  ;;  %v4597_v30 = vsel %vm117_vm0, %v4572_v46, 0 }
 0x679   :  { %v11214_v61 = vand.u32 4294901760, %v4597_v30 }
 0x67a   :  { %4076 = vmatmul.f32.gmra.mxu3 %v14323_v24  ;;  %v13616_v42 = vand.u32 4294901760, %v11193_v35 }
 0x67b   :  { %3919 = vmatmul.f32.gmra.mxu2 %v14324_v41 }
 0x67d   :  { %4209 = vmatmul.f32.gmra.mxu0 %v14325_v19  ;;  %v8020_v19 = vld [vmem:[%s13340_s3 + $0x18] sm:$0xff] }
 0x67e   :  { %4338 = vmatmul.f32.gmra.mxu1 %v14326_v16  ;;  %v4571_v44 = vmul.f32 %v8020_v19, %v8020_v19 }
 0x680   :  { %v4594_v5 = vsel %vm117_vm0, %v4571_v44, 0  ;;  %v4669_v44 = vsub.f32 %v11193_v35, %v13616_v42 }
 0x681   :  { %v11198_v19 = vand.u32 4294901760, %v4594_v5 }
 0x682   :  { %4080 = vmatmul.f32.gmra.mxu3 %v14327_v18  ;;  %v4135_v41 = vpop.f32.mrf.mxu0  ;;  %v4670_v17 = vand.u32 4294901760, %v4669_v44 }
 0x683   :  { %4407 = vmatmul.f32.vlgmr.msra.gmra.mxu2 %v14262_v48  ;;  %v4249_v63 = vpop.f32.mrf.mxu1  ;;  %v11209_v59 = vsub.f32 %v4594_v5, %v11198_v19  ;;  %v8022_v5 = vld [vmem:[%s13340_s3 + $0x28] sm:$0xff] }
 0x685   :  { %4655 = vmatmul.f32.vlgmr.msrb.gmra.mxu0 %v4654_v32  ;;  %v13617_v26 = vand.u32 4294901760, %v11209_v59 }
 0x686   :  { %v3800_v16 = vpop.f32.mrf.mxu2  ;;  %4806 = vmatmul.f32.vlgmr.msrb.gmra.mxu1 %v11151_v49 }
 0x68a   :  { %4504 = vmatmul.f32.vlgmr.msra.gmra.mxu3 %v14262_v48  ;;  %v4140_v32 = vpop.f32.mrf.mxu0 }
 0x68b   :  { %4411 = vmatmul.f32.gmra.mxu2 %v14269_v8  ;;  %v4255_v14 = vpop.f32.mrf.mxu1 }
 0x68d   :  { %v4021_v12 = vpop.f32.mrf.mxu3  ;;  %4663 = vmatmul.f32.gmra.mxu0 %v4662_v55 }
 0x68e   :  { %v3808_v9 = vpop.f32.mrf.mxu2  ;;  %v4022_v13 = vadd.f32 %v4021_v12, %v3800_v16  ;;  %4810 = vmatmul.f32.gmra.mxu1 %v11165_v60  ;;  %v4573_v12 = vmul.f32 %v8022_v5, %v8022_v5 }
 0x690   :  { %v4136_v50 = vadd.f32 %v4135_v41, %v4022_v13  ;;  %v4677_v13 = vsub.f32 %v11209_v59, %v13617_v26  ;;  %v4600_v44 = vsel %vm117_vm0, %v4573_v12, 0 }
 0x691   :  { %v11232_v33 = vand.u32 4294901760, %v4600_v44 }
 0x692   :  { %v11216_v55 = vadd.f32 %v4249_v63, %v4136_v50  ;;  %4508 = vmatmul.f32.gmra.mxu3 %v14269_v8  ;;  %v4145_v42 = vpop.f32.mrf.mxu0  ;;  %v11227_v50 = vsub.f32 %v4597_v30, %v11214_v61  ;;  %v4678_v5 = vand.u32 4294901760, %v4677_v13  ;;  %v8023_v30 = vld [vmem:[%s13340_s3 + $0x30] sm:$0xff] }
 0x693   :  { %4415 = vmatmul.f32.gmra.mxu2 %v14273_v1  ;;  %v4261_v16 = vpop.f32.mrf.mxu1 }
 0x694   :  { %v13618_v47 = vand.u32 4294901760, %v11227_v50 }
 0x695   :  { %v4025_v46 = vpop.f32.mrf.mxu3  ;;  %4671 = vmatmul.f32.gmra.mxu0 %v4670_v17 }
 0x696   :  { %v3816_v41 = vpop.f32.mrf.mxu2  ;;  %v4026_v63 = vadd.f32 %v4025_v46, %v3808_v9  ;;  %4814 = vmatmul.f32.gmra.mxu1 %v11182_v62  ;;  %v4574_v9 = vmul.f32 %v8023_v30, %v8023_v30 }
 0x698   :  { %v4141_v0 = vadd.f32 %v4140_v32, %v4026_v63  ;;  %v4685_v32 = vsub.f32 %v11227_v50, %v13618_v47  ;;  %v4603_v63 = vsel %vm117_vm0, %v4574_v9, 0 }
 0x699   :  { %v11250_v52 = vand.u32 4294901760, %v4603_v63 }
 0x69a   :  { %v11234_v17 = vadd.f32 %v4255_v14, %v4141_v0  ;;  %4512 = vmatmul.f32.gmra.mxu3 %v14273_v1  ;;  %v4150_v26 = vpop.f32.mrf.mxu0  ;;  %v11245_v0 = vsub.f32 %v4600_v44, %v11232_v33  ;;  %v4686_v30 = vand.u32 4294901760, %v4685_v32  ;;  %v8024_v44 = vld [vmem:[%s13340_s3 + $0x38] sm:$0xff] }
 0x69b   :  { %4419 = vmatmul.f32.gmra.mxu2 %v14277_v3  ;;  %v4267_v46 = vpop.f32.mrf.mxu1 }
 0x69c   :  { %v13621_v34 = vand.u32 4294901760, %v11245_v0 }
 0x69d   :  { %v4029_v12 = vpop.f32.mrf.mxu3  ;;  %4679 = vmatmul.f32.gmra.mxu0 %v4678_v5 }
 0x69e   :  { %v3824_v14 = vpop.f32.mrf.mxu2  ;;  %v4030_v13 = vadd.f32 %v4029_v12, %v3816_v41  ;;  %4818 = vmatmul.f32.gmra.mxu1 %v11198_v19  ;;  %v4575_v41 = vmul.f32 %v8024_v44, %v8024_v44 }
 0x6a0   :  { %v4146_v21 = vadd.f32 %v4145_v42, %v4030_v13  ;;  %v4693_v42 = vsub.f32 %v11245_v0, %v13621_v34  ;;  %v4606_v13 = vsel %vm117_vm0, %v4575_v41, 0 }
 0x6a1   :  { %v11268_v1 = vand.u32 4294901760, %v4606_v13 }
 0x6a2   :  { %v11252_v5 = vadd.f32 %v4261_v16, %v4146_v21  ;;  %4516 = vmatmul.f32.gmra.mxu3 %v14277_v3  ;;  %v4155_v47 = vpop.f32.mrf.mxu0  ;;  %v11263_v21 = vsub.f32 %v4603_v63, %v11250_v52  ;;  %v4694_v44 = vand.u32 4294901760, %v4693_v42  ;;  %v8025_v63 = vld [vmem:[%s13340_s3 + $0x40] sm:$0xff] }
 0x6a3   :  { %4423 = vmatmul.f32.gmra.mxu2 %v14283_v15  ;;  %v4273_v12 = vpop.f32.mrf.mxu1 }
 0x6a4   :  { %v13623_v29 = vand.u32 4294901760, %v11263_v21 }
 0x6a5   :  { %v4033_v9 = vpop.f32.mrf.mxu3  ;;  %4687 = vmatmul.f32.gmra.mxu0 %v4686_v30 }
 0x6a6   :  { %v3832_v16 = vpop.f32.mrf.mxu2  ;;  %v4034_v32 = vadd.f32 %v4033_v9, %v3824_v14  ;;  %4822 = vmatmul.f32.gmra.mxu1 %v11214_v61  ;;  %v4576_v14 = vmul.f32 %v8025_v63, %v8025_v63 }
 0x6a8   :  { %v4151_v3 = vadd.f32 %v4150_v26, %v4034_v32  ;;  %v4701_v26 = vsub.f32 %v11263_v21, %v13623_v29  ;;  %v4609_v32 = vsel %vm117_vm0, %v4576_v14, 0 }
 0x6a9   :  { %v11286_v37 = vand.u32 4294901760, %v4609_v32 }
 0x6aa   :  { %v11270_v30 = vadd.f32 %v4267_v46, %v4151_v3  ;;  %4520 = vmatmul.f32.gmra.mxu3 %v14283_v15  ;;  %v4160_v34 = vpop.f32.mrf.mxu0  ;;  %v11281_v3 = vsub.f32 %v4606_v13, %v11268_v1  ;;  %v4702_v63 = vand.u32 4294901760, %v4701_v26  ;;  %v8026_v13 = vld [vmem:[%s13340_s3 + $0x48] sm:$0xff] }
 0x6ab   :  { %4427 = vmatmul.f32.gmra.mxu2 %v14287_v23  ;;  %v4279_v9 = vpop.f32.mrf.mxu1 }
 0x6ac   :  { %v13626_v31 = vand.u32 4294901760, %v11281_v3 }
 0x6ad   :  { %v4037_v41 = vpop.f32.mrf.mxu3  ;;  %4695 = vmatmul.f32.gmra.mxu0 %v4694_v44 }
 0x6ae   :  { %v3840_v46 = vpop.f32.mrf.mxu2  ;;  %v4038_v42 = vadd.f32 %v4037_v41, %v3832_v16  ;;  %4826 = vmatmul.f32.gmra.mxu1 %v11232_v33  ;;  %v4577_v16 = vmul.f32 %v8026_v13, %v8026_v13 }
 0x6b0   :  { %v4156_v15 = vadd.f32 %v4155_v47, %v4038_v42  ;;  %v4709_v47 = vsub.f32 %v11281_v3, %v13626_v31  ;;  %v4612_v42 = vsel %vm117_vm0, %v4577_v16, 0 }
 0x6b1   :  { %v11304_v8 = vand.u32 4294901760, %v4612_v42 }
 0x6b2   :  { %v11288_v44 = vadd.f32 %v4273_v12, %v4156_v15  ;;  %4524 = vmatmul.f32.gmra.mxu3 %v14287_v23  ;;  %v4165_v29 = vpop.f32.mrf.mxu0  ;;  %v11299_v15 = vsub.f32 %v4609_v32, %v11286_v37  ;;  %v4710_v13 = vand.u32 4294901760, %v4709_v47  ;;  %v8027_v32 = vld [vmem:[%s13340_s3 + $0x50] sm:$0xff] }
 0x6b3   :  { %4431 = vmatmul.f32.gmra.mxu2 %v14291_v7  ;;  %v4285_v41 = vpop.f32.mrf.mxu1 }
 0x6b4   :  { %v13628_v36 = vand.u32 4294901760, %v11299_v15 }
 0x6b5   :  { %v4041_v14 = vpop.f32.mrf.mxu3  ;;  %4703 = vmatmul.f32.gmra.mxu0 %v4702_v63 }
 0x6b6   :  { %v3848_v12 = vpop.f32.mrf.mxu2  ;;  %v4042_v26 = vadd.f32 %v4041_v14, %v3840_v46  ;;  %4830 = vmatmul.f32.gmra.mxu1 %v11250_v52  ;;  %v4578_v46 = vmul.f32 %v8027_v32, %v8027_v32 }
 0x6b8   :  { %v4161_v23 = vadd.f32 %v4160_v34, %v4042_v26  ;;  %v4717_v34 = vsub.f32 %v11299_v15, %v13628_v36  ;;  %v4615_v26 = vsel %vm117_vm0, %v4578_v46, 0 }
 0x6b9   :  { %v11322_v56 = vand.u32 4294901760, %v4615_v26 }
 0x6ba   :  { %v11306_v63 = vadd.f32 %v4279_v9, %v4161_v23  ;;  %4528 = vmatmul.f32.gmra.mxu3 %v14291_v7  ;;  %v4170_v31 = vpop.f32.mrf.mxu0  ;;  %v11317_v23 = vsub.f32 %v4612_v42, %v11304_v8  ;;  %v4718_v32 = vand.u32 4294901760, %v4717_v34  ;;  %v8028_v42 = vld [vmem:[%s13340_s3 + $0x58] sm:$0xff] }
 0x6bb   :  { %4435 = vmatmul.f32.gmra.mxu2 %v14295_v25  ;;  %v4291_v14 = vpop.f32.mrf.mxu1 }
 0x6bc   :  { %v13630_v38 = vand.u32 4294901760, %v11317_v23 }
 0x6bd   :  { %v4045_v16 = vpop.f32.mrf.mxu3  ;;  %4711 = vmatmul.f32.gmra.mxu0 %v4710_v13 }
 0x6be   :  { %v3856_v9 = vpop.f32.mrf.mxu2  ;;  %v4046_v47 = vadd.f32 %v4045_v16, %v3848_v12  ;;  %4834 = vmatmul.f32.gmra.mxu1 %v11268_v1  ;;  %v4579_v12 = vmul.f32 %v8028_v42, %v8028_v42 }
 0x6c0   :  { %v4166_v7 = vadd.f32 %v4165_v29, %v4046_v47  ;;  %v4725_v29 = vsub.f32 %v11317_v23, %v13630_v38  ;;  %v4618_v47 = vsel %vm117_vm0, %v4579_v12, 0 }
 0x6c1   :  { %v11340_v57 = vand.u32 4294901760, %v4618_v47 }
 0x6c2   :  { %v11324_v13 = vadd.f32 %v4285_v41, %v4166_v7  ;;  %4532 = vmatmul.f32.gmra.mxu3 %v14295_v25  ;;  %v4175_v36 = vpop.f32.mrf.mxu0  ;;  %v11335_v7 = vsub.f32 %v4615_v26, %v11322_v56  ;;  %v4726_v42 = vand.u32 4294901760, %v4725_v29  ;;  %v8029_v26 = vld [vmem:[%s13340_s3 + $0x60] sm:$0xff] }
 0x6c3   :  { %4439 = vmatmul.f32.gmra.mxu2 %v14299_v58  ;;  %v4297_v16 = vpop.f32.mrf.mxu1 }
 0x6c4   :  { %v13632_v45 = vand.u32 4294901760, %v11335_v7 }
 0x6c5   :  { %v4049_v46 = vpop.f32.mrf.mxu3  ;;  %4719 = vmatmul.f32.gmra.mxu0 %v4718_v32 }
 0x6c6   :  { %v3864_v41 = vpop.f32.mrf.mxu2  ;;  %v4050_v34 = vadd.f32 %v4049_v46, %v3856_v9  ;;  %4838 = vmatmul.f32.gmra.mxu1 %v11286_v37  ;;  %v4580_v9 = vmul.f32 %v8029_v26, %v8029_v26 }
 0x6c8   :  { %v4171_v25 = vadd.f32 %v4170_v31, %v4050_v34  ;;  %v4733_v31 = vsub.f32 %v11335_v7, %v13632_v45  ;;  %v4621_v34 = vsel %vm117_vm0, %v4580_v9, 0 }
 0x6c9   :  { %v11358_v10 = vand.u32 4294901760, %v4621_v34 }
 0x6ca   :  { %v11342_v32 = vadd.f32 %v4291_v14, %v4171_v25  ;;  %4536 = vmatmul.f32.gmra.mxu3 %v14299_v58  ;;  %v4180_v38 = vpop.f32.mrf.mxu0  ;;  %v11353_v25 = vsub.f32 %v4618_v47, %v11340_v57  ;;  %v4734_v26 = vand.u32 4294901760, %v4733_v31  ;;  %v8030_v47 = vld [vmem:[%s13340_s3 + $0x68] sm:$0xff] }
 0x6cb   :  { %4443 = vmatmul.f32.gmra.mxu2 %v14303_v6  ;;  %v4303_v46 = vpop.f32.mrf.mxu1 }
 0x6cc   :  { %v13636_v39 = vand.u32 4294901760, %v11353_v25 }
 0x6cd   :  { %v4053_v12 = vpop.f32.mrf.mxu3  ;;  %4727 = vmatmul.f32.gmra.mxu0 %v4726_v42 }
 0x6ce   :  { %v3872_v14 = vpop.f32.mrf.mxu2  ;;  %v4054_v29 = vadd.f32 %v4053_v12, %v3864_v41  ;;  %4842 = vmatmul.f32.gmra.mxu1 %v11304_v8  ;;  %v4581_v41 = vmul.f32 %v8030_v47, %v8030_v47 }
 0x6d0   :  { %v4176_v58 = vadd.f32 %v4175_v36, %v4054_v29  ;;  %v4741_v36 = vsub.f32 %v11353_v25, %v13636_v39  ;;  %v4624_v29 = vsel %vm117_vm0, %v4581_v41, 0 }
 0x6d1   :  { %v11376_v53 = vand.u32 4294901760, %v4624_v29 }
 0x6d2   :  { %v11360_v42 = vadd.f32 %v4297_v16, %v4176_v58  ;;  %4540 = vmatmul.f32.gmra.mxu3 %v14303_v6  ;;  %v4185_v45 = vpop.f32.mrf.mxu0  ;;  %v11371_v58 = vsub.f32 %v4621_v34, %v11358_v10  ;;  %v4742_v47 = vand.u32 4294901760, %v4741_v36  ;;  %v8031_v34 = vld [vmem:[%s13340_s3 + $0x70] sm:$0xff] }
 0x6d3   :  { %4447 = vmatmul.f32.gmra.mxu2 %v14307_v40  ;;  %v4309_v12 = vpop.f32.mrf.mxu1 }
 0x6d4   :  { %v13639_v48 = vand.u32 4294901760, %v11371_v58 }
 0x6d5   :  { %v4057_v9 = vpop.f32.mrf.mxu3  ;;  %4735 = vmatmul.f32.gmra.mxu0 %v4734_v26 }
 0x6d6   :  { %v3880_v16 = vpop.f32.mrf.mxu2  ;;  %v4058_v31 = vadd.f32 %v4057_v9, %v3872_v14  ;;  %4846 = vmatmul.f32.gmra.mxu1 %v11322_v56  ;;  %v4582_v14 = vmul.f32 %v8031_v34, %v8031_v34 }
 0x6d8   :  { %v4181_v6 = vadd.f32 %v4180_v38, %v4058_v31  ;;  %v4749_v38 = vsub.f32 %v11371_v58, %v13639_v48  ;;  %v4627_v31 = vsel %vm117_vm0, %v4582_v14, 0 }
 0x6d9   :  { %v11394_v2 = vand.u32 4294901760, %v4627_v31 }
 0x6da   :  { %v11378_v26 = vadd.f32 %v4303_v46, %v4181_v6  ;;  %4544 = vmatmul.f32.gmra.mxu3 %v14307_v40  ;;  %v4190_v39 = vpop.f32.mrf.mxu0  ;;  %v11389_v6 = vsub.f32 %v4624_v29, %v11376_v53  ;;  %v4750_v34 = vand.u32 4294901760, %v4749_v38  ;;  %v8032_v29 = vld [vmem:[%s13340_s3 + $0x78] sm:$0xff] }
 0x6db   :  { %4451 = vmatmul.f32.gmra.mxu2 %v14311_v20  ;;  %v4315_v9 = vpop.f32.mrf.mxu1 }
 0x6dc   :  { %v13641_v4 = vand.u32 4294901760, %v11389_v6 }
 0x6dd   :  { %v4061_v41 = vpop.f32.mrf.mxu3  ;;  %4743 = vmatmul.f32.gmra.mxu0 %v4742_v47 }
 0x6de   :  { %v3888_v46 = vpop.f32.mrf.mxu2  ;;  %v4062_v36 = vadd.f32 %v4061_v41, %v3880_v16  ;;  %4850 = vmatmul.f32.gmra.mxu1 %v11340_v57  ;;  %v4583_v16 = vmul.f32 %v8032_v29, %v8032_v29 }
 0x6e0   :  { %v4186_v40 = vadd.f32 %v4185_v45, %v4062_v36  ;;  %v4757_v45 = vsub.f32 %v11389_v6, %v13641_v4  ;;  %v4630_v36 = vsel %vm117_vm0, %v4583_v16, 0 }
 0x6e1   :  { %v11412_v22 = vand.u32 4294901760, %v4630_v36 }
 0x6e2   :  { %v11396_v47 = vadd.f32 %v4309_v12, %v4186_v40  ;;  %4548 = vmatmul.f32.gmra.mxu3 %v14311_v20  ;;  %v4195_v48 = vpop.f32.mrf.mxu0  ;;  %v11407_v40 = vsub.f32 %v4627_v31, %v11394_v2  ;;  %v4758_v29 = vand.u32 4294901760, %v4757_v45 }
 0x6e3   :  { %4455 = vmatmul.f32.gmra.mxu2 %v14315_v27  ;;  %v4321_v41 = vpop.f32.mrf.mxu1 }
 0x6e4   :  { %14328 = vst [vmem:[#allocation134_spill] sm:$0xff] %v11407_v40  ;;  %v13643_v11 = vand.u32 4294901760, %v11407_v40 }
 0x6e5   :  { %v4065_v14 = vpop.f32.mrf.mxu3  ;;  %4751 = vmatmul.f32.gmra.mxu0 %v4750_v34 }
 0x6e6   :  { %v3896_v12 = vpop.f32.mrf.mxu2  ;;  %v4066_v38 = vadd.f32 %v4065_v14, %v3888_v46  ;;  %4854 = vmatmul.f32.gmra.mxu1 %v11358_v10  ;;  %v4765_v46 = vsub.f32 %v11407_v40, %v13643_v11 }
 0x6e8   :  { %v4191_v20 = vadd.f32 %v4190_v39, %v4066_v38  ;;  %v11422_v39 = vsub.f32 %v4630_v36, %v11412_v22 }
 0x6ea   :  { %v11414_v34 = vadd.f32 %v4315_v9, %v4191_v20  ;;  %4552 = vmatmul.f32.gmra.mxu3 %v14315_v27  ;;  %v4200_v4 = vpop.f32.mrf.mxu0  ;;  %v4766_v9 = vand.u32 4294901760, %v4765_v46  ;;  %v13647_v45 = vand.u32 4294901760, %v11422_v39 }
 0x6eb   :  { %4459 = vmatmul.f32.gmra.mxu2 %v14319_v54  ;;  %v4327_v31 = vpop.f32.mrf.mxu1 }
 0x6ed   :  { %v4069_v51 = vpop.f32.mrf.mxu3  ;;  %4759 = vmatmul.f32.gmra.mxu0 %v4758_v29 }
 0x6ee   :  { %v3904_v16 = vpop.f32.mrf.mxu2  ;;  %v4070_v14 = vadd.f32 %v4069_v51, %v3896_v12  ;;  %4858 = vmatmul.f32.gmra.mxu1 %v11376_v53  ;;  %v4773_v51 = vsub.f32 %v11422_v39, %v13647_v45 }
 0x6f0   :  { %v4196_v20 = vadd.f32 %v4195_v48, %v4070_v14  ;;  %v4774_v46 = vand.u32 4294901760, %v4773_v51 }
 0x6f2   :  { %v11426_v38 = vadd.f32 %v4321_v41, %v4196_v20  ;;  %4556 = vmatmul.f32.gmra.mxu3 %v14319_v54  ;;  %v4205_v29 = vpop.f32.mrf.mxu0 }
 0x6f3   :  { %4463 = vmatmul.f32.gmra.mxu2 %v14323_v24  ;;  %v4333_v27 = vpop.f32.mrf.mxu1 }
 0x6f5   :  { %v4073_v11 = vpop.f32.mrf.mxu3  ;;  %4767 = vmatmul.f32.gmra.mxu0 %v4766_v9 }
 0x6f6   :  { %v3912_v12 = vpop.f32.mrf.mxu2  ;;  %v4074_v36 = vadd.f32 %v4073_v11, %v3904_v16  ;;  %4862 = vmatmul.f32.gmra.mxu1 %v11394_v2 }
 0x6f8   :  { %v4201_v48 = vadd.f32 %v4200_v4, %v4074_v36 }
 0x6fa   :  { %v11434_v41 = vadd.f32 %v4327_v31, %v4201_v48  ;;  %4560 = vmatmul.f32.gmra.mxu3 %v14323_v24  ;;  %v4210_v14 = vpop.f32.mrf.mxu0 }
 0x6fb   :  { %4467 = vmatmul.f32.gmra.mxu2 %v14327_v18  ;;  %v4339_v20 = vpop.f32.mrf.mxu1 }
 0x6fd   :  { %v4077_v54 = vpop.f32.mrf.mxu3  ;;  %4775 = vmatmul.f32.gmra.mxu0 %v4774_v46 }
 0x6fe   :  { %v3920_v9 = vpop.f32.mrf.mxu2  ;;  %v4078_v40 = vadd.f32 %v4077_v54, %v3912_v12  ;;  %4866 = vmatmul.f32.gmra.mxu1 %v11412_v22 }
 0x700   :  { %v4206_v45 = vadd.f32 %v4205_v29, %v4078_v40 }
 0x702   :  { %v11439_v11 = vadd.f32 %v4333_v27, %v4206_v45  ;;  %4564 = vmatmul.f32.gmra.mxu3 %v14327_v18  ;;  %v11442_v4 = vpop.f32.mrf.mxu0  ;;  %v14329_v45 = vand.u32 4294901760, %v11160_v28 }
 0x703   :  { %4892 = vmatmul.f32.vlgmr.msrb.gmra.mxu2 %v11160_v28  ;;  %v11445_v31 = vpop.f32.mrf.mxu1 }
 0x705   :  { %v4081_v16 = vpop.f32.mrf.mxu3  ;;  %5109 = vmatmul.f32.vlgmr.msra.gmra.mxu0 %v11151_v49 }
 0x706   :  { %v4082_v51 = vadd.f32 %v4081_v16, %v3920_v9  ;;  %v4408_v36 = vpop.f32.mrf.mxu2  ;;  %5192 = vmatmul.f32.vlgmr.msra.gmra.mxu1 %v11151_v49 }
 0x707   :  { %v4409_v54 = vadd.f32 %v4408_v36, %v11216_v55 }
 0x708   :  { %v4211_v40 = vadd.f32 %v4210_v14, %v4082_v51  ;;  %v14332_v14 = vand.u32 4294901760, %v11177_v43 }
 0x70a   :  { %v11450_v27 = vadd.f32 %v4339_v20, %v4211_v40  ;;  %4992 = vmatmul.f32.vlgmr.msrb.gmra.mxu3 %v14329_v45  ;;  %v11454_v29 = vpop.f32.mrf.mxu0  ;;  %v14335_v40 = vand.u32 4294901760, %v11193_v35 }
 0x70b   :  { %4897 = vmatmul.f32.gmra.mxu2 %v11177_v43  ;;  %v11457_v12 = vpop.f32.mrf.mxu1 }
 0x70d   :  { %v4505_v48 = vpop.f32.mrf.mxu3  ;;  %5113 = vmatmul.f32.gmra.mxu0 %v11165_v60 }
 0x70e   :  { %v4412_v46 = vpop.f32.mrf.mxu2  ;;  %v11460_v9 = vadd.f32 %v4505_v48, %v4409_v54  ;;  %5196 = vmatmul.f32.gmra.mxu1 %v11165_v60 }
 0x70f   :  { %v4413_v49 = vadd.f32 %v4412_v46, %v11234_v17 }
 0x710   :  { %14330 = vst [vmem:[#allocation169_spill] sm:$0xff] %v11460_v9 }
 0x712   :  { %4998 = vmatmul.f32.gmra.mxu3 %v14332_v14  ;;  %v11468_v20 = vpop.f32.mrf.mxu0 }
 0x713   :  { %4902 = vmatmul.f32.gmra.mxu2 %v11193_v35  ;;  %v11471_v16 = vpop.f32.mrf.mxu1 }
 0x715   :  { %v4509_v51 = vpop.f32.mrf.mxu3  ;;  %5117 = vmatmul.f32.gmra.mxu0 %v11182_v62 }
 0x716   :  { %v4416_v36 = vpop.f32.mrf.mxu2  ;;  %v11474_v54 = vadd.f32 %v4509_v51, %v4413_v49  ;;  %5200 = vmatmul.f32.gmra.mxu1 %v11182_v62  ;;  %v14338_v51 = vand.u32 4294901760, %v11209_v59 }
 0x717   :  { %v4417_v60 = vadd.f32 %v4416_v36, %v11252_v5 }
 0x718   :  { %14333 = vst [vmem:[#allocation175_spill] sm:$0xff] %v11474_v54 }
 0x71a   :  { %5004 = vmatmul.f32.gmra.mxu3 %v14335_v40  ;;  %v11482_v45 = vpop.f32.mrf.mxu0 }
 0x71b   :  { %4907 = vmatmul.f32.gmra.mxu2 %v11209_v59  ;;  %v11485_v48 = vpop.f32.mrf.mxu1 }
 0x71d   :  { %v4513_v46 = vpop.f32.mrf.mxu3  ;;  %5121 = vmatmul.f32.gmra.mxu0 %v11198_v19 }
 0x71e   :  { %v4420_v49 = vpop.f32.mrf.mxu2  ;;  %v11488_v14 = vadd.f32 %v4513_v46, %v4417_v60  ;;  %5204 = vmatmul.f32.gmra.mxu1 %v11198_v19 }
 0x71f   :  { %v4421_v62 = vadd.f32 %v4420_v49, %v11270_v30  ;;  %v14341_v49 = vand.u32 4294901760, %v11227_v50 }
 0x720   :  { %14336 = vst [vmem:[#allocation176_spill] sm:$0xff] %v11488_v14 }
 0x722   :  { %5010 = vmatmul.f32.gmra.mxu3 %v14338_v51  ;;  %v11496_v36 = vpop.f32.mrf.mxu0 }
 0x723   :  { %4912 = vmatmul.f32.gmra.mxu2 %v11227_v50  ;;  %v11499_v40 = vpop.f32.mrf.mxu1 }
 0x725   :  { %v4517_v43 = vpop.f32.mrf.mxu3  ;;  %5125 = vmatmul.f32.gmra.mxu0 %v11214_v61 }
 0x726   :  { %v4424_v60 = vpop.f32.mrf.mxu2  ;;  %v11502_v46 = vadd.f32 %v4517_v43, %v4421_v62  ;;  %5208 = vmatmul.f32.gmra.mxu1 %v11214_v61 }
 0x727   :  { %v4425_v19 = vadd.f32 %v4424_v60, %v11288_v44  ;;  %v14345_v60 = vand.u32 4294901760, %v11245_v0 }
 0x728   :  { %14339 = vst [vmem:[#allocation179_spill] sm:$0xff] %v11502_v46 }
 0x72a   :  { %5016 = vmatmul.f32.gmra.mxu3 %v14341_v49  ;;  %v11510_v51 = vpop.f32.mrf.mxu0 }
 0x72b   :  { %4917 = vmatmul.f32.gmra.mxu2 %v11245_v0  ;;  %v11513_v35 = vpop.f32.mrf.mxu1 }
 0x72c   :  { %14342 = vst [vmem:[#allocation106_spill] sm:$0xff] %v11513_v35 }
 0x72d   :  { %v4521_v28 = vpop.f32.mrf.mxu3  ;;  %5129 = vmatmul.f32.gmra.mxu0 %v11232_v33 }
 0x72e   :  { %v4428_v43 = vpop.f32.mrf.mxu2  ;;  %v11516_v62 = vadd.f32 %v4521_v28, %v4425_v19  ;;  %5212 = vmatmul.f32.gmra.mxu1 %v11232_v33 }
 0x72f   :  { %v4429_v61 = vadd.f32 %v4428_v43, %v11306_v63  ;;  %v14348_v43 = vand.u32 4294901760, %v11263_v21 }
 0x730   :  { %14343 = vst [vmem:[#allocation165_spill] sm:$0xff] %v11516_v62 }
 0x732   :  { %5022 = vmatmul.f32.gmra.mxu3 %v14345_v60  ;;  %v11524_v49 = vpop.f32.mrf.mxu0 }
 0x733   :  { %4922 = vmatmul.f32.gmra.mxu2 %v11263_v21  ;;  %v11527_v59 = vpop.f32.mrf.mxu1 }
 0x735   :  { %v4525_v30 = vpop.f32.mrf.mxu3  ;;  %5133 = vmatmul.f32.gmra.mxu0 %v11250_v52 }
 0x736   :  { %v4432_v28 = vpop.f32.mrf.mxu2  ;;  %v11530_v19 = vadd.f32 %v4525_v30, %v4429_v61  ;;  %5216 = vmatmul.f32.gmra.mxu1 %v11250_v52 }
 0x737   :  { %v4433_v33 = vadd.f32 %v4432_v28, %v11324_v13  ;;  %v14351_v28 = vand.u32 4294901760, %v11281_v3 }
 0x738   :  { %14346 = vst [vmem:[#allocation172_spill] sm:$0xff] %v11530_v19 }
 0x73a   :  { %5028 = vmatmul.f32.gmra.mxu3 %v14348_v43  ;;  %v11538_v60 = vpop.f32.mrf.mxu0 }
 0x73b   :  { %4927 = vmatmul.f32.gmra.mxu2 %v11281_v3  ;;  %v11541_v50 = vpop.f32.mrf.mxu1  ;;  %v14354_v3 = vand.u32 4294901760, %v11299_v15 }
 0x73d   :  { %v4529_v44 = vpop.f32.mrf.mxu3  ;;  %5137 = vmatmul.f32.gmra.mxu0 %v11268_v1 }
 0x73e   :  { %v4436_v30 = vpop.f32.mrf.mxu2  ;;  %v11544_v61 = vadd.f32 %v4529_v44, %v4433_v33  ;;  %5220 = vmatmul.f32.gmra.mxu1 %v11268_v1 }
 0x73f   :  { %v4437_v52 = vadd.f32 %v4436_v30, %v11342_v32 }
 0x740   :  { %14349 = vst [vmem:[#allocation173_spill] sm:$0xff] %v11544_v61 }
 0x742   :  { %5034 = vmatmul.f32.gmra.mxu3 %v14351_v28  ;;  %v11552_v43 = vpop.f32.mrf.mxu0 }
 0x743   :  { %4932 = vmatmul.f32.gmra.mxu2 %v11299_v15  ;;  %v11555_v0 = vpop.f32.mrf.mxu1 }
 0x745   :  { %v4533_v63 = vpop.f32.mrf.mxu3  ;;  %5141 = vmatmul.f32.gmra.mxu0 %v11286_v37 }
 0x746   :  { %v4440_v44 = vpop.f32.mrf.mxu2  ;;  %v11558_v33 = vadd.f32 %v4533_v63, %v4437_v52  ;;  %5224 = vmatmul.f32.gmra.mxu1 %v11286_v37 }
 0x747   :  { %v4441_v21 = vadd.f32 %v4440_v44, %v11360_v42 }
 0x748   :  { %14352 = vst [vmem:[#allocation178_spill] sm:$0xff] %v11558_v33 }
 0x74a   :  { %5040 = vmatmul.f32.gmra.mxu3 %v14354_v3  ;;  %v11565_v30 = vpop.f32.mrf.mxu0  ;;  %v14357_v3 = vand.u32 4294901760, %v11317_v23 }
 0x74b   :  { %4937 = vmatmul.f32.gmra.mxu2 %v11317_v23  ;;  %v11568_v28 = vpop.f32.mrf.mxu1 }
 0x74d   :  { %v4537_v13 = vpop.f32.mrf.mxu3  ;;  %5145 = vmatmul.f32.gmra.mxu0 %v11304_v8 }
 0x74e   :  { %v4444_v63 = vpop.f32.mrf.mxu2  ;;  %v11572_v52 = vadd.f32 %v4537_v13, %v4441_v21  ;;  %5228 = vmatmul.f32.gmra.mxu1 %v11304_v8 }
 0x74f   :  { %v4445_v42 = vadd.f32 %v4444_v63, %v11378_v26 }
 0x750   :  { %14355 = vst [vmem:[#allocation149_spill] sm:$0xff] %v11572_v52 }
 0x752   :  { %5046 = vmatmul.f32.gmra.mxu3 %v14357_v3  ;;  %v11579_v32 = vpop.f32.mrf.mxu0  ;;  %v14360_v3 = vand.u32 4294901760, %v11335_v7 }
 0x753   :  { %4942 = vmatmul.f32.gmra.mxu2 %v11335_v7  ;;  %v11582_v1 = vpop.f32.mrf.mxu1 }
 0x755   :  { %v4541_v44 = vpop.f32.mrf.mxu3  ;;  %5149 = vmatmul.f32.gmra.mxu0 %v11322_v56 }
 0x756   :  { %v4448_v13 = vpop.f32.mrf.mxu2  ;;  %v11586_v21 = vadd.f32 %v4541_v44, %v4445_v42  ;;  %5232 = vmatmul.f32.gmra.mxu1 %v11322_v56 }
 0x757   :  { %v4449_v26 = vadd.f32 %v4448_v13, %v11396_v47 }
 0x758   :  { %14358 = vst [vmem:[#allocation161_spill] sm:$0xff] %v11586_v21 }
 0x75a   :  { %5052 = vmatmul.f32.gmra.mxu3 %v14360_v3  ;;  %v11593_v15 = vpop.f32.mrf.mxu0  ;;  %v14363_v3 = vand.u32 4294901760, %v11353_v25 }
 0x75b   :  { %4947 = vmatmul.f32.gmra.mxu2 %v11353_v25  ;;  %v11596_v37 = vpop.f32.mrf.mxu1 }
 0x75d   :  { %v4545_v63 = vpop.f32.mrf.mxu3  ;;  %5153 = vmatmul.f32.gmra.mxu0 %v11340_v57 }
 0x75e   :  { %v4452_v42 = vpop.f32.mrf.mxu2  ;;  %v11600_v44 = vadd.f32 %v4545_v63, %v4449_v26  ;;  %5236 = vmatmul.f32.gmra.mxu1 %v11340_v57  ;;  %v14370_v57 = vld [vmem:[#allocation134_spill] sm:$0xff] }
 0x75f   :  { %v4453_v47 = vadd.f32 %v4452_v42, %v11414_v34 }
 0x760   :  { %14361 = vst [vmem:[#allocation168_spill] sm:$0xff] %v11600_v44 }
 0x762   :  { %5058 = vmatmul.f32.gmra.mxu3 %v14363_v3  ;;  %v11607_v23 = vpop.f32.mrf.mxu0  ;;  %v14366_v3 = vand.u32 4294901760, %v11371_v58 }
 0x763   :  { %4952 = vmatmul.f32.gmra.mxu2 %v11371_v58  ;;  %v11610_v8 = vpop.f32.mrf.mxu1 }
 0x765   :  { %v4549_v13 = vpop.f32.mrf.mxu3  ;;  %5157 = vmatmul.f32.gmra.mxu0 %v11358_v10 }
 0x766   :  { %v4456_v26 = vpop.f32.mrf.mxu2  ;;  %v11614_v63 = vadd.f32 %v4549_v13, %v4453_v47  ;;  %5240 = vmatmul.f32.gmra.mxu1 %v11358_v10 }
 0x767   :  { %v4457_v34 = vadd.f32 %v4456_v26, %v11426_v38 }
 0x768   :  { %14364 = vst [vmem:[#allocation170_spill] sm:$0xff] %v11614_v63 }
 0x76a   :  { %5064 = vmatmul.f32.gmra.mxu3 %v14366_v3  ;;  %v11621_v7 = vpop.f32.mrf.mxu0  ;;  %v14369_v3 = vand.u32 4294901760, %v11389_v6 }
 0x76b   :  { %4957 = vmatmul.f32.gmra.mxu2 %v11389_v6  ;;  %v11624_v56 = vpop.f32.mrf.mxu1 }
 0x76d   :  { %v4553_v42 = vpop.f32.mrf.mxu3  ;;  %5161 = vmatmul.f32.gmra.mxu0 %v11376_v53 }
 0x76e   :  { %v4460_v47 = vpop.f32.mrf.mxu2  ;;  %v11628_v13 = vadd.f32 %v4553_v42, %v4457_v34  ;;  %5244 = vmatmul.f32.gmra.mxu1 %v11376_v53 }
 0x76f   :  { %v4461_v38 = vadd.f32 %v4460_v47, %v11434_v41 }
 0x770   :  { %14367 = vst [vmem:[#allocation177_spill] sm:$0xff] %v11628_v13 }
 0x772   :  { %5070 = vmatmul.f32.gmra.mxu3 %v14369_v3  ;;  %v11635_v25 = vpop.f32.mrf.mxu0  ;;  %v14373_v3 = vand.u32 4294901760, %v14370_v57 }
 0x773   :  { %4962 = vmatmul.f32.gmra.mxu2 %v14370_v57  ;;  %v11638_v63 = vpop.f32.mrf.mxu1 }
 0x775   :  { %v4557_v26 = vpop.f32.mrf.mxu3  ;;  %5165 = vmatmul.f32.gmra.mxu0 %v11394_v2 }
 0x776   :  { %v4464_v34 = vpop.f32.mrf.mxu2  ;;  %v11642_v42 = vadd.f32 %v4557_v26, %v4461_v38  ;;  %5248 = vmatmul.f32.gmra.mxu1 %v11394_v2 }
 0x777   :  { %v4465_v41 = vadd.f32 %v4464_v34, %v11439_v11 }
 0x778   :  { %14371 = vst [vmem:[#allocation157_spill] sm:$0xff] %v11642_v42 }
 0x77a   :  { %5076 = vmatmul.f32.gmra.mxu3 %v14373_v3  ;;  %v11649_v58 = vpop.f32.mrf.mxu0  ;;  %v14376_v3 = vand.u32 4294901760, %v11422_v39 }
 0x77b   :  { %4967 = vmatmul.f32.gmra.mxu2 %v11422_v39  ;;  %v11652_v10 = vpop.f32.mrf.mxu1 }
 0x77d   :  { %v4561_v47 = vpop.f32.mrf.mxu3  ;;  %5169 = vmatmul.f32.gmra.mxu0 %v11412_v22 }
 0x77e   :  { %v4468_v38 = vpop.f32.mrf.mxu2  ;;  %v11656_v26 = vadd.f32 %v4561_v47, %v4465_v41  ;;  %5252 = vmatmul.f32.gmra.mxu1 %v11412_v22 }
 0x77f   :  { %v4469_v11 = vadd.f32 %v4468_v38, %v11450_v27 }
 0x780   :  { %14374 = vst [vmem:[#allocation164_spill] sm:$0xff] %v11656_v26 }
 0x782   :  { %5082 = vmatmul.f32.gmra.mxu3 %v14376_v3  ;;  %v11663_v6 = vpop.f32.mrf.mxu0 }
 0x783   :  { %14377 = vst [vmem:[#allocation166_spill] sm:$0xff] %v11663_v6  ;;  %v11665_v53 = vpop.f32.mrf.mxu1 }
 0x784   :  { %14378 = vst [vmem:[#allocation174_spill] sm:$0xff] %v11665_v53 }
 0x785   :  { %v4565_v34 = vpop.f32.mrf.mxu3 }
 0x786   :  { %v11668_v42 = vadd.f32 %v4565_v34, %v4469_v11  ;;  %v11670_v13 = vpop.f32.mrf.mxu2 }
 0x787   :  { %14380 = vst [vmem:[#allocation160_spill] sm:$0xff] %v11670_v13 }
 0x788   :  { %14379 = vst [vmem:[#allocation153_spill] sm:$0xff] %v11668_v42 }
 0x78a   :  { %v11674_v47 = vpop.f32.mrf.mxu0 }
 0x78b   :  { %14382 = vst [vmem:[#allocation162_spill] sm:$0xff] %v11674_v47  ;;  %v11676_v57 = vpop.f32.mrf.mxu1 }
 0x78c   :  { %14383 = vst [vmem:[#allocation171_spill] sm:$0xff] %v11676_v57 }
 0x78d   :  { %v11678_v39 = vpop.f32.mrf.mxu3 }
 0x78e   :  { %14384 = vst [vmem:[#allocation156_spill] sm:$0xff] %v11678_v39  ;;  %v11680_v3 = vpop.f32.mrf.mxu2 }
 0x78f   :  { %14385 = vst [vmem:[#allocation158_spill] sm:$0xff] %v11680_v3  ;;  %v4864_v3 = vadd.f32 %v11638_v63, %v11635_v25 }
 0x792   :  { %v11682_v2 = vpop.f32.mrf.mxu0 }
 0x793   :  { %14386 = vst [vmem:[#allocation167_spill] sm:$0xff] %v11682_v2  ;;  %v11684_v26 = vpop.f32.mrf.mxu1 }
 0x794   :  { %14387 = vst [vmem:[#allocation152_spill] sm:$0xff] %v11684_v26 }
 0x795   :  { %v11686_v27 = vpop.f32.mrf.mxu3 }
 0x796   :  { %14388 = vst [vmem:[#allocation154_spill] sm:$0xff] %v11686_v27  ;;  %v11688_v38 = vpop.f32.mrf.mxu2 }
 0x797   :  { %14389 = vst [vmem:[#allocation163_spill] sm:$0xff] %v11688_v38 }
 0x79a   :  { %v11690_v11 = vpop.f32.mrf.mxu0 }
 0x79b   :  { %14390 = vst [vmem:[#allocation148_spill] sm:$0xff] %v11690_v11  ;;  %v11692_v34 = vpop.f32.mrf.mxu1 }
 0x79c   :  { %14391 = vst [vmem:[#allocation150_spill] sm:$0xff] %v11692_v34 }
 0x79d   :  { %v11694_v22 = vpop.f32.mrf.mxu3 }
 0x79e   :  { %14392 = vst [vmem:[#allocation159_spill] sm:$0xff] %v11694_v22  ;;  %v11696_v41 = vpop.f32.mrf.mxu2 }
 0x79f   :  { %14393 = vst [vmem:[#allocation109_spill] sm:$0xff] %v11696_v41 }
 0x7a2   :  { %v11698_v42 = vpop.f32.mrf.mxu0 }
 0x7a3   :  { %14394 = vst [vmem:[#allocation155_spill] sm:$0xff] %v11698_v42  ;;  %v11700_v44 = vpop.f32.mrf.mxu1 }
 0x7a4   :  { %14395 = vst [vmem:[#allocation105_spill] sm:$0xff] %v11700_v44 }
 0x7a5   :  { %v11702_v21 = vpop.f32.mrf.mxu3 }
 0x7a6   :  { %14396 = vst [vmem:[#allocation151_spill] sm:$0xff] %v11702_v21  ;;  %v11704_v52 = vpop.f32.mrf.mxu2 }
 0x7a7   :  { %14397 = vst [vmem:[#allocation112_spill] sm:$0xff] %v11704_v52  ;;  %v4856_v52 = vadd.f32 %v11610_v8, %v11607_v23  ;;  %v4844_v8 = vadd.f32 %v11568_v28, %v11565_v30  ;;  %v4832_v30 = vadd.f32 %v11527_v59, %v11524_v49 }
 0x7aa   :  { %v11706_v33 = vpop.f32.mrf.mxu0 }
 0x7ab   :  { %14398 = vst [vmem:[#allocation90_spill] sm:$0xff] %v11706_v33  ;;  %v11708_v61 = vpop.f32.mrf.mxu1 }
 0x7ac   :  { %14399 = vst [vmem:[#allocation134_spill] sm:$0xff] %v11708_v61 }
 0x7ad   :  { %v11710_v19 = vpop.f32.mrf.mxu3 }
 0x7ae   :  { %14400 = vst [vmem:[#allocation180_spill] sm:$0xff] %v11710_v19  ;;  %v11712_v62 = vpop.f32.mrf.mxu2 }
 0x7af   :  { %14401 = vst [vmem:[#allocation181_spill] sm:$0xff] %v11712_v62 }
 0x7b2   :  { %v11714_v46 = vpop.f32.mrf.mxu0 }
 0x7b3   :  { %14402 = vst [vmem:[#allocation182_spill] sm:$0xff] %v11714_v46  ;;  %v11716_v5 = vpop.f32.mrf.mxu1 }
 0x7b4   :  { %14403 = vst [vmem:[#allocation183_spill] sm:$0xff] %v11716_v5 }
 0x7b5   :  { %v11718_v14 = vpop.f32.mrf.mxu3 }
 0x7b6   :  { %14404 = vst [vmem:[#allocation184_spill] sm:$0xff] %v11718_v14  ;;  %v11720_v17 = vpop.f32.mrf.mxu2  ;;  %v4860_v14 = vadd.f32 %v11624_v56, %v11621_v7 }
 0x7b7   :  { %14405 = vst [vmem:[#allocation185_spill] sm:$0xff] %v11720_v17  ;;  %v4848_v17 = vadd.f32 %v11582_v1, %v11579_v32 }
 0x7ba   :  { %v11722_v54 = vpop.f32.mrf.mxu0 }
 0x7bb   :  { %14406 = vst [vmem:[#allocation186_spill] sm:$0xff] %v11722_v54  ;;  %v11724_v55 = vpop.f32.mrf.mxu1 }
 0x7bc   :  { %14407 = vst [vmem:[#allocation187_spill] sm:$0xff] %v11724_v55 }
 0x7bd   :  { %v11726_v9 = vpop.f32.mrf.mxu3 }
 0x7be   :  { %14408 = vst [vmem:[#allocation188_spill] sm:$0xff] %v11726_v9  ;;  %v11728_v18 = vpop.f32.mrf.mxu2  ;;  %v4852_v9 = vadd.f32 %v11596_v37, %v11593_v15 }
 0x7c2   :  { %v11730_v24 = vpop.f32.mrf.mxu0 }
 0x7c3   :  { %14409 = vst [vmem:[#allocation189_spill] sm:$0xff] %v11730_v24  ;;  %v11732_v53 = vpop.f32.mrf.mxu1 }
 0x7c4   :  { %14410 = vst [vmem:[#allocation190_spill] sm:$0xff] %v11732_v53 }
 0x7c5   :  { %v11734_v57 = vpop.f32.mrf.mxu3 }
 0x7c6   :  { %14411 = vst [vmem:[#allocation191_spill] sm:$0xff] %v11734_v57  ;;  %v4933_v26 = vpop.f32.mrf.mxu2 }
 0x7ca   :  { %v11736_v6 = vpop.f32.mrf.mxu0 }
 0x7cb   :  { %14412 = vst [vmem:[#allocation192_spill] sm:$0xff] %v11736_v6  ;;  %v11738_v34 = vpop.f32.mrf.mxu1 }
 0x7cc   :  { %14413 = vst [vmem:[#allocation193_spill] sm:$0xff] %v11738_v34 }
 0x7cd   :  { %v5041_v47 = vpop.f32.mrf.mxu3 }
 0x7ce   :  { %v4938_v44 = vpop.f32.mrf.mxu2 }
 0x7d2   :  { %v5150_v2 = vpop.f32.mrf.mxu0 }
 0x7d3   :  { %v11740_v61 = vpop.f32.mrf.mxu1 }
 0x7d4   :  { %14414 = vst [vmem:[#allocation194_spill] sm:$0xff] %v11740_v61 }
 0x7d5   :  { %v5047_v39 = vpop.f32.mrf.mxu3 }
 0x7d6   :  { %v4943_v11 = vpop.f32.mrf.mxu2 }
 0x7d7   :  { %v4944_v23 = vadd.f32 %v4943_v11, %v4848_v17  ;;  %v4812_v17 = vadd.f32 %v11457_v12, %v11454_v29  ;;  %v14427_v11 = vld [vmem:[#allocation112_spill] sm:$0xff] }
 0x7da   :  { %v5154_v5 = vpop.f32.mrf.mxu0 }
 0x7db   :  { %v11742_v22 = vpop.f32.mrf.mxu1 }
 0x7dc   :  { %14415 = vst [vmem:[#allocation195_spill] sm:$0xff] %v11742_v22 }
 0x7dd   :  { %v5053_v27 = vpop.f32.mrf.mxu3 }
 0x7de   :  { %v4948_v42 = vpop.f32.mrf.mxu2 }
 0x7df   :  { %v4949_v56 = vadd.f32 %v4948_v42, %v4852_v9  ;;  %v4939_v9 = vadd.f32 %v4938_v44, %v4844_v8  ;;  %v14418_v44 = vld [vmem:[#allocation191_spill] sm:$0xff]  ;;  %v14429_v8 = vld [vmem:[#allocation186_spill] sm:$0xff] }
 0x7e2   :  { %v5158_v21 = vpop.f32.mrf.mxu0 }
 0x7e3   :  { %v5241_v38 = vpop.f32.mrf.mxu1 }
 0x7e5   :  { %v5059_v55 = vpop.f32.mrf.mxu3 }
 0x7e6   :  { %v4953_v33 = vpop.f32.mrf.mxu2 }
 0x7e7   :  { %v4954_v62 = vadd.f32 %v4953_v33, %v4856_v52  ;;  %v4808_v33 = vadd.f32 %v11445_v31, %v11442_v4  ;;  %v4836_v4 = vadd.f32 %v11541_v50, %v11538_v60  ;;  %v14416_v60 = vld [vmem:[#allocation106_spill] sm:$0xff] }
 0x7e9   :  { %v4929_v28 = vadd.f32 %v11728_v18, %v4836_v4  ;;  %v14419_v18 = vld [vmem:[#allocation192_spill] sm:$0xff] }
 0x7ea   :  { %v5162_v19 = vpop.f32.mrf.mxu0 }
 0x7eb   :  { %v5245_v41 = vpop.f32.mrf.mxu1  ;;  %v5036_v59 = vadd.f32 %v14418_v44, %v4929_v28  ;;  %v14441_v44 = vld [vmem:[#allocation183_spill] sm:$0xff] }
 0x7ed   :  { %v5065_v53 = vpop.f32.mrf.mxu3 }
 0x7ee   :  { %v4958_v46 = vpop.f32.mrf.mxu2  ;;  %v5066_v7 = vadd.f32 %v5065_v53, %v4954_v62  ;;  %v5054_v62 = vadd.f32 %v5053_v27, %v4944_v23  ;;  %v14421_v53 = vld [vmem:[#allocation160_spill] sm:$0xff]  ;;  %v14426_v27 = vld [vmem:[#allocation158_spill] sm:$0xff]  ;;  %v5139_v23 = vadd.f32 %v14429_v8, %v5036_v59 }
 0x7ef   :  { %v4959_v61 = vadd.f32 %v4958_v46, %v4860_v14  ;;  %v5060_v14 = vadd.f32 %v5059_v55, %v4949_v56  ;;  %v5048_v55 = vadd.f32 %v5047_v39, %v4939_v9  ;;  %v14428_v56 = vld [vmem:[#allocation184_spill] sm:$0xff] }
 0x7f0   :  { %v5159_v32 = vadd.f32 %v5158_v21, %v5066_v7  ;;  %v4828_v21 = vadd.f32 %v14416_v60, %v11510_v51  ;;  %v14432_v9 = vld [vmem:[#allocation180_spill] sm:$0xff] }
 0x7f1   :  { %v5147_v25 = vadd.f32 %v14419_v18, %v5048_v55 }
 0x7f2   :  { %v5166_v24 = vpop.f32.mrf.mxu0 }
 0x7f3   :  { %v5249_v57 = vpop.f32.mrf.mxu1 }
 0x7f5   :  { %v5071_v34 = vpop.f32.mrf.mxu3 }
 0x7f6   :  { %v4963_v54 = vpop.f32.mrf.mxu2  ;;  %v5072_v22 = vadd.f32 %v5071_v34, %v4959_v61  ;;  %v4868_v61 = vadd.f32 %v11652_v10, %v11649_v58 }
 0x7f7   :  { %v4964_v13 = vadd.f32 %v4963_v54, %v4864_v3  ;;  %v4840_v54 = vadd.f32 %v11555_v0, %v11552_v43  ;;  %v4820_v43 = vadd.f32 %v11485_v48, %v11482_v45  ;;  %v14417_v45 = vld [vmem:[#allocation185_spill] sm:$0xff] }
 0x7f8   :  { %v5163_v46 = vadd.f32 %v5162_v19, %v5072_v22  ;;  %v4924_v48 = vadd.f32 %v14417_v45, %v4832_v30  ;;  %v14436_v30 = vld [vmem:[#allocation151_spill] sm:$0xff] }
 0x7f9   :  { %v4934_v31 = vadd.f32 %v4933_v26, %v4840_v54  ;;  %v14422_v26 = vld [vmem:[#allocation181_spill] sm:$0xff]  ;;  %v14440_v45 = vld [vmem:[#allocation155_spill] sm:$0xff] }
 0x7fa   :  { %v5246_v19 = vadd.f32 %v5245_v41, %v5163_v46  ;;  %v5170_v37 = vpop.f32.mrf.mxu0  ;;  %v14425_v41 = vld [vmem:[#allocation194_spill] sm:$0xff] }
 0x7fb   :  { %v5042_v29 = vadd.f32 %v5041_v47, %v4934_v31  ;;  %v5253_v49 = vpop.f32.mrf.mxu1 }
 0x7fc   :  { %v11783_v58 = vand.u32 4294901760, %v5246_v19 }
 0x7fd   :  { %v5077_v6 = vpop.f32.mrf.mxu3 }
 0x7fe   :  { %v5078_v35 = vadd.f32 %v5077_v6, %v4964_v13  ;;  %v4968_v1 = vpop.f32.mrf.mxu2  ;;  %v14420_v13 = vld [vmem:[#allocation195_spill] sm:$0xff]  ;;  %v4894_v6 = vadd.f32 %v14421_v53, %v4808_v33  ;;  %v11803_v33 = vsub.f32 %v5246_v19, %v11783_v58 }
 0x7ff   :  { %v4969_v0 = vadd.f32 %v4968_v1, %v4868_v61  ;;  %v14431_v61 = vld [vmem:[#allocation109_spill] sm:$0xff] }
 0x800   :  { %v5167_v63 = vadd.f32 %v5166_v24, %v5078_v35  ;;  %v4816_v24 = vadd.f32 %v11471_v16, %v11468_v20  ;;  %v5155_v35 = vadd.f32 %v5154_v5, %v5060_v14  ;;  %v5151_v20 = vadd.f32 %v5150_v2, %v5054_v62  ;;  %v14430_v14 = vld [vmem:[#allocation193_spill] sm:$0xff] }
 0x801   :  { %v5242_v16 = vadd.f32 %v5241_v38, %v5159_v32  ;;  %v4824_v5 = vadd.f32 %v11499_v40, %v11496_v36  ;;  %v4919_v2 = vadd.f32 %v14422_v26, %v4828_v21  ;;  %v14423_v36 = vld [vmem:[#allocation188_spill] sm:$0xff]  ;;  %v4899_v38 = vadd.f32 %v14426_v27, %v4812_v17  ;;  %v14433_v32 = vld [vmem:[#allocation182_spill] sm:$0xff] }
 0x802   :  { %v5250_v52 = vadd.f32 %v5249_v57, %v5167_v63  ;;  %v5238_v10 = vadd.f32 %v14420_v13, %v5155_v35  ;;  %v5030_v40 = vadd.f32 %v14423_v36, %v4924_v48  ;;  %v14424_v57 = vld [vmem:[#allocation189_spill] sm:$0xff]  ;;  %v5234_v22 = vadd.f32 %v14425_v41, %v5151_v20  ;;  %v14434_v17 = vld [vmem:[#allocation190_spill] sm:$0xff]  ;;  %v14443_v26 = vld [vmem:[#allocation148_spill] sm:$0xff] }
 0x803   :  { %v5143_v51 = vadd.f32 %v14424_v57, %v5042_v29  ;;  %v11790_v47 = vand.u32 4294901760, %v5242_v16  ;;  %v4914_v34 = vadd.f32 %v14427_v11, %v4824_v5  ;;  %v5024_v7 = vadd.f32 %v14428_v56, %v4919_v2  ;;  %v14437_v29 = vld [vmem:[#allocation90_spill] sm:$0xff]  ;;  %v14445_v27 = vld [vmem:[#allocation156_spill] sm:$0xff]  ;;  %v14446_v11 = vld [vmem:[#allocation167_spill] sm:$0xff] }
 0x804   :  { %v11773_v15 = vand.u32 4294901760, %v5250_v52  ;;  %v5230_v46 = vadd.f32 %v14430_v14, %v5147_v25  ;;  %v11800_v63 = vand.u32 4294901760, %v5238_v10  ;;  %v4909_v1 = vadd.f32 %v14431_v61, %v4820_v43  ;;  %v14444_v36 = vld [vmem:[#allocation134_spill] sm:$0xff]  ;;  %v14447_v56 = vld [vmem:[#allocation105_spill] sm:$0xff] }
 0x805   :  { %v5083_v12 = vpop.f32.mrf.mxu3  ;;  %v5018_v62 = vadd.f32 %v14432_v9, %v4914_v34  ;;  %v5226_v4 = vadd.f32 %v14434_v17, %v5143_v51  ;;  %v11811_v31 = vand.u32 4294901760, %v5234_v22  ;;  %v11814_v55 = vsub.f32 %v5242_v16, %v11790_v47  ;;  %v14448_v61 = vld [vmem:[#allocation162_spill] sm:$0xff] }
 0x806   :  { %v5084_v50 = vadd.f32 %v5083_v12, %v4969_v0  ;;  %v11793_v39 = vsub.f32 %v5250_v52, %v11773_v15  ;;  %v5135_v52 = vadd.f32 %v14433_v32, %v5030_v40  ;;  %v14435_v0 = vld [vmem:[#allocation163_spill] sm:$0xff]  ;;  %v5012_v28 = vadd.f32 %v14436_v30, %v4909_v1  ;;  %v14449_v9 = vld [vmem:[#allocation150_spill] sm:$0xff] }
 0x807   :  { %v4904_v43 = vadd.f32 %v14435_v0, %v4816_v24  ;;  %v5131_v12 = vadd.f32 %v14437_v29, %v5024_v7  ;;  %v11829_v16 = vsub.f32 %v5238_v10, %v11800_v63  ;;  %v5431_v60 = vand.u32 4294901760, %v11803_v33  ;;  %v14439_v24 = vld [vmem:[#allocation159_spill] sm:$0xff] }
 0x808   :  { %v5171_v42 = vadd.f32 %v5170_v37, %v5084_v50  ;;  %v5425_v19 = vand.u32 4294901760, %v11793_v39  ;;  %v14438_v37 = vld [vmem:[#allocation187_spill] sm:$0xff]  ;;  %v11826_v50 = vand.u32 4294901760, %v5230_v46  ;;  %v5127_v48 = vadd.f32 %v14440_v45, %v5018_v62 }
 0x809   :  { %v5222_v20 = vadd.f32 %v14438_v37, %v5139_v23  ;;  %v5006_v21 = vadd.f32 %v14439_v24, %v4904_v43  ;;  %v5218_v59 = vadd.f32 %v14441_v44, %v5135_v52  ;;  %v11842_v18 = vsub.f32 %v5234_v22, %v11811_v31  ;;  %v14450_v43 = vld [vmem:[#allocation166_spill] sm:$0xff]  ;;  %v14452_v45 = vld [vmem:[#allocation171_spill] sm:$0xff] }
 0x80a   :  { %v5254_v3 = vadd.f32 %v5253_v49, %v5171_v42  ;;  %v11838_v49 = vand.u32 4294901760, %v5226_v4  ;;  %v5426_v13 = vsub.f32 %v11793_v39, %v5425_v19  ;;  %v5437_v10 = vand.u32 4294901760, %v11814_v55  ;;  %v14442_v42 = vld [vmem:[#allocation154_spill] sm:$0xff] }
 0x80b   :  { %v5000_v53 = vadd.f32 %v14442_v42, %v4899_v38  ;;  %v5123_v2 = vadd.f32 %v14443_v26, %v5012_v28  ;;  %v5214_v40 = vadd.f32 %v14444_v36, %v5131_v12  ;;  %v11856_v57 = vand.u32 4294901760, %v5222_v20  ;;  %v14451_v28 = vld [vmem:[#allocation152_spill] sm:$0xff] }
 0x80c   :  { %v11805_v54 = vand.u32 4294901760, %v5254_v3  ;;  %v11860_v51 = vsub.f32 %v5230_v46, %v11826_v50  ;;  %v5432_v22 = vsub.f32 %v11803_v33, %v5431_v60  ;;  %v4994_v38 = vadd.f32 %v14445_v27, %v4894_v6 }
 0x80d   :  { %v5119_v34 = vadd.f32 %v14446_v11, %v5006_v21  ;;  %v5210_v7 = vadd.f32 %v14447_v56, %v5127_v48  ;;  %v11871_v8 = vand.u32 4294901760, %v5218_v59  ;;  %v11875_v23 = vsub.f32 %v5226_v4, %v11838_v49 }
 0x80e   :  { %v11817_v35 = vsub.f32 %v5254_v3, %v11805_v54  ;;  %5257 = vmatpush.msra.mxu2 %v11805_v54  ;;  %5708 = vmatpush.msrb.mxu1 %v11805_v54  ;;  %v5443_v3 = vand.u32 4294901760, %v11829_v16  ;;  %v5427_v14 = vand.u32 4294901760, %v5426_v13  ;;  %v5438_v46 = vsub.f32 %v11814_v55, %v5437_v10 }
 0x80f   :  { %v5449_v6 = vand.u32 4294901760, %v11842_v18  ;;  %v5115_v1 = vadd.f32 %v14448_v61, %v5000_v53  ;;  %v5206_v62 = vadd.f32 %v14449_v9, %v5123_v2  ;;  %v11884_v32 = vand.u32 4294901760, %v5214_v40  ;;  %v14453_v53 = vld [vmem:[#allocation174_spill] sm:$0xff] }
 0x810   :  { %v5419_v5 = vand.u32 4294901760, %v11817_v35  ;;  %5259 = vmatpush.msra.mxu2 %v11773_v15  ;;  %5580 = vmatpush.msrb.mxu0 %v11817_v35  ;;  %v11889_v52 = vsub.f32 %v5222_v20, %v11856_v57  ;;  %v5433_v17 = vand.u32 4294901760, %v5432_v22  ;;  %v5444_v4 = vsub.f32 %v11829_v16, %v5443_v3 }
 0x811   :  { %5710 = vmatpush.msrb.mxu1 %v11773_v15  ;;  %v5455_v0 = vand.u32 4294901760, %v11860_v51  ;;  %v5111_v30 = vadd.f32 %v14450_v43, %v4994_v38  ;;  %v5202_v29 = vadd.f32 %v14451_v28, %v5119_v34  ;;  %v11898_v12 = vand.u32 4294901760, %v5210_v7 }
 0x812   :  { %5261 = vmatpush.msra.mxu2 %v11783_v58  ;;  %5583 = vmatpush.msrb.mxu0 %v11793_v39  ;;  %v5420_v25 = vsub.f32 %v11817_v35, %v5419_v5  ;;  %v11903_v37 = vsub.f32 %v5218_v59, %v11871_v8  ;;  %v5439_v20 = vand.u32 4294901760, %v5438_v46  ;;  %v5450_v24 = vsub.f32 %v11842_v18, %v5449_v6  ;;  %v14458_v35 = vld [vmem:[#allocation12_spill] sm:$0xff]  ;;  %v14461_v39 = vld [vmem:[#allocation43_spill] sm:$0xff] }
 0x813   :  { %5712 = vmatpush.msrb.mxu1 %v11783_v58  ;;  %v5461_v21 = vand.u32 4294901760, %v11875_v23  ;;  %v5198_v48 = vadd.f32 %v14452_v45, %v5115_v1  ;;  %v11911_v44 = vand.u32 4294901760, %v5206_v62  ;;  %v11916_v59 = vsub.f32 %v5214_v40, %v11884_v32 }
 0x814   :  { %5263 = vmatpush.msra.mxu2 %v11790_v47  ;;  %5586 = vmatpush.msrb.mxu0 %v11803_v33  ;;  %v5421_v41 = vand.u32 4294901760, %v5420_v25  ;;  %v5445_v25 = vand.u32 4294901760, %v5444_v4  ;;  %v5456_v13 = vsub.f32 %v11860_v51, %v5455_v0  ;;  %v5467_v42 = vand.u32 4294901760, %v11889_v52  ;;  %v14463_v33 = vld [vmem:[#allocation48_spill] sm:$0xff] }
 0x815   :  { %5714 = vmatpush.msrb.mxu1 %v11790_v47  ;;  %v5194_v26 = vadd.f32 %v14453_v53, %v5111_v30  ;;  %v11924_v2 = vand.u32 4294901760, %v5202_v29  ;;  %v11929_v36 = vsub.f32 %v5210_v7, %v11898_v12  ;;  %v5451_v40 = vand.u32 4294901760, %v5450_v24 }
 0x816   :  { %5265 = vmatpush.msra.mxu2 %v11800_v63  ;;  %5422 = vmatpush.msra.mxu3 %v5421_v41  ;;  %v5462_v41 = vsub.f32 %v11875_v23, %v5461_v21  ;;  %v5473_v22 = vand.u32 4294901760, %v11903_v37  ;;  %v11936_v27 = vand.u32 4294901760, %v5198_v48  ;;  %v11941_v38 = vsub.f32 %v5206_v62, %v11911_v44 }
 0x817   :  { %5589 = vmatpush.msrb.mxu0 %v11814_v55  ;;  %5716 = vmatpush.msrb.mxu1 %v11800_v63  ;;  %v5457_v11 = vand.u32 4294901760, %v5456_v13  ;;  %v5468_v34 = vsub.f32 %v11889_v52, %v5467_v42  ;;  %v5479_v56 = vand.u32 4294901760, %v11916_v59  ;;  %v11948_v7 = vand.u32 4294901760, %v5194_v26  ;;  %v14464_v55 = vld [vmem:[#allocation15_spill] sm:$0xff] }
 0x818   :  { %5267 = vmatpush.msra.mxu2 %v11811_v31  ;;  %5428 = vmatpush.msra.mxu3 %v5427_v14  ;;  %v11953_v14 = vsub.f32 %v5202_v29, %v11924_v2  ;;  %v5463_v46 = vand.u32 4294901760, %v5462_v41  ;;  %v5474_v61 = vsub.f32 %v11903_v37, %v5473_v22  ;;  %v5485_v1 = vand.u32 4294901760, %v11929_v36 }
 0x819   :  { %5592 = vmatpush.msrb.mxu0 %v11829_v16  ;;  %5718 = vmatpush.msrb.mxu1 %v11811_v31  ;;  %v11963_v9 = vsub.f32 %v5198_v48, %v11936_v27  ;;  %v5469_v62 = vand.u32 4294901760, %v5468_v34  ;;  %v5491_v4 = vand.u32 4294901760, %v11941_v38  ;;  %v11973_v43 = vsub.f32 %v5194_v26, %v11948_v7  ;;  %v14468_v16 = vld [vmem:[#allocation41_spill] sm:$0xff] }
 0x81a   :  { %5269 = vmatpush.msra.mxu2 %v11826_v50  ;;  %5434 = vmatpush.msra.mxu3 %v5433_v17  ;;  %v5480_v17 = vsub.f32 %v11916_v59, %v5479_v56  ;;  %v5475_v30 = vand.u32 4294901760, %v5474_v61  ;;  %v5486_v28 = vsub.f32 %v11929_v36, %v5485_v1  ;;  %v5497_v29 = vand.u32 4294901760, %v11953_v14  ;;  %v14456_v61 = vld [vmem:[#allocation38_spill] sm:$0xff] }
 0x81b   :  { %5595 = vmatpush.msrb.mxu0 %v11842_v18  ;;  %5720 = vmatpush.msrb.mxu1 %v11826_v50  ;;  %v5492_v24 = vsub.f32 %v11941_v38, %v5491_v4  ;;  %v5503_v45 = vand.u32 4294901760, %v11963_v9  ;;  %v5509_v13 = vand.u32 4294901760, %v11973_v43  ;;  %v14475_v18 = vld [vmem:[#allocation21_spill] sm:$0xff] }
 0x81c   :  { %5271 = vmatpush.msra.mxu2 %v11838_v49  ;;  %5440 = vmatpush.msra.mxu3 %v5439_v20  ;;  %v5481_v20 = vand.u32 4294901760, %v5480_v17  ;;  %v5487_v48 = vand.u32 4294901760, %v5486_v28  ;;  %v14457_v17 = vld [vmem:[#allocation5_spill] sm:$0xff]  ;;  %v14504_v28 = vld [vmem:[#allocation56_spill] sm:$0xff] }
 0x81d   :  { %5598 = vmatpush.msrb.mxu0 %v11860_v51  ;;  %5722 = vmatpush.msrb.mxu1 %v11838_v49  ;;  %v5493_v53 = vand.u32 4294901760, %v5492_v24  ;;  %v5504_v26 = vsub.f32 %v11963_v9, %v5503_v45  ;;  %v14478_v51 = vld [vmem:[#allocation26_spill] sm:$0xff] }
 0x81e   :  { %5273 = vmatpush.msra.mxu2 %v11856_v57  ;;  %5446 = vmatpush.msra.mxu3 %v5445_v25  ;;  %v5498_v25 = vsub.f32 %v11953_v14, %v5497_v29  ;;  %v14507_v24 = vld [vmem:[#allocation58_spill] sm:$0xff] }
 0x81f   :  { %5601 = vmatpush.msrb.mxu0 %v11875_v23  ;;  %5724 = vmatpush.msrb.mxu1 %v11856_v57  ;;  %v5505_v34 = vand.u32 4294901760, %v5504_v26  ;;  %v14481_v23 = vld [vmem:[#allocation19_spill] sm:$0xff]  ;;  %v14513_v26 = vld [vmem:[#allocation61_spill] sm:$0xff] }
 0x820   :  { %5275 = vmatpush.msra.mxu2 %v11871_v8  ;;  %5452 = vmatpush.msra.mxu3 %v5451_v40  ;;  %v14454_v40 = vld [vmem:[#allocation14_spill] sm:$0xff]  ;;  %v5499_v41 = vand.u32 4294901760, %v5498_v25  ;;  %v14510_v25 = vld [vmem:[#allocation67_spill] sm:$0xff] }
 0x821   :  { %5604 = vmatpush.msrb.mxu0 %v11889_v52  ;;  %5726 = vmatpush.msrb.mxu1 %v11871_v8  ;;  %v14484_v52 = vld [vmem:[#allocation20_spill] sm:$0xff] }
 0x822   :  { %5277 = vmatpush.msra.mxu2 %v11884_v32  ;;  %5458 = vmatpush.msra.mxu3 %v5457_v11  ;;  %v5510_v11 = vsub.f32 %v11973_v43, %v5509_v13 }
 0x823   :  { %5607 = vmatpush.msrb.mxu0 %v11903_v37  ;;  %5728 = vmatpush.msrb.mxu1 %v11884_v32  ;;  %v14487_v37 = vld [vmem:[#allocation40_spill] sm:$0xff] }
 0x824   :  { %5279 = vmatpush.msra.mxu2 %v11898_v12  ;;  %5464 = vmatpush.msra.mxu3 %v5463_v46  ;;  %v14455_v46 = vld [vmem:[#allocation29_spill] sm:$0xff] }
 0x825   :  { %5610 = vmatpush.msrb.mxu0 %v11916_v59  ;;  %5730 = vmatpush.msrb.mxu1 %v11898_v12  ;;  %v14490_v59 = vld [vmem:[#allocation28_spill] sm:$0xff] }
 0x826   :  { %5281 = vmatpush.msra.mxu2 %v11911_v44  ;;  %5470 = vmatpush.msra.mxu3 %v5469_v62  ;;  %v5511_v62 = vand.u32 4294901760, %v5510_v11  ;;  %v14515_v11 = vld [vmem:[#allocation66_spill] sm:$0xff] }
 0x827   :  { %5613 = vmatpush.msrb.mxu0 %v11929_v36  ;;  %5732 = vmatpush.msrb.mxu1 %v11911_v44  ;;  %v14493_v36 = vld [vmem:[#allocation37_spill] sm:$0xff] }
 0x828   :  { %5283 = vmatpush.msra.mxu2 %v11924_v2  ;;  %5476 = vmatpush.msra.mxu3 %v5475_v30  ;;  %v14460_v30 = vld [vmem:[#allocation16_spill] sm:$0xff] }
 0x829   :  { %5616 = vmatpush.msrb.mxu0 %v11941_v38  ;;  %5734 = vmatpush.msrb.mxu1 %v11924_v2  ;;  %v14496_v38 = vld [vmem:[#allocation25_spill] sm:$0xff] }
 0x82a   :  { %5285 = vmatpush.msra.mxu2 %v11936_v27  ;;  %5482 = vmatpush.msra.mxu3 %v5481_v20  ;;  %v14506_v20 = vld [vmem:[#allocation63_spill] sm:$0xff] }
 0x82b   :  { %5619 = vmatpush.msrb.mxu0 %v11953_v14  ;;  %5736 = vmatpush.msrb.mxu1 %v11936_v27  ;;  %v14499_v14 = vld [vmem:[#allocation50_spill] sm:$0xff] }
 0x82c   :  { %5287 = vmatpush.msra.mxu2 %v11948_v7  ;;  %5488 = vmatpush.msra.mxu3 %v5487_v48  ;;  %v14509_v48 = vld [vmem:[#allocation57_spill] sm:$0xff] }
 0x82d   :  { %5622 = vmatpush.msrb.mxu0 %v11963_v9  ;;  %5738 = vmatpush.msrb.mxu1 %v11948_v7  ;;  %v14501_v9 = vld [vmem:[#allocation49_spill] sm:$0xff] }
 0x82e   :  { %5293 = vmatmul.f32.vlgmr.msra.gmra.mxu2 %v14454_v40  ;;  %5494 = vmatpush.msra.mxu3 %v5493_v53  ;;  %v14512_v53 = vld [vmem:[#allocation64_spill] sm:$0xff] }
 0x82f   :  { %5839 = vmatpush.msrb.mxu2 %v5419_v5  ;;  %5625 = vmatpush.msrb.mxu0 %v11973_v43  ;;  %v14459_v5 = vld [vmem:[#allocation6_spill] sm:$0xff] }
 0x830   :  { %5500 = vmatpush.msra.mxu3 %v5499_v41  ;;  %5628 = vmatmul.f32.vlgmr.msrb.gmra.mxu0 %v14455_v46  ;;  %v14503_v43 = vld [vmem:[#allocation54_spill] sm:$0xff]  ;;  %v14514_v41 = vld [vmem:[#allocation71_spill] sm:$0xff] }
 0x831   :  { %5843 = vmatpush.msrb.mxu2 %v5425_v19  ;;  %5742 = vmatmul.f32.vlgmr.msrb.gmra.mxu1 %v14456_v61  ;;  %v14462_v19 = vld [vmem:[#allocation13_spill] sm:$0xff] }
 0x832   :  { %5506 = vmatpush.msra.mxu3 %v5505_v34  ;;  %6141 = vmatpush.msra.mxu0 %v14457_v17  ;;  %v14516_v34 = vld [vmem:[#allocation7_spill] sm:$0xff] }
 0x833   :  { %5847 = vmatpush.msrb.mxu2 %v5431_v60  ;;  %6292 = vmatpush.msra.mxu1 %v14458_v35  ;;  %v14465_v60 = vld [vmem:[#allocation10_spill] sm:$0xff] }
 0x834   :  { %5512 = vmatpush.msra.mxu3 %v5511_v62  ;;  %6143 = vmatpush.msra.mxu0 %v14459_v5  ;;  %v6079_v62 = vsel %vm117_vm0, %v14516_v34, 0  ;;  %v14520_v34 = vld [vmem:[#allocation70_spill] sm:$0xff] }
 0x835   :  { %5851 = vmatpush.msrb.mxu2 %v5437_v10  ;;  %5514 = vmatmul.f32.vlgmr.msra.gmra.mxu3 %v14460_v30  ;;  %v14476_v10 = vld [vmem:[#allocation42_spill] sm:$0xff]  ;;  %v12123_v35 = vand.u32 4294901760, %v6079_v62 }
 0x836   :  { %5301 = vmatmul.f32.gmra.mxu2 %v14461_v39  ;;  %5966 = vmatpush.msrb.mxu3 %v11805_v54  ;;  %v14466_v54 = vld [vmem:[#allocation11_spill] sm:$0xff] }
 0x837   :  { %5855 = vmatpush.msrb.mxu2 %v5443_v3  ;;  %6298 = vmatpush.msra.mxu1 %v14462_v19  ;;  %v14479_v3 = vld [vmem:[#allocation44_spill] sm:$0xff]  ;;  %v8034_v19 = vld [vmem:[%s13340_s3 + $0x8] sm:$0xff] }
 0x838   :  { %5968 = vmatpush.msrb.mxu3 %v11773_v15  ;;  %5633 = vmatmul.f32.gmra.mxu0 %v14463_v33  ;;  %v14467_v15 = vld [vmem:[#allocation45_spill] sm:$0xff] }
 0x839   :  { %5859 = vmatpush.msrb.mxu2 %v5449_v6  ;;  %5748 = vmatmul.f32.gmra.mxu1 %v14464_v55  ;;  %v14482_v6 = vld [vmem:[#allocation18_spill] sm:$0xff] }
 0x83a   :  { %5970 = vmatpush.msrb.mxu3 %v11783_v58  ;;  %6597 = vmatpush.msrb.mxu0 %v14465_v60  ;;  %v14469_v58 = vld [vmem:[#allocation34_spill] sm:$0xff] }
 0x83b   :  { %5863 = vmatpush.msrb.mxu2 %v5455_v0  ;;  %6682 = vmatpush.msrb.mxu1 %v14457_v17  ;;  %v14485_v0 = vld [vmem:[#allocation22_spill] sm:$0xff] }
 0x83c   :  { %5972 = vmatpush.msrb.mxu3 %v11790_v47  ;;  %6601 = vmatpush.msrb.mxu0 %v14466_v54  ;;  %v14470_v47 = vld [vmem:[#allocation47_spill] sm:$0xff]  ;;  %v14518_v54 = vld [vmem:[#allocation65_spill] sm:$0xff] }
 0x83d   :  { %5867 = vmatpush.msrb.mxu2 %v5461_v21  ;;  %5518 = vmatmul.f32.gmra.mxu3 %v14467_v15  ;;  %v14488_v21 = vld [vmem:[#allocation31_spill] sm:$0xff] }
 0x83e   :  { %5309 = vmatmul.f32.gmra.mxu2 %v14468_v16  ;;  %5974 = vmatpush.msrb.mxu3 %v11800_v63  ;;  %v14471_v63 = vld [vmem:[#allocation24_spill] sm:$0xff] }
 0x83f   :  { %5871 = vmatpush.msrb.mxu2 %v5467_v42  ;;  %6684 = vmatpush.msrb.mxu1 %v14459_v5  ;;  %v14491_v42 = vld [vmem:[#allocation17_spill] sm:$0xff] }
 0x840   :  { %5976 = vmatpush.msrb.mxu3 %v11811_v31  ;;  %5638 = vmatmul.f32.gmra.mxu0 %v14469_v58  ;;  %v14472_v31 = vld [vmem:[#allocation39_spill] sm:$0xff] }
 0x841   :  { %5875 = vmatpush.msrb.mxu2 %v5473_v22  ;;  %5754 = vmatmul.f32.gmra.mxu1 %v14470_v47  ;;  %v14494_v22 = vld [vmem:[#allocation51_spill] sm:$0xff] }
 0x842   :  { %5978 = vmatpush.msrb.mxu3 %v11826_v50  ;;  %v14473_v50 = vld [vmem:[#allocation30_spill] sm:$0xff] }
 0x843   :  { %5879 = vmatpush.msrb.mxu2 %v5479_v56  ;;  %v14497_v56 = vld [vmem:[#allocation23_spill] sm:$0xff] }
 0x844   :  { %5980 = vmatpush.msrb.mxu3 %v11838_v49  ;;  %v14474_v49 = vld [vmem:[#allocation46_spill] sm:$0xff] }
 0x845   :  { %5883 = vmatpush.msrb.mxu2 %v5485_v1  ;;  %5522 = vmatmul.f32.gmra.mxu3 %v14471_v63  ;;  %v14500_v1 = vld [vmem:[#allocation52_spill] sm:$0xff] }
 0x846   :  { %5317 = vmatmul.f32.gmra.mxu2 %v14472_v31  ;;  %5982 = vmatpush.msrb.mxu3 %v11856_v57  ;;  %v14477_v57 = vld [vmem:[#allocation8_spill] sm:$0xff] }
 0x847   :  { %5887 = vmatpush.msrb.mxu2 %v5491_v4  ;;  %v14502_v4 = vld [vmem:[#allocation59_spill] sm:$0xff] }
 0x848   :  { %5984 = vmatpush.msrb.mxu3 %v11871_v8  ;;  %5643 = vmatmul.f32.gmra.mxu0 %v14473_v50  ;;  %v14480_v8 = vld [vmem:[#allocation9_spill] sm:$0xff] }
 0x849   :  { %5891 = vmatpush.msrb.mxu2 %v5497_v29  ;;  %5760 = vmatmul.f32.gmra.mxu1 %v14474_v49  ;;  %v14505_v29 = vld [vmem:[#allocation53_spill] sm:$0xff] }
 0x84a   :  { %5986 = vmatpush.msrb.mxu3 %v11884_v32  ;;  %v14483_v32 = vld [vmem:[#allocation36_spill] sm:$0xff] }
 0x84b   :  { %5895 = vmatpush.msrb.mxu2 %v5503_v45  ;;  %v14508_v45 = vld [vmem:[#allocation60_spill] sm:$0xff] }
 0x84c   :  { %5988 = vmatpush.msrb.mxu3 %v11898_v12  ;;  %v14486_v12 = vld [vmem:[#allocation27_spill] sm:$0xff] }
 0x84d   :  { %5899 = vmatpush.msrb.mxu2 %v5509_v13  ;;  %5526 = vmatmul.f32.gmra.mxu3 %v14475_v18  ;;  %v14511_v13 = vld [vmem:[#allocation62_spill] sm:$0xff] }
 0x84e   :  { %5325 = vmatmul.f32.gmra.mxu2 %v14476_v10  ;;  %5990 = vmatpush.msrb.mxu3 %v11911_v44  ;;  %v14489_v44 = vld [vmem:[#allocation33_spill] sm:$0xff] }
 0x84f   :  { %6380 = vmatpush.msra.mxu2 %v14477_v57  ;;  %v14519_v57 = vld [vmem:[#allocation75_spill] sm:$0xff] }
 0x850   :  { %5992 = vmatpush.msrb.mxu3 %v11924_v2  ;;  %5648 = vmatmul.f32.gmra.mxu0 %v14478_v51  ;;  %v14492_v2 = vld [vmem:[#allocation35_spill] sm:$0xff] }
 0x851   :  { %5766 = vmatmul.f32.gmra.mxu1 %v14479_v3  ;;  %6383 = vmatpush.msra.mxu2 %v14480_v8  ;;  %v12134_v8 = vsub.f32 %v6079_v62, %v12123_v35 }
 0x852   :  { %5994 = vmatpush.msrb.mxu3 %v11936_v27  ;;  %v14495_v27 = vld [vmem:[#allocation32_spill] sm:$0xff] }
 0x854   :  { %5996 = vmatpush.msrb.mxu3 %v11948_v7  ;;  %v14498_v7 = vld [vmem:[#allocation55_spill] sm:$0xff] }
 0x855   :  { %5530 = vmatmul.f32.gmra.mxu3 %v14481_v23 }
 0x856   :  { %5333 = vmatmul.f32.gmra.mxu2 %v14482_v6  ;;  %6480 = vmatpush.msra.mxu3 %v14457_v17  ;;  %v14517_v17 = vld [vmem:[#allocation68_spill] sm:$0xff] }
 0x858   :  { %5653 = vmatmul.f32.gmra.mxu0 %v14483_v32  ;;  %6482 = vmatpush.msra.mxu3 %v14459_v5  ;;  %v8033_v5 = vld [vmem:[%s13339_s2 + $0x8] sm:$0xff] }
 0x859   :  { %5772 = vmatmul.f32.gmra.mxu1 %v14484_v52  ;;  %v6063_v60 = vmul.f32 %v8034_v19, %v8033_v5  ;;  %v8035_v5 = vld [vmem:[%s13339_s2 + $0x10] sm:$0xff] }
 0x85a   :  { %v8036_v19 = vld [vmem:[%s13340_s3 + $0x10] sm:$0xff] }
 0x85b   :  { %v6064_v62 = vmul.f32 %v8036_v19, %v8035_v5 }
 0x85d   :  { %5534 = vmatmul.f32.gmra.mxu3 %v14485_v0 }
 0x85e   :  { %5341 = vmatmul.f32.gmra.mxu2 %v14486_v12 }
 0x860   :  { %5658 = vmatmul.f32.gmra.mxu0 %v14487_v37 }
 0x861   :  { %5778 = vmatmul.f32.gmra.mxu1 %v14488_v21 }
 0x865   :  { %5538 = vmatmul.f32.gmra.mxu3 %v14489_v44 }
 0x866   :  { %5349 = vmatmul.f32.gmra.mxu2 %v14490_v59 }
 0x868   :  { %5663 = vmatmul.f32.gmra.mxu0 %v14491_v42 }
 0x869   :  { %5784 = vmatmul.f32.gmra.mxu1 %v14492_v2 }
 0x86d   :  { %5542 = vmatmul.f32.gmra.mxu3 %v14493_v36 }
 0x86e   :  { %5357 = vmatmul.f32.gmra.mxu2 %v14494_v22 }
 0x870   :  { %5668 = vmatmul.f32.gmra.mxu0 %v14495_v27 }
 0x871   :  { %5790 = vmatmul.f32.gmra.mxu1 %v14496_v38 }
 0x875   :  { %5546 = vmatmul.f32.gmra.mxu3 %v14497_v56 }
 0x876   :  { %5365 = vmatmul.f32.gmra.mxu2 %v14498_v7 }
 0x878   :  { %5673 = vmatmul.f32.gmra.mxu0 %v14499_v14 }
 0x879   :  { %5796 = vmatmul.f32.gmra.mxu1 %v14500_v1 }
 0x87d   :  { %5550 = vmatmul.f32.gmra.mxu3 %v14501_v9 }
 0x87e   :  { %5373 = vmatmul.f32.gmra.mxu2 %v14502_v4 }
 0x880   :  { %5678 = vmatmul.f32.gmra.mxu0 %v14503_v43 }
 0x881   :  { %5802 = vmatmul.f32.gmra.mxu1 %v14504_v28 }
 0x885   :  { %5554 = vmatmul.f32.gmra.mxu3 %v14505_v29 }
 0x886   :  { %5381 = vmatmul.f32.gmra.mxu2 %v14506_v20 }
 0x888   :  { %5683 = vmatmul.f32.gmra.mxu0 %v14507_v24 }
 0x889   :  { %5808 = vmatmul.f32.gmra.mxu1 %v14508_v45  ;;  %v6085_v45 = vsel %vm117_vm0, %v6064_v62, 0 }
 0x88a   :  { %v12160_v19 = vand.u32 4294901760, %v6085_v45 }
 0x88d   :  { %5558 = vmatmul.f32.gmra.mxu3 %v14509_v48 }
 0x88e   :  { %5389 = vmatmul.f32.gmra.mxu2 %v14510_v25  ;;  %v14525_v25 = vld [vmem:[#allocation76_spill] sm:$0xff] }
 0x890   :  { %5688 = vmatmul.f32.gmra.mxu0 %v14511_v13 }
 0x891   :  { %5814 = vmatmul.f32.gmra.mxu1 %v14512_v53 }
 0x895   :  { %5562 = vmatmul.f32.gmra.mxu3 %v14513_v26 }
 0x896   :  { %5397 = vmatmul.f32.gmra.mxu2 %v14514_v41  ;;  %v13666_v41 = vand.u32 4294901760, %v12134_v8 }
 0x898   :  { %5693 = vmatmul.f32.gmra.mxu0 %v14515_v11  ;;  %v6082_v11 = vsel %vm117_vm0, %v6063_v60, 0  ;;  %v6147_v60 = vsub.f32 %v12134_v8, %v13666_v41  ;;  %v8038_v41 = vld [vmem:[%s13340_s3 + $0x18] sm:$0xff] }
 0x899   :  { %5820 = vmatmul.f32.gmra.mxu1 %v14517_v17  ;;  %v14521_v17 = vld [vmem:[#allocation72_spill] sm:$0xff]  ;;  %v12140_v53 = vand.u32 4294901760, %v6082_v11 }
 0x89a   :  { %v6148_v24 = vand.u32 4294901760, %v6147_v60 }
 0x89b   :  { %v12155_v13 = vsub.f32 %v6082_v11, %v12140_v53  ;;  %v14526_v11 = vld [vmem:[#allocation73_spill] sm:$0xff] }
 0x89d   :  { %5566 = vmatmul.f32.gmra.mxu3 %v14518_v54  ;;  %v13667_v5 = vand.u32 4294901760, %v12155_v13 }
 0x89e   :  { %5405 = vmatmul.f32.gmra.mxu2 %v14519_v57  ;;  %v14522_v57 = vld [vmem:[#allocation69_spill] sm:$0xff] }
 0x89f   :  { %v6155_v60 = vsub.f32 %v12155_v13, %v13667_v5  ;;  %v8040_v5 = vld [vmem:[%s13340_s3 + $0x20] sm:$0xff] }
 0x8a0   :  { %5698 = vmatmul.f32.gmra.mxu0 %v14520_v34  ;;  %v14523_v34 = vld [vmem:[#allocation77_spill] sm:$0xff] }
 0x8a1   :  { %5826 = vmatmul.f32.gmra.mxu1 %v14521_v17  ;;  %v14524_v17 = vld [vmem:[#allocation74_spill] sm:$0xff] }
 0x8a5   :  { %5570 = vmatmul.f32.gmra.mxu3 %v14522_v57 }
 0x8a6   :  { %5413 = vmatmul.f32.gmra.mxu2 %v14523_v34 }
 0x8a8   :  { %5703 = vmatmul.f32.gmra.mxu0 %v14524_v17  ;;  %v8037_v17 = vld [vmem:[%s13339_s2 + $0x18] sm:$0xff] }
 0x8a9   :  { %5832 = vmatmul.f32.gmra.mxu1 %v14525_v25  ;;  %v6065_v34 = vmul.f32 %v8038_v41, %v8037_v17  ;;  %v12174_v25 = vsub.f32 %v6085_v45, %v12160_v19  ;;  %v6156_v41 = vand.u32 4294901760, %v6155_v60 }
 0x8ab   :  { %v6088_v43 = vsel %vm117_vm0, %v6065_v34, 0  ;;  %v13668_v17 = vand.u32 4294901760, %v12174_v25 }
 0x8ac   :  { %v12179_v4 = vand.u32 4294901760, %v6088_v43 }
 0x8ad   :  { %5574 = vmatmul.f32.gmra.mxu3 %v14526_v11  ;;  %v5629_v20 = vpop.f32.mrf.mxu0  ;;  %v6163_v14 = vsub.f32 %v12174_v25, %v13668_v17 }
 0x8ae   :  { %5901 = vmatmul.f32.vlgmr.msrb.gmra.mxu2 %v14460_v30  ;;  %v5743_v62 = vpop.f32.mrf.mxu1  ;;  %v12193_v7 = vsub.f32 %v6088_v43, %v12179_v4  ;;  %v8042_v43 = vld [vmem:[%s13340_s3 + $0x28] sm:$0xff] }
 0x8af   :  { %v6164_v22 = vand.u32 4294901760, %v6163_v14 }
 0x8b0   :  { %6149 = vmatmul.f32.vlgmr.msra.gmra.mxu0 %v6148_v24  ;;  %v8039_v24 = vld [vmem:[%s13339_s2 + $0x20] sm:$0xff]  ;;  %v13669_v2 = vand.u32 4294901760, %v12193_v7 }
 0x8b1   :  { %v5294_v28 = vpop.f32.mrf.mxu2  ;;  %6300 = vmatmul.f32.vlgmr.msra.gmra.mxu1 %v12123_v35  ;;  %v6066_v45 = vmul.f32 %v8040_v5, %v8039_v24 }
 0x8b3   :  { %v6091_v5 = vsel %vm117_vm0, %v6066_v45, 0 }
 0x8b4   :  { %v12198_v42 = vand.u32 4294901760, %v6091_v5 }
 0x8b5   :  { %5998 = vmatmul.f32.vlgmr.msrb.gmra.mxu3 %v14460_v30  ;;  %v5634_v1 = vpop.f32.mrf.mxu0 }
 0x8b6   :  { %5905 = vmatmul.f32.gmra.mxu2 %v14467_v15  ;;  %v5749_v34 = vpop.f32.mrf.mxu1 }
 0x8b8   :  { %v5515_v60 = vpop.f32.mrf.mxu3  ;;  %6157 = vmatmul.f32.gmra.mxu0 %v6156_v41  ;;  %v8041_v41 = vld [vmem:[%s13339_s2 + $0x28] sm:$0xff] }
 0x8b9   :  { %v5302_v38 = vpop.f32.mrf.mxu2  ;;  %v5516_v27 = vadd.f32 %v5515_v60, %v5294_v28  ;;  %6304 = vmatmul.f32.gmra.mxu1 %v12140_v53  ;;  %v6067_v17 = vmul.f32 %v8042_v43, %v8041_v41  ;;  %v12214_v60 = vsub.f32 %v6091_v5, %v12198_v42  ;;  %v8044_v5 = vld [vmem:[%s13340_s3 + $0x30] sm:$0xff] }
 0x8bb   :  { %v5630_v24 = vadd.f32 %v5629_v20, %v5516_v27  ;;  %v6171_v20 = vsub.f32 %v12193_v7, %v13669_v2  ;;  %v13670_v43 = vand.u32 4294901760, %v12214_v60 }
 0x8bd   :  { %v12206_v28 = vadd.f32 %v5743_v62, %v5630_v24  ;;  %6002 = vmatmul.f32.gmra.mxu3 %v14467_v15  ;;  %v5639_v45 = vpop.f32.mrf.mxu0  ;;  %v6094_v62 = vsel %vm117_vm0, %v6067_v17, 0  ;;  %v6172_v41 = vand.u32 4294901760, %v6171_v20 }
 0x8be   :  { %5909 = vmatmul.f32.gmra.mxu2 %v14471_v63  ;;  %v5755_v27 = vpop.f32.mrf.mxu1  ;;  %v12219_v37 = vand.u32 4294901760, %v6094_v62 }
 0x8c0   :  { %v5519_v14 = vpop.f32.mrf.mxu3  ;;  %6165 = vmatmul.f32.gmra.mxu0 %v6164_v22  ;;  %v8043_v22 = vld [vmem:[%s13339_s2 + $0x30] sm:$0xff]  ;;  %v12235_v20 = vsub.f32 %v6094_v62, %v12219_v37  ;;  %v8046_v62 = vld [vmem:[%s13340_s3 + $0x38] sm:$0xff] }
 0x8c1   :  { %v5310_v59 = vpop.f32.mrf.mxu2  ;;  %v5520_v21 = vadd.f32 %v5519_v14, %v5302_v38  ;;  %6308 = vmatmul.f32.gmra.mxu1 %v12160_v19  ;;  %v6068_v2 = vmul.f32 %v8044_v5, %v8043_v22  ;;  %v6179_v14 = vsub.f32 %v12214_v60, %v13670_v43 }
 0x8c2   :  { %v13671_v5 = vand.u32 4294901760, %v12235_v20 }
 0x8c3   :  { %v5635_v24 = vadd.f32 %v5634_v1, %v5520_v21  ;;  %v6180_v22 = vand.u32 4294901760, %v6179_v14 }
 0x8c5   :  { %v12227_v38 = vadd.f32 %v5749_v34, %v5635_v24  ;;  %6006 = vmatmul.f32.gmra.mxu3 %v14471_v63  ;;  %v5644_v17 = vpop.f32.mrf.mxu0  ;;  %v6097_v34 = vsel %vm117_vm0, %v6068_v2, 0 }
 0x8c6   :  { %5913 = vmatmul.f32.gmra.mxu2 %v14475_v18  ;;  %v5761_v21 = vpop.f32.mrf.mxu1  ;;  %v12240_v32 = vand.u32 4294901760, %v6097_v34 }
 0x8c8   :  { %v5523_v1 = vpop.f32.mrf.mxu3  ;;  %6173 = vmatmul.f32.gmra.mxu0 %v6172_v41  ;;  %v8045_v41 = vld [vmem:[%s13339_s2 + $0x38] sm:$0xff]  ;;  %v12256_v14 = vsub.f32 %v6097_v34, %v12240_v32  ;;  %v8048_v34 = vld [vmem:[%s13340_s3 + $0x40] sm:$0xff] }
 0x8c9   :  { %v5318_v12 = vpop.f32.mrf.mxu2  ;;  %v5524_v52 = vadd.f32 %v5523_v1, %v5310_v59  ;;  %6312 = vmatmul.f32.gmra.mxu1 %v12179_v4  ;;  %v6069_v43 = vmul.f32 %v8046_v62, %v8045_v41  ;;  %v6187_v1 = vsub.f32 %v12235_v20, %v13671_v5 }
 0x8ca   :  { %v13674_v62 = vand.u32 4294901760, %v12256_v14 }
 0x8cb   :  { %v5640_v24 = vadd.f32 %v5639_v45, %v5524_v52  ;;  %v6188_v41 = vand.u32 4294901760, %v6187_v1 }
 0x8cd   :  { %v12248_v59 = vadd.f32 %v5755_v27, %v5640_v24  ;;  %6010 = vmatmul.f32.gmra.mxu3 %v14475_v18  ;;  %v5649_v2 = vpop.f32.mrf.mxu0  ;;  %v6100_v27 = vsel %vm117_vm0, %v6069_v43, 0 }
 0x8ce   :  { %5917 = vmatmul.f32.gmra.mxu2 %v14481_v23  ;;  %v5767_v52 = vpop.f32.mrf.mxu1  ;;  %v12261_v51 = vand.u32 4294901760, %v6100_v27 }
 0x8d0   :  { %v5527_v45 = vpop.f32.mrf.mxu3  ;;  %6181 = vmatmul.f32.gmra.mxu0 %v6180_v22  ;;  %v8047_v22 = vld [vmem:[%s13339_s2 + $0x40] sm:$0xff]  ;;  %v12277_v1 = vsub.f32 %v6100_v27, %v12261_v51  ;;  %v8050_v27 = vld [vmem:[%s13340_s3 + $0x48] sm:$0xff] }
 0x8d1   :  { %v5326_v6 = vpop.f32.mrf.mxu2  ;;  %v5528_v3 = vadd.f32 %v5527_v45, %v5318_v12  ;;  %6316 = vmatmul.f32.gmra.mxu1 %v12198_v42  ;;  %v6070_v5 = vmul.f32 %v8048_v34, %v8047_v22  ;;  %v6195_v45 = vsub.f32 %v12256_v14, %v13674_v62 }
 0x8d2   :  { %v13676_v34 = vand.u32 4294901760, %v12277_v1 }
 0x8d3   :  { %v5645_v24 = vadd.f32 %v5644_v17, %v5528_v3  ;;  %v6196_v22 = vand.u32 4294901760, %v6195_v45 }
 0x8d5   :  { %v12269_v12 = vadd.f32 %v5761_v21, %v5645_v24  ;;  %6014 = vmatmul.f32.gmra.mxu3 %v14481_v23  ;;  %v5654_v43 = vpop.f32.mrf.mxu0  ;;  %v6103_v21 = vsel %vm117_vm0, %v6070_v5, 0 }
 0x8d6   :  { %5921 = vmatmul.f32.gmra.mxu2 %v14485_v0  ;;  %v5773_v3 = vpop.f32.mrf.mxu1  ;;  %v12282_v23 = vand.u32 4294901760, %v6103_v21 }
 0x8d8   :  { %v5531_v17 = vpop.f32.mrf.mxu3  ;;  %6189 = vmatmul.f32.gmra.mxu0 %v6188_v41  ;;  %v8049_v41 = vld [vmem:[%s13339_s2 + $0x48] sm:$0xff]  ;;  %v12298_v45 = vsub.f32 %v6103_v21, %v12282_v23  ;;  %v8052_v21 = vld [vmem:[%s13340_s3 + $0x50] sm:$0xff] }
 0x8d9   :  { %v5334_v10 = vpop.f32.mrf.mxu2  ;;  %v5532_v18 = vadd.f32 %v5531_v17, %v5326_v6  ;;  %6320 = vmatmul.f32.gmra.mxu1 %v12219_v37  ;;  %v6071_v62 = vmul.f32 %v8050_v27, %v8049_v41  ;;  %v6203_v17 = vsub.f32 %v12277_v1, %v13676_v34 }
 0x8da   :  { %v13679_v27 = vand.u32 4294901760, %v12298_v45 }
 0x8db   :  { %v5650_v24 = vadd.f32 %v5649_v2, %v5532_v18  ;;  %v6204_v41 = vand.u32 4294901760, %v6203_v17 }
 0x8dd   :  { %v12290_v6 = vadd.f32 %v5767_v52, %v5650_v24  ;;  %6018 = vmatmul.f32.gmra.mxu3 %v14485_v0  ;;  %v5659_v5 = vpop.f32.mrf.mxu0  ;;  %v6106_v52 = vsel %vm117_vm0, %v6071_v62, 0 }
 0x8de   :  { %5925 = vmatmul.f32.gmra.mxu2 %v14489_v44  ;;  %v5779_v18 = vpop.f32.mrf.mxu1  ;;  %v12303_v0 = vand.u32 4294901760, %v6106_v52 }
 0x8e0   :  { %v5535_v2 = vpop.f32.mrf.mxu3  ;;  %6197 = vmatmul.f32.gmra.mxu0 %v6196_v22  ;;  %v8051_v22 = vld [vmem:[%s13339_s2 + $0x50] sm:$0xff]  ;;  %v12319_v17 = vsub.f32 %v6106_v52, %v12303_v0  ;;  %v8054_v52 = vld [vmem:[%s13340_s3 + $0x58] sm:$0xff] }
 0x8e1   :  { %v5342_v49 = vpop.f32.mrf.mxu2  ;;  %v5536_v50 = vadd.f32 %v5535_v2, %v5334_v10  ;;  %6324 = vmatmul.f32.gmra.mxu1 %v12240_v32  ;;  %v6072_v34 = vmul.f32 %v8052_v21, %v8051_v22  ;;  %v6211_v2 = vsub.f32 %v12298_v45, %v13679_v27 }
 0x8e2   :  { %v13681_v21 = vand.u32 4294901760, %v12319_v17 }
 0x8e3   :  { %v5655_v24 = vadd.f32 %v5654_v43, %v5536_v50  ;;  %v6212_v22 = vand.u32 4294901760, %v6211_v2 }
 0x8e5   :  { %v12311_v10 = vadd.f32 %v5773_v3, %v5655_v24  ;;  %6022 = vmatmul.f32.gmra.mxu3 %v14489_v44  ;;  %v5664_v62 = vpop.f32.mrf.mxu0  ;;  %v6109_v3 = vsel %vm117_vm0, %v6072_v34, 0 }
 0x8e6   :  { %5929 = vmatmul.f32.gmra.mxu2 %v14493_v36  ;;  %v5785_v50 = vpop.f32.mrf.mxu1  ;;  %v12324_v44 = vand.u32 4294901760, %v6109_v3 }
 0x8e8   :  { %v5539_v43 = vpop.f32.mrf.mxu3  ;;  %6205 = vmatmul.f32.gmra.mxu0 %v6204_v41  ;;  %v8053_v41 = vld [vmem:[%s13339_s2 + $0x58] sm:$0xff]  ;;  %v12340_v2 = vsub.f32 %v6109_v3, %v12324_v44  ;;  %v8056_v3 = vld [vmem:[%s13340_s3 + $0x60] sm:$0xff] }
 0x8e9   :  { %v5350_v31 = vpop.f32.mrf.mxu2  ;;  %v5540_v63 = vadd.f32 %v5539_v43, %v5342_v49  ;;  %6328 = vmatmul.f32.gmra.mxu1 %v12261_v51  ;;  %v6073_v27 = vmul.f32 %v8054_v52, %v8053_v41  ;;  %v6219_v43 = vsub.f32 %v12319_v17, %v13681_v21 }
 0x8ea   :  { %v13684_v52 = vand.u32 4294901760, %v12340_v2 }
 0x8eb   :  { %v5660_v24 = vadd.f32 %v5659_v5, %v5540_v63  ;;  %v6220_v41 = vand.u32 4294901760, %v6219_v43 }
 0x8ed   :  { %v12332_v49 = vadd.f32 %v5779_v18, %v5660_v24  ;;  %6026 = vmatmul.f32.gmra.mxu3 %v14493_v36  ;;  %v5669_v34 = vpop.f32.mrf.mxu0  ;;  %v6112_v18 = vsel %vm117_vm0, %v6073_v27, 0 }
 0x8ee   :  { %5933 = vmatmul.f32.gmra.mxu2 %v14497_v56  ;;  %v5791_v63 = vpop.f32.mrf.mxu1  ;;  %v12345_v36 = vand.u32 4294901760, %v6112_v18 }
 0x8f0   :  { %v5543_v5 = vpop.f32.mrf.mxu3  ;;  %6213 = vmatmul.f32.gmra.mxu0 %v6212_v22  ;;  %v8055_v22 = vld [vmem:[%s13339_s2 + $0x60] sm:$0xff]  ;;  %v12361_v43 = vsub.f32 %v6112_v18, %v12345_v36  ;;  %v8058_v18 = vld [vmem:[%s13340_s3 + $0x68] sm:$0xff] }
 0x8f1   :  { %v5358_v47 = vpop.f32.mrf.mxu2  ;;  %v5544_v58 = vadd.f32 %v5543_v5, %v5350_v31  ;;  %6332 = vmatmul.f32.gmra.mxu1 %v12282_v23  ;;  %v6074_v21 = vmul.f32 %v8056_v3, %v8055_v22  ;;  %v6227_v5 = vsub.f32 %v12340_v2, %v13684_v52 }
 0x8f2   :  { %v13686_v3 = vand.u32 4294901760, %v12361_v43 }
 0x8f3   :  { %v5665_v24 = vadd.f32 %v5664_v62, %v5544_v58  ;;  %v6228_v22 = vand.u32 4294901760, %v6227_v5 }
 0x8f5   :  { %v12353_v31 = vadd.f32 %v5785_v50, %v5665_v24  ;;  %6030 = vmatmul.f32.gmra.mxu3 %v14497_v56  ;;  %v5674_v27 = vpop.f32.mrf.mxu0  ;;  %v6115_v50 = vsel %vm117_vm0, %v6074_v21, 0 }
 0x8f6   :  { %5937 = vmatmul.f32.gmra.mxu2 %v14501_v9  ;;  %v5797_v58 = vpop.f32.mrf.mxu1  ;;  %v12366_v56 = vand.u32 4294901760, %v6115_v50 }
 0x8f8   :  { %v5547_v62 = vpop.f32.mrf.mxu3  ;;  %6221 = vmatmul.f32.gmra.mxu0 %v6220_v41  ;;  %v8057_v41 = vld [vmem:[%s13339_s2 + $0x68] sm:$0xff]  ;;  %v12382_v5 = vsub.f32 %v6115_v50, %v12366_v56  ;;  %v8060_v50 = vld [vmem:[%s13340_s3 + $0x70] sm:$0xff] }
 0x8f9   :  { %v5366_v16 = vpop.f32.mrf.mxu2  ;;  %v5548_v15 = vadd.f32 %v5547_v62, %v5358_v47  ;;  %6336 = vmatmul.f32.gmra.mxu1 %v12303_v0  ;;  %v6075_v52 = vmul.f32 %v8058_v18, %v8057_v41  ;;  %v6235_v62 = vsub.f32 %v12361_v43, %v13686_v3 }
 0x8fa   :  { %v13689_v18 = vand.u32 4294901760, %v12382_v5 }
 0x8fb   :  { %v5670_v24 = vadd.f32 %v5669_v34, %v5548_v15  ;;  %v6236_v41 = vand.u32 4294901760, %v6235_v62 }
 0x8fd   :  { %v12374_v47 = vadd.f32 %v5791_v63, %v5670_v24  ;;  %6034 = vmatmul.f32.gmra.mxu3 %v14501_v9  ;;  %v5679_v21 = vpop.f32.mrf.mxu0  ;;  %v6118_v63 = vsel %vm117_vm0, %v6075_v52, 0 }
 0x8fe   :  { %5941 = vmatmul.f32.gmra.mxu2 %v14505_v29  ;;  %v5803_v15 = vpop.f32.mrf.mxu1  ;;  %v12387_v9 = vand.u32 4294901760, %v6118_v63 }
 0x900   :  { %v5551_v34 = vpop.f32.mrf.mxu3  ;;  %6229 = vmatmul.f32.gmra.mxu0 %v6228_v22  ;;  %v8059_v22 = vld [vmem:[%s13339_s2 + $0x70] sm:$0xff]  ;;  %v12403_v62 = vsub.f32 %v6118_v63, %v12387_v9  ;;  %v8062_v63 = vld [vmem:[%s13340_s3 + $0x78] sm:$0xff] }
 0x901   :  { %v5374_v55 = vpop.f32.mrf.mxu2  ;;  %v5552_v33 = vadd.f32 %v5551_v34, %v5366_v16  ;;  %6340 = vmatmul.f32.gmra.mxu1 %v12324_v44  ;;  %v6076_v3 = vmul.f32 %v8060_v50, %v8059_v22  ;;  %v6243_v34 = vsub.f32 %v12382_v5, %v13689_v18 }
 0x902   :  { %v13691_v50 = vand.u32 4294901760, %v12403_v62 }
 0x903   :  { %v5675_v24 = vadd.f32 %v5674_v27, %v5552_v33  ;;  %v6244_v22 = vand.u32 4294901760, %v6243_v34 }
 0x905   :  { %v12395_v16 = vadd.f32 %v5797_v58, %v5675_v24  ;;  %6038 = vmatmul.f32.gmra.mxu3 %v14505_v29  ;;  %v5684_v52 = vpop.f32.mrf.mxu0  ;;  %v6121_v58 = vsel %vm117_vm0, %v6076_v3, 0 }
 0x906   :  { %5945 = vmatmul.f32.gmra.mxu2 %v14509_v48  ;;  %v5809_v33 = vpop.f32.mrf.mxu1  ;;  %v12408_v29 = vand.u32 4294901760, %v6121_v58 }
 0x908   :  { %v5555_v27 = vpop.f32.mrf.mxu3  ;;  %6237 = vmatmul.f32.gmra.mxu0 %v6236_v41  ;;  %v8061_v41 = vld [vmem:[%s13339_s2 + $0x78] sm:$0xff]  ;;  %v12424_v34 = vsub.f32 %v6121_v58, %v12408_v29  ;;  %s8089_s2 = smov [#allocation2]  }
 0x909   :  { %v5382_v39 = vpop.f32.mrf.mxu2  ;;  %v5556_v30 = vadd.f32 %v5555_v27, %v5374_v55  ;;  %6344 = vmatmul.f32.gmra.mxu1 %v12345_v36  ;;  %v6077_v18 = vmul.f32 %v8062_v63, %v8061_v41  ;;  %v6251_v27 = vsub.f32 %v12403_v62, %v13691_v50  ;;  %s7941_s3 = sshll.u32 %s8089_s2, 4  ;;  %s7942_s3 = int_to_ptr.vmem [resolvable:$true] %s7941_s3 }
 0x90a   :  { %14527 = vst [vmem:[#allocation106_spill] sm:$0xff] %v12424_v34  ;;  %v13693_v63 = vand.u32 4294901760, %v12424_v34 }
 0x90b   :  { %v5680_v24 = vadd.f32 %v5679_v21, %v5556_v30  ;;  %v6252_v41 = vand.u32 4294901760, %v6251_v27 }
 0x90d   :  { %v12416_v55 = vadd.f32 %v5803_v15, %v5680_v24  ;;  %6042 = vmatmul.f32.gmra.mxu3 %v14509_v48  ;;  %v5689_v3 = vpop.f32.mrf.mxu0  ;;  %v6124_v15 = vsel %vm117_vm0, %v6077_v18, 0 }
 0x90e   :  { %5949 = vmatmul.f32.gmra.mxu2 %v14513_v26  ;;  %v5815_v30 = vpop.f32.mrf.mxu1  ;;  %v12429_v48 = vand.u32 4294901760, %v6124_v15 }
 0x910   :  { %v5559_v21 = vpop.f32.mrf.mxu3  ;;  %6245 = vmatmul.f32.gmra.mxu0 %v6244_v22 }
 0x911   :  { %v5390_v61 = vpop.f32.mrf.mxu2  ;;  %v5560_v46 = vadd.f32 %v5559_v21, %v5382_v39  ;;  %6348 = vmatmul.f32.gmra.mxu1 %v12366_v56  ;;  %v6259_v39 = vsub.f32 %v12424_v34, %v13693_v63 }
 0x913   :  { %v5685_v24 = vadd.f32 %v5684_v52, %v5560_v46  ;;  %v12439_v46 = vsub.f32 %v6124_v15, %v12429_v48  ;;  %v6260_v21 = vand.u32 4294901760, %v6259_v39 }
 0x915   :  { %v12431_v22 = vadd.f32 %v5809_v33, %v5685_v24  ;;  %6046 = vmatmul.f32.gmra.mxu3 %v14513_v26  ;;  %v5694_v50 = vpop.f32.mrf.mxu0  ;;  %v13697_v27 = vand.u32 4294901760, %v12439_v46 }
 0x916   :  { %5953 = vmatmul.f32.gmra.mxu2 %v14518_v54  ;;  %v5821_v58 = vpop.f32.mrf.mxu1 }
 0x918   :  { %v5563_v40 = vpop.f32.mrf.mxu3  ;;  %6253 = vmatmul.f32.gmra.mxu0 %v6252_v41 }
 0x919   :  { %v5398_v18 = vpop.f32.mrf.mxu2  ;;  %v5564_v52 = vadd.f32 %v5563_v40, %v5390_v61  ;;  %6352 = vmatmul.f32.gmra.mxu1 %v12387_v9  ;;  %v6267_v40 = vsub.f32 %v12439_v46, %v13697_v27 }
 0x91b   :  { %v5690_v33 = vadd.f32 %v5689_v3, %v5564_v52  ;;  %v6268_v39 = vand.u32 4294901760, %v6267_v40 }
 0x91d   :  { %v12443_v24 = vadd.f32 %v5815_v30, %v5690_v33  ;;  %6050 = vmatmul.f32.gmra.mxu3 %v14518_v54  ;;  %v5699_v41 = vpop.f32.mrf.mxu0 }
 0x91e   :  { %5957 = vmatmul.f32.gmra.mxu2 %v14522_v57  ;;  %v5827_v26 = vpop.f32.mrf.mxu1 }
 0x920   :  { %v5567_v63 = vpop.f32.mrf.mxu3  ;;  %6261 = vmatmul.f32.gmra.mxu0 %v6260_v21 }
 0x921   :  { %v5406_v61 = vpop.f32.mrf.mxu2  ;;  %v5568_v15 = vadd.f32 %v5567_v63, %v5398_v18  ;;  %6356 = vmatmul.f32.gmra.mxu1 %v12408_v29 }
 0x923   :  { %v5695_v3 = vadd.f32 %v5694_v50, %v5568_v15 }
 0x925   :  { %v12451_v30 = vadd.f32 %v5821_v58, %v5695_v3  ;;  %6054 = vmatmul.f32.gmra.mxu3 %v14522_v57  ;;  %v5704_v52 = vpop.f32.mrf.mxu0 }
 0x926   :  { %5961 = vmatmul.f32.gmra.mxu2 %v14526_v11  ;;  %v5833_v33 = vpop.f32.mrf.mxu1 }
 0x928   :  { %v5571_v54 = vpop.f32.mrf.mxu3  ;;  %6269 = vmatmul.f32.gmra.mxu0 %v6268_v39 }
 0x929   :  { %v5414_v21 = vpop.f32.mrf.mxu2  ;;  %v5572_v34 = vadd.f32 %v5571_v54, %v5406_v61  ;;  %6360 = vmatmul.f32.gmra.mxu1 %v12429_v48 }
 0x92b   :  { %v5700_v27 = vadd.f32 %v5699_v41, %v5572_v34 }
 0x92d   :  { %v12456_v63 = vadd.f32 %v5827_v26, %v5700_v27  ;;  %6058 = vmatmul.f32.gmra.mxu3 %v14526_v11  ;;  %v12459_v50 = vpop.f32.mrf.mxu0  ;;  %v14528_v27 = vand.u32 4294901760, %v12134_v8 }
 0x92e   :  { %6386 = vmatmul.f32.vlgmr.msra.gmra.mxu2 %v12134_v8  ;;  %v12462_v58 = vpop.f32.mrf.mxu1  ;;  %v14531_v8 = vld [vmem:[#allocation137_spill] sm:$0xff] }
 0x930   :  { %v5575_v18 = vpop.f32.mrf.mxu3  ;;  %6603 = vmatmul.f32.vlgmr.msrb.gmra.mxu0 %v12123_v35 }
 0x931   :  { %v5576_v40 = vadd.f32 %v5575_v18, %v5414_v21  ;;  %v5902_v15 = vpop.f32.mrf.mxu2  ;;  %6686 = vmatmul.f32.vlgmr.msrb.gmra.mxu1 %v12123_v35 }
 0x932   :  { %v5903_v54 = vadd.f32 %v5902_v15, %v12206_v28  ;;  %v14529_v28 = vld [vmem:[#allocation143_spill] sm:$0xff]  ;;  %v14533_v15 = vand.u32 4294901760, %v12155_v13 }
 0x933   :  { %v5705_v34 = vadd.f32 %v5704_v52, %v5576_v40 }
 0x935   :  { %v12467_v26 = vadd.f32 %v5833_v33, %v5705_v34  ;;  %6486 = vmatmul.f32.vlgmr.msra.gmra.mxu3 %v14528_v27  ;;  %v12471_v41 = vpop.f32.mrf.mxu0  ;;  %v14530_v33 = vld [vmem:[#allocation169_spill] sm:$0xff] }
 0x936   :  { %6391 = vmatmul.f32.gmra.mxu2 %v12155_v13  ;;  %v12474_v61 = vpop.f32.mrf.mxu1  ;;  %v14532_v18 = vsub.f32 %v14530_v33, %v14531_v8  ;;  %v14537_v33 = vld [vmem:[#allocation175_spill] sm:$0xff]  ;;  %v14538_v8 = vld [vmem:[#allocation113_spill] sm:$0xff] }
 0x938   :  { %v5999_v3 = vpop.f32.mrf.mxu3  ;;  %6607 = vmatmul.f32.gmra.mxu0 %v12140_v53 }
 0x939   :  { %v5906_v39 = vpop.f32.mrf.mxu2  ;;  %v6000_v21 = vadd.f32 %v5999_v3, %v5903_v54  ;;  %6690 = vmatmul.f32.gmra.mxu1 %v12140_v53  ;;  %v14534_v54 = vld [vmem:[#allocation147_spill] sm:$0xff] }
 0x93a   :  { %v5907_v35 = vadd.f32 %v5906_v39, %v12227_v38  ;;  %v7748_v3 = vadd.f32 0.0001, %v14534_v54  ;;  %v14540_v54 = vand.u32 4294901760, %v12174_v25 }
 0x93b   :  { %v7620_v52 = vsub.f32 %v6000_v21, %v14529_v28  ;;  %v14536_v28 = vld [vmem:[#allocation133_spill] sm:$0xff] }
 0x93d   :  { %v7764_v40 = vadd.f32 %v7620_v52, %v14532_v18  ;;  %6492 = vmatmul.f32.gmra.mxu3 %v14533_v15  ;;  %v12485_v34 = vpop.f32.mrf.mxu0  ;;  %v14539_v18 = vsub.f32 %v14537_v33, %v14538_v8  ;;  %v14544_v33 = vld [vmem:[#allocation176_spill] sm:$0xff]  ;;  %v14545_v8 = vld [vmem:[#allocation146_spill] sm:$0xff] }
 0x93e   :  { %6396 = vmatmul.f32.gmra.mxu2 %v12174_v25  ;;  %v12488_v27 = vpop.f32.mrf.mxu1 }
 0x93f   :  { %v7780_v53 = vadd.f32 0.0009, %v7764_v40 }
 0x940   :  { %v6003_v11 = vpop.f32.mrf.mxu3  ;;  %6611 = vmatmul.f32.gmra.mxu0 %v12160_v19 }
 0x941   :  { %v12492_v38 = vmul.f32 %v7780_v53, %v7748_v3  ;;  %v5910_v39 = vpop.f32.mrf.mxu2  ;;  %v6004_v21 = vadd.f32 %v6003_v11, %v5907_v35  ;;  %6694 = vmatmul.f32.gmra.mxu1 %v12160_v19  ;;  %v14541_v11 = vld [vmem:[#allocation141_spill] sm:$0xff] }
 0x942   :  { %v5911_v13 = vadd.f32 %v5910_v39, %v12248_v59  ;;  %v7749_v35 = vadd.f32 0.0001, %v14541_v11  ;;  %v14547_v11 = vand.u32 4294901760, %v12193_v7 }
 0x943   :  { %14535 = vst [vmem:[#allocation185_spill] sm:$0xff] %v12492_v38  ;;  %v7621_v52 = vsub.f32 %v6004_v21, %v14536_v28  ;;  %v14543_v28 = vld [vmem:[#allocation117_spill] sm:$0xff] }
 0x945   :  { %v7765_v15 = vadd.f32 %v7621_v52, %v14539_v18  ;;  %6498 = vmatmul.f32.gmra.mxu3 %v14540_v54  ;;  %v12502_v40 = vpop.f32.mrf.mxu0  ;;  %v14546_v18 = vsub.f32 %v14544_v33, %v14545_v8  ;;  %v14552_v33 = vld [vmem:[#allocation179_spill] sm:$0xff]  ;;  %v14553_v8 = vld [vmem:[#allocation138_spill] sm:$0xff] }
 0x946   :  { %6401 = vmatmul.f32.gmra.mxu2 %v12193_v7  ;;  %v12505_v3 = vpop.f32.mrf.mxu1 }
 0x947   :  { %v7781_v19 = vadd.f32 0.0009, %v7765_v15 }
 0x948   :  { %v6007_v53 = vpop.f32.mrf.mxu3  ;;  %6615 = vmatmul.f32.gmra.mxu0 %v12179_v4 }
 0x949   :  { %v12509_v59 = vmul.f32 %v7781_v19, %v7749_v35  ;;  %v5914_v39 = vpop.f32.mrf.mxu2  ;;  %v6008_v21 = vadd.f32 %v6007_v53, %v5911_v13  ;;  %6698 = vmatmul.f32.gmra.mxu1 %v12179_v4  ;;  %v14549_v13 = vld [vmem:[#allocation136_spill] sm:$0xff] }
 0x94a   :  { %v5915_v25 = vadd.f32 %v5914_v39, %v12269_v12  ;;  %v7750_v19 = vadd.f32 0.0001, %v14549_v13  ;;  %v14555_v13 = vand.u32 4294901760, %v12214_v60 }
 0x94b   :  { %14542 = vst [vmem:[#allocation191_spill] sm:$0xff] %v12509_v59  ;;  %v7622_v52 = vsub.f32 %v6008_v21, %v14543_v28  ;;  %v14551_v28 = vld [vmem:[#allocation145_spill] sm:$0xff] }
 0x94d   :  { %v7766_v54 = vadd.f32 %v7622_v52, %v14546_v18  ;;  %6504 = vmatmul.f32.gmra.mxu3 %v14547_v11  ;;  %v12519_v15 = vpop.f32.mrf.mxu0  ;;  %v14554_v18 = vsub.f32 %v14552_v33, %v14553_v8  ;;  %v14559_v33 = vld [vmem:[#allocation165_spill] sm:$0xff]  ;;  %v14560_v8 = vld [vmem:[#allocation142_spill] sm:$0xff] }
 0x94e   :  { %6406 = vmatmul.f32.gmra.mxu2 %v12214_v60  ;;  %v12522_v35 = vpop.f32.mrf.mxu1 }
 0x94f   :  { %14548 = vst [vmem:[#allocation192_spill] sm:$0xff] %v12522_v35  ;;  %v7782_v4 = vadd.f32 0.0009, %v7766_v54 }
 0x950   :  { %v6011_v53 = vpop.f32.mrf.mxu3  ;;  %6619 = vmatmul.f32.gmra.mxu0 %v12198_v42 }
 0x951   :  { %v12526_v12 = vmul.f32 %v7782_v4, %v7750_v19  ;;  %v5918_v39 = vpop.f32.mrf.mxu2  ;;  %v6012_v21 = vadd.f32 %v6011_v53, %v5915_v25  ;;  %6702 = vmatmul.f32.gmra.mxu1 %v12198_v42  ;;  %v14556_v25 = vld [vmem:[#allocation132_spill] sm:$0xff] }
 0x952   :  { %v5919_v7 = vadd.f32 %v5918_v39, %v12290_v6  ;;  %v7751_v4 = vadd.f32 0.0001, %v14556_v25  ;;  %v14562_v25 = vand.u32 4294901760, %v12235_v20 }
 0x953   :  { %14550 = vst [vmem:[#allocation195_spill] sm:$0xff] %v12526_v12  ;;  %v7623_v52 = vsub.f32 %v6012_v21, %v14551_v28  ;;  %v14558_v28 = vld [vmem:[#allocation121_spill] sm:$0xff] }
 0x955   :  { %v7767_v11 = vadd.f32 %v7623_v52, %v14554_v18  ;;  %6510 = vmatmul.f32.gmra.mxu3 %v14555_v13  ;;  %v12536_v54 = vpop.f32.mrf.mxu0  ;;  %v14561_v18 = vsub.f32 %v14559_v33, %v14560_v8  ;;  %v14566_v33 = vld [vmem:[#allocation172_spill] sm:$0xff]  ;;  %v14567_v8 = vld [vmem:[#allocation139_spill] sm:$0xff] }
 0x956   :  { %6411 = vmatmul.f32.gmra.mxu2 %v12235_v20  ;;  %v12539_v19 = vpop.f32.mrf.mxu1 }
 0x957   :  { %v7783_v42 = vadd.f32 0.0009, %v7767_v11 }
 0x958   :  { %v6015_v53 = vpop.f32.mrf.mxu3  ;;  %6623 = vmatmul.f32.gmra.mxu0 %v12219_v37 }
 0x959   :  { %v12543_v6 = vmul.f32 %v7783_v42, %v7751_v4  ;;  %v5922_v39 = vpop.f32.mrf.mxu2  ;;  %v6016_v21 = vadd.f32 %v6015_v53, %v5919_v7  ;;  %6706 = vmatmul.f32.gmra.mxu1 %v12219_v37  ;;  %v14563_v7 = vld [vmem:[#allocation130_spill] sm:$0xff] }
 0x95a   :  { %v5923_v60 = vadd.f32 %v5922_v39, %v12311_v10  ;;  %v7752_v42 = vadd.f32 0.0001, %v14563_v7  ;;  %v14569_v7 = vand.u32 4294901760, %v12256_v14 }
 0x95b   :  { %14557 = vst [vmem:[#allocation160_spill] sm:$0xff] %v12543_v6  ;;  %v7624_v52 = vsub.f32 %v6016_v21, %v14558_v28  ;;  %v14565_v28 = vld [vmem:[#allocation124_spill] sm:$0xff] }
 0x95d   :  { %v7768_v13 = vadd.f32 %v7624_v52, %v14561_v18  ;;  %6516 = vmatmul.f32.gmra.mxu3 %v14562_v25  ;;  %v12553_v11 = vpop.f32.mrf.mxu0  ;;  %v14568_v18 = vsub.f32 %v14566_v33, %v14567_v8  ;;  %v14573_v33 = vld [vmem:[#allocation173_spill] sm:$0xff]  ;;  %v14574_v8 = vld [vmem:[#allocation120_spill] sm:$0xff] }
 0x95e   :  { %6416 = vmatmul.f32.gmra.mxu2 %v12256_v14  ;;  %v12556_v4 = vpop.f32.mrf.mxu1 }
 0x95f   :  { %v7784_v37 = vadd.f32 0.0009, %v7768_v13 }
 0x960   :  { %v6019_v53 = vpop.f32.mrf.mxu3  ;;  %6627 = vmatmul.f32.gmra.mxu0 %v12240_v32 }
 0x961   :  { %v12560_v10 = vmul.f32 %v7784_v37, %v7752_v42  ;;  %v5926_v39 = vpop.f32.mrf.mxu2  ;;  %v6020_v21 = vadd.f32 %v6019_v53, %v5923_v60  ;;  %6710 = vmatmul.f32.gmra.mxu1 %v12240_v32  ;;  %v14570_v60 = vld [vmem:[#allocation135_spill] sm:$0xff] }
 0x962   :  { %v5927_v20 = vadd.f32 %v5926_v39, %v12332_v49  ;;  %v7753_v37 = vadd.f32 0.0001, %v14570_v60  ;;  %v14576_v60 = vand.u32 4294901760, %v12277_v1 }
 0x963   :  { %14564 = vst [vmem:[#allocation181_spill] sm:$0xff] %v12560_v10  ;;  %v7625_v52 = vsub.f32 %v6020_v21, %v14565_v28  ;;  %v14572_v28 = vld [vmem:[#allocation122_spill] sm:$0xff] }
 0x965   :  { %v7769_v25 = vadd.f32 %v7625_v52, %v14568_v18  ;;  %6522 = vmatmul.f32.gmra.mxu3 %v14569_v7  ;;  %v12570_v13 = vpop.f32.mrf.mxu0  ;;  %v14575_v18 = vsub.f32 %v14573_v33, %v14574_v8  ;;  %v14581_v33 = vld [vmem:[#allocation118_spill] sm:$0xff] }
 0x966   :  { %6421 = vmatmul.f32.gmra.mxu2 %v12277_v1  ;;  %v12573_v42 = vpop.f32.mrf.mxu1  ;;  %v14579_v1 = vld [vmem:[#allocation127_spill] sm:$0xff] }
 0x967   :  { %v7785_v32 = vadd.f32 0.0009, %v7769_v25 }
 0x968   :  { %v6023_v53 = vpop.f32.mrf.mxu3  ;;  %6631 = vmatmul.f32.gmra.mxu0 %v12261_v51 }
 0x969   :  { %v12577_v49 = vmul.f32 %v7785_v32, %v7753_v37  ;;  %v5930_v39 = vpop.f32.mrf.mxu2  ;;  %v6024_v21 = vadd.f32 %v6023_v53, %v5927_v20  ;;  %6714 = vmatmul.f32.gmra.mxu1 %v12261_v51  ;;  %v14577_v20 = vld [vmem:[#allocation116_spill] sm:$0xff] }
 0x96a   :  { %v5931_v14 = vadd.f32 %v5930_v39, %v12353_v31  ;;  %v7754_v32 = vadd.f32 0.0001, %v14577_v20 }
 0x96b   :  { %14571 = vst [vmem:[#allocation188_spill] sm:$0xff] %v12577_v49  ;;  %v7626_v52 = vsub.f32 %v6024_v21, %v14572_v28 }
 0x96d   :  { %v7770_v7 = vadd.f32 %v7626_v52, %v14575_v18  ;;  %6528 = vmatmul.f32.gmra.mxu3 %v14576_v60  ;;  %v12587_v25 = vpop.f32.mrf.mxu0  ;;  %v14580_v52 = vld [vmem:[#allocation178_spill] sm:$0xff]  ;;  %v14583_v60 = vand.u32 4294901760, %v12298_v45 }
 0x96e   :  { %6426 = vmatmul.f32.gmra.mxu2 %v12298_v45  ;;  %v12590_v37 = vpop.f32.mrf.mxu1  ;;  %v14582_v8 = vsub.f32 %v14580_v52, %v14581_v33  ;;  %v14586_v45 = vld [vmem:[#allocation119_spill] sm:$0xff]  ;;  %v14587_v33 = vld [vmem:[#allocation149_spill] sm:$0xff] }
 0x96f   :  { %v7786_v51 = vadd.f32 0.0009, %v7770_v7 }
 0x970   :  { %v6027_v53 = vpop.f32.mrf.mxu3  ;;  %6635 = vmatmul.f32.gmra.mxu0 %v12282_v23 }
 0x971   :  { %v12594_v31 = vmul.f32 %v7786_v51, %v7754_v32  ;;  %v5934_v39 = vpop.f32.mrf.mxu2  ;;  %v6028_v21 = vadd.f32 %v6027_v53, %v5931_v14  ;;  %6718 = vmatmul.f32.gmra.mxu1 %v12282_v23  ;;  %v14584_v32 = vld [vmem:[#allocation123_spill] sm:$0xff] }
 0x972   :  { %v7755_v51 = vadd.f32 0.0001, %v14584_v32  ;;  %v5935_v14 = vadd.f32 %v5934_v39, %v12374_v47  ;;  %v14590_v32 = vand.u32 4294901760, %v12319_v17 }
 0x973   :  { %14578 = vst [vmem:[#allocation189_spill] sm:$0xff] %v12594_v31  ;;  %v7627_v28 = vsub.f32 %v6028_v21, %v14579_v1 }
 0x975   :  { %v7771_v18 = vadd.f32 %v7627_v28, %v14582_v8  ;;  %6534 = vmatmul.f32.gmra.mxu3 %v14583_v60  ;;  %v12603_v20 = vpop.f32.mrf.mxu0  ;;  %v14588_v8 = vld [vmem:[#allocation110_spill] sm:$0xff] }
 0x976   :  { %6431 = vmatmul.f32.gmra.mxu2 %v12319_v17  ;;  %v12606_v7 = vpop.f32.mrf.mxu1  ;;  %v14589_v60 = vsub.f32 %v14587_v33, %v14588_v8  ;;  %v14593_v17 = vld [vmem:[#allocation87_spill] sm:$0xff]  ;;  %v14594_v33 = vld [vmem:[#allocation161_spill] sm:$0xff]  ;;  %v14595_v8 = vld [vmem:[#allocation86_spill] sm:$0xff] }
 0x977   :  { %v7787_v23 = vadd.f32 0.0009, %v7771_v18  ;;  %v14591_v18 = vld [vmem:[#allocation111_spill] sm:$0xff] }
 0x978   :  { %v6031_v53 = vpop.f32.mrf.mxu3  ;;  %6639 = vmatmul.f32.gmra.mxu0 %v12303_v0 }
 0x979   :  { %v12611_v21 = vmul.f32 %v7787_v23, %v7755_v51  ;;  %v5938_v1 = vpop.f32.mrf.mxu2  ;;  %v6032_v28 = vadd.f32 %v6031_v53, %v5935_v14  ;;  %6722 = vmatmul.f32.gmra.mxu1 %v12303_v0  ;;  %v7756_v51 = vadd.f32 0.0001, %v14591_v18  ;;  %v14597_v18 = vand.u32 4294901760, %v12340_v2 }
 0x97a   :  { %v5939_v14 = vadd.f32 %v5938_v1, %v12395_v16  ;;  %v14598_v1 = vld [vmem:[#allocation89_spill] sm:$0xff] }
 0x97b   :  { %14585 = vst [vmem:[#allocation194_spill] sm:$0xff] %v12611_v21  ;;  %v7628_v52 = vsub.f32 %v6032_v28, %v14586_v45 }
 0x97d   :  { %v7772_v31 = vadd.f32 %v7628_v52, %v14589_v60  ;;  %6540 = vmatmul.f32.gmra.mxu3 %v14590_v32  ;;  %v12620_v47 = vpop.f32.mrf.mxu0  ;;  %v14596_v60 = vsub.f32 %v14594_v33, %v14595_v8  ;;  %v14601_v33 = vld [vmem:[#allocation168_spill] sm:$0xff]  ;;  %v14602_v8 = vld [vmem:[#allocation91_spill] sm:$0xff] }
 0x97e   :  { %6436 = vmatmul.f32.gmra.mxu2 %v12340_v2  ;;  %v12623_v39 = vpop.f32.mrf.mxu1  ;;  %v14600_v2 = vld [vmem:[#allocation92_spill] sm:$0xff] }
 0x97f   :  { %v7788_v0 = vadd.f32 0.0009, %v7772_v31 }
 0x980   :  { %v6035_v23 = vpop.f32.mrf.mxu3  ;;  %6643 = vmatmul.f32.gmra.mxu0 %v12324_v44 }
 0x981   :  { %v12628_v53 = vmul.f32 %v7788_v0, %v7756_v51  ;;  %v5942_v28 = vpop.f32.mrf.mxu2  ;;  %v6036_v45 = vadd.f32 %v6035_v23, %v5939_v14  ;;  %6726 = vmatmul.f32.gmra.mxu1 %v12324_v44  ;;  %v7757_v51 = vadd.f32 0.0001, %v14598_v1  ;;  %v14604_v1 = vand.u32 4294901760, %v12361_v43 }
 0x982   :  { %v5943_v14 = vadd.f32 %v5942_v28, %v12416_v55 }
 0x983   :  { %14592 = vst [vmem:[#allocation158_spill] sm:$0xff] %v12628_v53  ;;  %v7629_v52 = vsub.f32 %v6036_v45, %v14593_v17 }
 0x985   :  { %v7773_v32 = vadd.f32 %v7629_v52, %v14596_v60  ;;  %6546 = vmatmul.f32.gmra.mxu3 %v14597_v18  ;;  %v12637_v16 = vpop.f32.mrf.mxu0  ;;  %v14603_v60 = vsub.f32 %v14601_v33, %v14602_v8  ;;  %v14608_v33 = vld [vmem:[#allocation170_spill] sm:$0xff] }
 0x986   :  { %6441 = vmatmul.f32.gmra.mxu2 %v12361_v43  ;;  %v12640_v31 = vpop.f32.mrf.mxu1  ;;  %v14607_v43 = vld [vmem:[#allocation94_spill] sm:$0xff] }
 0x987   :  { %v7789_v44 = vadd.f32 0.0009, %v7773_v32  ;;  %v14605_v32 = vld [vmem:[#allocation95_spill] sm:$0xff]  ;;  %v14609_v8 = vld [vmem:[#allocation78_spill] sm:$0xff] }
 0x988   :  { %v6039_v0 = vpop.f32.mrf.mxu3  ;;  %6647 = vmatmul.f32.gmra.mxu0 %v12345_v36 }
 0x989   :  { %v12645_v23 = vmul.f32 %v7789_v44, %v7757_v51  ;;  %v5946_v45 = vpop.f32.mrf.mxu2  ;;  %v6040_v17 = vadd.f32 %v6039_v0, %v5943_v14  ;;  %6730 = vmatmul.f32.gmra.mxu1 %v12345_v36  ;;  %v7758_v51 = vadd.f32 0.0001, %v14605_v32  ;;  %v14611_v32 = vand.u32 4294901760, %v12382_v5 }
 0x98a   :  { %v5947_v14 = vadd.f32 %v5946_v45, %v12431_v22 }
 0x98b   :  { %14599 = vst [vmem:[#allocation112_spill] sm:$0xff] %v12645_v23  ;;  %v7630_v52 = vsub.f32 %v6040_v17, %v14600_v2 }
 0x98d   :  { %v7774_v18 = vadd.f32 %v7630_v52, %v14603_v60  ;;  %6552 = vmatmul.f32.gmra.mxu3 %v14604_v1  ;;  %v12654_v55 = vpop.f32.mrf.mxu0  ;;  %v14610_v60 = vsub.f32 %v14608_v33, %v14609_v8  ;;  %v14615_v33 = vld [vmem:[#allocation177_spill] sm:$0xff] }
 0x98e   :  { %6446 = vmatmul.f32.gmra.mxu2 %v12382_v5  ;;  %v12657_v28 = vpop.f32.mrf.mxu1  ;;  %v14614_v5 = vld [vmem:[#allocation98_spill] sm:$0xff]  ;;  %v14616_v8 = vld [vmem:[#allocation97_spill] sm:$0xff] }
 0x98f   :  { %v7790_v36 = vadd.f32 0.0009, %v7774_v18  ;;  %v14612_v18 = vld [vmem:[#allocation79_spill] sm:$0xff] }
 0x990   :  { %v6043_v44 = vpop.f32.mrf.mxu3  ;;  %6651 = vmatmul.f32.gmra.mxu0 %v12366_v56 }
 0x991   :  { %v12662_v0 = vmul.f32 %v7790_v36, %v7758_v51  ;;  %v5950_v17 = vpop.f32.mrf.mxu2  ;;  %v6044_v2 = vadd.f32 %v6043_v44, %v5947_v14  ;;  %6734 = vmatmul.f32.gmra.mxu1 %v12366_v56  ;;  %v7759_v51 = vadd.f32 0.0001, %v14612_v18  ;;  %v14618_v18 = vand.u32 4294901760, %v12403_v62 }
 0x992   :  { %v5951_v14 = vadd.f32 %v5950_v17, %v12443_v24  ;;  %v14619_v17 = vld [vmem:[#allocation106_spill] sm:$0xff] }
 0x993   :  { %14606 = vst [vmem:[#allocation184_spill] sm:$0xff] %v12662_v0  ;;  %v7631_v52 = vsub.f32 %v6044_v2, %v14607_v43 }
 0x995   :  { %v7775_v1 = vadd.f32 %v7631_v52, %v14610_v60  ;;  %6558 = vmatmul.f32.gmra.mxu3 %v14611_v32  ;;  %v12671_v22 = vpop.f32.mrf.mxu0  ;;  %v14617_v60 = vsub.f32 %v14615_v33, %v14616_v8  ;;  %v14623_v8 = vld [vmem:[#allocation157_spill] sm:$0xff] }
 0x996   :  { %6451 = vmatmul.f32.gmra.mxu2 %v12403_v62  ;;  %v12674_v45 = vpop.f32.mrf.mxu1  ;;  %v14622_v62 = vld [vmem:[#allocation81_spill] sm:$0xff] }
 0x997   :  { %v7791_v56 = vadd.f32 0.0009, %v7775_v1 }
 0x998   :  { %v6047_v36 = vpop.f32.mrf.mxu3  ;;  %6655 = vmatmul.f32.gmra.mxu0 %v12387_v9 }
 0x999   :  { %v12679_v44 = vmul.f32 %v7791_v56, %v7759_v51  ;;  %v5954_v2 = vpop.f32.mrf.mxu2  ;;  %v6048_v43 = vadd.f32 %v6047_v36, %v5951_v14  ;;  %6738 = vmatmul.f32.gmra.mxu1 %v12387_v9  ;;  %v14620_v51 = vld [vmem:[#allocation99_spill] sm:$0xff] }
 0x99a   :  { %v7760_v56 = vadd.f32 0.0001, %v14620_v51  ;;  %v5955_v14 = vadd.f32 %v5954_v2, %v12451_v30  ;;  %v14626_v51 = vand.u32 4294901760, %v14619_v17 }
 0x99b   :  { %14613 = vst [vmem:[#allocation186_spill] sm:$0xff] %v12679_v44  ;;  %v7632_v52 = vsub.f32 %v6048_v43, %v14614_v5 }
 0x99d   :  { %v7776_v32 = vadd.f32 %v7632_v52, %v14617_v60  ;;  %6564 = vmatmul.f32.gmra.mxu3 %v14618_v18  ;;  %v12688_v24 = vpop.f32.mrf.mxu0  ;;  %v14624_v60 = vld [vmem:[#allocation100_spill] sm:$0xff] }
 0x99e   :  { %6456 = vmatmul.f32.gmra.mxu2 %v14619_v17  ;;  %v12691_v1 = vpop.f32.mrf.mxu1  ;;  %v14625_v18 = vsub.f32 %v14623_v8, %v14624_v60  ;;  %v14629_v17 = vld [vmem:[#allocation103_spill] sm:$0xff]  ;;  %v14630_v8 = vld [vmem:[#allocation164_spill] sm:$0xff]  ;;  %v14631_v60 = vld [vmem:[#allocation82_spill] sm:$0xff] }
 0x99f   :  { %v7792_v9 = vadd.f32 0.0009, %v7776_v32  ;;  %v14627_v32 = vld [vmem:[#allocation102_spill] sm:$0xff] }
 0x9a0   :  { %v6051_v36 = vpop.f32.mrf.mxu3  ;;  %6659 = vmatmul.f32.gmra.mxu0 %v12408_v29 }
 0x9a1   :  { %v12696_v43 = vmul.f32 %v7792_v9, %v7760_v56  ;;  %v5958_v5 = vpop.f32.mrf.mxu2  ;;  %v6052_v52 = vadd.f32 %v6051_v36, %v5955_v14  ;;  %6742 = vmatmul.f32.gmra.mxu1 %v12408_v29  ;;  %v7761_v56 = vadd.f32 0.0001, %v14627_v32  ;;  %v14633_v32 = vand.u32 4294901760, %v12439_v46 }
 0x9a2   :  { %v5959_v14 = vadd.f32 %v5958_v5, %v12456_v63  ;;  %v14636_v5 = vld [vmem:[#allocation83_spill] sm:$0xff] }
 0x9a3   :  { %14621 = vst [vmem:[#allocation193_spill] sm:$0xff] %v12696_v43  ;;  %v7633_v33 = vsub.f32 %v6052_v52, %v14622_v62 }
 0x9a5   :  { %v7777_v44 = vadd.f32 %v7633_v33, %v14625_v18  ;;  %6570 = vmatmul.f32.gmra.mxu3 %v14626_v51  ;;  %v12705_v30 = vpop.f32.mrf.mxu0  ;;  %v14632_v18 = vsub.f32 %v14630_v8, %v14631_v60  ;;  %v14639_v8 = vld [vmem:[#allocation107_spill] sm:$0xff]  ;;  %v14640_v60 = vld [vmem:[#allocation153_spill] sm:$0xff] }
 0x9a6   :  { %6461 = vmatmul.f32.gmra.mxu2 %v12439_v46  ;;  %v12708_v2 = vpop.f32.mrf.mxu1  ;;  %v14641_v46 = vld [vmem:[#allocation84_spill] sm:$0xff] }
 0x9a7   :  { %v7793_v29 = vadd.f32 0.0009, %v7777_v44 }
 0x9a8   :  { %v6055_v9 = vpop.f32.mrf.mxu3  ;;  %6663 = vmatmul.f32.gmra.mxu0 %v12429_v48 }
 0x9a9   :  { %v12713_v36 = vmul.f32 %v7793_v29, %v7761_v56  ;;  %v5962_v52 = vpop.f32.mrf.mxu2  ;;  %v6056_v62 = vadd.f32 %v6055_v9, %v5959_v14  ;;  %6746 = vmatmul.f32.gmra.mxu1 %v12429_v48  ;;  %v7762_v56 = vadd.f32 0.0001, %v14636_v5  ;;  %v14645_v5 = vld [vmem:[#allocation85_spill] sm:$0xff] }
 0x9aa   :  { %v5963_v29 = vadd.f32 %v5962_v52, %v12467_v26  ;;  %v7763_v0 = vadd.f32 0.0001, %v14645_v5 }
 0x9ab   :  { %14628 = vst [vmem:[#allocation109_spill] sm:$0xff] %v12713_v36  ;;  %v7634_v33 = vsub.f32 %v6056_v62, %v14629_v17 }
 0x9ad   :  { %v7778_v51 = vadd.f32 %v7634_v33, %v14632_v18  ;;  %6576 = vmatmul.f32.gmra.mxu3 %v14633_v32  ;;  %v12722_v63 = vpop.f32.mrf.mxu0  ;;  %v14642_v18 = vsub.f32 %v14640_v60, %v14641_v46 }
 0x9ae   :  { %14634 = vst [vmem:[#allocation180_spill] sm:$0xff] %v12722_v63  ;;  %v12724_v44 = vpop.f32.mrf.mxu1  ;;  %v6334_v63 = vadd.f32 %v12590_v37, %v12587_v25 }
 0x9af   :  { %14635 = vst [vmem:[#allocation182_spill] sm:$0xff] %v12724_v44  ;;  %v7794_v14 = vadd.f32 0.0009, %v7778_v51 }
 0x9b0   :  { %v6059_v9 = vpop.f32.mrf.mxu3 }
 0x9b1   :  { %v12728_v48 = vmul.f32 %v7794_v14, %v7762_v56  ;;  %v6060_v62 = vadd.f32 %v6059_v9, %v5963_v29  ;;  %v12730_v17 = vpop.f32.mrf.mxu2 }
 0x9b2   :  { %14638 = vst [vmem:[#allocation163_spill] sm:$0xff] %v12730_v17 }
 0x9b3   :  { %14637 = vst [vmem:[#allocation190_spill] sm:$0xff] %v12728_v48  ;;  %v7635_v33 = vsub.f32 %v6060_v62, %v14639_v8 }
 0x9b5   :  { %v7779_v32 = vadd.f32 %v7635_v33, %v14642_v18  ;;  %v12736_v36 = vpop.f32.mrf.mxu0 }
 0x9b6   :  { %14643 = vst [vmem:[#allocation151_spill] sm:$0xff] %v12736_v36  ;;  %v12738_v43 = vpop.f32.mrf.mxu1 }
 0x9b7   :  { %14644 = vst [vmem:[#allocation90_spill] sm:$0xff] %v12738_v43  ;;  %v7795_v26 = vadd.f32 0.0009, %v7779_v32 }
 0x9b8   :  { %v12741_v52 = vpop.f32.mrf.mxu3 }
 0x9b9   :  { %14646 = vst [vmem:[#allocation187_spill] sm:$0xff] %v12741_v52  ;;  %v12743_v51 = vmul.f32 %v7795_v26, %v7763_v0  ;;  %v12745_v56 = vpop.f32.mrf.mxu2 }
 0x9ba   :  { %14648 = vst [vmem:[#allocation155_spill] sm:$0xff] %v12745_v56 }
 0x9bb   :  { %14647 = vst [vmem:[#allocation159_spill] sm:$0xff] %v12743_v51 }
 0x9bd   :  { %v12747_v29 = vpop.f32.mrf.mxu0 }
 0x9be   :  { %14649 = vst [vmem:[#allocation183_spill] sm:$0xff] %v12747_v29  ;;  %v12749_v14 = vpop.f32.mrf.mxu1 }
 0x9bf   :  { %14650 = vst [vmem:[#allocation154_spill] sm:$0xff] %v12749_v14 }
 0x9c0   :  { %v12751_v9 = vpop.f32.mrf.mxu3 }
 0x9c1   :  { %14651 = vst [vmem:[#allocation148_spill] sm:$0xff] %v12751_v9  ;;  %v12753_v62 = vpop.f32.mrf.mxu2 }
 0x9c2   :  { %14652 = vst [vmem:[#allocation134_spill] sm:$0xff] %v12753_v62 }
 0x9c5   :  { %v12755_v8 = vpop.f32.mrf.mxu0 }
 0x9c6   :  { %14653 = vst [vmem:[#allocation156_spill] sm:$0xff] %v12755_v8  ;;  %v12757_v33 = vpop.f32.mrf.mxu1 }
 0x9c7   :  { %14654 = vst [vmem:[#allocation167_spill] sm:$0xff] %v12757_v33 }
 0x9c8   :  { %v12759_v60 = vpop.f32.mrf.mxu3 }
 0x9c9   :  { %14655 = vst [vmem:[#allocation105_spill] sm:$0xff] %v12759_v60  ;;  %v12761_v46 = vpop.f32.mrf.mxu2 }
 0x9ca   :  { %14656 = vst [vmem:[#allocation162_spill] sm:$0xff] %v12761_v46 }
 0x9cd   :  { %v12763_v0 = vpop.f32.mrf.mxu0 }
 0x9ce   :  { %14657 = vst [vmem:[#allocation150_spill] sm:$0xff] %v12763_v0  ;;  %v12765_v18 = vpop.f32.mrf.mxu1 }
 0x9cf   :  { %14658 = vst [vmem:[#allocation166_spill] sm:$0xff] %v12765_v18 }
 0x9d0   :  { %v12767_v32 = vpop.f32.mrf.mxu3 }
 0x9d1   :  { %14659 = vst [vmem:[#allocation152_spill] sm:$0xff] %v12767_v32  ;;  %v12769_v5 = vpop.f32.mrf.mxu2 }
 0x9d2   :  { %14660 = vst [vmem:[#allocation171_spill] sm:$0xff] %v12769_v5 }
 0x9d5   :  { %v12771_v26 = vpop.f32.mrf.mxu0 }
 0x9d6   :  { %14661 = vst [vmem:[#allocation174_spill] sm:$0xff] %v12771_v26  ;;  %v12773_v51 = vpop.f32.mrf.mxu1 }
 0x9d7   :  { %14662 = vst [vmem:[#allocation5_spill] sm:$0xff] %v12773_v51 }
 0x9d8   :  { %v12775_v48 = vpop.f32.mrf.mxu3 }
 0x9d9   :  { %14663 = vst [vmem:[#allocation12_spill] sm:$0xff] %v12775_v48  ;;  %v12777_v23 = vpop.f32.mrf.mxu2 }
 0x9da   :  { %14664 = vst [vmem:[#allocation6_spill] sm:$0xff] %v12777_v23  ;;  %v6342_v23 = vadd.f32 %v12623_v39, %v12620_v47 }
 0x9dd   :  { %v12779_v53 = vpop.f32.mrf.mxu0 }
 0x9de   :  { %14665 = vst [vmem:[#allocation13_spill] sm:$0xff] %v12779_v53  ;;  %v12781_v21 = vpop.f32.mrf.mxu1 }
 0x9df   :  { %14666 = vst [vmem:[#allocation10_spill] sm:$0xff] %v12781_v21 }
 0x9e0   :  { %v12783_v49 = vpop.f32.mrf.mxu3 }
 0x9e1   :  { %14667 = vst [vmem:[#allocation11_spill] sm:$0xff] %v12783_v49  ;;  %v12785_v10 = vpop.f32.mrf.mxu2 }
 0x9e5   :  { %v12787_v6 = vpop.f32.mrf.mxu0 }
 0x9e6   :  { %14668 = vst [vmem:[#allocation8_spill] sm:$0xff] %v12787_v6  ;;  %v12789_v12 = vpop.f32.mrf.mxu1  ;;  %v6346_v6 = vadd.f32 %v12640_v31, %v12637_v16 }
 0x9e7   :  { %14669 = vst [vmem:[#allocation9_spill] sm:$0xff] %v12789_v12 }
 0x9e8   :  { %v12791_v59 = vpop.f32.mrf.mxu3 }
 0x9e9   :  { %14670 = vst [vmem:[#allocation7_spill] sm:$0xff] %v12791_v59  ;;  %v12793_v38 = vpop.f32.mrf.mxu2 }
 0x9ed   :  { %v6636_v57 = vpop.f32.mrf.mxu0 }
 0x9ee   :  { %v6719_v44 = vpop.f32.mrf.mxu1 }
 0x9f0   :  { %v12795_v43 = vpop.f32.mrf.mxu3 }
 0x9f1   :  { %v6427_v14 = vpop.f32.mrf.mxu2 }
 0x9f2   :  { %v6428_v18 = vadd.f32 %v6427_v14, %v6334_v63 }
 0x9f5   :  { %v12799_v33 = vpop.f32.mrf.mxu0 }
 0x9f6   :  { %v12801_v36 = vpop.f32.mrf.mxu1 }
 0x9f7   :  { %14671 = vst [vmem:[#allocation143_spill] sm:$0xff] %v12801_v36 }
 0x9f8   :  { %v6535_v29 = vpop.f32.mrf.mxu3 }
 0x9f9   :  { %v6432_v52 = vpop.f32.mrf.mxu2  ;;  %v6536_v51 = vadd.f32 %v6535_v29, %v6428_v18  ;;  %v6358_v18 = vadd.f32 %v12691_v1, %v12688_v24 }
 0x9fb   :  { %v6637_v8 = vadd.f32 %v6636_v57, %v6536_v51  ;;  %v6354_v51 = vadd.f32 %v12674_v45, %v12671_v22 }
 0x9fd   :  { %v12803_v9 = vadd.f32 %v6719_v44, %v6637_v8  ;;  %v6644_v21 = vpop.f32.mrf.mxu0  ;;  %v6350_v8 = vadd.f32 %v12657_v28, %v12654_v55  ;;  %v6338_v55 = vadd.f32 %v12606_v7, %v12603_v20  ;;  %v6326_v20 = vadd.f32 %v12556_v4, %v12553_v11 }
 0x9fe   :  { %v12805_v60 = vpop.f32.mrf.mxu1 }
 0x9ff   :  { %14672 = vst [vmem:[#allocation169_spill] sm:$0xff] %v12803_v9  ;;  %v6433_v31 = vadd.f32 %v6432_v52, %v6338_v55  ;;  %v14685_v55 = vld [vmem:[#allocation12_spill] sm:$0xff] }
 0xa00   :  { %v6541_v0 = vpop.f32.mrf.mxu3  ;;  %14673 = vst [vmem:[#allocation137_spill] sm:$0xff] %v12805_v60 }
 0xa01   :  { %v6437_v12 = vpop.f32.mrf.mxu2 }
 0xa02   :  { %v6438_v28 = vadd.f32 %v6437_v12, %v6342_v23  ;;  %v6302_v12 = vadd.f32 %v12462_v58, %v12459_v50  ;;  %v6322_v50 = vadd.f32 %v12539_v19, %v12536_v54  ;;  %v6418_v58 = vadd.f32 %v12785_v10, %v6326_v20  ;;  %v14676_v54 = vld [vmem:[#allocation7_spill] sm:$0xff] }
 0xa04   :  { %v6524_v19 = vadd.f32 %v14676_v54, %v6418_v58 }
 0xa05   :  { %v6648_v32 = vpop.f32.mrf.mxu0 }
 0xa06   :  { %v6731_v25 = vpop.f32.mrf.mxu1 }
 0xa07   :  { %v14677_v10 = vld [vmem:[#allocation137_spill] sm:$0xff] }
 0xa08   :  { %v6547_v26 = vpop.f32.mrf.mxu3 }
 0xa09   :  { %v6442_v62 = vpop.f32.mrf.mxu2 }
 0xa0a   :  { %v6443_v22 = vadd.f32 %v6442_v62, %v6346_v6  ;;  %v6330_v6 = vadd.f32 %v12573_v42, %v12570_v13 }
 0xa0c   :  { %v6423_v7 = vadd.f32 %v12793_v38, %v6330_v6 }
 0xa0d   :  { %v6652_v48 = vpop.f32.mrf.mxu0 }
 0xa0e   :  { %v6735_v46 = vpop.f32.mrf.mxu1 }
 0xa10   :  { %v6553_v37 = vpop.f32.mrf.mxu3 }
 0xa11   :  { %v6447_v53 = vpop.f32.mrf.mxu2  ;;  %v6554_v24 = vadd.f32 %v6553_v37, %v6443_v22  ;;  %v14684_v22 = vld [vmem:[#allocation162_spill] sm:$0xff] }
 0xa12   :  { %v6448_v49 = vadd.f32 %v6447_v53, %v6350_v8  ;;  %v6362_v53 = vadd.f32 %v12708_v2, %v12705_v30  ;;  %v14683_v8 = vld [vmem:[#allocation155_spill] sm:$0xff] }
 0xa13   :  { %v6649_v47 = vadd.f32 %v6648_v32, %v6554_v24  ;;  %v14679_v32 = vld [vmem:[#allocation171_spill] sm:$0xff]  ;;  %v14686_v24 = vld [vmem:[#allocation13_spill] sm:$0xff] }
 0xa15   :  { %v6656_v56 = vpop.f32.mrf.mxu0  ;;  %v6732_v11 = vadd.f32 %v6731_v25, %v6649_v47  ;;  %v14682_v25 = vld [vmem:[#allocation143_spill] sm:$0xff] }
 0xa16   :  { %v6739_v29 = vpop.f32.mrf.mxu1 }
 0xa18   :  { %v6559_v63 = vpop.f32.mrf.mxu3 }
 0xa19   :  { %v6452_v14 = vpop.f32.mrf.mxu2  ;;  %v6560_v45 = vadd.f32 %v6559_v63, %v6448_v49  ;;  %v6542_v49 = vadd.f32 %v6541_v0, %v6433_v31  ;;  %v12858_v63 = vand.u32 4294901760, %v6732_v11 }
 0xa1a   :  { %v6453_v9 = vadd.f32 %v6452_v14, %v6354_v51 }
 0xa1b   :  { %v6641_v38 = vadd.f32 %v12799_v33, %v6542_v49  ;;  %v14689_v49 = vld [vmem:[#allocation174_spill] sm:$0xff] }
 0xa1d   :  { %v6660_v36 = vpop.f32.mrf.mxu0  ;;  %v6724_v37 = vadd.f32 %v14682_v25, %v6641_v38 }
 0xa1e   :  { %v6743_v59 = vpop.f32.mrf.mxu1 }
 0xa20   :  { %v6565_v57 = vpop.f32.mrf.mxu3 }
 0xa21   :  { %v6457_v44 = vpop.f32.mrf.mxu2  ;;  %v6566_v17 = vadd.f32 %v6565_v57, %v6453_v9  ;;  %v6548_v9 = vadd.f32 %v6547_v26, %v6438_v28  ;;  %v6653_v57 = vadd.f32 %v6652_v48, %v6560_v45  ;;  %v6314_v48 = vadd.f32 %v12505_v3, %v12502_v40  ;;  %v14680_v40 = vld [vmem:[#allocation11_spill] sm:$0xff]  ;;  %v14681_v26 = vld [vmem:[#allocation8_spill] sm:$0xff] }
 0xa22   :  { %v6458_v5 = vadd.f32 %v6457_v44, %v6358_v18 }
 0xa23   :  { %v6657_v1 = vadd.f32 %v6656_v56, %v6566_v17  ;;  %v6645_v30 = vadd.f32 %v6644_v21, %v6548_v9  ;;  %v6736_v2 = vadd.f32 %v6735_v46, %v6653_v57  ;;  %v14674_v17 = vld [vmem:[#allocation192_spill] sm:$0xff]  ;;  %v14678_v46 = vld [vmem:[#allocation163_spill] sm:$0xff]  ;;  %v6403_v45 = vadd.f32 %v14684_v22, %v6314_v48  ;;  %v14687_v9 = vld [vmem:[#allocation134_spill] sm:$0xff] }
 0xa24   :  { %v6388_v0 = vadd.f32 %v14678_v46, %v6302_v12  ;;  %v12884_v12 = vand.u32 4294901760, %v6724_v37  ;;  %v14698_v46 = vld [vmem:[#allocation187_spill] sm:$0xff] }
 0xa25   :  { %v6740_v39 = vadd.f32 %v6739_v29, %v6657_v1  ;;  %v6728_v56 = vadd.f32 %v14677_v10, %v6645_v30  ;;  %v6629_v1 = vadd.f32 %v14686_v24, %v6524_v19  ;;  %v14692_v30 = vld [vmem:[#allocation150_spill] sm:$0xff] }
 0xa26   :  { %v12919_v19 = vsub.f32 %v6724_v37, %v12884_v12 }
 0xa27   :  { %v12839_v4 = vand.u32 4294901760, %v6740_v39 }
 0xa28   :  { %v6571_v60 = vpop.f32.mrf.mxu3 }
 0xa29   :  { %v6572_v35 = vadd.f32 %v6571_v60, %v6458_v5  ;;  %v6462_v16 = vpop.f32.mrf.mxu2  ;;  %v12861_v29 = vsub.f32 %v6740_v39, %v12839_v4  ;;  %v14690_v39 = vld [vmem:[#allocation9_spill] sm:$0xff] }
 0xa2a   :  { %v6463_v62 = vadd.f32 %v6462_v16, %v6362_v53 }
 0xa2b   :  { %v6661_v14 = vadd.f32 %v6660_v36, %v6572_v35  ;;  %v6306_v35 = vadd.f32 %v12474_v61, %v12471_v41  ;;  %v6310_v36 = vadd.f32 %v12488_v27, %v12485_v34  ;;  %v6530_v41 = vadd.f32 %v12795_v43, %v6423_v7  ;;  %v6747_v61 = vpop.f32.mrf.mxu1  ;;  %v14675_v27 = vld [vmem:[#allocation6_spill] sm:$0xff] }
 0xa2c   :  { %v6318_v34 = vadd.f32 %v14674_v17, %v12519_v15  ;;  %v6413_v52 = vadd.f32 %v14675_v27, %v6322_v50  ;;  %v12848_v43 = vand.u32 4294901760, %v6736_v2  ;;  %v6925_v7 = vand.u32 4294901760, %v12861_v29  ;;  %v14694_v50 = vld [vmem:[#allocation169_spill] sm:$0xff]  ;;  %v14696_v17 = vld [vmem:[#allocation156_spill] sm:$0xff] }
 0xa2d   :  { %v6744_v44 = vadd.f32 %v6743_v59, %v6661_v14  ;;  %v6664_v59 = vpop.f32.mrf.mxu0  ;;  %v6633_v15 = vadd.f32 %v14681_v26, %v6530_v41  ;;  %v6393_v18 = vadd.f32 %v14683_v8, %v6306_v35  ;;  %v12869_v14 = vand.u32 4294901760, %v6728_v56  ;;  %v14697_v27 = vld [vmem:[#allocation5_spill] sm:$0xff] }
 0xa2e   :  { %v6408_v5 = vadd.f32 %v14679_v32, %v6318_v34  ;;  %v6518_v3 = vadd.f32 %v14680_v40, %v6413_v52  ;;  %v12872_v53 = vsub.f32 %v6736_v2, %v12848_v43  ;;  %v6398_v57 = vadd.f32 %v14687_v9, %v6310_v36 }
 0xa2f   :  { %v12830_v13 = vand.u32 4294901760, %v6744_v44  ;;  %v12887_v35 = vsub.f32 %v6732_v11, %v12858_v63  ;;  %v12897_v58 = vand.u32 4294901760, %v14694_v50  ;;  %v12901_v41 = vsub.f32 %v6728_v56, %v12869_v14 }
 0xa30   :  { %v6577_v23 = vpop.f32.mrf.mxu3  ;;  %v6512_v28 = vadd.f32 %v14685_v55, %v6408_v5  ;;  %v6625_v47 = vadd.f32 %v14689_v49, %v6518_v3  ;;  %v6931_v11 = vand.u32 4294901760, %v12872_v53  ;;  %v6926_v56 = vsub.f32 %v12861_v29, %v6925_v7  ;;  %v14699_v5 = vld [vmem:[#allocation183_spill] sm:$0xff]  ;;  %v14700_v3 = vld [vmem:[#allocation166_spill] sm:$0xff] }
 0xa31   :  { %v6578_v42 = vadd.f32 %v6577_v23, %v6463_v62  ;;  %v12851_v33 = vsub.f32 %v6744_v44, %v12830_v13  ;;  %v14688_v44 = vld [vmem:[#allocation152_spill] sm:$0xff]  ;;  %v6716_v62 = vadd.f32 %v14690_v39, %v6633_v15  ;;  %v14691_v23 = vld [vmem:[#allocation105_spill] sm:$0xff]  ;;  %v6488_v32 = vadd.f32 %v14698_v46, %v6388_v0  ;;  %v14704_v49 = vld [vmem:[#allocation154_spill] sm:$0xff] }
 0xa32   :  { %v6506_v6 = vadd.f32 %v14688_v44, %v6403_v45  ;;  %v6621_v2 = vadd.f32 %v14692_v30, %v6512_v28  ;;  %v6708_v52 = vadd.f32 %v14697_v27, %v6625_v47  ;;  %v12935_v25 = vsub.f32 %v14694_v50, %v12897_v58  ;;  %v14702_v45 = vld [vmem:[#allocation167_spill] sm:$0xff]  ;;  %v14703_v44 = vld [vmem:[#allocation180_spill] sm:$0xff] }
 0xa33   :  { %v6665_v21 = vadd.f32 %v6664_v59, %v6578_v42  ;;  %v6919_v31 = vand.u32 4294901760, %v12851_v33  ;;  %v6500_v59 = vadd.f32 %v14691_v23, %v6398_v57  ;;  %v14693_v42 = vld [vmem:[#allocation10_spill] sm:$0xff]  ;;  %v12915_v54 = vand.u32 4294901760, %v6716_v62 }
 0xa34   :  { %v6712_v36 = vadd.f32 %v14693_v42, %v6629_v1  ;;  %v6617_v34 = vadd.f32 %v14696_v17, %v6506_v6  ;;  %v6704_v26 = vadd.f32 %v14700_v3, %v6621_v2  ;;  %v6932_v0 = vsub.f32 %v12872_v53, %v6931_v11  ;;  %v14705_v2 = vld [vmem:[#allocation90_spill] sm:$0xff] }
 0xa35   :  { %v6748_v60 = vadd.f32 %v6747_v61, %v6665_v21  ;;  %v6920_v38 = vsub.f32 %v12851_v33, %v6919_v31  ;;  %v14695_v21 = vld [vmem:[#allocation148_spill] sm:$0xff]  ;;  %v6613_v40 = vadd.f32 %v14699_v5, %v6500_v59  ;;  %v6943_v8 = vand.u32 4294901760, %v12901_v41 }
 0xa36   :  { %v6494_v48 = vadd.f32 %v14695_v21, %v6393_v18  ;;  %v12930_v15 = vand.u32 4294901760, %v6712_v36  ;;  %v14701_v18 = vld [vmem:[#allocation151_spill] sm:$0xff]  ;;  %v6700_v55 = vadd.f32 %v14702_v45, %v6617_v34  ;;  %v12944_v28 = vand.u32 4294901760, %v6708_v52 }
 0xa37   :  { %v12863_v51 = vand.u32 4294901760, %v6748_v60  ;;  %v6921_v37 = vand.u32 4294901760, %v6920_v38  ;;  %v12949_v24 = vsub.f32 %v6716_v62, %v12915_v54  ;;  %v6927_v1 = vand.u32 4294901760, %v6926_v56 }
 0xa38   :  { %v6609_v22 = vadd.f32 %v14701_v18, %v6494_v48  ;;  %v6949_v57 = vand.u32 4294901760, %v12919_v19  ;;  %v6605_v6 = vadd.f32 %v14703_v44, %v6488_v32  ;;  %v6696_v47 = vadd.f32 %v14704_v49, %v6613_v40  ;;  %v14706_v48 = vld [vmem:[#allocation182_spill] sm:$0xff] }
 0xa39   :  { %v12875_v16 = vsub.f32 %v6748_v60, %v12863_v51  ;;  %6751 = vmatpush.msrb.mxu2 %v12863_v51  ;;  %7202 = vmatpush.msra.mxu1 %v12863_v51  ;;  %v6937_v60 = vand.u32 4294901760, %v12887_v35  ;;  %v12958_v39 = vand.u32 4294901760, %v6704_v26  ;;  %v12963_v62 = vsub.f32 %v6712_v36, %v12930_v15 }
 0xa3a   :  { %v6933_v23 = vand.u32 4294901760, %v6932_v0  ;;  %v6944_v59 = vsub.f32 %v12901_v41, %v6943_v8  ;;  %v6955_v30 = vand.u32 4294901760, %v12935_v25  ;;  %v6692_v42 = vadd.f32 %v14705_v2, %v6609_v22 }
 0xa3b   :  { %v6913_v20 = vand.u32 4294901760, %v12875_v16  ;;  %6753 = vmatpush.msrb.mxu2 %v12830_v13  ;;  %7074 = vmatpush.msra.mxu0 %v12875_v16  ;;  %v6938_v9 = vsub.f32 %v12887_v35, %v6937_v60  ;;  %v12971_v50 = vand.u32 4294901760, %v6700_v55  ;;  %v12976_v36 = vsub.f32 %v6708_v52, %v12944_v28 }
 0xa3c   :  { %7204 = vmatpush.msra.mxu1 %v12830_v13  ;;  %v6950_v38 = vsub.f32 %v12919_v19, %v6949_v57  ;;  %v6961_v21 = vand.u32 4294901760, %v12949_v24  ;;  %v6688_v17 = vadd.f32 %v14706_v48, %v6605_v6  ;;  %v12984_v34 = vand.u32 4294901760, %v6696_v47 }
 0xa3d   :  { %v6914_v61 = vsub.f32 %v12875_v16, %v6913_v20  ;;  %6755 = vmatpush.msrb.mxu2 %v12839_v4  ;;  %7077 = vmatpush.msra.mxu0 %v12851_v33  ;;  %v12989_v27 = vsub.f32 %v6704_v26, %v12958_v39  ;;  %v6945_v52 = vand.u32 4294901760, %v6944_v59  ;;  %v6967_v56 = vand.u32 4294901760, %v12963_v62  ;;  %v14710_v16 = vld [vmem:[#allocation16_spill] sm:$0xff] }
 0xa3e   :  { %7206 = vmatpush.msra.mxu1 %v12839_v4  ;;  %v12996_v46 = vand.u32 4294901760, %v6692_v42  ;;  %v13001_v32 = vsub.f32 %v6700_v55, %v12971_v50  ;;  %v6951_v5 = vand.u32 4294901760, %v6950_v38  ;;  %v6962_v40 = vsub.f32 %v12949_v24, %v6961_v21  ;;  %v14712_v33 = vld [vmem:[#allocation48_spill] sm:$0xff] }
 0xa3f   :  { %6757 = vmatpush.msrb.mxu2 %v12848_v43  ;;  %7080 = vmatpush.msra.mxu0 %v12861_v29  ;;  %v6915_v10 = vand.u32 4294901760, %v6914_v61  ;;  %v6939_v61 = vand.u32 4294901760, %v6938_v9  ;;  %v6973_v3 = vand.u32 4294901760, %v12976_v36  ;;  %v13008_v26 = vand.u32 4294901760, %v6688_v17  ;;  %v14713_v29 = vld [vmem:[#allocation15_spill] sm:$0xff] }
 0xa40   :  { %7208 = vmatpush.msra.mxu1 %v12848_v43  ;;  %v6968_v18 = vsub.f32 %v12963_v62, %v6967_v56  ;;  %v6979_v22 = vand.u32 4294901760, %v12989_v27  ;;  %v13023_v45 = vsub.f32 %v6692_v42, %v12996_v46  ;;  %v6963_v55 = vand.u32 4294901760, %v6962_v40 }
 0xa41   :  { %6759 = vmatpush.msrb.mxu2 %v12858_v63  ;;  %6916 = vmatpush.msrb.mxu3 %v6915_v10  ;;  %v6956_v10 = vsub.f32 %v12935_v25, %v6955_v30  ;;  %v6985_v9 = vand.u32 4294901760, %v13001_v32  ;;  %v13033_v44 = vsub.f32 %v6688_v17, %v13008_v26 }
 0xa42   :  { %7083 = vmatpush.msra.mxu0 %v12872_v53  ;;  %7210 = vmatpush.msra.mxu1 %v12858_v63  ;;  %v6969_v6 = vand.u32 4294901760, %v6968_v18  ;;  %v6980_v49 = vsub.f32 %v12989_v27, %v6979_v22  ;;  %v6997_v2 = vand.u32 4294901760, %v13023_v45  ;;  %v14709_v18 = vld [vmem:[#allocation38_spill] sm:$0xff] }
 0xa43   :  { %6761 = vmatpush.msrb.mxu2 %v12869_v14  ;;  %6922 = vmatpush.msrb.mxu3 %v6921_v37  ;;  %v13013_v37 = vsub.f32 %v6696_v47, %v12984_v34  ;;  %v6957_v0 = vand.u32 4294901760, %v6956_v10  ;;  %v6986_v59 = vsub.f32 %v13001_v32, %v6985_v9  ;;  %v7003_v38 = vand.u32 4294901760, %v13033_v44  ;;  %v14720_v53 = vld [vmem:[#allocation30_spill] sm:$0xff] }
 0xa44   :  { %7086 = vmatpush.msra.mxu0 %v12887_v35  ;;  %7212 = vmatpush.msra.mxu1 %v12869_v14  ;;  %v6981_v42 = vand.u32 4294901760, %v6980_v49  ;;  %v6998_v17 = vsub.f32 %v13023_v45, %v6997_v2  ;;  %v14723_v35 = vld [vmem:[#allocation42_spill] sm:$0xff]  ;;  %v14757_v49 = vld [vmem:[#allocation64_spill] sm:$0xff] }
 0xa45   :  { %6763 = vmatpush.msrb.mxu2 %v12884_v12  ;;  %6928 = vmatpush.msrb.mxu3 %v6927_v1  ;;  %v6974_v1 = vsub.f32 %v12976_v36, %v6973_v3  ;;  %v6991_v47 = vand.u32 4294901760, %v13013_v37  ;;  %v6987_v48 = vand.u32 4294901760, %v6986_v59  ;;  %v14760_v59 = vld [vmem:[#allocation66_spill] sm:$0xff] }
 0xa46   :  { %7089 = vmatpush.msra.mxu0 %v12901_v41  ;;  %7214 = vmatpush.msra.mxu1 %v12884_v12  ;;  %v6999_v40 = vand.u32 4294901760, %v6998_v17  ;;  %v14726_v41 = vld [vmem:[#allocation19_spill] sm:$0xff]  ;;  %v14766_v17 = vld [vmem:[#allocation69_spill] sm:$0xff] }
 0xa47   :  { %6765 = vmatpush.msrb.mxu2 %v12897_v58  ;;  %6934 = vmatpush.msrb.mxu3 %v6933_v23  ;;  %v6975_v23 = vand.u32 4294901760, %v6974_v1  ;;  %v14753_v1 = vld [vmem:[#allocation60_spill] sm:$0xff] }
 0xa48   :  { %7092 = vmatpush.msra.mxu0 %v12919_v19  ;;  %7216 = vmatpush.msra.mxu1 %v12897_v58  ;;  %v14729_v19 = vld [vmem:[#allocation20_spill] sm:$0xff] }
 0xa49   :  { %6767 = vmatpush.msrb.mxu2 %v12915_v54  ;;  %6940 = vmatpush.msrb.mxu3 %v6939_v61  ;;  %v6992_v61 = vsub.f32 %v13013_v37, %v6991_v47 }
 0xa4a   :  { %7095 = vmatpush.msra.mxu0 %v12935_v25  ;;  %7218 = vmatpush.msra.mxu1 %v12915_v54  ;;  %v14732_v25 = vld [vmem:[#allocation40_spill] sm:$0xff] }
 0xa4b   :  { %6769 = vmatpush.msrb.mxu2 %v12930_v15  ;;  %6946 = vmatpush.msrb.mxu3 %v6945_v52  ;;  %v14707_v52 = vld [vmem:[#allocation14_spill] sm:$0xff]  ;;  %v6993_v10 = vand.u32 4294901760, %v6992_v61  ;;  %v14763_v61 = vld [vmem:[#allocation75_spill] sm:$0xff] }
 0xa4c   :  { %7098 = vmatpush.msra.mxu0 %v12949_v24  ;;  %7220 = vmatpush.msra.mxu1 %v12930_v15  ;;  %v14735_v24 = vld [vmem:[#allocation28_spill] sm:$0xff] }
 0xa4d   :  { %6771 = vmatpush.msrb.mxu2 %v12944_v28  ;;  %6952 = vmatpush.msrb.mxu3 %v6951_v5  ;;  %v7004_v5 = vsub.f32 %v13033_v44, %v7003_v38 }
 0xa4e   :  { %7101 = vmatpush.msra.mxu0 %v12963_v62  ;;  %7222 = vmatpush.msra.mxu1 %v12944_v28  ;;  %v14738_v62 = vld [vmem:[#allocation37_spill] sm:$0xff] }
 0xa4f   :  { %6773 = vmatpush.msrb.mxu2 %v12958_v39  ;;  %6958 = vmatpush.msrb.mxu3 %v6957_v0  ;;  %v14708_v0 = vld [vmem:[#allocation29_spill] sm:$0xff] }
 0xa50   :  { %7104 = vmatpush.msra.mxu0 %v12976_v36  ;;  %7224 = vmatpush.msra.mxu1 %v12958_v39  ;;  %v14741_v36 = vld [vmem:[#allocation25_spill] sm:$0xff] }
 0xa51   :  { %6775 = vmatpush.msrb.mxu2 %v12971_v50  ;;  %6964 = vmatpush.msrb.mxu3 %v6963_v55  ;;  %v7005_v55 = vand.u32 4294901760, %v7004_v5  ;;  %v14769_v5 = vld [vmem:[#allocation76_spill] sm:$0xff] }
 0xa52   :  { %7107 = vmatpush.msra.mxu0 %v12989_v27  ;;  %7226 = vmatpush.msra.mxu1 %v12971_v50  ;;  %v14744_v27 = vld [vmem:[#allocation50_spill] sm:$0xff] }
 0xa53   :  { %6777 = vmatpush.msrb.mxu2 %v12984_v34  ;;  %6970 = vmatpush.msrb.mxu3 %v6969_v6  ;;  %v14756_v6 = vld [vmem:[#allocation62_spill] sm:$0xff] }
 0xa54   :  { %7110 = vmatpush.msra.mxu0 %v13001_v32  ;;  %7228 = vmatpush.msra.mxu1 %v12984_v34  ;;  %v14747_v32 = vld [vmem:[#allocation59_spill] sm:$0xff] }
 0xa55   :  { %6779 = vmatpush.msrb.mxu2 %v12996_v46  ;;  %6976 = vmatpush.msrb.mxu3 %v6975_v23  ;;  %v14759_v23 = vld [vmem:[#allocation71_spill] sm:$0xff] }
 0xa56   :  { %7113 = vmatpush.msra.mxu0 %v13013_v37  ;;  %7230 = vmatpush.msra.mxu1 %v12996_v46  ;;  %v14750_v37 = vld [vmem:[#allocation53_spill] sm:$0xff] }
 0xa57   :  { %6781 = vmatpush.msrb.mxu2 %v13008_v26  ;;  %6982 = vmatpush.msrb.mxu3 %v6981_v42  ;;  %v14762_v42 = vld [vmem:[#allocation65_spill] sm:$0xff] }
 0xa58   :  { %7116 = vmatpush.msra.mxu0 %v13023_v45  ;;  %7232 = vmatpush.msra.mxu1 %v13008_v26  ;;  %v14752_v45 = vld [vmem:[#allocation58_spill] sm:$0xff] }
 0xa59   :  { %6787 = vmatmul.f32.vlgmr.msrb.gmra.mxu2 %v14707_v52  ;;  %6988 = vmatpush.msrb.mxu3 %v6987_v48  ;;  %v14765_v48 = vld [vmem:[#allocation72_spill] sm:$0xff]  ;;  %v14767_v52 = vld [vmem:[#allocation77_spill] sm:$0xff] }
 0xa5a   :  { %7333 = vmatpush.msra.mxu2 %v6913_v20  ;;  %7119 = vmatpush.msra.mxu0 %v13033_v44  ;;  %v14711_v20 = vld [vmem:[#allocation43_spill] sm:$0xff] }
 0xa5b   :  { %6994 = vmatpush.msrb.mxu3 %v6993_v10  ;;  %7122 = vmatmul.f32.vlgmr.msra.gmra.mxu0 %v14708_v0  ;;  %v14755_v44 = vld [vmem:[#allocation67_spill] sm:$0xff]  ;;  %v14768_v10 = vld [vmem:[#allocation74_spill] sm:$0xff] }
 0xa5c   :  { %7337 = vmatpush.msra.mxu2 %v6919_v31  ;;  %7236 = vmatmul.f32.vlgmr.msra.gmra.mxu1 %v14709_v18  ;;  %v14721_v31 = vld [vmem:[#allocation46_spill] sm:$0xff] }
 0xa5d   :  { %7000 = vmatpush.msrb.mxu3 %v6999_v40  ;;  %v14770_v40 = vld [vmem:[#allocation73_spill] sm:$0xff] }
 0xa5e   :  { %7341 = vmatpush.msra.mxu2 %v6925_v7  ;;  %v14724_v7 = vld [vmem:[#allocation26_spill] sm:$0xff] }
 0xa5f   :  { %7006 = vmatpush.msrb.mxu3 %v7005_v55 }
 0xa60   :  { %7345 = vmatpush.msra.mxu2 %v6931_v11  ;;  %7008 = vmatmul.f32.vlgmr.msrb.gmra.mxu3 %v14710_v16  ;;  %v14727_v11 = vld [vmem:[#allocation18_spill] sm:$0xff] }
 0xa61   :  { %6795 = vmatmul.f32.gmra.mxu2 %v14711_v20  ;;  %7460 = vmatpush.msra.mxu3 %v12863_v51  ;;  %v14714_v51 = vld [vmem:[#allocation45_spill] sm:$0xff] }
 0xa62   :  { %7349 = vmatpush.msra.mxu2 %v6937_v60  ;;  %v14730_v60 = vld [vmem:[#allocation22_spill] sm:$0xff] }
 0xa63   :  { %7462 = vmatpush.msra.mxu3 %v12830_v13  ;;  %7127 = vmatmul.f32.gmra.mxu0 %v14712_v33  ;;  %v14715_v13 = vld [vmem:[#allocation41_spill] sm:$0xff] }
 0xa64   :  { %7353 = vmatpush.msra.mxu2 %v6943_v8  ;;  %7242 = vmatmul.f32.gmra.mxu1 %v14713_v29  ;;  %v14733_v8 = vld [vmem:[#allocation31_spill] sm:$0xff] }
 0xa65   :  { %7464 = vmatpush.msra.mxu3 %v12839_v4  ;;  %v14716_v4 = vld [vmem:[#allocation34_spill] sm:$0xff] }
 0xa66   :  { %7357 = vmatpush.msra.mxu2 %v6949_v57  ;;  %v14736_v57 = vld [vmem:[#allocation17_spill] sm:$0xff] }
 0xa67   :  { %7466 = vmatpush.msra.mxu3 %v12848_v43  ;;  %v14717_v43 = vld [vmem:[#allocation47_spill] sm:$0xff] }
 0xa68   :  { %7361 = vmatpush.msra.mxu2 %v6955_v30  ;;  %7012 = vmatmul.f32.gmra.mxu3 %v14714_v51  ;;  %v14739_v30 = vld [vmem:[#allocation51_spill] sm:$0xff] }
 0xa69   :  { %6803 = vmatmul.f32.gmra.mxu2 %v14715_v13  ;;  %7468 = vmatpush.msra.mxu3 %v12858_v63  ;;  %v14718_v63 = vld [vmem:[#allocation24_spill] sm:$0xff] }
 0xa6a   :  { %7365 = vmatpush.msra.mxu2 %v6961_v21  ;;  %v14742_v21 = vld [vmem:[#allocation23_spill] sm:$0xff] }
 0xa6b   :  { %7470 = vmatpush.msra.mxu3 %v12869_v14  ;;  %7132 = vmatmul.f32.gmra.mxu0 %v14716_v4  ;;  %v14719_v14 = vld [vmem:[#allocation39_spill] sm:$0xff] }
 0xa6c   :  { %7369 = vmatpush.msra.mxu2 %v6967_v56  ;;  %7248 = vmatmul.f32.gmra.mxu1 %v14717_v43  ;;  %v14745_v56 = vld [vmem:[#allocation52_spill] sm:$0xff] }
 0xa6d   :  { %7472 = vmatpush.msra.mxu3 %v12884_v12  ;;  %v14722_v12 = vld [vmem:[#allocation21_spill] sm:$0xff] }
 0xa6e   :  { %7373 = vmatpush.msra.mxu2 %v6973_v3  ;;  %v14748_v3 = vld [vmem:[#allocation54_spill] sm:$0xff] }
 0xa6f   :  { %7474 = vmatpush.msra.mxu3 %v12897_v58  ;;  %v14725_v58 = vld [vmem:[#allocation44_spill] sm:$0xff] }
 0xa70   :  { %7377 = vmatpush.msra.mxu2 %v6979_v22  ;;  %7016 = vmatmul.f32.gmra.mxu3 %v14718_v63  ;;  %v14751_v22 = vld [vmem:[#allocation63_spill] sm:$0xff] }
 0xa71   :  { %6811 = vmatmul.f32.gmra.mxu2 %v14719_v14  ;;  %7476 = vmatpush.msra.mxu3 %v12915_v54  ;;  %v14728_v54 = vld [vmem:[#allocation36_spill] sm:$0xff] }
 0xa72   :  { %7381 = vmatpush.msra.mxu2 %v6985_v9  ;;  %v14754_v9 = vld [vmem:[#allocation57_spill] sm:$0xff] }
 0xa73   :  { %7478 = vmatpush.msra.mxu3 %v12930_v15  ;;  %7137 = vmatmul.f32.gmra.mxu0 %v14720_v53  ;;  %v14731_v15 = vld [vmem:[#allocation27_spill] sm:$0xff] }
 0xa74   :  { %7385 = vmatpush.msra.mxu2 %v6991_v47  ;;  %7254 = vmatmul.f32.gmra.mxu1 %v14721_v31  ;;  %v14758_v47 = vld [vmem:[#allocation61_spill] sm:$0xff] }
 0xa75   :  { %7480 = vmatpush.msra.mxu3 %v12944_v28  ;;  %v14734_v28 = vld [vmem:[#allocation33_spill] sm:$0xff] }
 0xa76   :  { %7389 = vmatpush.msra.mxu2 %v6997_v2  ;;  %v14761_v2 = vld [vmem:[#allocation68_spill] sm:$0xff] }
 0xa77   :  { %7482 = vmatpush.msra.mxu3 %v12958_v39  ;;  %v14737_v39 = vld [vmem:[#allocation35_spill] sm:$0xff] }
 0xa78   :  { %7393 = vmatpush.msra.mxu2 %v7003_v38  ;;  %7020 = vmatmul.f32.gmra.mxu3 %v14722_v12  ;;  %v14764_v38 = vld [vmem:[#allocation70_spill] sm:$0xff] }
 0xa79   :  { %6819 = vmatmul.f32.gmra.mxu2 %v14723_v35  ;;  %7484 = vmatpush.msra.mxu3 %v12971_v50  ;;  %v14740_v50 = vld [vmem:[#allocation32_spill] sm:$0xff] }
 0xa7b   :  { %7486 = vmatpush.msra.mxu3 %v12984_v34  ;;  %7142 = vmatmul.f32.gmra.mxu0 %v14724_v7  ;;  %v14743_v34 = vld [vmem:[#allocation55_spill] sm:$0xff] }
 0xa7c   :  { %7260 = vmatmul.f32.gmra.mxu1 %v14725_v58 }
 0xa7d   :  { %7488 = vmatpush.msra.mxu3 %v12996_v46  ;;  %v14746_v46 = vld [vmem:[#allocation49_spill] sm:$0xff] }
 0xa7f   :  { %7490 = vmatpush.msra.mxu3 %v13008_v26  ;;  %v14749_v26 = vld [vmem:[#allocation56_spill] sm:$0xff] }
 0xa80   :  { %7024 = vmatmul.f32.gmra.mxu3 %v14726_v41 }
 0xa81   :  { %6827 = vmatmul.f32.gmra.mxu2 %v14727_v11 }
 0xa83   :  { %7147 = vmatmul.f32.gmra.mxu0 %v14728_v54 }
 0xa84   :  { %7266 = vmatmul.f32.gmra.mxu1 %v14729_v19 }
 0xa88   :  { %7028 = vmatmul.f32.gmra.mxu3 %v14730_v60 }
 0xa89   :  { %6835 = vmatmul.f32.gmra.mxu2 %v14731_v15 }
 0xa8b   :  { %7152 = vmatmul.f32.gmra.mxu0 %v14732_v25 }
 0xa8c   :  { %7272 = vmatmul.f32.gmra.mxu1 %v14733_v8 }
 0xa90   :  { %7032 = vmatmul.f32.gmra.mxu3 %v14734_v28 }
 0xa91   :  { %6843 = vmatmul.f32.gmra.mxu2 %v14735_v24 }
 0xa93   :  { %7157 = vmatmul.f32.gmra.mxu0 %v14736_v57 }
 0xa94   :  { %7278 = vmatmul.f32.gmra.mxu1 %v14737_v39 }
 0xa98   :  { %7036 = vmatmul.f32.gmra.mxu3 %v14738_v62 }
 0xa99   :  { %6851 = vmatmul.f32.gmra.mxu2 %v14739_v30 }
 0xa9b   :  { %7162 = vmatmul.f32.gmra.mxu0 %v14740_v50 }
 0xa9c   :  { %7284 = vmatmul.f32.gmra.mxu1 %v14741_v36 }
 0xaa0   :  { %7040 = vmatmul.f32.gmra.mxu3 %v14742_v21 }
 0xaa1   :  { %6859 = vmatmul.f32.gmra.mxu2 %v14743_v34 }
 0xaa3   :  { %7167 = vmatmul.f32.gmra.mxu0 %v14744_v27 }
 0xaa4   :  { %7290 = vmatmul.f32.gmra.mxu1 %v14745_v56 }
 0xaa8   :  { %7044 = vmatmul.f32.gmra.mxu3 %v14746_v46 }
 0xaa9   :  { %6867 = vmatmul.f32.gmra.mxu2 %v14747_v32 }
 0xaab   :  { %7172 = vmatmul.f32.gmra.mxu0 %v14748_v3 }
 0xaac   :  { %7296 = vmatmul.f32.gmra.mxu1 %v14749_v26 }
 0xab0   :  { %7048 = vmatmul.f32.gmra.mxu3 %v14750_v37 }
 0xab1   :  { %6875 = vmatmul.f32.gmra.mxu2 %v14751_v22 }
 0xab3   :  { %7177 = vmatmul.f32.gmra.mxu0 %v14752_v45 }
 0xab4   :  { %7302 = vmatmul.f32.gmra.mxu1 %v14753_v1 }
 0xab8   :  { %7052 = vmatmul.f32.gmra.mxu3 %v14754_v9 }
 0xab9   :  { %6883 = vmatmul.f32.gmra.mxu2 %v14755_v44 }
 0xabb   :  { %7182 = vmatmul.f32.gmra.mxu0 %v14756_v6 }
 0xabc   :  { %7308 = vmatmul.f32.gmra.mxu1 %v14757_v49 }
 0xac0   :  { %7056 = vmatmul.f32.gmra.mxu3 %v14758_v47 }
 0xac1   :  { %6891 = vmatmul.f32.gmra.mxu2 %v14759_v23 }
 0xac3   :  { %7187 = vmatmul.f32.gmra.mxu0 %v14760_v59 }
 0xac4   :  { %7314 = vmatmul.f32.gmra.mxu1 %v14761_v2 }
 0xac8   :  { %7060 = vmatmul.f32.gmra.mxu3 %v14762_v42 }
 0xac9   :  { %6899 = vmatmul.f32.gmra.mxu2 %v14763_v61 }
 0xacb   :  { %7192 = vmatmul.f32.gmra.mxu0 %v14764_v38 }
 0xacc   :  { %7320 = vmatmul.f32.gmra.mxu1 %v14765_v48 }
 0xad0   :  { %7064 = vmatmul.f32.gmra.mxu3 %v14766_v17 }
 0xad1   :  { %6907 = vmatmul.f32.gmra.mxu2 %v14767_v52 }
 0xad3   :  { %7197 = vmatmul.f32.gmra.mxu0 %v14768_v10 }
 0xad4   :  { %7326 = vmatmul.f32.gmra.mxu1 %v14769_v5 }
 0xad8   :  { %7068 = vmatmul.f32.gmra.mxu3 %v14770_v40  ;;  %v7123_v0 = vpop.f32.mrf.mxu0 }
 0xad9   :  { %7395 = vmatmul.f32.vlgmr.msra.gmra.mxu2 %v14710_v16  ;;  %v7237_v55 = vpop.f32.mrf.mxu1 }
 0xadc   :  { %v6788_v18 = vpop.f32.mrf.mxu2 }
 0xae0   :  { %7492 = vmatmul.f32.vlgmr.msra.gmra.mxu3 %v14710_v16  ;;  %v7128_v13 = vpop.f32.mrf.mxu0 }
 0xae1   :  { %7399 = vmatmul.f32.gmra.mxu2 %v14714_v51  ;;  %v7243_v43 = vpop.f32.mrf.mxu1 }
 0xae3   :  { %v7009_v20 = vpop.f32.mrf.mxu3 }
 0xae4   :  { %v6796_v33 = vpop.f32.mrf.mxu2  ;;  %v7010_v29 = vadd.f32 %v7009_v20, %v6788_v18 }
 0xae6   :  { %v7124_v4 = vadd.f32 %v7123_v0, %v7010_v29  ;;  %v14771_v29 = vld [vmem:[#allocation185_spill] sm:$0xff] }
 0xae7   :  { %7968 = vrcp.f32 %v14771_v29 }
 0xae8   :  { %7496 = vmatmul.f32.gmra.mxu3 %v14714_v51  ;;  %v13178_v14 = vadd.f32 %v7237_v55, %v7124_v4  ;;  %v7133_v58 = vpop.f32.mrf.mxu0 }
 0xae9   :  { %7403 = vmatmul.f32.gmra.mxu2 %v14718_v63  ;;  %v7249_v11 = vpop.f32.mrf.mxu1 }
 0xaeb   :  { %v7013_v53 = vpop.f32.mrf.mxu3 }
 0xaec   :  { %v6804_v31 = vpop.f32.mrf.mxu2  ;;  %v7014_v35 = vadd.f32 %v7013_v53, %v6796_v33 }
 0xaed   :  { %v7969_v53 = vpop.eup %7968 }
 0xaee   :  { %v7129_v7 = vadd.f32 %v7128_v13, %v7014_v35  ;;  %v7828_v35 = vmul.f32 %v7969_v53, %v14771_v29 }
 0xaf0   :  { %7500 = vmatmul.f32.gmra.mxu3 %v14718_v63  ;;  %v13182_v16 = vadd.f32 %v7243_v43, %v7129_v7  ;;  %v7138_v8 = vpop.f32.mrf.mxu0 }
 0xaf1   :  { %7407 = vmatmul.f32.gmra.mxu2 %v14722_v12  ;;  %v7255_v57 = vpop.f32.mrf.mxu1 }
 0xaf3   :  { %v7017_v54 = vpop.f32.mrf.mxu3 }
 0xaf4   :  { %v6812_v19 = vpop.f32.mrf.mxu2  ;;  %v7018_v15 = vadd.f32 %v7017_v54, %v6804_v31  ;;  %v14772_v31 = vld [vmem:[#allocation191_spill] sm:$0xff]  ;;  %v14773_v54 = vld [vmem:[#allocation144_spill] sm:$0xff] }
 0xaf5   :  { %7970 = vrcp.f32 %v14772_v31 }
 0xaf6   :  { %v7134_v51 = vadd.f32 %v7133_v58, %v7018_v15  ;;  %v7844_v15 = vsub.f32 2.0, %v7828_v35 }
 0xaf8   :  { %7504 = vmatmul.f32.gmra.mxu3 %v14722_v12  ;;  %v13186_v25 = vadd.f32 %v7249_v11, %v7134_v51  ;;  %v7143_v34 = vpop.f32.mrf.mxu0 }
 0xaf9   :  { %7411 = vmatmul.f32.gmra.mxu2 %v14726_v41  ;;  %v7261_v56 = vpop.f32.mrf.mxu1 }
 0xafb   :  { %v7021_v24 = vpop.f32.mrf.mxu3 }
 0xafc   :  { %v6820_v39 = vpop.f32.mrf.mxu2  ;;  %v7022_v63 = vadd.f32 %v7021_v24, %v6812_v19 }
 0xafe   :  { %v7139_v30 = vadd.f32 %v7138_v8, %v7022_v63  ;;  %v7971_v8 = vpop.eup %7970 }
 0xaff   :  { %v7829_v63 = vmul.f32 %v7971_v8, %v14772_v31 }
 0xb00   :  { %7508 = vmatmul.f32.gmra.mxu3 %v14726_v41  ;;  %v13190_v50 = vadd.f32 %v7255_v57, %v7139_v30 }
 0xb01   :  { %7415 = vmatmul.f32.gmra.mxu2 %v14730_v60 }
 0xb03   :  { %v7025_v36 = vpop.f32.mrf.mxu3 }
 0xb04   :  { %v6828_v27 = vpop.f32.mrf.mxu2  ;;  %v7026_v12 = vadd.f32 %v7025_v36, %v6820_v39  ;;  %v7860_v36 = vmul.f32 %v7969_v53, %v7844_v15 }
 0xb06   :  { %v7144_v32 = vadd.f32 %v7143_v34, %v7026_v12  ;;  %v7148_v12 = vpop.f32.mrf.mxu0 }
 0xb08   :  { %7512 = vmatmul.f32.gmra.mxu3 %v14730_v60  ;;  %v13194_v3 = vadd.f32 %v7261_v56, %v7144_v32  ;;  %v14775_v56 = vld [vmem:[#allocation140_spill] sm:$0xff] }
 0xb09   :  { %7419 = vmatmul.f32.gmra.mxu2 %v14734_v28  ;;  %v7653_v32 = vmul.f32 2.0, %v14775_v56 }
 0xb0b   :  { %v7029_v26 = vpop.f32.mrf.mxu3 }
 0xb0c   :  { %v6836_v22 = vpop.f32.mrf.mxu2  ;;  %v13197_v45 = vadd.f32 %v7029_v26, %v6828_v27 }
 0xb10   :  { %7516 = vmatmul.f32.gmra.mxu3 %v14734_v28 }
 0xb11   :  { %7423 = vmatmul.f32.gmra.mxu2 %v14738_v62 }
 0xb13   :  { %v7033_v41 = vpop.f32.mrf.mxu3 }
 0xb14   :  { %v6844_v1 = vpop.f32.mrf.mxu2  ;;  %v13201_v44 = vadd.f32 %v7033_v41, %v6836_v22  ;;  %v7845_v41 = vsub.f32 2.0, %v7829_v63 }
 0xb18   :  { %7520 = vmatmul.f32.gmra.mxu3 %v14738_v62 }
 0xb19   :  { %7427 = vmatmul.f32.gmra.mxu2 %v14742_v21 }
 0xb1b   :  { %v7037_v60 = vpop.f32.mrf.mxu3 }
 0xb1c   :  { %v6852_v6 = vpop.f32.mrf.mxu2  ;;  %v13205_v49 = vadd.f32 %v7037_v60, %v6844_v1 }
 0xb20   :  { %7524 = vmatmul.f32.gmra.mxu3 %v14742_v21 }
 0xb21   :  { %7431 = vmatmul.f32.gmra.mxu2 %v14746_v46 }
 0xb23   :  { %v7041_v23 = vpop.f32.mrf.mxu3 }
 0xb24   :  { %v6860_v28 = vpop.f32.mrf.mxu2  ;;  %v13209_v59 = vadd.f32 %v7041_v23, %v6852_v6  ;;  %v7267_v6 = vpop.f32.mrf.mxu1  ;;  %v7669_v23 = vadd.f32 0.0001, %v7653_v32 }
 0xb28   :  { %7528 = vmatmul.f32.gmra.mxu3 %v14746_v46 }
 0xb29   :  { %7435 = vmatmul.f32.gmra.mxu2 %v14750_v37 }
 0xb2b   :  { %v7045_v2 = vpop.f32.mrf.mxu3 }
 0xb2c   :  { %v6868_v62 = vpop.f32.mrf.mxu2  ;;  %v13213_v61 = vadd.f32 %v7045_v2, %v6860_v28  ;;  %v14776_v28 = vld [vmem:[#allocation160_spill] sm:$0xff] }
 0xb30   :  { %7532 = vmatmul.f32.gmra.mxu3 %v14750_v37 }
 0xb31   :  { %7439 = vmatmul.f32.gmra.mxu2 %v14754_v9 }
 0xb33   :  { %v7049_v38 = vpop.f32.mrf.mxu3 }
 0xb34   :  { %v6876_v21 = vpop.f32.mrf.mxu2  ;;  %v13217_v48 = vadd.f32 %v7049_v38, %v6868_v62 }
 0xb38   :  { %7536 = vmatmul.f32.gmra.mxu3 %v14754_v9 }
 0xb39   :  { %7443 = vmatmul.f32.gmra.mxu2 %v14758_v47 }
 0xb3b   :  { %v7053_v52 = vpop.f32.mrf.mxu3 }
 0xb3c   :  { %v6884_v46 = vpop.f32.mrf.mxu2  ;;  %v13221_v10 = vadd.f32 %v7053_v52, %v6876_v21  ;;  %v7861_v52 = vmul.f32 %v7971_v8, %v7845_v41  ;;  %v14779_v8 = vld [vmem:[#allocation125_spill] sm:$0xff]  ;;  %v7149_v41 = vadd.f32 %v7148_v12, %v13197_v45 }
 0xb3d   :  { %v14782_v12 = vld [vmem:[#allocation189_spill] sm:$0xff] }
 0xb40   :  { %7540 = vmatmul.f32.gmra.mxu3 %v14758_v47 }
 0xb41   :  { %7447 = vmatmul.f32.gmra.mxu2 %v14762_v42 }
 0xb43   :  { %v7057_v5 = vpop.f32.mrf.mxu3 }
 0xb44   :  { %v6892_v37 = vpop.f32.mrf.mxu2  ;;  %v13225_v0 = vadd.f32 %v7057_v5, %v6884_v46 }
 0xb48   :  { %7544 = vmatmul.f32.gmra.mxu3 %v14762_v42 }
 0xb49   :  { %7451 = vmatmul.f32.gmra.mxu2 %v14766_v17 }
 0xb4b   :  { %v7061_v18 = vpop.f32.mrf.mxu3 }
 0xb4c   :  { %v6900_v9 = vpop.f32.mrf.mxu2  ;;  %v13229_v55 = vadd.f32 %v7061_v18, %v6892_v37  ;;  %v14777_v37 = vld [vmem:[#allocation129_spill] sm:$0xff] }
 0xb4d   :  { %v7654_v18 = vmul.f32 2.0, %v14777_v37 }
 0xb50   :  { %7548 = vmatmul.f32.gmra.mxu3 %v14766_v17 }
 0xb51   :  { %7455 = vmatmul.f32.gmra.mxu2 %v14770_v40 }
 0xb53   :  { %v7065_v20 = vpop.f32.mrf.mxu3 }
 0xb54   :  { %v6908_v47 = vpop.f32.mrf.mxu2  ;;  %v13233_v33 = vadd.f32 %v7065_v20, %v6900_v9 }
 0xb58   :  { %7552 = vmatmul.f32.gmra.mxu3 %v14770_v40  ;;  %v7652_v40 = vmul.f32 2.0, %v14773_v54 }
 0xb5a   :  { %v7668_v24 = vadd.f32 0.0001, %v7652_v40 }
 0xb5b   :  { %v7069_v13 = vpop.f32.mrf.mxu3 }
 0xb5c   :  { %v13237_v42 = vadd.f32 %v7069_v13, %v6908_v47  ;;  %v7396_v4 = vpop.f32.mrf.mxu2  ;;  %v7153_v47 = vpop.f32.mrf.mxu0 }
 0xb5d   :  { %v7397_v43 = vadd.f32 %v7396_v4, %v13178_v14  ;;  %v14774_v14 = vld [vmem:[#allocation195_spill] sm:$0xff] }
 0xb5e   :  { %7972 = vrcp.f32 %v14774_v14 }
 0xb5f   :  { %7974 = vrcp.f32 %v14776_v28 }
 0xb63   :  { %v7493_v17 = vpop.f32.mrf.mxu3 }
 0xb64   :  { %v7400_v7 = vpop.f32.mrf.mxu2  ;;  %v7494_v58 = vadd.f32 %v7493_v17, %v7397_v43  ;;  %v7973_v60 = vpop.eup %7972  ;;  %v7670_v17 = vadd.f32 0.0001, %v7654_v18 }
 0xb65   :  { %v7401_v11 = vadd.f32 %v7400_v7, %v13182_v16  ;;  %v7830_v38 = vmul.f32 %v7973_v60, %v14774_v14  ;;  %v7975_v29 = vpop.eup %7974 }
 0xb66   :  { %v7636_v19 = vsub.f32 %v7494_v58, %v14773_v54  ;;  %v7831_v7 = vmul.f32 %v7975_v29, %v14776_v28  ;;  %v14778_v58 = vld [vmem:[#allocation181_spill] sm:$0xff] }
 0xb67   :  { %v7846_v13 = vsub.f32 2.0, %v7830_v38  ;;  %7976 = vrcp.f32 %v14778_v58 }
 0xb68   :  { %v7684_v51 = vmul.f32 2.0, %v7636_v19 }
 0xb69   :  { %v7862_v40 = vmul.f32 %v7973_v60, %v7846_v13 }
 0xb6a   :  { %v7700_v57 = vadd.f32 0.0009, %v7684_v51 }
 0xb6b   :  { %v7497_v39 = vpop.f32.mrf.mxu3 }
 0xb6c   :  { %v7716_v30 = vmul.f32 %v7700_v57, %v7668_v24  ;;  %v7404_v34 = vpop.f32.mrf.mxu2  ;;  %v7498_v27 = vadd.f32 %v7497_v39, %v7401_v11  ;;  %v7655_v24 = vmul.f32 2.0, %v14779_v8  ;;  %v7847_v39 = vsub.f32 2.0, %v7831_v7 }
 0xb6d   :  { %v7405_v16 = vadd.f32 %v7404_v34, %v13186_v25 }
 0xb6e   :  { %v7876_v26 = vmul.f32 %v7860_v36, %v7716_v30  ;;  %v7637_v22 = vsub.f32 %v7498_v27, %v14775_v56  ;;  %v7977_v36 = vpop.eup %7976  ;;  %v7158_v27 = vpop.f32.mrf.mxu0  ;;  %v14780_v56 = vld [vmem:[#allocation188_spill] sm:$0xff] }
 0xb6f   :  { %7978 = vrcp.f32 %v14780_v56 }
 0xb70   :  { %v7685_v1 = vmul.f32 2.0, %v7637_v22  ;;  %v7892_v4 = vsel %vm117_vm0, %v7876_v26, 0.0  ;;  %v7863_v26 = vmul.f32 %v7975_v29, %v7847_v39  ;;  %7980 = vrcp.f32 %v14782_v12 }
 0xb72   :  { %v7701_v2 = vadd.f32 0.0009, %v7685_v1 }
 0xb73   :  { %v7501_v62 = vpop.f32.mrf.mxu3 }
 0xb74   :  { %v7717_v21 = vmul.f32 %v7701_v2, %v7669_v23  ;;  %v7408_v25 = vpop.f32.mrf.mxu2  ;;  %v7502_v46 = vadd.f32 %v7501_v62, %v7405_v16  ;;  %v7671_v16 = vadd.f32 0.0001, %v7655_v24  ;;  %v14781_v2 = vld [vmem:[#allocation128_spill] sm:$0xff] }
 0xb75   :  { %v7409_v5 = vadd.f32 %v7408_v25, %v13190_v50  ;;  %v7273_v50 = vpop.f32.mrf.mxu1  ;;  %v7656_v62 = vmul.f32 2.0, %v14781_v2 }
 0xb76   :  { %v7877_v9 = vmul.f32 %v7861_v52, %v7717_v21  ;;  %v7638_v20 = vsub.f32 %v7502_v46, %v14777_v37  ;;  %v7979_v52 = vpop.eup %7978  ;;  %v7268_v46 = vadd.f32 %v7267_v6, %v7149_v41  ;;  %v7163_v13 = vpop.f32.mrf.mxu0  ;;  %v14783_v6 = vld [vmem:[#allocation126_spill] sm:$0xff] }
 0xb77   :  { %v7833_v45 = vmul.f32 %v7979_v52, %v14780_v56  ;;  %v7657_v7 = vmul.f32 2.0, %v14783_v6 }
 0xb78   :  { %v7893_v43 = vsel %vm117_vm0, %v7877_v9, 0.0  ;;  %v7686_v53 = vmul.f32 2.0, %v7638_v20  ;;  %v7672_v9 = vadd.f32 0.0001, %v7656_v62 }
 0xb79   :  { %v7894_v31 = vadd.f32 %v7893_v43, %v7892_v4  ;;  %v7154_v43 = vadd.f32 %v7153_v47, %v13201_v44 }
 0xb7a   :  { %v7702_v35 = vadd.f32 0.0009, %v7686_v53 }
 0xb7b   :  { %v7505_v11 = vpop.f32.mrf.mxu3 }
 0xb7c   :  { %v7718_v54 = vmul.f32 %v7702_v35, %v7670_v17  ;;  %v7412_v19 = vpop.f32.mrf.mxu2  ;;  %v7506_v15 = vadd.f32 %v7505_v11, %v7409_v5 }
 0xb7d   :  { %v7413_v51 = vadd.f32 %v7412_v19, %v13194_v3  ;;  %v7832_v3 = vmul.f32 %v7977_v36, %v14778_v58  ;;  %v7279_v28 = vpop.f32.mrf.mxu1  ;;  %v7274_v19 = vadd.f32 %v7273_v50, %v7154_v43 }
 0xb7e   :  { %v7878_v57 = vmul.f32 %v7862_v40, %v7718_v54  ;;  %v7639_v14 = vsub.f32 %v7506_v15, %v14779_v8  ;;  %v7849_v54 = vsub.f32 2.0, %v7833_v45  ;;  %v7981_v8 = vpop.eup %7980  ;;  %v7168_v50 = vpop.f32.mrf.mxu0 }
 0xb7f   :  { %v7848_v25 = vsub.f32 2.0, %v7832_v3 }
 0xb80   :  { %v7895_v63 = vsel %vm117_vm0, %v7878_v57, 0.0  ;;  %v7687_v30 = vmul.f32 2.0, %v7639_v14  ;;  %v7673_v57 = vadd.f32 0.0001, %v7657_v7  ;;  %v14784_v14 = vld [vmem:[#allocation194_spill] sm:$0xff]  ;;  %v7865_v39 = vmul.f32 %v7979_v52, %v7849_v54 }
 0xb81   :  { %v7896_v34 = vadd.f32 %v7895_v63, %v7894_v31  ;;  %v7864_v31 = vmul.f32 %v7977_v36, %v7848_v25  ;;  %7982 = vrcp.f32 %v14784_v14  ;;  %v7159_v36 = vadd.f32 %v7158_v27, %v13205_v49  ;;  %v14786_v25 = vld [vmem:[#allocation158_spill] sm:$0xff] }
 0xb82   :  { %v7703_v32 = vadd.f32 0.0009, %v7687_v30  ;;  %v7834_v30 = vmul.f32 %v7981_v8, %v14782_v12  ;;  %7984 = vrcp.f32 %v14786_v25 }
 0xb83   :  { %v7509_v22 = vpop.f32.mrf.mxu3 }
 0xb84   :  { %v7719_v1 = vmul.f32 %v7703_v32, %v7671_v16  ;;  %v7416_v60 = vpop.f32.mrf.mxu2  ;;  %v7510_v23 = vadd.f32 %v7509_v22, %v7413_v51  ;;  %v14785_v32 = vld [vmem:[#allocation131_spill] sm:$0xff] }
 0xb85   :  { %v7417_v20 = vadd.f32 %v7416_v60, %v7268_v46  ;;  %v7285_v40 = vpop.f32.mrf.mxu1  ;;  %v7280_v60 = vadd.f32 %v7279_v28, %v7159_v36  ;;  %v14787_v28 = vld [vmem:[#allocation114_spill] sm:$0xff] }
 0xb86   :  { %v7879_v38 = vmul.f32 %v7863_v26, %v7719_v1  ;;  %v7640_v21 = vsub.f32 %v7510_v23, %v14781_v2  ;;  %v7658_v26 = vmul.f32 2.0, %v14785_v32  ;;  %v7850_v1 = vsub.f32 2.0, %v7834_v30  ;;  %v7173_v43 = vpop.f32.mrf.mxu0 }
 0xb87   :  { %v7983_v41 = vpop.eup %7982 }
 0xb88   :  { %v7897_v5 = vsel %vm117_vm0, %v7879_v38, 0.0  ;;  %v7688_v37 = vmul.f32 2.0, %v7640_v21  ;;  %v7674_v21 = vadd.f32 0.0001, %v7658_v26  ;;  %v7835_v27 = vmul.f32 %v7983_v41, %v14784_v14 }
 0xb89   :  { %v7898_v18 = vadd.f32 %v7897_v5, %v7896_v34  ;;  %v7164_v5 = vadd.f32 %v7163_v13, %v13209_v59 }
 0xb8a   :  { %v7704_v29 = vadd.f32 0.0009, %v7688_v37 }
 0xb8b   :  { %v7513_v4 = vpop.f32.mrf.mxu3 }
 0xb8c   :  { %v7720_v53 = vmul.f32 %v7704_v29, %v7672_v9  ;;  %v7420_v17 = vpop.f32.mrf.mxu2  ;;  %v7514_v35 = vadd.f32 %v7513_v4, %v7417_v20  ;;  %v7659_v29 = vmul.f32 2.0, %v14787_v28  ;;  %v7851_v4 = vsub.f32 2.0, %v7835_v27 }
 0xb8d   :  { %v7421_v44 = vadd.f32 %v7420_v17, %v7274_v19  ;;  %v7291_v38 = vpop.f32.mrf.mxu1 }
 0xb8e   :  { %v7880_v58 = vmul.f32 %v7864_v31, %v7720_v53  ;;  %v7641_v11 = vsub.f32 %v7514_v35, %v14783_v6  ;;  %v7286_v53 = vadd.f32 %v7285_v40, %v7164_v5  ;;  %v7985_v35 = vpop.eup %7984  ;;  %v7675_v7 = vadd.f32 0.0001, %v7659_v29 }
 0xb8f   :  { %v7867_v54 = vmul.f32 %v7983_v41, %v7851_v4  ;;  %v7174_v41 = vadd.f32 %v7173_v43, %v13217_v48 }
 0xb90   :  { %v7899_v15 = vsel %vm117_vm0, %v7880_v58, 0.0  ;;  %v7689_v51 = vmul.f32 2.0, %v7641_v11  ;;  %v14788_v58 = vld [vmem:[#allocation112_spill] sm:$0xff] }
 0xb91   :  { %v7900_v24 = vadd.f32 %v7899_v15, %v7898_v18  ;;  %v7866_v18 = vmul.f32 %v7981_v8, %v7850_v1  ;;  %7986 = vrcp.f32 %v14788_v58  ;;  %v7836_v15 = vmul.f32 %v7985_v35, %v14786_v25 }
 0xb92   :  { %v7705_v47 = vadd.f32 0.0009, %v7689_v51  ;;  %v7169_v51 = vadd.f32 %v7168_v50, %v13213_v61  ;;  %v14790_v50 = vld [vmem:[#allocation184_spill] sm:$0xff] }
 0xb93   :  { %v7517_v63 = vpop.f32.mrf.mxu3  ;;  %7988 = vrcp.f32 %v14790_v50 }
 0xb94   :  { %v7721_v34 = vmul.f32 %v7705_v47, %v7673_v57  ;;  %v7424_v16 = vpop.f32.mrf.mxu2  ;;  %v7518_v56 = vadd.f32 %v7517_v63, %v7421_v44  ;;  %v14789_v57 = vld [vmem:[#allocation115_spill] sm:$0xff]  ;;  %v7852_v63 = vsub.f32 2.0, %v7836_v15  ;;  %v7292_v30 = vadd.f32 %v7291_v38, %v7169_v51  ;;  %v14791_v38 = vld [vmem:[#allocation88_spill] sm:$0xff] }
 0xb95   :  { %v7425_v52 = vadd.f32 %v7424_v16, %v7280_v60  ;;  %v7297_v11 = vpop.f32.mrf.mxu1  ;;  %v7660_v14 = vmul.f32 2.0, %v14789_v57 }
 0xb96   :  { %v7881_v22 = vmul.f32 %v7865_v39, %v7721_v34  ;;  %v7642_v3 = vsub.f32 %v7518_v56, %v14785_v32  ;;  %v7178_v56 = vpop.f32.mrf.mxu0  ;;  %v7868_v60 = vmul.f32 %v7985_v35, %v7852_v63  ;;  %v7298_v25 = vadd.f32 %v7297_v11, %v7174_v41  ;;  %v14793_v35 = vld [vmem:[#allocation93_spill] sm:$0xff] }
 0xb97   :  { %v7987_v39 = vpop.eup %7986  ;;  %v7676_v32 = vadd.f32 0.0001, %v7660_v14  ;;  %v7179_v43 = vadd.f32 %v7178_v56, %v13221_v10 }
 0xb98   :  { %v7901_v23 = vsel %vm117_vm0, %v7881_v22, 0.0  ;;  %v7690_v2 = vmul.f32 2.0, %v7642_v3  ;;  %v7837_v61 = vmul.f32 %v7987_v39, %v14788_v58 }
 0xb99   :  { %v7902_v62 = vadd.f32 %v7901_v23, %v7900_v24 }
 0xb9a   :  { %v7706_v49 = vadd.f32 0.0009, %v7690_v2  ;;  %v7853_v27 = vsub.f32 2.0, %v7837_v61 }
 0xb9b   :  { %v7521_v46 = vpop.f32.mrf.mxu3 }
 0xb9c   :  { %v7722_v37 = vmul.f32 %v7706_v49, %v7674_v21  ;;  %v7428_v9 = vpop.f32.mrf.mxu2  ;;  %v7522_v20 = vadd.f32 %v7521_v46, %v7425_v52  ;;  %v7661_v21 = vmul.f32 2.0, %v14791_v38 }
 0xb9d   :  { %v7429_v59 = vadd.f32 %v7428_v9, %v7286_v53 }
 0xb9e   :  { %v7882_v45 = vmul.f32 %v7866_v18, %v7722_v37  ;;  %v7643_v12 = vsub.f32 %v7522_v20, %v14787_v28  ;;  %v7989_v37 = vpop.eup %7988  ;;  %v7677_v9 = vadd.f32 0.0001, %v7661_v21  ;;  %v14792_v20 = vld [vmem:[#allocation186_spill] sm:$0xff]  ;;  %v7183_v29 = vpop.f32.mrf.mxu0 }
 0xb9f   :  { %7990 = vrcp.f32 %v14792_v20  ;;  %v7838_v4 = vmul.f32 %v7989_v37, %v14790_v50 }
 0xba0   :  { %v7903_v31 = vsel %vm117_vm0, %v7882_v45, 0.0  ;;  %v7691_v17 = vmul.f32 2.0, %v7643_v12  ;;  %v7869_v45 = vmul.f32 %v7987_v39, %v7853_v27 }
 0xba1   :  { %v7904_v6 = vadd.f32 %v7903_v31, %v7902_v62  ;;  %v7303_v62 = vpop.f32.mrf.mxu1  ;;  %v7854_v11 = vsub.f32 2.0, %v7838_v4 }
 0xba2   :  { %v7707_v13 = vadd.f32 0.0009, %v7691_v17 }
 0xba3   :  { %v7525_v19 = vpop.f32.mrf.mxu3  ;;  %v7870_v39 = vmul.f32 %v7989_v37, %v7854_v11  ;;  %v14799_v11 = vld [vmem:[#allocation101_spill] sm:$0xff] }
 0xba4   :  { %v7723_v8 = vmul.f32 %v7707_v13, %v7675_v7  ;;  %v7432_v24 = vpop.f32.mrf.mxu2  ;;  %v7526_v40 = vadd.f32 %v7525_v19, %v7429_v59 }
 0xba5   :  { %v7433_v26 = vadd.f32 %v7432_v24, %v7292_v30  ;;  %v7991_v13 = vpop.eup %7990 }
 0xba6   :  { %v7883_v44 = vmul.f32 %v7867_v54, %v7723_v8  ;;  %v7644_v47 = vsub.f32 %v7526_v40, %v14789_v57  ;;  %v7304_v54 = vadd.f32 %v7303_v62, %v7179_v43  ;;  %v7839_v10 = vmul.f32 %v7991_v13, %v14792_v20  ;;  %v14794_v57 = vld [vmem:[#allocation193_spill] sm:$0xff] }
 0xba7   :  { %7992 = vrcp.f32 %v14794_v57 }
 0xba8   :  { %v7905_v36 = vsel %vm117_vm0, %v7883_v44, 0.0  ;;  %v7692_v34 = vmul.f32 2.0, %v7644_v47  ;;  %v7184_v44 = vadd.f32 %v7183_v29, %v13225_v0  ;;  %v14796_v0 = vld [vmem:[#allocation109_spill] sm:$0xff] }
 0xba9   :  { %v7906_v16 = vadd.f32 %v7905_v36, %v7904_v6  ;;  %v7662_v6 = vmul.f32 2.0, %v14793_v35  ;;  %v7309_v59 = vpop.f32.mrf.mxu1  ;;  %v7188_v36 = vpop.f32.mrf.mxu0  ;;  %7994 = vrcp.f32 %v14796_v0 }
 0xbaa   :  { %v7708_v22 = vadd.f32 0.0009, %v7692_v34  ;;  %v14795_v34 = vld [vmem:[#allocation96_spill] sm:$0xff] }
 0xbab   :  { %v7529_v3 = vpop.f32.mrf.mxu3  ;;  %v7678_v8 = vadd.f32 0.0001, %v7662_v6 }
 0xbac   :  { %v7724_v1 = vmul.f32 %v7708_v22, %v7676_v32  ;;  %v7436_v23 = vpop.f32.mrf.mxu2  ;;  %v7530_v2 = vadd.f32 %v7529_v3, %v7433_v26  ;;  %v7855_v26 = vsub.f32 2.0, %v7839_v10  ;;  %v7310_v22 = vadd.f32 %v7309_v59, %v7184_v44 }
 0xbad   :  { %v7437_v48 = vadd.f32 %v7436_v23, %v7298_v25  ;;  %v7993_v3 = vpop.eup %7992 }
 0xbae   :  { %v7884_v52 = vmul.f32 %v7868_v60, %v7724_v1  ;;  %v7645_v49 = vsub.f32 %v7530_v2, %v14791_v38  ;;  %v7871_v62 = vmul.f32 %v7991_v13, %v7855_v26  ;;  %v7840_v21 = vmul.f32 %v7993_v3, %v14794_v57  ;;  %v14801_v26 = vld [vmem:[#allocation104_spill] sm:$0xff] }
 0xbaf   :  { %v7995_v20 = vpop.eup %7994 }
 0xbb0   :  { %v7907_v46 = vsel %vm117_vm0, %v7884_v52, 0.0  ;;  %v7693_v5 = vmul.f32 2.0, %v7645_v49  ;;  %v7189_v52 = vadd.f32 %v7188_v36, %v13229_v55  ;;  %v7841_v55 = vmul.f32 %v7995_v20, %v14796_v0 }
 0xbb1   :  { %v7908_v18 = vadd.f32 %v7907_v46, %v7906_v16  ;;  %v7663_v16 = vmul.f32 2.0, %v14795_v34  ;;  %v7315_v41 = vpop.f32.mrf.mxu1  ;;  %v14797_v46 = vld [vmem:[#allocation80_spill] sm:$0xff] }
 0xbb2   :  { %v7709_v28 = vadd.f32 0.0009, %v7693_v5  ;;  %v7664_v5 = vmul.f32 2.0, %v14797_v46 }
 0xbb3   :  { %v7533_v12 = vpop.f32.mrf.mxu3  ;;  %v7679_v60 = vadd.f32 0.0001, %v7663_v16 }
 0xbb4   :  { %v7725_v53 = vmul.f32 %v7709_v28, %v7677_v9  ;;  %v7440_v31 = vpop.f32.mrf.mxu2  ;;  %v7534_v17 = vadd.f32 %v7533_v12, %v7437_v48  ;;  %v7193_v9 = vpop.f32.mrf.mxu0  ;;  %v7856_v48 = vsub.f32 2.0, %v7840_v21  ;;  %v7316_v28 = vadd.f32 %v7315_v41, %v7189_v52 }
 0xbb5   :  { %v7441_v24 = vadd.f32 %v7440_v31, %v7304_v54  ;;  %v7680_v4 = vadd.f32 0.0001, %v7664_v5  ;;  %v14798_v31 = vld [vmem:[#allocation190_spill] sm:$0xff]  ;;  %v7194_v6 = vadd.f32 %v7193_v9, %v13233_v33  ;;  %v7665_v54 = vmul.f32 2.0, %v14799_v11 }
 0xbb6   :  { %v7885_v7 = vmul.f32 %v7869_v45, %v7725_v53  ;;  %v7646_v58 = vsub.f32 %v7534_v17, %v14793_v35  ;;  %7996 = vrcp.f32 %v14798_v31 }
 0xbb7   :  { %v7681_v44 = vadd.f32 0.0001, %v7665_v54 }
 0xbb8   :  { %v7909_v19 = vsel %vm117_vm0, %v7885_v7, 0.0  ;;  %v7694_v15 = vmul.f32 2.0, %v7646_v58  ;;  %v7872_v58 = vmul.f32 %v7993_v3, %v7856_v48 }
 0xbb9   :  { %v7910_v51 = vadd.f32 %v7909_v19, %v7908_v18  ;;  %v7321_v17 = vpop.f32.mrf.mxu1 }
 0xbba   :  { %v7710_v40 = vadd.f32 0.0009, %v7694_v15 }
 0xbbb   :  { %v7537_v14 = vpop.f32.mrf.mxu3 }
 0xbbc   :  { %v7726_v47 = vmul.f32 %v7710_v40, %v7678_v8  ;;  %v7444_v63 = vpop.f32.mrf.mxu2  ;;  %v7538_v30 = vadd.f32 %v7537_v14, %v7441_v24  ;;  %v7322_v8 = vadd.f32 %v7321_v17, %v7194_v6  ;;  %v7997_v10 = vpop.eup %7996 }
 0xbbd   :  { %v7445_v23 = vadd.f32 %v7444_v63, %v7310_v22  ;;  %v7198_v57 = vpop.f32.mrf.mxu0  ;;  %v7666_v22 = vmul.f32 2.0, %v14801_v26 }
 0xbbe   :  { %v7886_v56 = vmul.f32 %v7870_v39, %v7726_v47  ;;  %v7647_v32 = vsub.f32 %v7538_v30, %v14795_v34  ;;  %v14800_v39 = vld [vmem:[#allocation159_spill] sm:$0xff]  ;;  %v7199_v36 = vadd.f32 %v7198_v57, %v13237_v42 }
 0xbbf   :  { %7998 = vrcp.f32 %v14800_v39 }
 0xbc0   :  { %v7911_v61 = vsel %vm117_vm0, %v7886_v56, 0.0  ;;  %v7695_v50 = vmul.f32 2.0, %v7647_v32  ;;  %v7842_v56 = vmul.f32 %v7997_v10, %v14798_v31 }
 0xbc1   :  { %v7912_v1 = vadd.f32 %v7911_v61, %v7910_v51  ;;  %v7857_v51 = vsub.f32 2.0, %v7841_v55  ;;  %v7327_v32 = vpop.f32.mrf.mxu1 }
 0xbc2   :  { %v7711_v2 = vadd.f32 0.0009, %v7695_v50  ;;  %v7328_v41 = vadd.f32 %v7327_v32, %v7199_v36 }
 0xbc3   :  { %v7541_v38 = vpop.f32.mrf.mxu3  ;;  %v7873_v30 = vmul.f32 %v7995_v20, %v7857_v51 }
 0xbc4   :  { %v7727_v49 = vmul.f32 %v7711_v2, %v7679_v60  ;;  %v7448_v27 = vpop.f32.mrf.mxu2  ;;  %v7542_v25 = vadd.f32 %v7541_v38, %v7445_v23  ;;  %v7858_v60 = vsub.f32 2.0, %v7842_v56 }
 0xbc5   :  { %v7449_v43 = vadd.f32 %v7448_v27, %v7316_v28  ;;  %v7999_v23 = vpop.eup %7998 }
 0xbc6   :  { %v7887_v37 = vmul.f32 %v7871_v62, %v7727_v49  ;;  %v7648_v18 = vsub.f32 %v7542_v25, %v14797_v46  ;;  %v7682_v62 = vadd.f32 0.0001, %v7666_v22  ;;  %v7843_v27 = vmul.f32 %v7999_v23, %v14800_v39  ;;  %v14802_v46 = vld [vmem:[#allocation108_spill] sm:$0xff] }
 0xbc7   :  { %v7874_v25 = vmul.f32 %v7997_v10, %v7858_v60  ;;  %v7667_v5 = vmul.f32 2.0, %v14802_v46 }
 0xbc8   :  { %v7696_v29 = vmul.f32 2.0, %v7648_v18  ;;  %v7913_v45 = vsel %vm117_vm0, %v7887_v37, 0.0  ;;  %v7859_v20 = vsub.f32 2.0, %v7843_v27 }
 0xbc9   :  { %v7914_v12 = vadd.f32 %v7913_v45, %v7912_v1 }
 0xbca   :  { %v7712_v53 = vadd.f32 0.0009, %v7696_v29  ;;  %v7683_v29 = vadd.f32 0.0001, %v7667_v5 }
 0xbcb   :  { %v7545_v35 = vpop.f32.mrf.mxu3 }
 0xbcc   :  { %v7728_v7 = vmul.f32 %v7712_v53, %v7680_v4  ;;  %v7546_v59 = vadd.f32 %v7545_v35, %v7449_v43  ;;  %v7452_v13 = vpop.f32.mrf.mxu2  ;;  %v7875_v4 = vmul.f32 %v7999_v23, %v7859_v20 }
 0xbcd   :  { %v7453_v47 = vadd.f32 %v7452_v13, %v7322_v8 }
 0xbce   :  { %v7888_v19 = vmul.f32 %v7872_v58, %v7728_v7  ;;  %v7649_v15 = vsub.f32 %v7546_v59, %v14799_v11 }
 0xbd0   :  { %v7697_v24 = vmul.f32 2.0, %v7649_v15  ;;  %v7915_v40 = vsel %vm117_vm0, %v7888_v19, 0.0 }
 0xbd1   :  { %v7916_v14 = vadd.f32 %v7915_v40, %v7914_v12 }
 0xbd2   :  { %v7713_v33 = vadd.f32 0.0009, %v7697_v24 }
 0xbd3   :  { %v7549_v63 = vpop.f32.mrf.mxu3 }
 0xbd4   :  { %v7729_v34 = vmul.f32 %v7713_v33, %v7681_v44  ;;  %v7550_v16 = vadd.f32 %v7549_v63, %v7453_v47  ;;  %v7456_v3 = vpop.f32.mrf.mxu2 }
 0xbd5   :  { %v7457_v42 = vadd.f32 %v7456_v3, %v7328_v41 }
 0xbd6   :  { %v7650_v61 = vsub.f32 %v7550_v16, %v14801_v26  ;;  %v7889_v50 = vmul.f32 %v7873_v30, %v7729_v34 }
 0xbd8   :  { %v7698_v1 = vmul.f32 2.0, %v7650_v61  ;;  %v7917_v0 = vsel %vm117_vm0, %v7889_v50, 0.0 }
 0xbd9   :  { %v7918_v2 = vadd.f32 %v7917_v0, %v7916_v14 }
 0xbda   :  { %v7714_v38 = vadd.f32 0.0009, %v7698_v1 }
 0xbdb   :  { %v7553_v21 = vpop.f32.mrf.mxu3 }
 0xbdc   :  { %v7730_v52 = vmul.f32 %v7714_v38, %v7682_v62  ;;  %v7554_v49 = vadd.f32 %v7553_v21, %v7457_v42 }
 0xbde   :  { %v7651_v37 = vsub.f32 %v7554_v49, %v14802_v46  ;;  %v7890_v18 = vmul.f32 %v7874_v25, %v7730_v52 }
 0xbe0   :  { %v7699_v9 = vmul.f32 2.0, %v7651_v37  ;;  %v7919_v48 = vsel %vm117_vm0, %v7890_v18, 0.0 }
 0xbe1   :  { %v7920_v28 = vadd.f32 %v7919_v48, %v7918_v2 }
 0xbe2   :  { %v7715_v45 = vadd.f32 0.0009, %v7699_v9 }
 0xbe4   :  { %v7731_v12 = vmul.f32 %v7715_v45, %v7683_v29 }
 0xbe6   :  { %v7891_v43 = vmul.f32 %v7875_v4, %v7731_v12 }
 0xbe8   :  { %v7921_v53 = vsel %vm117_vm0, %v7891_v43, 0.0 }
 0xbe9   :  { %v7922_v55 = vadd.f32 %v7921_v53, %v7920_v28 }
 0xbeb   :  { %7923 = vadd.xlane.f32.xlu0 %v7922_v55 }
 0xc5e   :  { %v7924_v31 = vpop.xlane.xlu0 %7923 }
 0xc5f   :  { %v7925_v17 = vrot.slane %v7924_v31, 4 }
 0xc61   :  { %v7926_v35 = vadd.f32 %v7925_v17, %v7924_v31 }
 0xc63   :  { %v7927_v6 = vrot.slane %v7926_v35, 2 }
 0xc65   :  { %v7928_v7 = vadd.f32 %v7927_v6, %v7926_v35 }
 0xc67   :  { %v7929_v58 = vrot.slane %v7928_v7, 1 }
 0xc69   :  { %v7930_v59 = vadd.f32 %v7929_v58, %v7928_v7 }
 0xc6b   :  { %7964 = vpush %v7930_v59 }
 0xc9c   :  { %s7965_s22 = spop %7964 }
 0xc9d   :  { %v7933_v13 = vstv %s7965_s22 }
 0xc9e   :  { %7935 = vst [vmem:[#allocation2] sm:$0xff] %v7933_v13 }
 0xc9f   :  { %7946 = dma.vmem_to_hbm [thread:$0]  %s7942_s3, 128, %s7944_s21, [#allocation3]  }
 0xca0   :  { %8087 = dma.done.wait [#allocation3], 128  }
 0xca1   :  { %8088 = vsyncadd [#allocation3], 4294967168 }
 0xca2   :  { %7951 = vsyncpa [#allocation3], 1 }

</bundles_post_ra>
